<compile_context>
chip_gen: v7x
topology: tpu7x:2x2x1
jax: 0.10.0
libtpu: 0.0.40
codegen_flags: <defaults>
</compile_context>

<pallas_src>
import functools

import jax
import jax.numpy as jnp
from jax.experimental import pallas as pl
from jax.experimental.pallas import tpu as pltpu


_TM_MM = 512        # M-tile for the MXU matmul kernels (multiple of 256)
_TM_REDUCE = 256    # M-tile for the big-K (C_out == 1) reduce kernels


def _round_up(x, m):
    return (x + m - 1) // m * m


def _apply_act(x, activation):
    if activation == "relu":
        return jnp.maximum(x, 0.0)
    if activation == "tanh":
        return jnp.tanh(x)
    return x


# ---------------------------------------------------------------------------
# Kernel 1: single fused matmul  act((a @ w) + shift)
# ---------------------------------------------------------------------------
def _mm_kernel(a_ref, w_ref, shift_ref, o_ref, *, activation):
    acc = jnp.dot(a_ref[...], w_ref[...], preferred_element_type=jnp.float32)
    acc = _apply_act(acc + shift_ref[...], activation)
    o_ref[...] = acc.astype(o_ref.dtype)


def mm_shift_act(a, w, shift, activation, out_dtype=jnp.bfloat16, tm=_TM_MM):
    """a: (M, K), w: (K, N), shift: (1, N).  Returns act(a @ w + shift)."""
    M, K = a.shape
    K2, N = w.shape
    assert K == K2
    tm = min(tm, M)                      # full-dim M block when M is tiny
    grid = (pl.cdiv(M, tm),)
    return pl.pallas_call(
        functools.partial(_mm_kernel, activation=activation),
        out_shape=jax.ShapeDtypeStruct((M, N), out_dtype),
        grid_spec=pltpu.PrefetchScalarGridSpec(
            num_scalar_prefetch=0,
            grid=grid,
            in_specs=[
                pl.BlockSpec((tm, K), lambda i: (i, 0)),   # activations
                pl.BlockSpec((K, N), lambda i: (0, 0)),    # weights (resident)
                pl.BlockSpec((1, N), lambda i: (0, 0)),    # per-channel shift
            ],
            out_specs=pl.BlockSpec((tm, N), lambda i: (i, 0)),
        ),
        compiler_params=pltpu.CompilerParams(dimension_semantics=("parallel",)),
    )(a, w, shift)


# ---------------------------------------------------------------------------
# Kernel 2: two fused matmuls (conv KxK + BN + ReLU, then 1x1 conv + BN + ReLU)
# ---------------------------------------------------------------------------
def _mm2_kernel(a_ref, w1_ref, s1_ref, w2_ref, s2_ref, o_ref):
    h = jnp.dot(a_ref[...], w1_ref[...], preferred_element_type=jnp.float32)
    h = jnp.maximum(h + s1_ref[...], 0.0)
    acc = jnp.dot(h.astype(w2_ref.dtype), w2_ref[...],
                  preferred_element_type=jnp.float32)
    acc = jnp.maximum(acc + s2_ref[...], 0.0)
    o_ref[...] = acc.astype(o_ref.dtype)


def mm2_relu(a, w1, s1, w2, s2, out_dtype=jnp.bfloat16, tm=_TM_MM):
    """relu(relu(a @ w1 + s1) @ w2 + s2) with both weights resident in VMEM."""
    M, K = a.shape
    K1, N1 = w1.shape
    N1b, N2 = w2.shape
    assert K == K1 and N1 == N1b
    tm = min(tm, M)
    grid = (pl.cdiv(M, tm),)
    return pl.pallas_call(
        _mm2_kernel,
        out_shape=jax.ShapeDtypeStruct((M, N2), out_dtype),
        grid_spec=pltpu.PrefetchScalarGridSpec(
            num_scalar_prefetch=0,
            grid=grid,
            in_specs=[
                pl.BlockSpec((tm, K), lambda i: (i, 0)),    # im2col patches
                pl.BlockSpec((K, N1), lambda i: (0, 0)),    # conv KxK weight
                pl.BlockSpec((1, N1), lambda i: (0, 0)),    # BN shift 1
                pl.BlockSpec((N1, N2), lambda i: (0, 0)),   # 1x1 conv weight
                pl.BlockSpec((1, N2), lambda i: (0, 0)),    # BN shift 2
            ],
            out_specs=pl.BlockSpec((tm, N2), lambda i: (i, 0)),
        ),
        compiler_params=pltpu.CompilerParams(dimension_semantics=("parallel",)),
    )(a, w1, s1, w2, s2)


# ---------------------------------------------------------------------------
# Kernel 3: C_out == 1 conv as VPU multiply + lane reduction (narrow output)
# ---------------------------------------------------------------------------
def _reduce1_kernel(a_ref, w_ref, shift_ref, o_ref, *, activation):
    a = a_ref[...].astype(jnp.float32)        # (tm, K)
    w = w_ref[...].astype(jnp.float32)        # (1, K) sublane-broadcast
    acc = jnp.sum(a * w, axis=-1, keepdims=True) + shift_ref[...]
    acc = _apply_act(acc, activation)
    o_ref[...] = acc.astype(o_ref.dtype)


def conv_to_1ch(a, w_row, shift, activation, out_dtype, tm=_TM_REDUCE):
    """act(a @ w_row.T + shift) for a single output channel, via VPU reduce."""
    M, K = a.shape
    assert w_row.shape == (1, K)
    tm = min(tm, M)
    grid = (pl.cdiv(M, tm),)
    return pl.pallas_call(
        functools.partial(_reduce1_kernel, activation=activation),
        out_shape=jax.ShapeDtypeStruct((M, 1), out_dtype),
        grid_spec=pltpu.PrefetchScalarGridSpec(
            num_scalar_prefetch=0,
            grid=grid,
            in_specs=[
                pl.BlockSpec((tm, K), lambda i: (i, 0)),   # im2col patches
                pl.BlockSpec((1, K), lambda i: (0, 0)),    # folded weight row
                pl.BlockSpec((1, 1), lambda i: (0, 0)),    # scalar shift
            ],
            out_specs=pl.BlockSpec((tm, 1), lambda i: (i, 0)),
        ),
        compiler_params=pltpu.CompilerParams(dimension_semantics=("parallel",)),
    )(a, w_row, shift)


# ---------------------------------------------------------------------------
# JAX-level glue: channels-last im2col (no transposes, only slices + concat)
# ---------------------------------------------------------------------------
def im2col_nhwc(x, ksize):
    """x: (B, H, W, C) -> (B*H*W, K*K*C); column order (kh*K + kw)*C + c."""
    B, H, W, C = x.shape
    pad = (ksize - 1) // 2
    xp = jnp.pad(x, ((0, 0), (pad, pad), (pad, pad), (0, 0)))
    cols = [xp[:, kh:kh + H, kw:kw + W, :]
            for kh in range(ksize) for kw in range(ksize)]
    patches = jnp.concatenate(cols, axis=-1)           # (B, H, W, K*K*C)
    return patches.reshape(B * H * W, ksize * ksize * C)


# ---------------------------------------------------------------------------
# ReconNet parameters (PyTorch layout), one-time BN folding + layout prep
# ---------------------------------------------------------------------------
# (C_in, C_out, kernel, activation) for the six conv blocks of `main`.
_MAIN_CFG = [
    (1, 64, 11, "relu"),
    (64, 32, 1, "relu"),
    (32, 1, 7, "relu"),
    (1, 64, 11, "relu"),
    (64, 32, 1, "relu"),
    (32, 1, 7, "tanh"),
]


def init_params(in_chs, key):
    keys = iter(jax.random.split(key, 64))
    params = {}

    # first: Linear(in_chs, 33*33)  (PyTorch weight layout (out, in))
    lin_w = jax.random.normal(next(keys), (33 * 33, in_chs), jnp.float32) / jnp.sqrt(in_chs)
    lin_b = 0.01 * jax.random.normal(next(keys), (33 * 33,), jnp.float32)
    params["first"] = (lin_w, lin_b)

    # main: Conv2d + BatchNorm2d blocks (PyTorch conv weight layout (Cout,Cin,K,K))
    convs = []
    for (c_in, c_out, k, _act) in _MAIN_CFG:
        fan_in = c_in * k * k
        w = jax.random.normal(next(keys), (c_out, c_in, k, k), jnp.float32) / jnp.sqrt(fan_in)
        b = 0.01 * jax.random.normal(next(keys), (c_out,), jnp.float32)
        gamma = 1.0 + 0.1 * jax.random.normal(next(keys), (c_out,), jnp.float32)
        beta = 0.1 * jax.random.normal(next(keys), (c_out,), jnp.float32)
        mean = 0.1 * jax.random.normal(next(keys), (c_out,), jnp.float32)
        var = 1.0 + 0.1 * jnp.abs(jax.random.normal(next(keys), (c_out,), jnp.float32))
        convs.append((w, b, gamma, beta, mean, var))
    params["main"] = convs
    return params


def fold_params(params, eps=1e-5, compute_dtype=jnp.bfloat16):
    """One-time prep: fold eval-mode BN scale into weights, reshape conv
    weights to im2col-matmul layout, cast MXU operands to bf16."""
    lin_w, lin_b = params["first"]
    fp = {
        "lin_w": lin_w.T.astype(compute_dtype),                  # (in_chs, 1089)
        "lin_b": lin_b.reshape(1, -1).astype(jnp.float32),       # (1, 1089)
    }

    mats = []
    for cfg, p in zip(_MAIN_CFG, params["main"]):
        c_in, c_out, k, _act = cfg
        w, b, gamma, beta, mean, var = p
        s = gamma / jnp.sqrt(var + eps)                          # BN scale (eval)
        shift = ((b - mean) * s + beta).astype(jnp.float32)
        # (Cout, Cin, K, K) -> (K*K*Cin, Cout); rows ordered (kh*K + kw)*Cin + c
        # to match im2col_nhwc column ordering.  Scale folded into columns.
        w_mat = w.transpose(2, 3, 1, 0).reshape(k * k * c_in, c_out) * s[None, :]
        mats.append((w_mat.astype(compute_dtype), shift))

    (w1, s1), (w2, s2), (w3, s3), (w4, s4), (w5, s5), (w6, s6) = mats
    fp["block1"] = (w1, s1.reshape(1, -1), w2, s2.reshape(1, -1))   # 11x11 + 1x1
    fp["conv3"] = (w3.T, s3.reshape(1, 1))                          # (1, 32*49)
    fp["block2"] = (w4, s4.reshape(1, -1), w5, s5.reshape(1, -1))   # 11x11 + 1x1
    fp["conv6"] = (w6.T, s6.reshape(1, 1))                          # (1, 32*49)
    return fp


# ---------------------------------------------------------------------------
# Forward pass (matches PyTorch ReconNet.forward, eval-mode BN)
# ---------------------------------------------------------------------------
def recon_net_forward(x, fp):
    """x: (B, in_chs) -> (B, 1, 33, 33)."""
    B = x.shape[0]

    # first: Linear + ReLU
    h = mm_shift_act(x.astype(fp["lin_w"].dtype), fp["lin_w"], fp["lin_b"],
                     "relu", out_dtype=jnp.bfloat16)              # (B, 1089)
    img = h.reshape(B, 33, 33, 1)                                 # NHWC, C=1

    # Conv(1->64, 11x11)+BN+ReLU  fused with  Conv(64->32, 1x1)+BN+ReLU
    p = im2col_nhwc(img, 11)                                      # (M, 121)
    h32 = mm2_relu(p, *fp["block1"])                              # (M, 32)

    # Conv(32->1, 7x7)+BN+ReLU
    p = im2col_nhwc(h32.reshape(B, 33, 33, 32), 7)                # (M, 1568)
    w3, s3 = fp["conv3"]
    h1 = conv_to_1ch(p, w3, s3, activation="relu",
                     out_dtype=jnp.bfloat16)                      # (M, 1)

    # Conv(1->64, 11x11)+BN+ReLU  fused with  Conv(64->32, 1x1)+BN+ReLU
    p = im2col_nhwc(h1.reshape(B, 33, 33, 1), 11)                 # (M, 121)
    h32 = mm2_relu(p, *fp["block2"])                              # (M, 32)

    # Conv(32->1, 7x7)+BN+Tanh
    p = im2col_nhwc(h32.reshape(B, 33, 33, 32), 7)                # (M, 1568)
    w6, s6 = fp["conv6"]
    out = conv_to_1ch(p, w6, s6, activation="tanh",
                      out_dtype=jnp.float32)                      # (M, 1)

    # Single output channel -> NCHW (B, 1, 33, 33) is a pure reshape.
    return out.reshape(B, 1, 33, 33)


if __name__ == "__main__":
    in_chs = 64
    batch = 2

    key = jax.random.PRNGKey(0)
    k_param, k_x = jax.random.split(key)
    params = init_params(in_chs, k_param)
    folded = fold_params(params)                 # one-time weight prep
    x = jax.random.normal(k_x, (batch, in_chs), jnp.float32)

    forward = jax.jit(recon_net_forward)
    out = forward(x, folded)
    out = jax.block_until_ready(out)

    assert out.shape == (batch, 1, 33, 33), out.shape
    assert bool(jnp.all(jnp.isfinite(out)))
    print("KERNEL_OK")
</pallas_src>

<mosaic_0001>
module attributes {stable_mosaic.version = 11 : i64} {
  func.func @_mm_kernel(%arg0: i32, %arg1: memref<2x64xbf16, #tpu.memory_space<vmem>>, %arg2: memref<64x1089xbf16, #tpu.memory_space<vmem>>, %arg3: memref<1x1089xf32, #tpu.memory_space<vmem>>, %arg4: memref<2x1089xbf16, #tpu.memory_space<vmem>>) attributes {dimension_semantics = [#tpu.dimension_semantics<parallel>], iteration_bounds = array<i64: 1>, scalar_prefetch = 0 : i64, scratch_operands = 0 : i64, tpu.core_type = #tpu.core_type<tc>, window_params = [{transform_indices = @transform_0, window_bounds = array<i64: 2, 64>}, {pipeline_mode = #tpu.pipeline_mode<synchronous>, transform_indices = @transform_1, window_bounds = array<i64: 64, 1089>}, {pipeline_mode = #tpu.pipeline_mode<synchronous>, transform_indices = @transform_2, window_bounds = array<i64: 1, 1089>}, {transform_indices = @transform_3, window_bounds = array<i64: 2, 1089>}]} {
    %c0 = arith.constant 0 : index
    %c0_0 = arith.constant 0 : index
    %0 = vector.load %arg1[%c0, %c0_0] : memref<2x64xbf16, #tpu.memory_space<vmem>>, vector<2x64xbf16>
    %c0_1 = arith.constant 0 : index
    %c0_2 = arith.constant 0 : index
    %1 = vector.load %arg2[%c0_1, %c0_2] : memref<64x1089xbf16, #tpu.memory_space<vmem>>, vector<64x1089xbf16>
    %cst = arith.constant dense<0.000000e+00> : vector<2x1089xf32>
    %2 = tpu.matmul %0, %1, %cst {dimension_numbers = #tpu.dot_dimension_numbers<[1], [0], [0], [1], [0, 0, 1, 1], [], []>} : vector<2x64xbf16>, vector<64x1089xbf16>, vector<2x1089xf32> -> vector<2x1089xf32>
    %c0_3 = arith.constant 0 : index
    %c0_4 = arith.constant 0 : index
    %3 = vector.load %arg3[%c0_3, %c0_4] : memref<1x1089xf32, #tpu.memory_space<vmem>>, vector<1x1089xf32>
    %4 = vector.broadcast %3 : vector<1x1089xf32> to vector<2x1089xf32>
    %5 = arith.addf %2, %4 : vector<2x1089xf32>
    %cst_5 = arith.constant 0.000000e+00 : f32
    %6 = vector.broadcast %cst_5 : f32 to vector<2x1089xf32>
    %7 = arith.maximumf %5, %6 : vector<2x1089xf32>
    %8 = arith.truncf %7 : vector<2x1089xf32> to vector<2x1089xbf16>
    %c0_6 = arith.constant 0 : index
    %c0_7 = arith.constant 0 : index
    %9 = vector.load %arg4[%c0_6, %c0_7] : memref<2x1089xbf16, #tpu.memory_space<vmem>>, vector<2x1089xbf16>
    tpu.vector_store %arg4[%c0_6, %c0_7], %8 {strides = array<i32>} : memref<2x1089xbf16, #tpu.memory_space<vmem>>, vector<2x1089xbf16>,
    return
  }
  func.func @transform_0(%arg0: i32) -> (i32, i32) {
    %c0_i32 = arith.constant 0 : i32
    %c0_i32_0 = arith.constant 0 : i32
    return %arg0, %c0_i32 : i32, i32
  }
  func.func @transform_1(%arg0: i32) -> (i32, i32) {
    %c0_i32 = arith.constant 0 : i32
    %c0_i32_0 = arith.constant 0 : i32
    %c0_i32_1 = arith.constant 0 : i32
    return %c0_i32, %c0_i32_0 : i32, i32
  }
  func.func @transform_2(%arg0: i32) -> (i32, i32) {
    %c0_i32 = arith.constant 0 : i32
    %c0_i32_0 = arith.constant 0 : i32
    %c0_i32_1 = arith.constant 0 : i32
    return %c0_i32, %c0_i32_0 : i32, i32
  }
  func.func @transform_3(%arg0: i32) -> (i32, i32) {
    %c0_i32 = arith.constant 0 : i32
    %c0_i32_0 = arith.constant 0 : i32
    return %arg0, %c0_i32 : i32, i32
  }
}

module attributes {stable_mosaic.version = 11 : i64} {
  func.func @_mm2_kernel(%arg0: i32, %arg1: memref<512x121xbf16, #tpu.memory_space<vmem>>, %arg2: memref<121x64xbf16, #tpu.memory_space<vmem>>, %arg3: memref<1x64xf32, #tpu.memory_space<vmem>>, %arg4: memref<64x32xbf16, #tpu.memory_space<vmem>>, %arg5: memref<1x32xf32, #tpu.memory_space<vmem>>, %arg6: memref<512x32xbf16, #tpu.memory_space<vmem>>) attributes {dimension_semantics = [#tpu.dimension_semantics<parallel>], iteration_bounds = array<i64: 5>, scalar_prefetch = 0 : i64, scratch_operands = 0 : i64, tpu.core_type = #tpu.core_type<tc>, window_params = [{transform_indices = @transform_0, window_bounds = array<i64: 512, 121>}, {pipeline_mode = #tpu.pipeline_mode<synchronous>, transform_indices = @transform_1, window_bounds = array<i64: 121, 64>}, {pipeline_mode = #tpu.pipeline_mode<synchronous>, transform_indices = @transform_2, window_bounds = array<i64: 1, 64>}, {pipeline_mode = #tpu.pipeline_mode<synchronous>, transform_indices = @transform_3, window_bounds = array<i64: 64, 32>}, {pipeline_mode = #tpu.pipeline_mode<synchronous>, transform_indices = @transform_4, window_bounds = array<i64: 1, 32>}, {transform_indices = @transform_5, window_bounds = array<i64: 512, 32>}]} {
    %c0 = arith.constant 0 : index
    %c0_0 = arith.constant 0 : index
    %0 = vector.load %arg1[%c0, %c0_0] : memref<512x121xbf16, #tpu.memory_space<vmem>>, vector<512x121xbf16>
    %c0_1 = arith.constant 0 : index
    %c0_2 = arith.constant 0 : index
    %1 = vector.load %arg2[%c0_1, %c0_2] : memref<121x64xbf16, #tpu.memory_space<vmem>>, vector<121x64xbf16>
    %cst = arith.constant dense<0.000000e+00> : vector<512x64xf32>
    %2 = tpu.matmul %0, %1, %cst {dimension_numbers = #tpu.dot_dimension_numbers<[1], [0], [0], [1], [0, 0, 1, 1], [], []>} : vector<512x121xbf16>, vector<121x64xbf16>, vector<512x64xf32> -> vector<512x64xf32>
    %c0_3 = arith.constant 0 : index
    %c0_4 = arith.constant 0 : index
    %3 = vector.load %arg3[%c0_3, %c0_4] : memref<1x64xf32, #tpu.memory_space<vmem>>, vector<1x64xf32>
    %4 = vector.broadcast %3 : vector<1x64xf32> to vector<512x64xf32>
    %5 = arith.addf %2, %4 : vector<512x64xf32>
    %cst_5 = arith.constant 0.000000e+00 : f32
    %6 = vector.broadcast %cst_5 : f32 to vector<512x64xf32>
    %7 = arith.maximumf %5, %6 : vector<512x64xf32>
    %8 = arith.truncf %7 : vector<512x64xf32> to vector<512x64xbf16>
    %c0_6 = arith.constant 0 : index
    %c0_7 = arith.constant 0 : index
    %9 = vector.load %arg4[%c0_6, %c0_7] : memref<64x32xbf16, #tpu.memory_space<vmem>>, vector<64x32xbf16>
    %cst_8 = arith.constant dense<0.000000e+00> : vector<512x32xf32>
    %10 = tpu.matmul %8, %9, %cst_8 {dimension_numbers = #tpu.dot_dimension_numbers<[1], [0], [0], [1], [0, 0, 1, 1], [], []>} : vector<512x64xbf16>, vector<64x32xbf16>, vector<512x32xf32> -> vector<512x32xf32>
    %c0_9 = arith.constant 0 : index
    %c0_10 = arith.constant 0 : index
    %11 = vector.load %arg5[%c0_9, %c0_10] : memref<1x32xf32, #tpu.memory_space<vmem>>, vector<1x32xf32>
    %12 = vector.broadcast %11 : vector<1x32xf32> to vector<512x32xf32>
    %13 = arith.addf %10, %12 : vector<512x32xf32>
    %cst_11 = arith.constant 0.000000e+00 : f32
    %14 = vector.broadcast %cst_11 : f32 to vector<512x32xf32>
    %15 = arith.maximumf %13, %14 : vector<512x32xf32>
    %16 = arith.truncf %15 : vector<512x32xf32> to vector<512x32xbf16>
    %c0_12 = arith.constant 0 : index
    %c0_13 = arith.constant 0 : index
    %17 = vector.load %arg6[%c0_12, %c0_13] : memref<512x32xbf16, #tpu.memory_space<vmem>>, vector<512x32xbf16>
    tpu.vector_store %arg6[%c0_12, %c0_13], %16 {strides = array<i32>} : memref<512x32xbf16, #tpu.memory_space<vmem>>, vector<512x32xbf16>,
    return
  }
  func.func @transform_0(%arg0: i32) -> (i32, i32) {
    %c0_i32 = arith.constant 0 : i32
    %c0_i32_0 = arith.constant 0 : i32
    return %arg0, %c0_i32 : i32, i32
  }
  func.func @transform_1(%arg0: i32) -> (i32, i32) {
    %c0_i32 = arith.constant 0 : i32
    %c0_i32_0 = arith.constant 0 : i32
    %c0_i32_1 = arith.constant 0 : i32
    return %c0_i32, %c0_i32_0 : i32, i32
  }
  func.func @transform_2(%arg0: i32) -> (i32, i32) {
    %c0_i32 = arith.constant 0 : i32
    %c0_i32_0 = arith.constant 0 : i32
    %c0_i32_1 = arith.constant 0 : i32
    return %c0_i32, %c0_i32_0 : i32, i32
  }
  func.func @transform_3(%arg0: i32) -> (i32, i32) {
    %c0_i32 = arith.constant 0 : i32
    %c0_i32_0 = arith.constant 0 : i32
    %c0_i32_1 = arith.constant 0 : i32
    return %c0_i32, %c0_i32_0 : i32, i32
  }
  func.func @transform_4(%arg0: i32) -> (i32, i32) {
    %c0_i32 = arith.constant 0 : i32
    %c0_i32_0 = arith.constant 0 : i32
    %c0_i32_1 = arith.constant 0 : i32
    return %c0_i32, %c0_i32_0 : i32, i32
  }
  func.func @transform_5(%arg0: i32) -> (i32, i32) {
    %c0_i32 = arith.constant 0 : i32
    %c0_i32_0 = arith.constant 0 : i32
    return %arg0, %c0_i32 : i32, i32
  }
}

module attributes {stable_mosaic.version = 11 : i64} {
  func.func @_reduce1_kernel(%arg0: i32, %arg1: memref<256x1568xbf16, #tpu.memory_space<vmem>>, %arg2: memref<1x1568xbf16, #tpu.memory_space<vmem>>, %arg3: memref<1x1xf32, #tpu.memory_space<vmem>>, %arg4: memref<256x1xbf16, #tpu.memory_space<vmem>>) attributes {dimension_semantics = [#tpu.dimension_semantics<parallel>], iteration_bounds = array<i64: 9>, scalar_prefetch = 0 : i64, scratch_operands = 0 : i64, tpu.core_type = #tpu.core_type<tc>, window_params = [{transform_indices = @transform_0, window_bounds = array<i64: 256, 1568>}, {pipeline_mode = #tpu.pipeline_mode<synchronous>, transform_indices = @transform_1, window_bounds = array<i64: 1, 1568>}, {pipeline_mode = #tpu.pipeline_mode<synchronous>, transform_indices = @transform_2, window_bounds = array<i64: 1, 1>}, {transform_indices = @transform_3, window_bounds = array<i64: 256, 1>}]} {
    %c0 = arith.constant 0 : index
    %c0_0 = arith.constant 0 : index
    %0 = vector.load %arg1[%c0, %c0_0] : memref<256x1568xbf16, #tpu.memory_space<vmem>>, vector<256x1568xbf16>
    %1 = arith.extf %0 : vector<256x1568xbf16> to vector<256x1568xf32>
    %c0_1 = arith.constant 0 : index
    %c0_2 = arith.constant 0 : index
    %2 = vector.load %arg2[%c0_1, %c0_2] : memref<1x1568xbf16, #tpu.memory_space<vmem>>, vector<1x1568xbf16>
    %3 = arith.extf %2 : vector<1x1568xbf16> to vector<1x1568xf32>
    %4 = vector.broadcast %3 : vector<1x1568xf32> to vector<256x1568xf32>
    %5 = arith.mulf %1, %4 : vector<256x1568xf32>
    %cst = arith.constant dense<0.000000e+00> : vector<256xf32>
    %6 = vector.multi_reduction <add>, %5, %cst [1] : vector<256x1568xf32> to vector<256xf32>
    %7 = vector.shape_cast %6 : vector<256xf32> to vector<256x1xf32>
    %c0_3 = arith.constant 0 : index
    %c0_4 = arith.constant 0 : index
    %8 = vector.load %arg3[%c0_3, %c0_4] : memref<1x1xf32, #tpu.memory_space<vmem>>, vector<1x1xf32>
    %9 = vector.broadcast %8 : vector<1x1xf32> to vector<256x1xf32>
    %10 = arith.addf %7, %9 : vector<256x1xf32>
    %cst_5 = arith.constant 0.000000e+00 : f32
    %11 = vector.broadcast %cst_5 : f32 to vector<256x1xf32>
    %12 = arith.maximumf %10, %11 : vector<256x1xf32>
    %13 = arith.truncf %12 : vector<256x1xf32> to vector<256x1xbf16>
    %c0_6 = arith.constant 0 : index
    %c0_7 = arith.constant 0 : index
    %14 = vector.load %arg4[%c0_6, %c0_7] : memref<256x1xbf16, #tpu.memory_space<vmem>>, vector<256x1xbf16>
    tpu.vector_store %arg4[%c0_6, %c0_7], %13 {strides = array<i32>} : memref<256x1xbf16, #tpu.memory_space<vmem>>, vector<256x1xbf16>,
    return
  }
  func.func @transform_0(%arg0: i32) -> (i32, i32) {
    %c0_i32 = arith.constant 0 : i32
    %c0_i32_0 = arith.constant 0 : i32
    return %arg0, %c0_i32 : i32, i32
  }
  func.func @transform_1(%arg0: i32) -> (i32, i32) {
    %c0_i32 = arith.constant 0 : i32
    %c0_i32_0 = arith.constant 0 : i32
    %c0_i32_1 = arith.constant 0 : i32
    return %c0_i32, %c0_i32_0 : i32, i32
  }
  func.func @transform_2(%arg0: i32) -> (i32, i32) {
    %c0_i32 = arith.constant 0 : i32
    %c0_i32_0 = arith.constant 0 : i32
    %c0_i32_1 = arith.constant 0 : i32
    return %c0_i32, %c0_i32_0 : i32, i32
  }
  func.func @transform_3(%arg0: i32) -> (i32, i32) {
    %c0_i32 = arith.constant 0 : i32
    %c0_i32_0 = arith.constant 0 : i32
    return %arg0, %c0_i32 : i32, i32
  }
}

module attributes {stable_mosaic.version = 11 : i64} {
  func.func @_reduce1_kernel(%arg0: i32, %arg1: memref<256x1568xbf16, #tpu.memory_space<vmem>>, %arg2: memref<1x1568xbf16, #tpu.memory_space<vmem>>, %arg3: memref<1x1xf32, #tpu.memory_space<vmem>>, %arg4: memref<256x1xf32, #tpu.memory_space<vmem>>) attributes {dimension_semantics = [#tpu.dimension_semantics<parallel>], iteration_bounds = array<i64: 9>, scalar_prefetch = 0 : i64, scratch_operands = 0 : i64, tpu.core_type = #tpu.core_type<tc>, window_params = [{transform_indices = @transform_0, window_bounds = array<i64: 256, 1568>}, {pipeline_mode = #tpu.pipeline_mode<synchronous>, transform_indices = @transform_1, window_bounds = array<i64: 1, 1568>}, {pipeline_mode = #tpu.pipeline_mode<synchronous>, transform_indices = @transform_2, window_bounds = array<i64: 1, 1>}, {transform_indices = @transform_3, window_bounds = array<i64: 256, 1>}]} {
    %c0 = arith.constant 0 : index
    %c0_0 = arith.constant 0 : index
    %0 = vector.load %arg1[%c0, %c0_0] : memref<256x1568xbf16, #tpu.memory_space<vmem>>, vector<256x1568xbf16>
    %1 = arith.extf %0 : vector<256x1568xbf16> to vector<256x1568xf32>
    %c0_1 = arith.constant 0 : index
    %c0_2 = arith.constant 0 : index
    %2 = vector.load %arg2[%c0_1, %c0_2] : memref<1x1568xbf16, #tpu.memory_space<vmem>>, vector<1x1568xbf16>
    %3 = arith.extf %2 : vector<1x1568xbf16> to vector<1x1568xf32>
    %4 = vector.broadcast %3 : vector<1x1568xf32> to vector<256x1568xf32>
    %5 = arith.mulf %1, %4 : vector<256x1568xf32>
    %cst = arith.constant dense<0.000000e+00> : vector<256xf32>
    %6 = vector.multi_reduction <add>, %5, %cst [1] : vector<256x1568xf32> to vector<256xf32>
    %7 = vector.shape_cast %6 : vector<256xf32> to vector<256x1xf32>
    %c0_3 = arith.constant 0 : index
    %c0_4 = arith.constant 0 : index
    %8 = vector.load %arg3[%c0_3, %c0_4] : memref<1x1xf32, #tpu.memory_space<vmem>>, vector<1x1xf32>
    %9 = vector.broadcast %8 : vector<1x1xf32> to vector<256x1xf32>
    %10 = arith.addf %7, %9 : vector<256x1xf32>
    %11 = math.tanh %10 : vector<256x1xf32>
    %c0_5 = arith.constant 0 : index
    %c0_6 = arith.constant 0 : index
    %12 = vector.load %arg4[%c0_5, %c0_6] : memref<256x1xf32, #tpu.memory_space<vmem>>, vector<256x1xf32>
    tpu.vector_store %arg4[%c0_5, %c0_6], %11 {strides = array<i32>} : memref<256x1xf32, #tpu.memory_space<vmem>>, vector<256x1xf32>,
    return
  }
  func.func @transform_0(%arg0: i32) -> (i32, i32) {
    %c0_i32 = arith.constant 0 : i32
    %c0_i32_0 = arith.constant 0 : i32
    return %arg0, %c0_i32 : i32, i32
  }
  func.func @transform_1(%arg0: i32) -> (i32, i32) {
    %c0_i32 = arith.constant 0 : i32
    %c0_i32_0 = arith.constant 0 : i32
    %c0_i32_1 = arith.constant 0 : i32
    return %c0_i32, %c0_i32_0 : i32, i32
  }
  func.func @transform_2(%arg0: i32) -> (i32, i32) {
    %c0_i32 = arith.constant 0 : i32
    %c0_i32_0 = arith.constant 0 : i32
    %c0_i32_1 = arith.constant 0 : i32
    return %c0_i32, %c0_i32_0 : i32, i32
  }
  func.func @transform_3(%arg0: i32) -> (i32, i32) {
    %c0_i32 = arith.constant 0 : i32
    %c0_i32_0 = arith.constant 0 : i32
    return %arg0, %c0_i32 : i32, i32
  }
}

</mosaic_0001>

<bundles_post_ra>
// kernel: recon_net_forward.5
= control target key start
LH: loop header
LB: loop body
LE: loop exit
PB: predicated region body
PF: predicated region fallthrough
CT: control target
= control target key end

     0   :  { %8 = vsyncpa [#allocation3], 0  ;;  %s861_s0 = inlined_call_operand.vmem [shape: bf16[2,64], index: 0, kind: input, shape index: {}]   ;;  %s862_s1 = inlined_call_operand.hbm [shape: bf16[64,1089], index: 1, kind: input, shape index: {}]   ;;  %s863_s2 = inlined_call_operand.hbm [shape: f32[1,1089], index: 2, kind: input, shape index: {}]   ;;  %s864_s3 = inlined_call_operand.vmem [shape: bf16[2,1089], index: 3, kind: output, shape index: {}]  }
   0x1   :  { %9 = vsyncpa [#allocation5], 0  ;;  %s795_s12 = smov [#allocation2]   ;;  %s747_s16 = scalar_lea.hbm %s862_s1, 4608 }
   0x2   :  { %s17_s13 = sshll.u32 %s795_s12, 4  ;;  %p748_p0 = scmp.ne.s32.totalorder %s862_s1, %s747_s16  ;;  %s18_s13 = int_to_ptr.vmem [resolvable:$true] %s17_s13 }
   0x3   :  { %p751_p1 = scmp.lt.u32.totalorder %s747_s16, %s862_s1 }
   0x5   :  { %p753_p2 = pnand %p751_p1, %p748_p0 }
   0x7   :  { %756 = shalt.err (!%p753_p2)
}
   0x8   :  { %s757_s21 = scalar_lea.vmem %s18_s13, 4608  ;;  %p762_p4 = scmp.lt.s32.totalorder %s18_s13, %s18_s13 }
   0x9   :  { %p758_p3 = scmp.ne.s32.totalorder %s18_s13, %s757_s21  ;;  %p763_p5 = scmp.lt.s32.totalorder %s757_s21, %s757_s21 }
   0xb   :  { %p764_p6 = por %p763_p5, %p762_p4 }
   0xd   :  { %p765_p7 = pnand %p764_p6, %p758_p3 }
   0xf   :  { %768 = shalt.err (!%p765_p7)
}
  0x10   :  { %s796_s22 = smov 576   ;;  %s797_s23 = smov 36  }
  0x11   :  { %23 = dma.hbm_to_vmem [thread:$0]  %s862_s1, 4608, %s18_s13, [#allocation3], %s796_s22, %s796_s22, %s797_s23  }
  0x12   :  { %s798_s26 = smov [#allocation4]   ;;  %s769_s30 = scalar_lea.hbm %s863_s2, 144 }
  0x13   :  { %s30_s27 = sshll.u32 %s798_s26, 4  ;;  %p770_p8 = scmp.ne.s32.totalorder %s863_s2, %s769_s30  ;;  %s31_s27 = int_to_ptr.vmem [resolvable:$true] %s30_s27 }
  0x14   :  { %p773_p9 = scmp.lt.u32.totalorder %s769_s30, %s863_s2 }
  0x16   :  { %p775_p10 = pnand %p773_p9, %p770_p8 }
  0x18   :  { %778 = shalt.err (!%p775_p10)
}
  0x19   :  { %s779_s8 = scalar_lea.vmem %s31_s27, 144  ;;  %s783_s1 = scalar_lea.vmem %s31_s27, 160 }
  0x1a   :  { %p780_p11 = scmp.ne.s32.totalorder %s31_s27, %s779_s8  ;;  %p784_p12 = scmp.lt.s32.totalorder %s31_s27, %s31_s27 }
  0x1b   :  { %p785_p13 = scmp.lt.s32.totalorder %s783_s1, %s779_s8 }
  0x1d   :  { %p786_p0 = por %p785_p13, %p784_p12 }
  0x1f   :  { %p787_p1 = pnand %p786_p0, %p780_p11 }
  0x21   :  { %790 = shalt.err (!%p787_p1)
}
  0x22   :  { %33 = dma.hbm_to_vmem [thread:$0]  %s863_s2, 144, %s31_s27, [#allocation5]  }
  0x23   :  { %791 = dma.done.wait [#allocation3], 4608  }
  0x24   :  { %792 = vsyncadd [#allocation3], 4294962688 }
  0x25   :  { %793 = dma.done.wait [#allocation5], 144  }
  0x26   :  { %794 = vsyncadd [#allocation5], 4294967152  ;;  %v799_v0 = vmov 0   ;;  %v695_v1 = vld [vmem:[#allocation2 + $0x4] ss:$36 sps:$4 sm:$0xff]   ;;  %vm315_vm0 = vcmask 523264   ;;  %v86_v39 = vlaneseq }
  0x27   :  { %351 = vmatprep.mubr.bf16.mxu0 %v799_v0  ;;  %392 = vmatprep.mubr.bf16.mxu1 %v799_v0  ;;  %v697_v2 = vld [vmem:[#allocation2 + $0xc] ss:$36 sps:$4 sm:$0xff]   ;;  %v699_v3 = vld [vmem:[#allocation2] ss:$36 sps:$4 sm:$0xff]   ;;  %v703_v6 = vld [vmem:[#allocation2 + $0x54] ss:$36 sps:$4 sm:$0xff]  }
  0x28   :  { %319 = vmatprep.subr.bf16.mxu0 %v695_v1  ;;  %v700_v4 = vld [vmem:[#allocation2 + $0x8] ss:$36 sps:$4 sm:$0xff]   ;;  %360 = vmatprep.subr.bf16.mxu1 %v697_v2  ;;  %v706_v8 = vld [vmem:[#allocation2 + $0x50] ss:$36 sps:$4 sm:$0xff]   ;;  %v709_v10 = vld [vmem:[#allocation2 + $0x9c] ss:$36 sps:$4 sm:$0xff]  }
  0x29   :  { %v701_v5 = vld [vmem:[#allocation2 + $0x4c] ss:$36 sps:$4 sm:$0xff]   ;;  %320 = vmatpush1.bf16.msra.mxu0 %v699_v3  ;;  %361 = vmatpush1.bf16.msra.mxu1 %v700_v4  ;;  %v707_v9 = vld [vmem:[#allocation2 + $0x94] ss:$36 sps:$4 sm:$0xff]   ;;  %v713_v13 = vld [vmem:[#allocation2 + $0xdc] ss:$36 sps:$4 sm:$0xff]  }
  0x2a   :  { %v705_v7 = vld [vmem:[#allocation2 + $0x48] ss:$36 sps:$4 sm:$0xff]   ;;  %321 = vmatprep.subr.bf16.mxu0 %v701_v5  ;;  %362 = vmatprep.subr.bf16.mxu1 %v703_v6  ;;  %v711_v11 = vld [vmem:[#allocation2 + $0x90] ss:$36 sps:$4 sm:$0xff]   ;;  %v712_v12 = vld [vmem:[#allocation2 + $0x98] ss:$36 sps:$4 sm:$0xff]  }
  0x2b   :  { %v715_v14 = vld [vmem:[#allocation2 + $0xe4] ss:$36 sps:$4 sm:$0xff]   ;;  %v717_v15 = vld [vmem:[#allocation2 + $0xd8] ss:$36 sps:$4 sm:$0xff]   ;;  %v41_v19 = vld [vmem:[%s861_s0] sm:$0x1] }
  0x2c   :  { %v718_v16 = vld [vmem:[#allocation2 + $0xe0] ss:$36 sps:$4 sm:$0xff]   ;;  %v721_v17 = vld [vmem:[#allocation2 + $0x14] ss:$36 sps:$4 sm:$0xff]   ;;  %v736_v27 = vld [vmem:[#allocation2 + $0xac] ss:$36 sps:$4 sm:$0xff]  }
  0x2d   :  { %322 = vmatpush1.bf16.msra.mxu0 %v705_v7  ;;  %363 = vmatpush1.bf16.msra.mxu1 %v706_v8  ;;  %v724_v18 = vld [vmem:[#allocation2 + $0x1c] ss:$36 sps:$4 sm:$0xff]   ;;  %v719_v20 = vld [vmem:[#allocation2 + $0x10] ss:$36 sps:$4 sm:$0xff]   ;;  %v730_v23 = vld [vmem:[#allocation2 + $0x64] ss:$36 sps:$4 sm:$0xff]  }
  0x2e   :  { %323 = vmatprep.subr.bf16.mxu0 %v707_v9  ;;  %364 = vmatprep.subr.bf16.mxu1 %v709_v10  ;;  %v722_v21 = vld [vmem:[#allocation2 + $0x18] ss:$36 sps:$4 sm:$0xff]   ;;  %v728_v25 = vld [vmem:[#allocation2 + $0x60] ss:$36 sps:$4 sm:$0xff]   ;;  %v734_v29 = vld [vmem:[#allocation2 + $0xa8] ss:$36 sps:$4 sm:$0xff]  }
  0x2f   :  { %v727_v22 = vld [vmem:[#allocation2 + $0x5c] ss:$36 sps:$4 sm:$0xff]   ;;  %v733_v26 = vld [vmem:[#allocation2 + $0xa4] ss:$36 sps:$4 sm:$0xff]   ;;  %v739_v30 = vld [vmem:[#allocation2 + $0xec] ss:$36 sps:$4 sm:$0xff]  }
  0x30   :  { %v725_v24 = vld [vmem:[#allocation2 + $0x58] ss:$36 sps:$4 sm:$0xff]   ;;  %v731_v28 = vld [vmem:[#allocation2 + $0xa0] ss:$36 sps:$4 sm:$0xff]   ;;  %v737_v32 = vld [vmem:[#allocation2 + $0xe8] ss:$36 sps:$4 sm:$0xff]  }
  0x31   :  { %324 = vmatpush1.bf16.msra.mxu0 %v711_v11  ;;  %365 = vmatpush1.bf16.msra.mxu1 %v712_v12  ;;  %v742_v31 = vld [vmem:[#allocation2 + $0xf4] ss:$36 sps:$4 sm:$0xff]   ;;  %v743_v34 = vld [vmem:[#allocation2 + $0x20] ss:$36 sps:$4 sm:$0xff]   ;;  %v800_v35 = vmov 0.0   ;;  %vm801_vm1 = vmmov 0  }
  0x32   :  { %325 = vmatprep.subr.bf16.mxu0 %v713_v13  ;;  %366 = vmatprep.subr.bf16.mxu1 %v715_v14  ;;  %v740_v33 = vld [vmem:[#allocation2 + $0xf0] ss:$36 sps:$4 sm:$0xff]   ;;  %v744_v36 = vld [vmem:[#allocation2 + $0x68] ss:$36 sps:$4 sm:$0xff]   ;;  %v746_v38 = vld [vmem:[#allocation2 + $0xf8] ss:$36 sps:$4 sm:$0xff]  }
  0x33   :  { %v745_v37 = vld [vmem:[#allocation2 + $0xb0] ss:$36 sps:$4 sm:$0xff]   ;;  %v87_v40 = vshrl.u32 %v86_v39, 7  ;;  %v82_v43 = vld [vmem:[#allocation4] sm:$0xff]  ;;  %v802_v46 = vmov 1966171168  }
  0x34   :  { %v555_v47 = vunpack.c.l.s4 %v802_v46  ;;  %vm616_vm2 = vcmask 524288  }
  0x35   :  { %326 = vmatpush1.bf16.msra.mxu0 %v717_v15  ;;  %367 = vmatpush1.bf16.msra.mxu1 %v718_v16  ;;  %v88_v41 = vsub.s32 0, %v87_v40  ;;  %v96_v42 = vsub.s32 2, %v87_v40  ;;  %v92_v44 = vsub.s32 1, %v87_v40  ;;  %v100_v45 = vsub.s32 3, %v87_v40 }
  0x36   :  { %401 = vmatprep.subr.bf16.mxu0 %v721_v17  ;;  %442 = vmatprep.subr.bf16.mxu1 %v724_v18  ;;  %v556_v54 = vunpack.c.0.s8 %v555_v47  ;;  %v104_v10 = vsub.s32 4, %v87_v40  ;;  %v112_v11 = vsub.s32 6, %v87_v40  ;;  %v108_v13 = vsub.s32 5, %v87_v40 }
  0x37   :  { %v89_v48 = vrot.slane %v82_v43, %v88_v41  ;;  %v97_v49 = vrot.slane %v82_v43, %v96_v42  ;;  %v93_v50 = vrot.slane %v82_v43, %v92_v44  ;;  %v101_v51 = vrot.slane %v82_v43, %v100_v45 }
  0x38   :  { %661 = vmatmul.mubr.msk.bf16.vlgmr.msra.gmra.mrb[0].mxu0 %vm315_vm0, %v41_v19  ;;  %662 = vmatmul.mubr.msk.bf16.vlgmr.msra.gmra.mrb[0].mxu1 %vm315_vm0, %v41_v19  ;;  %v559_v4 = vsub.s32 %v556_v54, %v87_v40  ;;  %v116_v14 = vsub.s32 7, %v87_v40  ;;  %v105_v15 = vrot.slane %v82_v43, %v104_v10  ;;  %v113_v16 = vrot.slane %v82_v43, %v112_v11 }
  0x39   :  { %402 = vmatpush1.bf16.msra.mxu0 %v719_v20  ;;  %443 = vmatpush1.bf16.msra.mxu1 %v722_v21  ;;  %v109_v17 = vrot.slane %v82_v43, %v108_v13 }
  0x3a   :  { %403 = vmatprep.subr.bf16.mxu0 %v727_v22  ;;  %444 = vmatprep.subr.bf16.mxu1 %v730_v23  ;;  %v117_v18 = vrot.slane %v82_v43, %v116_v14  ;;  %v624_v43 = vld [vmem:[#allocation4 + $0x8] ss:$0 sm:$0xff] }
  0x3b   :  { %433 = vmatprep.mubr.bf16.mxu0 %v799_v0  ;;  %474 = vmatprep.mubr.bf16.mxu1 %v799_v0 }
  0x3d   :  { %404 = vmatpush1.bf16.msra.mxu0 %v725_v24  ;;  %445 = vmatpush1.bf16.msra.mxu1 %v728_v25 }
  0x3e   :  { %405 = vmatprep.subr.bf16.mxu0 %v733_v26  ;;  %446 = vmatprep.subr.bf16.mxu1 %v736_v27 }
  0x41   :  { %406 = vmatpush1.bf16.msra.mxu0 %v731_v28  ;;  %447 = vmatpush1.bf16.msra.mxu1 %v734_v29 }
  0x42   :  { %407 = vmatprep.subr.bf16.mxu0 %v739_v30  ;;  %448 = vmatprep.subr.bf16.mxu1 %v742_v31 }
  0x45   :  { %408 = vmatpush1.bf16.msra.mxu0 %v737_v32  ;;  %449 = vmatpush1.bf16.msra.mxu1 %v740_v33 }
  0x46   :  { %675 = vmatprep.subr.bf16.mxu0 %v800_v35 }
  0x48   :  { %663 = vmatmul.mubr.msk.bf16.vlgmr.msra.gmra.mrb[4].mxu0 %vm315_vm0, %v41_v19  ;;  %664 = vmatmul.mubr.msk.bf16.vlgmr.msra.gmra.mrb[4].mxu1 %vm315_vm0, %v41_v19 }
  0x49   :  { %676 = vmatpush3.bf16.msra.mxu0 %v743_v34  ;;  %683 = vmatprep.mubr.msk.bf16.mxu0 %vm801_vm1, %v800_v35 }
  0x4a   :  { %677 = vmatprep.subr.bf16.mxu0 %v800_v35 }
  0x4d   :  { %678 = vmatpush3.bf16.msra.mxu0 %v744_v36 }
  0x4e   :  { %679 = vmatprep.subr.bf16.mxu0 %v800_v35 }
  0x51   :  { %680 = vmatpush3.bf16.msra.mxu0 %v745_v37 }
  0x52   :  { %681 = vmatprep.subr.bf16.mxu0 %v800_v35 }
  0x55   :  { %682 = vmatpush3.bf16.msra.mxu0 %v746_v38 }
  0x58   :  { %684 = vmatmul.mubr.msk.bf16.vlgmr.msra.gmra.mrb[8].mxu0 %vm315_vm0, %v41_v19 }
 0x10b   :  { %v353_v52 = vpop.f32.mrb[0].mxu0  ;;  %v394_v53 = vpop.f32.mrb[0].mxu1 }
 0x10c   :  { %v354_v55 = vadd.f32 %v353_v52, %v89_v48  ;;  %v395_v56 = vadd.f32 %v394_v53, %v97_v49  ;;  %v355_v57 = vpop.f32.mrb[1].mxu0  ;;  %v396_v58 = vpop.f32.mrb[1].mxu1 }
 0x10d   :  { %v356_v59 = vadd.f32 %v355_v57, %v93_v50  ;;  %v397_v60 = vadd.f32 %v396_v58, %v101_v51  ;;  %v357_v61 = vpop.f32.mrb[2].mxu0  ;;  %v398_v62 = vpop.f32.mrb[2].mxu1 }
 0x10e   :  { %v523_v63 = vmax.f32 %v354_v55, 0.0  ;;  %v525_v0 = vmax.f32 %v395_v56, 0.0  ;;  %v358_v1 = vpop.f32.mrb[3].mxu0  ;;  %v399_v2 = vpop.f32.mrb[3].mxu1 }
 0x10f   :  { %v524_v3 = vmax.f32 %v356_v59, 0.0  ;;  %v526_v5 = vmax.f32 %v397_v60, 0.0 }
 0x111   :  { %v666_v6 = vpack.c.bf16 %v524_v3, %v523_v63  ;;  %v667_v7 = vpack.c.bf16 %v526_v5, %v525_v0 }
 0x113   :  { %v560_v8 = vrot.slane %v666_v6, %v559_v4  ;;  %v567_v9 = vrot.slane %v667_v7, %v559_v4 }
 0x115   :  { %v582_v12 = vcombine.low %v560_v8, %v567_v9 }
 0x117   :  { %v590_v40 = vrot.slane %v582_v12, %v559_v4 }
 0x11b   :  { %v435_v19 = vpop.f32.mrb[4].mxu0  ;;  %v476_v20 = vpop.f32.mrb[4].mxu1 }
 0x11c   :  { %v436_v21 = vadd.f32 %v435_v19, %v105_v15  ;;  %v477_v22 = vadd.f32 %v476_v20, %v113_v16  ;;  %v437_v23 = vpop.f32.mrb[5].mxu0  ;;  %v478_v24 = vpop.f32.mrb[5].mxu1 }
 0x11d   :  { %v438_v25 = vadd.f32 %v437_v23, %v109_v17  ;;  %v479_v26 = vadd.f32 %v478_v24, %v117_v18  ;;  %v439_v27 = vpop.f32.mrb[6].mxu0  ;;  %v480_v28 = vpop.f32.mrb[6].mxu1 }
 0x11e   :  { %v527_v29 = vmax.f32 %v436_v21, 0.0  ;;  %v529_v30 = vmax.f32 %v477_v22, 0.0  ;;  %v440_v31 = vpop.f32.mrb[7].mxu0  ;;  %v481_v32 = vpop.f32.mrb[7].mxu1 }
 0x11f   :  { %v528_v33 = vmax.f32 %v438_v25, 0.0  ;;  %v530_v34 = vmax.f32 %v479_v26, 0.0 }
 0x121   :  { %v668_v35 = vpack.c.bf16 %v528_v33, %v527_v29  ;;  %v669_v36 = vpack.c.bf16 %v530_v34, %v529_v30 }
 0x123   :  { %v574_v37 = vrot.slane %v668_v35, %v559_v4  ;;  %v581_v38 = vrot.slane %v669_v36, %v559_v4 }
 0x125   :  { %v583_v39 = vcombine.low %v574_v37, %v581_v38 }
 0x127   :  { %v597_v41 = vrot.slane %v583_v39, %v559_v4 }
 0x129   :  { %v598_v42 = vcombine.low %v590_v40, %v597_v41 }
 0x12b   :  { %615 = vst [vmem:[%s864_s3] sm:$0xff] %v598_v42  ;;  %v517_v44 = vpop.f32.mrb[8].mxu0 }
 0x12c   :  { %v518_v45 = vadd.f32 %v624_v43, %v517_v44  ;;  %v685_v46 = vpop.f32.mrb[9].mxu0 }
 0x12d   :  { %v520_v47 = vpop.f32.mrb[10].mxu0 }
 0x12e   :  { %v531_v48 = vmax.f32 %v518_v45, 0.0  ;;  %v686_v49 = vpop.f32.mrb[11].mxu0 }
 0x130   :  { %v540_v50 = vpack.c.bf16 %v531_v48, %v531_v48 }
 0x132   :  { %v605_v51 = vrot.slane %v540_v50, %v559_v4 }
 0x134   :  { %v612_v52 = vrot.slane %v605_v51, %v559_v4 }
 0x136   :  { %617 = vst.msk [vmem:[%s864_s3 + $0x8] sm:$0x1] %vm616_vm2, %v612_v52 }
 0x137   :  { %622 = vsyncpa [#allocation3], 1 }
 0x138   :  { %623 = vsyncpa [#allocation5], 1 }

// kernel: recon_net_forward.6
= control target key start
LH: loop header
LB: loop body
LE: loop exit
PB: predicated region body
PF: predicated region fallthrough
CT: control target
= control target key end

     0   :  { %10 = vsyncpa [#allocation3], 0  ;;  %s3834_s0 = inlined_call_operand.hbm [shape: bf16[2178,121], index: 0, kind: input, shape index: {}]   ;;  %s3835_s1 = inlined_call_operand.vmem [shape: bf16[121,64], index: 1, kind: input, shape index: {}]   ;;  %s3836_s2 = inlined_call_operand.vmem [shape: f32[1,64], index: 2, kind: input, shape index: {}]   ;;  %s3837_s3 = inlined_call_operand.vmem [shape: bf16[64,32], index: 3, kind: input, shape index: {}]   ;;  %s3838_s4 = inlined_call_operand.vmem [shape: f32[1,32], index: 4, kind: input, shape index: {}]   ;;  %s3839_s5 = inlined_call_operand.vmem [shape: bf16[2178,32], index: 5, kind: output, shape index: {}]  }
   0x1   :  { %12 = vsyncpa [#allocation3 + $0x1], 0  ;;  %s3132_s18 = smov 0   ;;  %s3134_s19 = smov 0  }
   0x2   :  { %s3136_s20 = smov 0   ;;  %s3138_s21 = smov 0  }
   0x3 LB: > { %s3151_s22 = sadd.s32 4294967295, %s3064_s21   ;;  %s3154_s23 = sadd.s32 1, %s3064_s21   ;;  %s3064_s21 = sphi %s3138_s21, %s3848_s21   ;;  %s3060_s20 = sphi %s3136_s20, %s3847_s20   ;;  %s3056_s19 = sphi %s3134_s19, %s3846_s19   ;;  %s3052_s18 = sphi %s3132_s18, %s3845_s18  }
   0x4   : > { %s22_s24 = ssub.s32 %s3064_s21, %s3154_s23  ;;  %s25_s25 = sadd.s32 1, %s3060_s20 }
   0x5   : > { %p23_p0 = scmp.eq.s32.totalorder %s22_s24, 0  ;;  %p32_p1 = scmp.ne.s32.totalorder %s3060_s20, %s3056_s19 }
   0x6   : > { %p33_p2 = scmp.eq.s32.totalorder %s3064_s21, 0  ;;  %p38_p3 = scmp.ne.s32.totalorder %s3056_s19, %s3052_s18 }
   0x7   : > { %s3164_s26 = scalar_select %p23_p0, %s3060_s20, %s25_s25  }
   0x8   : > { %p34_p4 = por %p33_p2, %p32_p1  ;;  %p39_p5 = scmp.eq.s32.totalorder %s3151_s22, 0 }
   0x9   : > { %p146_p6 = scmp.eq.s32.totalorder %s3151_s22, 4  ;;  %p2328_p9 = scmp.ge.s32.totalorder %s3064_s21, 5 }
   0xa   : > { %p3168_p7 = por %p39_p5, %p38_p3 }
   0xb   : > { %p3172_p8 = por %p146_p6, %p32_p1  ;;  %180 = sbr.rel (%p2328_p9) target bundleno = 53 (0x35), region = 32 }
  0x12   : > { %183 = sbr.rel (!%p34_p4) target bundleno = 53 (0x35), region = 36  ;;  %s184_s29 = sand.u32 (%p34_p4), 1, %s3060_s20  }
  0x13   : > { %s2330_s30 = sshll.u32 (%p34_p4), %s3064_s21, 6  ;;  %s2329_s6 = sshll.u32 (%p34_p4), %s184_s29, 8 }
  0x14   : > { %s190_s7 = ssub.s32 (%p34_p4), 273, %s2330_s30  ;;  %s3182_s10 = scalar_lea.sflag (%p34_p4), [#allocation3], %s184_s29 }
  0x15   : > { %p191_p10 = scmp.lt.s32.totalorder (%p34_p4), %s190_s7, 64  ;;  %s188_s11 = scalar_lea.vmem (%p34_p4), [#allocation2], %s2329_s6 }
  0x19   : > { %s3850_s7 = smov (!%p191_p10, %s190_s7), 64 }
  0x1a   : > { %s3179_s8 = sshll.u32 %s3850_s7, 6 }
  0x1b   : > { %s195_s9 = ssub.s32 4096, %s3179_s8 }
  0x1c   : > { %196 = vsyncadd %s3182_s10, %s195_s9  ;;  %p2332_p11 = scmp.ne.s32.totalorder %s3179_s8, 0  ;;  %s2530_s12 = sshll.u32 %s3064_s21, 12 }
  0x1d   : > { %s3190_s15 = scalar_lea.hbm %s3834_s0, %s2530_s12  ;;  %s201_s16 = sshll.u32 %s188_s11, 4  ;;  %s3192_s16 = int_to_ptr.vmem [resolvable:$true] %s201_s16 }
  0x1e   : > { %s2970_s17 = scalar_lea.hbm %s3190_s15, %s3179_s8  ;;  %s2974_s25 = scalar_lea.hbm %s3834_s0, 17472 }
  0x1f   : > { %p2971_p12 = scmp.ne.s32.totalorder %s3190_s15, %s2970_s17  ;;  %p2975_p1 = scmp.lt.u32.totalorder %s3190_s15, %s3834_s0 }
  0x20   : > { %p2976_p2 = scmp.lt.u32.totalorder %s2974_s25, %s2970_s17  ;;  %p2978_p4 = scmp.lt.u32.totalorder %s2970_s17, %s3190_s15 }
  0x21   : > { %p2972_p13 = pnand %p2971_p12, %p2332_p11 }
  0x22   : > { %p2977_p3 = por %p2976_p2, %p2975_p1 }
  0x23   : > { %p2973_p0 = pneg %p2972_p13 }
  0x24   : > { %p2979_p5 = por %p2978_p4, %p2977_p3 }
  0x26   : > { %p2980_p6 = pnand %p2979_p5, %p2973_p0 }
  0x28   : > { %2983 = shalt.err (!%p2980_p6)
}
  0x29   : > { %s2984_s6 = scalar_lea.vmem %s3192_s16, %s3179_s8  ;;  %s3098_s7 = smov [#allocation2]  }
  0x2a   : > { %p2985_p9 = scmp.ne.s32.totalorder %s3192_s16, %s2984_s6  ;;  %s2988_s9 = sshll.u32 %s3098_s7, 4  ;;  %s2989_s9 = int_to_ptr.vmem [resolvable:$false] %s2988_s9 }
  0x2b   : > { %s2990_s11 = scalar_lea.vmem %s2989_s9, 8192  ;;  %p2991_p13 = scmp.lt.s32.totalorder %s3192_s16, %s2989_s9 }
  0x2c   : > { %p2986_p10 = pnand %p2985_p9, %p2332_p11  ;;  %p2992_p1 = scmp.lt.s32.totalorder %s2990_s11, %s2984_s6 }
  0x2e   : > { %p2987_p12 = pneg %p2986_p10  ;;  %p2993_p2 = por %p2992_p1, %p2991_p13 }
  0x30   : > { %p2994_p3 = pnand %p2993_p2, %p2987_p12 }
  0x32   : > { %2997 = shalt.err (!%p2994_p3)
}
  0x33   : > { %s3099_s12 = smov 64   ;;  %s3100_s13 = smov 4  }
  0x34   : > { %207 = dma.hbm_to_vmem [thread:$0]  (%p2332_p11), %s3190_s15, %s3179_s8, %s3192_s16, %s3182_s10, %s3099_s12, %s3099_s12, %s3100_s13  }
  0x35 PF: > { %p2336_p0 = scmp.ge.s32.totalorder %s3064_s21, 1  ;;  %p209_p4 = scmp.lt.s32.totalorder %s3064_s21, 6 }
  0x37   : > { %p210_p5 = pnand %p2336_p0, %p209_p4 }
  0x38   : > { %s215_s14 = sand.u32 (!%p210_p5), 1, %s3056_s19  }
  0x39   : > { %213 = sbr.rel (%p210_p5) target bundleno = 753 (0x2f1), region = 40  ;;  %s3222_s17 = sshll.u32 (!%p210_p5), %s215_s14, 8 }
  0x3a   : > { %s216_s18 = scalar_lea.sflag (!%p210_p5), [#allocation3], %s215_s14  ;;  %s3225_s24 = scalar_lea.vmem (!%p210_p5), [#allocation2], %s3222_s17 }
  0x40   : > { %3047 = dma.done.wait (%p3168_p7), %s216_s18, 4096  }
  0x41   : > { %3049 = vsyncadd (%p3168_p7), %s216_s18, 4294963200  ;;  %v2926_v0 = vld [vmem:[%s3835_s1] sm:$0xff]   ;;  %v2927_v1 = vld [vmem:[%s3835_s1 + $0x8] sm:$0xff]   ;;  %vm550_vm0 = vcmask 990208   ;;  %vm647_vm1 = vcmask 1043456   ;;  %vm648_vm2 = vcmask 1044480  }
  0x42   : > { %2674 = vmatprep.subr.bf16.mxu0 %v2926_v0  ;;  %v2928_v2 = vld [vmem:[%s3835_s1 + $0x10] sm:$0xff]   ;;  %v2929_v3 = vld [vmem:[%s3835_s1 + $0x18] sm:$0xff]   ;;  %v2934_v4 = vld [vmem:[%s3225_s24] sm:$0xff]   ;;  %v3101_v7 = vmov 65535   ;;  %vm1078_vm3 = vcmask 523264   ;;  %vm1784_vm4 = vcmask 257024  }
  0x43   : > { %2675 = vmatpush3.bf16.msra.mxu0 %v2926_v0  ;;  %2690 = vmatprep.mubr.msk.bf16.mxu0 %vm550_vm0, %v2934_v4  ;;  %v2930_v5 = vld [vmem:[%s3835_s1 + $0x20] sm:$0xff]   ;;  %v2931_v6 = vld [vmem:[%s3835_s1 + $0x28] sm:$0xff]   ;;  %v649_v8 = vsel %vm647_vm1, 4294967295, %v3101_v7  ;;  %v2932_v9 = vld [vmem:[%s3835_s1 + $0x30] sm:$0xff]   ;;  %s3442_s7 = scalar_lea.vmem [#allocation4], %s3222_s17   ;;  %s2514_s17 = sshll.u32 (%p3172_p8), %s3151_s22, 6 }
  0x44   : > { %2676 = vmatprep.subr.bf16.mxu0 %v2927_v1  ;;  %v2933_v10 = vld [vmem:[%s3835_s1 + $0x38] sm:$0x1f]   ;;  %v650_v11 = vsel %vm648_vm2, %v649_v8, 0  ;;  %v2935_v13 = vld [vmem:[%s3225_s24 + $0x8] sm:$0xff]   ;;  %v2936_v14 = vld [vmem:[%s3225_s24 + $0x10] sm:$0xff]   ;;  %s2595_s9 = sshll.u32 (%p3172_p8), %s3151_s22, 8 }
  0x45   : > { %v652_v12 = vand.u32 %v2933_v10, %v650_v11  ;;  %v2937_v15 = vld [vmem:[%s3225_s24 + $0x18] sm:$0xff]   ;;  %v2938_v16 = vld [vmem:[%s3225_s24 + $0x20] sm:$0xff]   ;;  %v2967_v18 = vld [vmem:[%s3837_s3 + $0x8] sm:$0xff]   ;;  %s1857_s11 = ssub.s32 (%p3172_p8), 273, %s2514_s17  ;;  %s3639_s14 = scalar_lea.vmem (%p3172_p8), %s3839_s5, %s2595_s9  }
  0x46   : > { %v2966_v17 = vld [vmem:[%s3837_s3] sm:$0xff]   ;;  %v2939_v19 = vld [vmem:[%s3225_s24 + $0x28] sm:$0xff]   ;;  %v2940_v20 = vld [vmem:[%s3225_s24 + $0x30] sm:$0xff]   ;;  %p1858_p7 = scmp.lt.s32.totalorder (%p3172_p8), %s1857_s11, 64 }
  0x47   : > { %2677 = vmatpush3.bf16.msra.mxu0 %v2927_v1  ;;  %2754 = vmatprep.subr.bf16.mxu1 %v2966_v17  ;;  %v2941_v21 = vld [vmem:[%s3225_s24 + $0x38] sm:$0xff]   ;;  %v2942_v22 = vld [vmem:[%s3225_s24 + $0x40] sm:$0xff]   ;;  %v2943_v23 = vld [vmem:[%s3225_s24 + $0x48] sm:$0xff]  }
  0x48   : > { %2678 = vmatprep.subr.bf16.mxu0 %v2928_v2  ;;  %2755 = vmatpush3.bf16.msra.mxu1 %v2966_v17  ;;  %v2944_v24 = vld [vmem:[%s3225_s24 + $0x50] sm:$0xff]   ;;  %v2945_v25 = vld [vmem:[%s3225_s24 + $0x58] sm:$0xff]   ;;  %v2946_v26 = vld [vmem:[%s3225_s24 + $0x60] sm:$0xff]  }
  0x49   : > { %2756 = vmatprep.subr.bf16.mxu1 %v2967_v18  ;;  %v2947_v27 = vld [vmem:[%s3225_s24 + $0x68] sm:$0xff]   ;;  %v2948_v28 = vld [vmem:[%s3225_s24 + $0x70] sm:$0xff]   ;;  %v2949_v29 = vld [vmem:[%s3225_s24 + $0x78] sm:$0xff]  }
  0x4a   : > { %v2950_v30 = vld [vmem:[%s3225_s24 + $0x80] sm:$0xff]   ;;  %v2951_v31 = vld [vmem:[%s3225_s24 + $0x88] sm:$0xff]   ;;  %v2952_v32 = vld [vmem:[%s3225_s24 + $0x90] sm:$0xff]  }
  0x4b   : > { %2679 = vmatpush3.bf16.msra.mxu0 %v2928_v2  ;;  %v2953_v33 = vld [vmem:[%s3225_s24 + $0x98] sm:$0xff]   ;;  %v2954_v34 = vld [vmem:[%s3225_s24 + $0xa0] sm:$0xff]   ;;  %v2955_v35 = vld [vmem:[%s3225_s24 + $0xa8] sm:$0xff]  }
  0x4c   : > { %2680 = vmatprep.subr.bf16.mxu0 %v2929_v3  ;;  %2757 = vmatpush3.bf16.msra.mxu1 %v2967_v18  ;;  %v2956_v36 = vld [vmem:[%s3225_s24 + $0xb0] sm:$0xff]   ;;  %v2957_v37 = vld [vmem:[%s3225_s24 + $0xb8] sm:$0xff]   ;;  %v2958_v39 = vld [vmem:[%s3225_s24 + $0xc0] sm:$0xff]  }
  0x4d   : > { %v2968_v38 = vld [vmem:[%s3837_s3 + $0x10] sm:$0xff]   ;;  %v2969_v40 = vld [vmem:[%s3837_s3 + $0x18] sm:$0xff]   ;;  %v2959_v41 = vld [vmem:[%s3225_s24 + $0xc8] sm:$0xff]  }
  0x4e   : > { %2758 = vmatprep.subr.bf16.mxu1 %v2968_v38  ;;  %v2960_v42 = vld [vmem:[%s3225_s24 + $0xd0] sm:$0xff]   ;;  %v2961_v43 = vld [vmem:[%s3225_s24 + $0xd8] sm:$0xff]   ;;  %v2962_v44 = vld [vmem:[%s3225_s24 + $0xe0] sm:$0xff]  }
  0x4f   : > { %2681 = vmatpush3.bf16.msra.mxu0 %v2929_v3  ;;  %v2963_v45 = vld [vmem:[%s3225_s24 + $0xe8] sm:$0xff]   ;;  %v2964_v46 = vld [vmem:[%s3225_s24 + $0xf0] sm:$0xff]   ;;  %v2965_v47 = vld [vmem:[%s3225_s24 + $0xf8] sm:$0xff]  }
  0x50   : > { %2682 = vmatprep.subr.bf16.mxu0 %v2930_v5  ;;  %2759 = vmatpush3.bf16.msra.mxu1 %v2968_v38  ;;  %v3334_v48 = vld [vmem:[%s3836_s2] ss:$0 sm:$0xff] }
  0x51   : > { %2760 = vmatprep.subr.bf16.mxu1 %v2969_v40 }
  0x53   : > { %2683 = vmatpush3.bf16.msra.mxu0 %v2930_v5 }
  0x54   : > { %2684 = vmatprep.subr.bf16.mxu0 %v2931_v6  ;;  %2761 = vmatpush3.bf16.msra.mxu1 %v2969_v40 }
  0x57   : > { %2685 = vmatpush3.bf16.msra.mxu0 %v2931_v6 }
  0x58   : > { %2686 = vmatprep.subr.bf16.mxu0 %v2932_v9 }
  0x5b   : > { %2687 = vmatpush3.bf16.msra.mxu0 %v2932_v9 }
  0x5c   : > { %2688 = vmatprep.subr.bf16.mxu0 %v652_v12 }
  0x5f   : > { %2689 = vmatpush3.bf16.msra.mxu0 %v652_v12 }
  0x62   : > { %2691 = vmatmul.mubr.msk.bf16.vlgmr.msra.gmra.mrb[0].mxu0 %vm550_vm0, %v2935_v13 }
  0x63   : > { %2694 = vmatprep.mubr.msk.bf16.mxu0 %vm550_vm0, %v2936_v14 }
  0x6a   : > { %2695 = vmatmul.mubr.msk.bf16.gmra.mrb[4].mxu0 %vm550_vm0, %v2937_v15 }
  0x6b   : > { %2698 = vmatprep.mubr.msk.bf16.mxu0 %vm550_vm0, %v2938_v16 }
  0x72   : > { %2699 = vmatmul.mubr.msk.bf16.gmra.mrb[8].mxu0 %vm550_vm0, %v2939_v19 }
  0x73   : > { %2702 = vmatprep.mubr.msk.bf16.mxu0 %vm550_vm0, %v2940_v20 }
  0x7a   : > { %2703 = vmatmul.mubr.msk.bf16.gmra.mrb[12].mxu0 %vm550_vm0, %v2941_v21 }
  0x7b   : > { %2706 = vmatprep.mubr.msk.bf16.mxu0 %vm550_vm0, %v2942_v22 }
  0x82   : > { %2707 = vmatmul.mubr.msk.bf16.gmra.mrb[16].mxu0 %vm550_vm0, %v2943_v23 }
  0x83   : > { %2710 = vmatprep.mubr.msk.bf16.mxu0 %vm550_vm0, %v2944_v24 }
  0x8a   : > { %2711 = vmatmul.mubr.msk.bf16.gmra.mrb[20].mxu0 %vm550_vm0, %v2945_v25 }
  0x8b   : > { %2714 = vmatprep.mubr.msk.bf16.mxu0 %vm550_vm0, %v2946_v26 }
  0x92   : > { %2715 = vmatmul.mubr.msk.bf16.gmra.mrb[24].mxu0 %vm550_vm0, %v2947_v27 }
  0x93   : > { %2718 = vmatprep.mubr.msk.bf16.mxu0 %vm550_vm0, %v2948_v28 }
  0x9a   : > { %2719 = vmatmul.mubr.msk.bf16.gmra.mrb[28].mxu0 %vm550_vm0, %v2949_v29 }
  0x9b   : > { %2722 = vmatprep.mubr.msk.bf16.mxu0 %vm550_vm0, %v2950_v30 }
  0xa2   : > { %2723 = vmatmul.mubr.msk.bf16.gmra.mrb[32].mxu0 %vm550_vm0, %v2951_v31 }
  0xa3   : > { %2726 = vmatprep.mubr.msk.bf16.mxu0 %vm550_vm0, %v2952_v32 }
  0xaa   : > { %2727 = vmatmul.mubr.msk.bf16.gmra.mrb[36].mxu0 %vm550_vm0, %v2953_v33 }
  0xab   : > { %2730 = vmatprep.mubr.msk.bf16.mxu0 %vm550_vm0, %v2954_v34 }
  0xb2   : > { %2731 = vmatmul.mubr.msk.bf16.gmra.mrb[40].mxu0 %vm550_vm0, %v2955_v35 }
  0xb3   : > { %2734 = vmatprep.mubr.msk.bf16.mxu0 %vm550_vm0, %v2956_v36 }
  0xba   : > { %2735 = vmatmul.mubr.msk.bf16.gmra.mrb[44].mxu0 %vm550_vm0, %v2957_v37 }
  0xbb   : > { %2738 = vmatprep.mubr.msk.bf16.mxu0 %vm550_vm0, %v2958_v39 }
  0xc2   : > { %2739 = vmatmul.mubr.msk.bf16.gmra.mrb[48].mxu0 %vm550_vm0, %v2959_v41 }
  0xc3   : > { %2742 = vmatprep.mubr.msk.bf16.mxu0 %vm550_vm0, %v2960_v42 }
  0xca   : > { %2743 = vmatmul.mubr.msk.bf16.gmra.mrb[52].mxu0 %vm550_vm0, %v2961_v43 }
  0xcb   : > { %2746 = vmatprep.mubr.msk.bf16.mxu0 %vm550_vm0, %v2962_v44 }
  0xd2   : > { %2747 = vmatmul.mubr.msk.bf16.gmra.mrb[56].mxu0 %vm550_vm0, %v2963_v45 }
  0xd3   : > { %2750 = vmatprep.mubr.msk.bf16.mxu0 %vm550_vm0, %v2964_v46 }
  0xda   : > { %2751 = vmatmul.mubr.msk.bf16.gmra.mrb[60].mxu0 %vm550_vm0, %v2965_v47 }
 0x135   : > { %v2692_v49 = vpop.f32.mrb[0].mxu0 }
 0x136   : > { %v697_v50 = vadd.f32 %v2692_v49, %v3334_v48  ;;  %v688_v51 = vpop.f32.mrb[1].mxu0 }
 0x137   : > { %v689_v52 = vadd.f32 %v3334_v48, %v688_v51  ;;  %v2693_v53 = vpop.f32.mrb[2].mxu0 }
 0x138   : > { %v700_v54 = vadd.f32 %v2693_v53, %v3334_v48  ;;  %v691_v55 = vpop.f32.mrb[3].mxu0  ;;  %v945_v57 = vmax.f32 %v697_v50, 0.0 }
 0x139   : > { %v692_v56 = vadd.f32 %v3334_v48, %v691_v55  ;;  %v943_v59 = vmax.f32 %v689_v52, 0.0 }
 0x13a   : > { %v946_v58 = vmax.f32 %v700_v54, 0.0 }
 0x13b   : > { %v944_v60 = vmax.f32 %v692_v56, 0.0 }
 0x13c   : > { %v1008_v61 = vpack.c.bf16 %v946_v58, %v945_v57 }
 0x13d   : > { %v2696_v62 = vpop.f32.mrb[4].mxu0  ;;  %v1007_v63 = vpack.c.bf16 %v944_v60, %v943_v59 }
 0x13e   : > { %v713_v0 = vadd.f32 %v2696_v62, %v3334_v48  ;;  %v704_v1 = vpop.f32.mrb[5].mxu0 }
 0x13f   : > { %v705_v2 = vadd.f32 %v3334_v48, %v704_v1  ;;  %v2697_v3 = vpop.f32.mrb[6].mxu0  ;;  %2762 = vmatprep.mubr.msk.bf16.mxu1 %vm1078_vm3, %v1007_v63 }
 0x140   : > { %v716_v4 = vadd.f32 %v2697_v3, %v3334_v48  ;;  %v707_v5 = vpop.f32.mrb[7].mxu0  ;;  %2763 = vmatmul.mubr.msk.bf16.vlgmr.msra.gmra.mrb[0].mxu1 %vm1078_vm3, %v1008_v61  ;;  %v949_v7 = vmax.f32 %v713_v0, 0.0 }
 0x141   : > { %v708_v6 = vadd.f32 %v3334_v48, %v707_v5  ;;  %v947_v9 = vmax.f32 %v705_v2, 0.0 }
 0x142   : > { %v950_v8 = vmax.f32 %v716_v4, 0.0 }
 0x143   : > { %v948_v10 = vmax.f32 %v708_v6, 0.0 }
 0x144   : > { %v1010_v11 = vpack.c.bf16 %v950_v8, %v949_v7 }
 0x145   : > { %v1009_v12 = vpack.c.bf16 %v948_v10, %v947_v9  ;;  %v2700_v13 = vpop.f32.mrb[8].mxu0 }
 0x146   : > { %v729_v14 = vadd.f32 %v2700_v13, %v3334_v48  ;;  %v720_v15 = vpop.f32.mrb[9].mxu0 }
 0x147   : > { %v721_v16 = vadd.f32 %v3334_v48, %v720_v15  ;;  %v2701_v17 = vpop.f32.mrb[10].mxu0  ;;  %2766 = vmatprep.mubr.msk.bf16.mxu1 %vm1078_vm3, %v1009_v12 }
 0x148   : > { %v732_v18 = vadd.f32 %v2701_v17, %v3334_v48  ;;  %v723_v19 = vpop.f32.mrb[11].mxu0  ;;  %2767 = vmatmul.mubr.msk.bf16.gmra.mrb[4].mxu1 %vm1078_vm3, %v1010_v11  ;;  %v953_v21 = vmax.f32 %v729_v14, 0.0 }
 0x149   : > { %v724_v20 = vadd.f32 %v3334_v48, %v723_v19  ;;  %v951_v23 = vmax.f32 %v721_v16, 0.0 }
 0x14a   : > { %v954_v22 = vmax.f32 %v732_v18, 0.0 }
 0x14b   : > { %v952_v24 = vmax.f32 %v724_v20, 0.0 }
 0x14c   : > { %v1012_v25 = vpack.c.bf16 %v954_v22, %v953_v21 }
 0x14d   : > { %v1011_v26 = vpack.c.bf16 %v952_v24, %v951_v23  ;;  %v2704_v27 = vpop.f32.mrb[12].mxu0 }
 0x14e   : > { %v745_v28 = vadd.f32 %v2704_v27, %v3334_v48  ;;  %v736_v29 = vpop.f32.mrb[13].mxu0 }
 0x14f   : > { %v737_v30 = vadd.f32 %v3334_v48, %v736_v29  ;;  %v2705_v31 = vpop.f32.mrb[14].mxu0  ;;  %2770 = vmatprep.mubr.msk.bf16.mxu1 %vm1078_vm3, %v1011_v26 }
 0x150   : > { %v748_v32 = vadd.f32 %v2705_v31, %v3334_v48  ;;  %v739_v33 = vpop.f32.mrb[15].mxu0  ;;  %2771 = vmatmul.mubr.msk.bf16.gmra.mrb[8].mxu1 %vm1078_vm3, %v1012_v25  ;;  %v957_v35 = vmax.f32 %v745_v28, 0.0 }
 0x151   : > { %v740_v34 = vadd.f32 %v3334_v48, %v739_v33  ;;  %v955_v37 = vmax.f32 %v737_v30, 0.0 }
 0x152   : > { %v958_v36 = vmax.f32 %v748_v32, 0.0 }
 0x153   : > { %v956_v38 = vmax.f32 %v740_v34, 0.0 }
 0x154   : > { %v1014_v39 = vpack.c.bf16 %v958_v36, %v957_v35 }
 0x155   : > { %v1013_v40 = vpack.c.bf16 %v956_v38, %v955_v37  ;;  %v2708_v41 = vpop.f32.mrb[16].mxu0 }
 0x156   : > { %v761_v42 = vadd.f32 %v2708_v41, %v3334_v48  ;;  %v752_v43 = vpop.f32.mrb[17].mxu0 }
 0x157   : > { %v753_v44 = vadd.f32 %v3334_v48, %v752_v43  ;;  %v2709_v45 = vpop.f32.mrb[18].mxu0  ;;  %2774 = vmatprep.mubr.msk.bf16.mxu1 %vm1078_vm3, %v1013_v40 }
 0x158   : > { %v764_v46 = vadd.f32 %v2709_v45, %v3334_v48  ;;  %v755_v47 = vpop.f32.mrb[19].mxu0  ;;  %2775 = vmatmul.mubr.msk.bf16.gmra.mrb[12].mxu1 %vm1078_vm3, %v1014_v39  ;;  %v961_v50 = vmax.f32 %v761_v42, 0.0 }
 0x159   : > { %v756_v49 = vadd.f32 %v3334_v48, %v755_v47  ;;  %v959_v52 = vmax.f32 %v753_v44, 0.0 }
 0x15a   : > { %v962_v51 = vmax.f32 %v764_v46, 0.0 }
 0x15b   : > { %v960_v53 = vmax.f32 %v756_v49, 0.0 }
 0x15c   : > { %v1016_v54 = vpack.c.bf16 %v962_v51, %v961_v50 }
 0x15d   : > { %v1015_v55 = vpack.c.bf16 %v960_v53, %v959_v52  ;;  %v2712_v56 = vpop.f32.mrb[20].mxu0 }
 0x15e   : > { %v777_v57 = vadd.f32 %v2712_v56, %v3334_v48  ;;  %v768_v58 = vpop.f32.mrb[21].mxu0 }
 0x15f   : > { %v769_v59 = vadd.f32 %v3334_v48, %v768_v58  ;;  %v2713_v60 = vpop.f32.mrb[22].mxu0  ;;  %2778 = vmatprep.mubr.msk.bf16.mxu1 %vm1078_vm3, %v1015_v55 }
 0x160   : > { %v780_v61 = vadd.f32 %v2713_v60, %v3334_v48  ;;  %v771_v62 = vpop.f32.mrb[23].mxu0  ;;  %2779 = vmatmul.mubr.msk.bf16.gmra.mrb[16].mxu1 %vm1078_vm3, %v1016_v54  ;;  %v965_v0 = vmax.f32 %v777_v57, 0.0 }
 0x161   : > { %v772_v63 = vadd.f32 %v3334_v48, %v771_v62  ;;  %v963_v2 = vmax.f32 %v769_v59, 0.0 }
 0x162   : > { %v966_v1 = vmax.f32 %v780_v61, 0.0 }
 0x163   : > { %v964_v3 = vmax.f32 %v772_v63, 0.0 }
 0x164   : > { %v1018_v4 = vpack.c.bf16 %v966_v1, %v965_v0 }
 0x165   : > { %v1017_v5 = vpack.c.bf16 %v964_v3, %v963_v2  ;;  %v2716_v6 = vpop.f32.mrb[24].mxu0 }
 0x166   : > { %v793_v7 = vadd.f32 %v2716_v6, %v3334_v48  ;;  %v784_v8 = vpop.f32.mrb[25].mxu0 }
 0x167   : > { %v785_v9 = vadd.f32 %v3334_v48, %v784_v8  ;;  %v2717_v10 = vpop.f32.mrb[26].mxu0  ;;  %2782 = vmatprep.mubr.msk.bf16.mxu1 %vm1078_vm3, %v1017_v5 }
 0x168   : > { %v796_v11 = vadd.f32 %v2717_v10, %v3334_v48  ;;  %v787_v12 = vpop.f32.mrb[27].mxu0  ;;  %2783 = vmatmul.mubr.msk.bf16.gmra.mrb[20].mxu1 %vm1078_vm3, %v1018_v4  ;;  %v969_v14 = vmax.f32 %v793_v7, 0.0 }
 0x169   : > { %v788_v13 = vadd.f32 %v3334_v48, %v787_v12  ;;  %v967_v16 = vmax.f32 %v785_v9, 0.0 }
 0x16a   : > { %v970_v15 = vmax.f32 %v796_v11, 0.0 }
 0x16b   : > { %v968_v17 = vmax.f32 %v788_v13, 0.0 }
 0x16c   : > { %v1020_v18 = vpack.c.bf16 %v970_v15, %v969_v14 }
 0x16d   : > { %v1019_v19 = vpack.c.bf16 %v968_v17, %v967_v16  ;;  %v2720_v20 = vpop.f32.mrb[28].mxu0 }
 0x16e   : > { %v809_v21 = vadd.f32 %v2720_v20, %v3334_v48  ;;  %v800_v22 = vpop.f32.mrb[29].mxu0 }
 0x16f   : > { %v801_v23 = vadd.f32 %v3334_v48, %v800_v22  ;;  %v2721_v24 = vpop.f32.mrb[30].mxu0  ;;  %2786 = vmatprep.mubr.msk.bf16.mxu1 %vm1078_vm3, %v1019_v19 }
 0x170   : > { %v812_v25 = vadd.f32 %v2721_v24, %v3334_v48  ;;  %v803_v26 = vpop.f32.mrb[31].mxu0  ;;  %2787 = vmatmul.mubr.msk.bf16.gmra.mrb[24].mxu1 %vm1078_vm3, %v1020_v18  ;;  %v973_v28 = vmax.f32 %v809_v21, 0.0 }
 0x171   : > { %v804_v27 = vadd.f32 %v3334_v48, %v803_v26  ;;  %v971_v30 = vmax.f32 %v801_v23, 0.0 }
 0x172   : > { %v974_v29 = vmax.f32 %v812_v25, 0.0 }
 0x173   : > { %v972_v31 = vmax.f32 %v804_v27, 0.0 }
 0x174   : > { %v1022_v32 = vpack.c.bf16 %v974_v29, %v973_v28 }
 0x175   : > { %v1021_v33 = vpack.c.bf16 %v972_v31, %v971_v30  ;;  %v2724_v34 = vpop.f32.mrb[32].mxu0 }
 0x176   : > { %v825_v35 = vadd.f32 %v2724_v34, %v3334_v48  ;;  %v816_v36 = vpop.f32.mrb[33].mxu0 }
 0x177   : > { %v817_v37 = vadd.f32 %v3334_v48, %v816_v36  ;;  %v2725_v38 = vpop.f32.mrb[34].mxu0  ;;  %2790 = vmatprep.mubr.msk.bf16.mxu1 %vm1078_vm3, %v1021_v33 }
 0x178   : > { %v828_v39 = vadd.f32 %v2725_v38, %v3334_v48  ;;  %v819_v40 = vpop.f32.mrb[35].mxu0  ;;  %2791 = vmatmul.mubr.msk.bf16.gmra.mrb[28].mxu1 %vm1078_vm3, %v1022_v32  ;;  %v977_v42 = vmax.f32 %v825_v35, 0.0 }
 0x179   : > { %v820_v41 = vadd.f32 %v3334_v48, %v819_v40  ;;  %v975_v44 = vmax.f32 %v817_v37, 0.0 }
 0x17a   : > { %v978_v43 = vmax.f32 %v828_v39, 0.0 }
 0x17b   : > { %v976_v45 = vmax.f32 %v820_v41, 0.0 }
 0x17c   : > { %v1024_v46 = vpack.c.bf16 %v978_v43, %v977_v42 }
 0x17d   : > { %v1023_v47 = vpack.c.bf16 %v976_v45, %v975_v44  ;;  %v2728_v49 = vpop.f32.mrb[36].mxu0 }
 0x17e   : > { %v841_v50 = vadd.f32 %v2728_v49, %v3334_v48  ;;  %v832_v51 = vpop.f32.mrb[37].mxu0 }
 0x17f   : > { %v833_v52 = vadd.f32 %v3334_v48, %v832_v51  ;;  %v2729_v53 = vpop.f32.mrb[38].mxu0  ;;  %2794 = vmatprep.mubr.msk.bf16.mxu1 %vm1078_vm3, %v1023_v47 }
 0x180   : > { %v844_v54 = vadd.f32 %v2729_v53, %v3334_v48  ;;  %v835_v55 = vpop.f32.mrb[39].mxu0  ;;  %2795 = vmatmul.mubr.msk.bf16.gmra.mrb[32].mxu1 %vm1078_vm3, %v1024_v46  ;;  %v981_v57 = vmax.f32 %v841_v50, 0.0 }
 0x181   : > { %v836_v56 = vadd.f32 %v3334_v48, %v835_v55  ;;  %v979_v59 = vmax.f32 %v833_v52, 0.0 }
 0x182   : > { %v982_v58 = vmax.f32 %v844_v54, 0.0 }
 0x183   : > { %v980_v60 = vmax.f32 %v836_v56, 0.0 }
 0x184   : > { %v1026_v61 = vpack.c.bf16 %v982_v58, %v981_v57 }
 0x185   : > { %v1025_v62 = vpack.c.bf16 %v980_v60, %v979_v59  ;;  %v2732_v63 = vpop.f32.mrb[40].mxu0 }
 0x186   : > { %v857_v0 = vadd.f32 %v2732_v63, %v3334_v48  ;;  %v848_v1 = vpop.f32.mrb[41].mxu0 }
 0x187   : > { %v849_v2 = vadd.f32 %v3334_v48, %v848_v1  ;;  %v2733_v3 = vpop.f32.mrb[42].mxu0  ;;  %2798 = vmatprep.mubr.msk.bf16.mxu1 %vm1078_vm3, %v1025_v62 }
 0x188   : > { %v860_v4 = vadd.f32 %v2733_v3, %v3334_v48  ;;  %v851_v5 = vpop.f32.mrb[43].mxu0  ;;  %2799 = vmatmul.mubr.msk.bf16.gmra.mrb[36].mxu1 %vm1078_vm3, %v1026_v61  ;;  %v985_v7 = vmax.f32 %v857_v0, 0.0 }
 0x189   : > { %v852_v6 = vadd.f32 %v3334_v48, %v851_v5  ;;  %v983_v9 = vmax.f32 %v849_v2, 0.0 }
 0x18a   : > { %v986_v8 = vmax.f32 %v860_v4, 0.0 }
 0x18b   : > { %v984_v10 = vmax.f32 %v852_v6, 0.0 }
 0x18c   : > { %v1028_v11 = vpack.c.bf16 %v986_v8, %v985_v7 }
 0x18d   : > { %v1027_v12 = vpack.c.bf16 %v984_v10, %v983_v9  ;;  %v2736_v13 = vpop.f32.mrb[44].mxu0 }
 0x18e   : > { %v873_v14 = vadd.f32 %v2736_v13, %v3334_v48  ;;  %v864_v15 = vpop.f32.mrb[45].mxu0 }
 0x18f   : > { %v865_v16 = vadd.f32 %v3334_v48, %v864_v15  ;;  %v2737_v17 = vpop.f32.mrb[46].mxu0  ;;  %2802 = vmatprep.mubr.msk.bf16.mxu1 %vm1078_vm3, %v1027_v12 }
 0x190   : > { %v876_v18 = vadd.f32 %v2737_v17, %v3334_v48  ;;  %v867_v19 = vpop.f32.mrb[47].mxu0  ;;  %2803 = vmatmul.mubr.msk.bf16.gmra.mrb[40].mxu1 %vm1078_vm3, %v1028_v11  ;;  %v989_v21 = vmax.f32 %v873_v14, 0.0 }
 0x191   : > { %v868_v20 = vadd.f32 %v3334_v48, %v867_v19  ;;  %v987_v23 = vmax.f32 %v865_v16, 0.0 }
 0x192   : > { %v990_v22 = vmax.f32 %v876_v18, 0.0 }
 0x193   : > { %v988_v24 = vmax.f32 %v868_v20, 0.0  ;;  %v3435_v20 = vld [vmem:[%s3838_s4] ss:$0 sm:$0xff] }
 0x194   : > { %v1030_v25 = vpack.c.bf16 %v990_v22, %v989_v21 }
 0x195   : > { %v1029_v26 = vpack.c.bf16 %v988_v24, %v987_v23  ;;  %v2740_v27 = vpop.f32.mrb[48].mxu0 }
 0x196   : > { %v889_v28 = vadd.f32 %v2740_v27, %v3334_v48  ;;  %v880_v29 = vpop.f32.mrb[49].mxu0 }
 0x197   : > { %v881_v30 = vadd.f32 %v3334_v48, %v880_v29  ;;  %v2741_v31 = vpop.f32.mrb[50].mxu0  ;;  %2806 = vmatprep.mubr.msk.bf16.mxu1 %vm1078_vm3, %v1029_v26 }
 0x198   : > { %v892_v32 = vadd.f32 %v2741_v31, %v3334_v48  ;;  %v883_v33 = vpop.f32.mrb[51].mxu0  ;;  %2807 = vmatmul.mubr.msk.bf16.gmra.mrb[44].mxu1 %vm1078_vm3, %v1030_v25  ;;  %v993_v35 = vmax.f32 %v889_v28, 0.0 }
 0x199   : > { %v884_v34 = vadd.f32 %v3334_v48, %v883_v33  ;;  %v991_v37 = vmax.f32 %v881_v30, 0.0 }
 0x19a   : > { %v994_v36 = vmax.f32 %v892_v32, 0.0 }
 0x19b   : > { %v992_v38 = vmax.f32 %v884_v34, 0.0 }
 0x19c   : > { %v1032_v39 = vpack.c.bf16 %v994_v36, %v993_v35 }
 0x19d   : > { %v1031_v40 = vpack.c.bf16 %v992_v38, %v991_v37  ;;  %v2744_v41 = vpop.f32.mrb[52].mxu0 }
 0x19e   : > { %v905_v42 = vadd.f32 %v2744_v41, %v3334_v48  ;;  %v896_v43 = vpop.f32.mrb[53].mxu0 }
 0x19f   : > { %v897_v44 = vadd.f32 %v3334_v48, %v896_v43  ;;  %v2745_v45 = vpop.f32.mrb[54].mxu0  ;;  %2810 = vmatprep.mubr.msk.bf16.mxu1 %vm1078_vm3, %v1031_v40 }
 0x1a0   : > { %v908_v46 = vadd.f32 %v2745_v45, %v3334_v48  ;;  %v899_v47 = vpop.f32.mrb[55].mxu0  ;;  %2811 = vmatmul.mubr.msk.bf16.gmra.mrb[48].mxu1 %vm1078_vm3, %v1032_v39  ;;  %v997_v50 = vmax.f32 %v905_v42, 0.0 }
 0x1a1   : > { %v900_v49 = vadd.f32 %v3334_v48, %v899_v47  ;;  %v995_v52 = vmax.f32 %v897_v44, 0.0 }
 0x1a2   : > { %v998_v51 = vmax.f32 %v908_v46, 0.0 }
 0x1a3   : > { %v996_v53 = vmax.f32 %v900_v49, 0.0 }
 0x1a4   : > { %v1034_v54 = vpack.c.bf16 %v998_v51, %v997_v50 }
 0x1a5   : > { %v1033_v55 = vpack.c.bf16 %v996_v53, %v995_v52  ;;  %v2748_v56 = vpop.f32.mrb[56].mxu0 }
 0x1a6   : > { %v921_v57 = vadd.f32 %v2748_v56, %v3334_v48  ;;  %v912_v58 = vpop.f32.mrb[57].mxu0 }
 0x1a7   : > { %v913_v59 = vadd.f32 %v3334_v48, %v912_v58  ;;  %v2749_v60 = vpop.f32.mrb[58].mxu0  ;;  %2814 = vmatprep.mubr.msk.bf16.mxu1 %vm1078_vm3, %v1033_v55 }
 0x1a8   : > { %v924_v61 = vadd.f32 %v2749_v60, %v3334_v48  ;;  %v915_v62 = vpop.f32.mrb[59].mxu0  ;;  %2815 = vmatmul.mubr.msk.bf16.gmra.mrb[52].mxu1 %vm1078_vm3, %v1034_v54  ;;  %v1001_v0 = vmax.f32 %v921_v57, 0.0 }
 0x1a9   : > { %v916_v63 = vadd.f32 %v3334_v48, %v915_v62  ;;  %v999_v2 = vmax.f32 %v913_v59, 0.0 }
 0x1aa   : > { %v1002_v1 = vmax.f32 %v924_v61, 0.0 }
 0x1ab   : > { %v1000_v3 = vmax.f32 %v916_v63, 0.0 }
 0x1ac   : > { %v1036_v4 = vpack.c.bf16 %v1002_v1, %v1001_v0 }
 0x1ad   : > { %v1035_v5 = vpack.c.bf16 %v1000_v3, %v999_v2  ;;  %v2752_v6 = vpop.f32.mrb[60].mxu0 }
 0x1ae   : > { %v937_v7 = vadd.f32 %v2752_v6, %v3334_v48  ;;  %v928_v8 = vpop.f32.mrb[61].mxu0 }
 0x1af   : > { %v929_v9 = vadd.f32 %v3334_v48, %v928_v8  ;;  %v2753_v10 = vpop.f32.mrb[62].mxu0  ;;  %2818 = vmatprep.mubr.msk.bf16.mxu1 %vm1078_vm3, %v1035_v5 }
 0x1b0   : > { %v940_v11 = vadd.f32 %v2753_v10, %v3334_v48  ;;  %v931_v12 = vpop.f32.mrb[63].mxu0  ;;  %2819 = vmatmul.mubr.msk.bf16.gmra.mrb[56].mxu1 %vm1078_vm3, %v1036_v4  ;;  %v1005_v14 = vmax.f32 %v937_v7, 0.0 }
 0x1b1   : > { %v932_v13 = vadd.f32 %v3334_v48, %v931_v12  ;;  %v1003_v16 = vmax.f32 %v929_v9, 0.0 }
 0x1b2   : > { %v1006_v15 = vmax.f32 %v940_v11, 0.0 }
 0x1b3   : > { %v1004_v17 = vmax.f32 %v932_v13, 0.0 }
 0x1b4   : > { %v1038_v18 = vpack.c.bf16 %v1006_v15, %v1005_v14 }
 0x1b5   : > { %v1037_v19 = vpack.c.bf16 %v1004_v17, %v1003_v16 }
 0x1b7   : > { %2822 = vmatprep.mubr.msk.bf16.mxu1 %vm1078_vm3, %v1037_v19 }
 0x1b8   : > { %2823 = vmatmul.mubr.msk.bf16.gmra.mrb[60].mxu1 %vm1078_vm3, %v1038_v18 }
 0x213   : > { %v2764_v21 = vpop.f32.mrb[0].mxu1 }
 0x214   : > { %v1218_v22 = vadd.f32 %v2764_v21, %v3435_v20  ;;  %v1209_v48 = vpop.f32.mrb[1].mxu1 }
 0x215   : > { %v1210_v23 = vadd.f32 %v3435_v20, %v1209_v48  ;;  %v2765_v24 = vpop.f32.mrb[2].mxu1 }
 0x216   : > { %v1466_v25 = vmax.f32 %v1218_v22, 0.0  ;;  %v1221_v26 = vadd.f32 %v2765_v24, %v3435_v20  ;;  %v1212_v27 = vpop.f32.mrb[3].mxu1 }
 0x217   : > { %v1464_v28 = vmax.f32 %v1210_v23, 0.0  ;;  %v1213_v29 = vadd.f32 %v3435_v20, %v1212_v27 }
 0x218   : > { %v2533_v30 = vpack.c.bf16 %v1466_v25, %v1466_v25  ;;  %v1467_v31 = vmax.f32 %v1221_v26, 0.0 }
 0x219   : > { %v2531_v32 = vpack.c.bf16 %v1464_v28, %v1464_v28  ;;  %v1465_v33 = vmax.f32 %v1213_v29, 0.0 }
 0x21a   : > { %1787 = vst.msk [vmem:[%s3442_s7 + $0x8] sm:$0xf] %vm1784_vm4, %v2533_v30  ;;  %v2534_v34 = vpack.c.bf16 %v1467_v31, %v1467_v31 }
 0x21b   : > { %1785 = vst.msk [vmem:[%s3442_s7] sm:$0xf] %vm1784_vm4, %v2531_v32  ;;  %v2532_v35 = vpack.c.bf16 %v1465_v33, %v1465_v33  ;;  %v2768_v36 = vpop.f32.mrb[4].mxu1 }
 0x21c   : > { %1788 = vst.msk [vmem:[%s3442_s7 + $0xc] sm:$0xf] %vm1784_vm4, %v2534_v34  ;;  %v1234_v37 = vadd.f32 %v2768_v36, %v3435_v20  ;;  %v1225_v38 = vpop.f32.mrb[5].mxu1 }
 0x21d   : > { %1786 = vst.msk [vmem:[%s3442_s7 + $0x4] sm:$0xf] %vm1784_vm4, %v2532_v35  ;;  %v1226_v39 = vadd.f32 %v3435_v20, %v1225_v38  ;;  %v2769_v40 = vpop.f32.mrb[6].mxu1 }
 0x21e   : > { %v1470_v41 = vmax.f32 %v1234_v37, 0.0  ;;  %v1237_v42 = vadd.f32 %v2769_v40, %v3435_v20  ;;  %v1228_v43 = vpop.f32.mrb[7].mxu1 }
 0x21f   : > { %v1468_v44 = vmax.f32 %v1226_v39, 0.0  ;;  %v1229_v45 = vadd.f32 %v3435_v20, %v1228_v43 }
 0x220   : > { %v2537_v46 = vpack.c.bf16 %v1470_v41, %v1470_v41  ;;  %v1471_v47 = vmax.f32 %v1237_v42, 0.0 }
 0x221   : > { %v2535_v49 = vpack.c.bf16 %v1468_v44, %v1468_v44  ;;  %v1469_v50 = vmax.f32 %v1229_v45, 0.0 }
 0x222   : > { %1791 = vst.msk [vmem:[%s3442_s7 + $0x18] sm:$0xf] %vm1784_vm4, %v2537_v46  ;;  %v2538_v51 = vpack.c.bf16 %v1471_v47, %v1471_v47 }
 0x223   : > { %1789 = vst.msk [vmem:[%s3442_s7 + $0x10] sm:$0xf] %vm1784_vm4, %v2535_v49  ;;  %v2536_v52 = vpack.c.bf16 %v1469_v50, %v1469_v50  ;;  %v2772_v53 = vpop.f32.mrb[8].mxu1 }
 0x224   : > { %1792 = vst.msk [vmem:[%s3442_s7 + $0x1c] sm:$0xf] %vm1784_vm4, %v2538_v51  ;;  %v1250_v54 = vadd.f32 %v2772_v53, %v3435_v20  ;;  %v1241_v55 = vpop.f32.mrb[9].mxu1 }
 0x225   : > { %1790 = vst.msk [vmem:[%s3442_s7 + $0x14] sm:$0xf] %vm1784_vm4, %v2536_v52  ;;  %v1242_v56 = vadd.f32 %v3435_v20, %v1241_v55  ;;  %v2773_v57 = vpop.f32.mrb[10].mxu1 }
 0x226   : > { %v1474_v58 = vmax.f32 %v1250_v54, 0.0  ;;  %v1253_v59 = vadd.f32 %v2773_v57, %v3435_v20  ;;  %v1244_v60 = vpop.f32.mrb[11].mxu1 }
 0x227   : > { %v1472_v61 = vmax.f32 %v1242_v56, 0.0  ;;  %v1245_v62 = vadd.f32 %v3435_v20, %v1244_v60 }
 0x228   : > { %v2541_v63 = vpack.c.bf16 %v1474_v58, %v1474_v58  ;;  %v1475_v0 = vmax.f32 %v1253_v59, 0.0 }
 0x229   : > { %v2539_v1 = vpack.c.bf16 %v1472_v61, %v1472_v61  ;;  %v1473_v2 = vmax.f32 %v1245_v62, 0.0 }
 0x22a   : > { %1795 = vst.msk [vmem:[%s3442_s7 + $0x28] sm:$0xf] %vm1784_vm4, %v2541_v63  ;;  %v2542_v3 = vpack.c.bf16 %v1475_v0, %v1475_v0 }
 0x22b   : > { %1793 = vst.msk [vmem:[%s3442_s7 + $0x20] sm:$0xf] %vm1784_vm4, %v2539_v1  ;;  %v2540_v4 = vpack.c.bf16 %v1473_v2, %v1473_v2  ;;  %v2776_v5 = vpop.f32.mrb[12].mxu1 }
 0x22c   : > { %1796 = vst.msk [vmem:[%s3442_s7 + $0x2c] sm:$0xf] %vm1784_vm4, %v2542_v3  ;;  %v1266_v6 = vadd.f32 %v2776_v5, %v3435_v20  ;;  %v1257_v7 = vpop.f32.mrb[13].mxu1 }
 0x22d   : > { %1794 = vst.msk [vmem:[%s3442_s7 + $0x24] sm:$0xf] %vm1784_vm4, %v2540_v4  ;;  %v1258_v8 = vadd.f32 %v3435_v20, %v1257_v7  ;;  %v2777_v9 = vpop.f32.mrb[14].mxu1 }
 0x22e   : > { %v1478_v10 = vmax.f32 %v1266_v6, 0.0  ;;  %v1269_v11 = vadd.f32 %v2777_v9, %v3435_v20  ;;  %v1260_v12 = vpop.f32.mrb[15].mxu1 }
 0x22f   : > { %v1476_v13 = vmax.f32 %v1258_v8, 0.0  ;;  %v1261_v14 = vadd.f32 %v3435_v20, %v1260_v12 }
 0x230   : > { %v2545_v15 = vpack.c.bf16 %v1478_v10, %v1478_v10  ;;  %v1479_v16 = vmax.f32 %v1269_v11, 0.0 }
 0x231   : > { %v2543_v17 = vpack.c.bf16 %v1476_v13, %v1476_v13  ;;  %v1477_v18 = vmax.f32 %v1261_v14, 0.0 }
 0x232   : > { %1799 = vst.msk [vmem:[%s3442_s7 + $0x38] sm:$0xf] %vm1784_vm4, %v2545_v15  ;;  %v2546_v19 = vpack.c.bf16 %v1479_v16, %v1479_v16 }
 0x233   : > { %1797 = vst.msk [vmem:[%s3442_s7 + $0x30] sm:$0xf] %vm1784_vm4, %v2543_v17  ;;  %v2544_v21 = vpack.c.bf16 %v1477_v18, %v1477_v18  ;;  %v2780_v22 = vpop.f32.mrb[16].mxu1 }
 0x234   : > { %1800 = vst.msk [vmem:[%s3442_s7 + $0x3c] sm:$0xf] %vm1784_vm4, %v2546_v19  ;;  %v1282_v48 = vadd.f32 %v2780_v22, %v3435_v20  ;;  %v1273_v23 = vpop.f32.mrb[17].mxu1 }
 0x235   : > { %1798 = vst.msk [vmem:[%s3442_s7 + $0x34] sm:$0xf] %vm1784_vm4, %v2544_v21  ;;  %v1274_v24 = vadd.f32 %v3435_v20, %v1273_v23  ;;  %v2781_v25 = vpop.f32.mrb[18].mxu1 }
 0x236   : > { %v1482_v26 = vmax.f32 %v1282_v48, 0.0  ;;  %v1285_v27 = vadd.f32 %v2781_v25, %v3435_v20  ;;  %v1276_v28 = vpop.f32.mrb[19].mxu1 }
 0x237   : > { %v1480_v29 = vmax.f32 %v1274_v24, 0.0  ;;  %v1277_v30 = vadd.f32 %v3435_v20, %v1276_v28 }
 0x238   : > { %v2549_v31 = vpack.c.bf16 %v1482_v26, %v1482_v26  ;;  %v1483_v32 = vmax.f32 %v1285_v27, 0.0 }
 0x239   : > { %v2547_v33 = vpack.c.bf16 %v1480_v29, %v1480_v29  ;;  %v1481_v34 = vmax.f32 %v1277_v30, 0.0 }
 0x23a   : > { %1803 = vst.msk [vmem:[%s3442_s7 + $0x48] sm:$0xf] %vm1784_vm4, %v2549_v31  ;;  %v2550_v35 = vpack.c.bf16 %v1483_v32, %v1483_v32 }
 0x23b   : > { %1801 = vst.msk [vmem:[%s3442_s7 + $0x40] sm:$0xf] %vm1784_vm4, %v2547_v33  ;;  %v2548_v36 = vpack.c.bf16 %v1481_v34, %v1481_v34  ;;  %v2784_v37 = vpop.f32.mrb[20].mxu1 }
 0x23c   : > { %1804 = vst.msk [vmem:[%s3442_s7 + $0x4c] sm:$0xf] %vm1784_vm4, %v2550_v35  ;;  %v1298_v38 = vadd.f32 %v2784_v37, %v3435_v20  ;;  %v1289_v39 = vpop.f32.mrb[21].mxu1 }
 0x23d   : > { %1802 = vst.msk [vmem:[%s3442_s7 + $0x44] sm:$0xf] %vm1784_vm4, %v2548_v36  ;;  %v1290_v40 = vadd.f32 %v3435_v20, %v1289_v39  ;;  %v2785_v41 = vpop.f32.mrb[22].mxu1 }
 0x23e   : > { %v1486_v42 = vmax.f32 %v1298_v38, 0.0  ;;  %v1301_v43 = vadd.f32 %v2785_v41, %v3435_v20  ;;  %v1292_v44 = vpop.f32.mrb[23].mxu1 }
 0x23f   : > { %v1484_v45 = vmax.f32 %v1290_v40, 0.0  ;;  %v1293_v46 = vadd.f32 %v3435_v20, %v1292_v44 }
 0x240   : > { %v2553_v47 = vpack.c.bf16 %v1486_v42, %v1486_v42  ;;  %v1487_v49 = vmax.f32 %v1301_v43, 0.0 }
 0x241   : > { %v2551_v50 = vpack.c.bf16 %v1484_v45, %v1484_v45  ;;  %v1485_v51 = vmax.f32 %v1293_v46, 0.0 }
 0x242   : > { %1807 = vst.msk [vmem:[%s3442_s7 + $0x58] sm:$0xf] %vm1784_vm4, %v2553_v47  ;;  %v2554_v52 = vpack.c.bf16 %v1487_v49, %v1487_v49 }
 0x243   : > { %1805 = vst.msk [vmem:[%s3442_s7 + $0x50] sm:$0xf] %vm1784_vm4, %v2551_v50  ;;  %v2552_v53 = vpack.c.bf16 %v1485_v51, %v1485_v51  ;;  %v2788_v54 = vpop.f32.mrb[24].mxu1 }
 0x244   : > { %1808 = vst.msk [vmem:[%s3442_s7 + $0x5c] sm:$0xf] %vm1784_vm4, %v2554_v52  ;;  %v1314_v55 = vadd.f32 %v2788_v54, %v3435_v20  ;;  %v1305_v56 = vpop.f32.mrb[25].mxu1 }
 0x245   : > { %1806 = vst.msk [vmem:[%s3442_s7 + $0x54] sm:$0xf] %vm1784_vm4, %v2552_v53  ;;  %v1306_v57 = vadd.f32 %v3435_v20, %v1305_v56  ;;  %v2789_v58 = vpop.f32.mrb[26].mxu1 }
 0x246   : > { %v1490_v59 = vmax.f32 %v1314_v55, 0.0  ;;  %v1317_v60 = vadd.f32 %v2789_v58, %v3435_v20  ;;  %v1308_v61 = vpop.f32.mrb[27].mxu1 }
 0x247   : > { %v1488_v62 = vmax.f32 %v1306_v57, 0.0  ;;  %v1309_v63 = vadd.f32 %v3435_v20, %v1308_v61 }
 0x248   : > { %v2557_v0 = vpack.c.bf16 %v1490_v59, %v1490_v59  ;;  %v1491_v1 = vmax.f32 %v1317_v60, 0.0 }
 0x249   : > { %v2555_v2 = vpack.c.bf16 %v1488_v62, %v1488_v62  ;;  %v1489_v3 = vmax.f32 %v1309_v63, 0.0 }
 0x24a   : > { %1811 = vst.msk [vmem:[%s3442_s7 + $0x68] sm:$0xf] %vm1784_vm4, %v2557_v0  ;;  %v2558_v4 = vpack.c.bf16 %v1491_v1, %v1491_v1 }
 0x24b   : > { %1809 = vst.msk [vmem:[%s3442_s7 + $0x60] sm:$0xf] %vm1784_vm4, %v2555_v2  ;;  %v2556_v5 = vpack.c.bf16 %v1489_v3, %v1489_v3  ;;  %v2792_v6 = vpop.f32.mrb[28].mxu1 }
 0x24c   : > { %1812 = vst.msk [vmem:[%s3442_s7 + $0x6c] sm:$0xf] %vm1784_vm4, %v2558_v4  ;;  %v1330_v7 = vadd.f32 %v2792_v6, %v3435_v20  ;;  %v1321_v8 = vpop.f32.mrb[29].mxu1 }
 0x24d   : > { %1810 = vst.msk [vmem:[%s3442_s7 + $0x64] sm:$0xf] %vm1784_vm4, %v2556_v5  ;;  %v1322_v9 = vadd.f32 %v3435_v20, %v1321_v8  ;;  %v2793_v10 = vpop.f32.mrb[30].mxu1 }
 0x24e   : > { %v1494_v11 = vmax.f32 %v1330_v7, 0.0  ;;  %v1333_v12 = vadd.f32 %v2793_v10, %v3435_v20  ;;  %v1324_v13 = vpop.f32.mrb[31].mxu1 }
 0x24f   : > { %v1492_v14 = vmax.f32 %v1322_v9, 0.0  ;;  %v1325_v15 = vadd.f32 %v3435_v20, %v1324_v13 }
 0x250   : > { %v2561_v16 = vpack.c.bf16 %v1494_v11, %v1494_v11  ;;  %v1495_v17 = vmax.f32 %v1333_v12, 0.0 }
 0x251   : > { %v2559_v18 = vpack.c.bf16 %v1492_v14, %v1492_v14  ;;  %v1493_v19 = vmax.f32 %v1325_v15, 0.0 }
 0x252   : > { %1815 = vst.msk [vmem:[%s3442_s7 + $0x78] sm:$0xf] %vm1784_vm4, %v2561_v16  ;;  %v2562_v21 = vpack.c.bf16 %v1495_v17, %v1495_v17 }
 0x253   : > { %1813 = vst.msk [vmem:[%s3442_s7 + $0x70] sm:$0xf] %vm1784_vm4, %v2559_v18  ;;  %v2560_v22 = vpack.c.bf16 %v1493_v19, %v1493_v19  ;;  %v2796_v48 = vpop.f32.mrb[32].mxu1 }
 0x254   : > { %1816 = vst.msk [vmem:[%s3442_s7 + $0x7c] sm:$0xf] %vm1784_vm4, %v2562_v21  ;;  %v1346_v23 = vadd.f32 %v2796_v48, %v3435_v20  ;;  %v1337_v24 = vpop.f32.mrb[33].mxu1 }
 0x255   : > { %1814 = vst.msk [vmem:[%s3442_s7 + $0x74] sm:$0xf] %vm1784_vm4, %v2560_v22  ;;  %v1338_v25 = vadd.f32 %v3435_v20, %v1337_v24  ;;  %v2797_v26 = vpop.f32.mrb[34].mxu1 }
 0x256   : > { %v1498_v27 = vmax.f32 %v1346_v23, 0.0  ;;  %v1349_v28 = vadd.f32 %v2797_v26, %v3435_v20  ;;  %v1340_v29 = vpop.f32.mrb[35].mxu1 }
 0x257   : > { %v1496_v30 = vmax.f32 %v1338_v25, 0.0  ;;  %v1341_v31 = vadd.f32 %v3435_v20, %v1340_v29 }
 0x258   : > { %v2565_v32 = vpack.c.bf16 %v1498_v27, %v1498_v27  ;;  %v1499_v33 = vmax.f32 %v1349_v28, 0.0 }
 0x259   : > { %v2563_v34 = vpack.c.bf16 %v1496_v30, %v1496_v30  ;;  %v1497_v35 = vmax.f32 %v1341_v31, 0.0 }
 0x25a   : > { %1819 = vst.msk [vmem:[%s3442_s7 + $0x88] sm:$0xf] %vm1784_vm4, %v2565_v32  ;;  %v2566_v36 = vpack.c.bf16 %v1499_v33, %v1499_v33 }
 0x25b   : > { %1817 = vst.msk [vmem:[%s3442_s7 + $0x80] sm:$0xf] %vm1784_vm4, %v2563_v34  ;;  %v2564_v37 = vpack.c.bf16 %v1497_v35, %v1497_v35  ;;  %v2800_v38 = vpop.f32.mrb[36].mxu1 }
 0x25c   : > { %1820 = vst.msk [vmem:[%s3442_s7 + $0x8c] sm:$0xf] %vm1784_vm4, %v2566_v36  ;;  %v1362_v39 = vadd.f32 %v2800_v38, %v3435_v20  ;;  %v1353_v40 = vpop.f32.mrb[37].mxu1 }
 0x25d   : > { %1818 = vst.msk [vmem:[%s3442_s7 + $0x84] sm:$0xf] %vm1784_vm4, %v2564_v37  ;;  %v1354_v41 = vadd.f32 %v3435_v20, %v1353_v40  ;;  %v2801_v42 = vpop.f32.mrb[38].mxu1 }
 0x25e   : > { %v1502_v43 = vmax.f32 %v1362_v39, 0.0  ;;  %v1365_v44 = vadd.f32 %v2801_v42, %v3435_v20  ;;  %v1356_v45 = vpop.f32.mrb[39].mxu1 }
 0x25f   : > { %v1500_v46 = vmax.f32 %v1354_v41, 0.0  ;;  %v1357_v47 = vadd.f32 %v3435_v20, %v1356_v45 }
 0x260   : > { %v2569_v49 = vpack.c.bf16 %v1502_v43, %v1502_v43  ;;  %v1503_v50 = vmax.f32 %v1365_v44, 0.0 }
 0x261   : > { %v2567_v51 = vpack.c.bf16 %v1500_v46, %v1500_v46  ;;  %v1501_v52 = vmax.f32 %v1357_v47, 0.0 }
 0x262   : > { %1823 = vst.msk [vmem:[%s3442_s7 + $0x98] sm:$0xf] %vm1784_vm4, %v2569_v49  ;;  %v2570_v53 = vpack.c.bf16 %v1503_v50, %v1503_v50 }
 0x263   : > { %1821 = vst.msk [vmem:[%s3442_s7 + $0x90] sm:$0xf] %vm1784_vm4, %v2567_v51  ;;  %v2568_v54 = vpack.c.bf16 %v1501_v52, %v1501_v52  ;;  %v2804_v55 = vpop.f32.mrb[40].mxu1 }
 0x264   : > { %1824 = vst.msk [vmem:[%s3442_s7 + $0x9c] sm:$0xf] %vm1784_vm4, %v2570_v53  ;;  %v1378_v56 = vadd.f32 %v2804_v55, %v3435_v20  ;;  %v1369_v57 = vpop.f32.mrb[41].mxu1 }
 0x265   : > { %1822 = vst.msk [vmem:[%s3442_s7 + $0x94] sm:$0xf] %vm1784_vm4, %v2568_v54  ;;  %v1370_v58 = vadd.f32 %v3435_v20, %v1369_v57  ;;  %v2805_v59 = vpop.f32.mrb[42].mxu1 }
 0x266   : > { %v1506_v60 = vmax.f32 %v1378_v56, 0.0  ;;  %v1381_v61 = vadd.f32 %v2805_v59, %v3435_v20  ;;  %v1372_v62 = vpop.f32.mrb[43].mxu1 }
 0x267   : > { %v1504_v63 = vmax.f32 %v1370_v58, 0.0  ;;  %v1373_v0 = vadd.f32 %v3435_v20, %v1372_v62 }
 0x268   : > { %v2573_v1 = vpack.c.bf16 %v1506_v60, %v1506_v60  ;;  %v1507_v2 = vmax.f32 %v1381_v61, 0.0 }
 0x269   : > { %v2571_v3 = vpack.c.bf16 %v1504_v63, %v1504_v63  ;;  %v1505_v4 = vmax.f32 %v1373_v0, 0.0 }
 0x26a   : > { %1827 = vst.msk [vmem:[%s3442_s7 + $0xa8] sm:$0xf] %vm1784_vm4, %v2573_v1  ;;  %v2574_v5 = vpack.c.bf16 %v1507_v2, %v1507_v2 }
 0x26b   : > { %1825 = vst.msk [vmem:[%s3442_s7 + $0xa0] sm:$0xf] %vm1784_vm4, %v2571_v3  ;;  %v2572_v6 = vpack.c.bf16 %v1505_v4, %v1505_v4  ;;  %v2808_v7 = vpop.f32.mrb[44].mxu1 }
 0x26c   : > { %1828 = vst.msk [vmem:[%s3442_s7 + $0xac] sm:$0xf] %vm1784_vm4, %v2574_v5  ;;  %v1394_v8 = vadd.f32 %v2808_v7, %v3435_v20  ;;  %v1385_v9 = vpop.f32.mrb[45].mxu1 }
 0x26d   : > { %1826 = vst.msk [vmem:[%s3442_s7 + $0xa4] sm:$0xf] %vm1784_vm4, %v2572_v6  ;;  %v1386_v10 = vadd.f32 %v3435_v20, %v1385_v9  ;;  %v2809_v11 = vpop.f32.mrb[46].mxu1 }
 0x26e   : > { %v1510_v12 = vmax.f32 %v1394_v8, 0.0  ;;  %v1397_v13 = vadd.f32 %v2809_v11, %v3435_v20  ;;  %v1388_v14 = vpop.f32.mrb[47].mxu1 }
 0x26f   : > { %v1508_v15 = vmax.f32 %v1386_v10, 0.0  ;;  %v1389_v16 = vadd.f32 %v3435_v20, %v1388_v14 }
 0x270   : > { %v2577_v17 = vpack.c.bf16 %v1510_v12, %v1510_v12  ;;  %v1511_v18 = vmax.f32 %v1397_v13, 0.0 }
 0x271   : > { %v2575_v19 = vpack.c.bf16 %v1508_v15, %v1508_v15  ;;  %v1509_v21 = vmax.f32 %v1389_v16, 0.0 }
 0x272   : > { %1831 = vst.msk [vmem:[%s3442_s7 + $0xb8] sm:$0xf] %vm1784_vm4, %v2577_v17  ;;  %v2578_v22 = vpack.c.bf16 %v1511_v18, %v1511_v18 }
 0x273   : > { %1829 = vst.msk [vmem:[%s3442_s7 + $0xb0] sm:$0xf] %vm1784_vm4, %v2575_v19  ;;  %v2576_v48 = vpack.c.bf16 %v1509_v21, %v1509_v21  ;;  %v2812_v23 = vpop.f32.mrb[48].mxu1 }
 0x274   : > { %1832 = vst.msk [vmem:[%s3442_s7 + $0xbc] sm:$0xf] %vm1784_vm4, %v2578_v22  ;;  %v1410_v24 = vadd.f32 %v2812_v23, %v3435_v20  ;;  %v1401_v25 = vpop.f32.mrb[49].mxu1 }
 0x275   : > { %1830 = vst.msk [vmem:[%s3442_s7 + $0xb4] sm:$0xf] %vm1784_vm4, %v2576_v48  ;;  %v1402_v26 = vadd.f32 %v3435_v20, %v1401_v25  ;;  %v2813_v27 = vpop.f32.mrb[50].mxu1 }
 0x276   : > { %v1514_v28 = vmax.f32 %v1410_v24, 0.0  ;;  %v1413_v29 = vadd.f32 %v2813_v27, %v3435_v20  ;;  %v1404_v30 = vpop.f32.mrb[51].mxu1 }
 0x277   : > { %v1512_v31 = vmax.f32 %v1402_v26, 0.0  ;;  %v1405_v32 = vadd.f32 %v3435_v20, %v1404_v30 }
 0x278   : > { %v2581_v33 = vpack.c.bf16 %v1514_v28, %v1514_v28  ;;  %v1515_v34 = vmax.f32 %v1413_v29, 0.0 }
 0x279   : > { %v2579_v35 = vpack.c.bf16 %v1512_v31, %v1512_v31  ;;  %v1513_v36 = vmax.f32 %v1405_v32, 0.0 }
 0x27a   : > { %1835 = vst.msk [vmem:[%s3442_s7 + $0xc8] sm:$0xf] %vm1784_vm4, %v2581_v33  ;;  %v2582_v37 = vpack.c.bf16 %v1515_v34, %v1515_v34 }
 0x27b   : > { %1833 = vst.msk [vmem:[%s3442_s7 + $0xc0] sm:$0xf] %vm1784_vm4, %v2579_v35  ;;  %v2580_v38 = vpack.c.bf16 %v1513_v36, %v1513_v36  ;;  %v2816_v39 = vpop.f32.mrb[52].mxu1 }
 0x27c   : > { %1836 = vst.msk [vmem:[%s3442_s7 + $0xcc] sm:$0xf] %vm1784_vm4, %v2582_v37  ;;  %v1426_v40 = vadd.f32 %v2816_v39, %v3435_v20  ;;  %v1417_v41 = vpop.f32.mrb[53].mxu1 }
 0x27d   : > { %1834 = vst.msk [vmem:[%s3442_s7 + $0xc4] sm:$0xf] %vm1784_vm4, %v2580_v38  ;;  %v1418_v42 = vadd.f32 %v3435_v20, %v1417_v41  ;;  %v2817_v43 = vpop.f32.mrb[54].mxu1 }
 0x27e   : > { %v1518_v44 = vmax.f32 %v1426_v40, 0.0  ;;  %v1429_v45 = vadd.f32 %v2817_v43, %v3435_v20  ;;  %v1420_v46 = vpop.f32.mrb[55].mxu1 }
 0x27f   : > { %v1516_v47 = vmax.f32 %v1418_v42, 0.0  ;;  %v1421_v49 = vadd.f32 %v3435_v20, %v1420_v46 }
 0x280   : > { %v2585_v50 = vpack.c.bf16 %v1518_v44, %v1518_v44  ;;  %v1519_v51 = vmax.f32 %v1429_v45, 0.0 }
 0x281   : > { %v2583_v52 = vpack.c.bf16 %v1516_v47, %v1516_v47  ;;  %v1517_v53 = vmax.f32 %v1421_v49, 0.0 }
 0x282   : > { %1839 = vst.msk [vmem:[%s3442_s7 + $0xd8] sm:$0xf] %vm1784_vm4, %v2585_v50  ;;  %v2586_v54 = vpack.c.bf16 %v1519_v51, %v1519_v51 }
 0x283   : > { %1837 = vst.msk [vmem:[%s3442_s7 + $0xd0] sm:$0xf] %vm1784_vm4, %v2583_v52  ;;  %v2584_v55 = vpack.c.bf16 %v1517_v53, %v1517_v53  ;;  %v2820_v56 = vpop.f32.mrb[56].mxu1 }
 0x284   : > { %1840 = vst.msk [vmem:[%s3442_s7 + $0xdc] sm:$0xf] %vm1784_vm4, %v2586_v54  ;;  %v1442_v57 = vadd.f32 %v2820_v56, %v3435_v20  ;;  %v1433_v58 = vpop.f32.mrb[57].mxu1 }
 0x285   : > { %1838 = vst.msk [vmem:[%s3442_s7 + $0xd4] sm:$0xf] %vm1784_vm4, %v2584_v55  ;;  %v1434_v59 = vadd.f32 %v3435_v20, %v1433_v58  ;;  %v2821_v60 = vpop.f32.mrb[58].mxu1 }
 0x286   : > { %v1522_v61 = vmax.f32 %v1442_v57, 0.0  ;;  %v1445_v62 = vadd.f32 %v2821_v60, %v3435_v20  ;;  %v1436_v63 = vpop.f32.mrb[59].mxu1 }
 0x287   : > { %v1520_v0 = vmax.f32 %v1434_v59, 0.0  ;;  %v1437_v1 = vadd.f32 %v3435_v20, %v1436_v63 }
 0x288   : > { %v2589_v2 = vpack.c.bf16 %v1522_v61, %v1522_v61  ;;  %v1523_v3 = vmax.f32 %v1445_v62, 0.0 }
 0x289   : > { %v2587_v4 = vpack.c.bf16 %v1520_v0, %v1520_v0  ;;  %v1521_v5 = vmax.f32 %v1437_v1, 0.0 }
 0x28a   : > { %1843 = vst.msk [vmem:[%s3442_s7 + $0xe8] sm:$0xf] %vm1784_vm4, %v2589_v2  ;;  %v2590_v6 = vpack.c.bf16 %v1523_v3, %v1523_v3 }
 0x28b   : > { %1841 = vst.msk [vmem:[%s3442_s7 + $0xe0] sm:$0xf] %vm1784_vm4, %v2587_v4  ;;  %v2588_v7 = vpack.c.bf16 %v1521_v5, %v1521_v5  ;;  %v2824_v8 = vpop.f32.mrb[60].mxu1 }
 0x28c   : > { %1844 = vst.msk [vmem:[%s3442_s7 + $0xec] sm:$0xf] %vm1784_vm4, %v2590_v6  ;;  %v1458_v9 = vadd.f32 %v2824_v8, %v3435_v20  ;;  %v1449_v10 = vpop.f32.mrb[61].mxu1 }
 0x28d   : > { %1842 = vst.msk [vmem:[%s3442_s7 + $0xe4] sm:$0xf] %vm1784_vm4, %v2588_v7  ;;  %v1450_v11 = vadd.f32 %v3435_v20, %v1449_v10  ;;  %v2825_v12 = vpop.f32.mrb[62].mxu1 }
 0x28e   : > { %v1526_v13 = vmax.f32 %v1458_v9, 0.0  ;;  %v1461_v14 = vadd.f32 %v2825_v12, %v3435_v20  ;;  %v1452_v15 = vpop.f32.mrb[63].mxu1 }
 0x28f   : > { %v1524_v16 = vmax.f32 %v1450_v11, 0.0  ;;  %v1453_v17 = vadd.f32 %v3435_v20, %v1452_v15  ;;  %1855 = sbr.rel (!%p3172_p8) target bundleno = 753 (0x2f1), region = 48 }
 0x290   : > { %v2593_v18 = vpack.c.bf16 %v1526_v13, %v1526_v13  ;;  %v1527_v19 = vmax.f32 %v1461_v14, 0.0 }
 0x291   : > { %v2591_v21 = vpack.c.bf16 %v1524_v16, %v1524_v16  ;;  %v1525_v22 = vmax.f32 %v1453_v17, 0.0 }
 0x292   : > { %1847 = vst.msk [vmem:[%s3442_s7 + $0xf8] sm:$0xf] %vm1784_vm4, %v2593_v18  ;;  %v2594_v48 = vpack.c.bf16 %v1527_v19, %v1527_v19 }
 0x293   : > { %1845 = vst.msk [vmem:[%s3442_s7 + $0xf0] sm:$0xf] %vm1784_vm4, %v2591_v21  ;;  %v2592_v23 = vpack.c.bf16 %v1525_v22, %v1525_v22 }
 0x294   : > { %1848 = vst.msk [vmem:[%s3442_s7 + $0xfc] sm:$0xf] %vm1784_vm4, %v2594_v48 }
 0x295   : > { %1846 = vst.msk [vmem:[%s3442_s7 + $0xf4] sm:$0xf] %vm1784_vm4, %v2592_v23 }
 0x296   : > { %s3852_s11 = smov (!%p1858_p7, %s1857_s11), 64 }
 0x297   : > { %s2515_s18 = sshll.u32 %s3852_s11, 6 }
 0x298   : > { %p2518_p11 = scmp.eq.s32.totalorder %s2515_s18, 0 }
 0x299   : > { %s3645_s28 = sshrl.u32 (!%p2518_p11), %s3852_s11, 6 }
 0x29a   : > { %1866 = sbr.rel (%p2518_p11) target bundleno = 753 (0x2f1), region = 52  ;;  %p2519_p8 = scmp.le.s32.totalorder (!%p2518_p11), %s3645_s28, 0 }
 0x2a1   : > { %2279 = sbr.rel (%p2519_p8) target bundleno = 732 (0x2dc), region = 130  ;;  %s3842_s22 = smov (!%p2519_p8), %s3639_s14 }
 0x2a2   : > { %s3843_s8 = smov (!%p2519_p8), %s3442_s7  ;;  %s3654_s10 = smov (!%p2519_p8), 0  }
 0x2a3   : > { %s3656_s21 = smov (!%p2519_p8), 0  }
 0x2a8 LB: >> { %v1882_v20 = vld [vmem:[%s3072_s8] sm:$0xf]  ;;  %v1884_v24 = vld [vmem:[%s3072_s8 + $0x4] sm:$0xf]  ;;  %v1886_v25 = vld [vmem:[%s3072_s8 + $0x8] sm:$0xf]  ;;  %s3080_s21 = sphi %s3656_s21, %s1876_s21   ;;  %s3076_s10 = sphi %s3654_s10, %s3844_s10   ;;  %s3072_s8 = sphi %s3843_s8, %s2015_s8   ;;  %s3068_s22 = sphi %s3842_s22, %s2016_s22  }
 0x2a9   : >> { %1883 = vst [vmem:[%s3068_s22] sm:$0xf] %v1882_v20  ;;  %1885 = vst [vmem:[%s3068_s22 + $0x4] sm:$0xf] %v1884_v24  ;;  %v1888_v26 = vld [vmem:[%s3072_s8 + $0xc] sm:$0xf]  ;;  %s2010_s15 = sadd.s32 1, %s3076_s10 }
 0x2aa   : >> { %1887 = vst [vmem:[%s3068_s22 + $0x8] sm:$0xf] %v1886_v25  ;;  %v1890_v27 = vld [vmem:[%s3072_s8 + $0x10] sm:$0xf]  ;;  %v1892_v28 = vld [vmem:[%s3072_s8 + $0x14] sm:$0xf]  ;;  %p2011_p6 = scmp.ge.s32.totalorder %s2010_s15, %s3645_s28 }
 0x2ab   : >> { %1889 = vst [vmem:[%s3068_s22 + $0xc] sm:$0xf] %v1888_v26  ;;  %1891 = vst [vmem:[%s3068_s22 + $0x10] sm:$0xf] %v1890_v27  ;;  %v1894_v29 = vld [vmem:[%s3072_s8 + $0x18] sm:$0xf] }
 0x2ac   : >> { %1893 = vst [vmem:[%s3068_s22 + $0x14] sm:$0xf] %v1892_v28  ;;  %v1896_v30 = vld [vmem:[%s3072_s8 + $0x1c] sm:$0xf]  ;;  %v1898_v31 = vld [vmem:[%s3072_s8 + $0x20] sm:$0xf] }
 0x2ad   : >> { %1895 = vst [vmem:[%s3068_s22 + $0x18] sm:$0xf] %v1894_v29  ;;  %1897 = vst [vmem:[%s3068_s22 + $0x1c] sm:$0xf] %v1896_v30  ;;  %v1900_v32 = vld [vmem:[%s3072_s8 + $0x24] sm:$0xf] }
 0x2ae   : >> { %1899 = vst [vmem:[%s3068_s22 + $0x20] sm:$0xf] %v1898_v31  ;;  %v1902_v33 = vld [vmem:[%s3072_s8 + $0x28] sm:$0xf]  ;;  %v1904_v34 = vld [vmem:[%s3072_s8 + $0x2c] sm:$0xf] }
 0x2af   : >> { %1901 = vst [vmem:[%s3068_s22 + $0x24] sm:$0xf] %v1900_v32  ;;  %1903 = vst [vmem:[%s3068_s22 + $0x28] sm:$0xf] %v1902_v33  ;;  %v1906_v35 = vld [vmem:[%s3072_s8 + $0x30] sm:$0xf] }
 0x2b0   : >> { %1905 = vst [vmem:[%s3068_s22 + $0x2c] sm:$0xf] %v1904_v34  ;;  %v1908_v36 = vld [vmem:[%s3072_s8 + $0x34] sm:$0xf]  ;;  %v1910_v37 = vld [vmem:[%s3072_s8 + $0x38] sm:$0xf] }
 0x2b1   : >> { %1907 = vst [vmem:[%s3068_s22 + $0x30] sm:$0xf] %v1906_v35  ;;  %1909 = vst [vmem:[%s3068_s22 + $0x34] sm:$0xf] %v1908_v36  ;;  %v1912_v38 = vld [vmem:[%s3072_s8 + $0x3c] sm:$0xf] }
 0x2b2   : >> { %1911 = vst [vmem:[%s3068_s22 + $0x38] sm:$0xf] %v1910_v37  ;;  %v1914_v39 = vld [vmem:[%s3072_s8 + $0x40] sm:$0xf]  ;;  %v1916_v40 = vld [vmem:[%s3072_s8 + $0x44] sm:$0xf] }
 0x2b3   : >> { %1913 = vst [vmem:[%s3068_s22 + $0x3c] sm:$0xf] %v1912_v38  ;;  %1915 = vst [vmem:[%s3068_s22 + $0x40] sm:$0xf] %v1914_v39  ;;  %v1918_v41 = vld [vmem:[%s3072_s8 + $0x48] sm:$0xf] }
 0x2b4   : >> { %1917 = vst [vmem:[%s3068_s22 + $0x44] sm:$0xf] %v1916_v40  ;;  %v1920_v42 = vld [vmem:[%s3072_s8 + $0x4c] sm:$0xf]  ;;  %v1922_v43 = vld [vmem:[%s3072_s8 + $0x50] sm:$0xf] }
 0x2b5   : >> { %1919 = vst [vmem:[%s3068_s22 + $0x48] sm:$0xf] %v1918_v41  ;;  %1921 = vst [vmem:[%s3068_s22 + $0x4c] sm:$0xf] %v1920_v42  ;;  %v1924_v44 = vld [vmem:[%s3072_s8 + $0x54] sm:$0xf] }
 0x2b6   : >> { %1923 = vst [vmem:[%s3068_s22 + $0x50] sm:$0xf] %v1922_v43  ;;  %v1926_v45 = vld [vmem:[%s3072_s8 + $0x58] sm:$0xf]  ;;  %v1928_v46 = vld [vmem:[%s3072_s8 + $0x5c] sm:$0xf] }
 0x2b7   : >> { %1925 = vst [vmem:[%s3068_s22 + $0x54] sm:$0xf] %v1924_v44  ;;  %1927 = vst [vmem:[%s3068_s22 + $0x58] sm:$0xf] %v1926_v45  ;;  %v1930_v47 = vld [vmem:[%s3072_s8 + $0x60] sm:$0xf] }
 0x2b8   : >> { %1929 = vst [vmem:[%s3068_s22 + $0x5c] sm:$0xf] %v1928_v46  ;;  %v1932_v49 = vld [vmem:[%s3072_s8 + $0x64] sm:$0xf]  ;;  %v1934_v50 = vld [vmem:[%s3072_s8 + $0x68] sm:$0xf] }
 0x2b9   : >> { %1931 = vst [vmem:[%s3068_s22 + $0x60] sm:$0xf] %v1930_v47  ;;  %1933 = vst [vmem:[%s3068_s22 + $0x64] sm:$0xf] %v1932_v49  ;;  %v1936_v51 = vld [vmem:[%s3072_s8 + $0x6c] sm:$0xf] }
 0x2ba   : >> { %1935 = vst [vmem:[%s3068_s22 + $0x68] sm:$0xf] %v1934_v50  ;;  %v1938_v52 = vld [vmem:[%s3072_s8 + $0x70] sm:$0xf]  ;;  %v1940_v53 = vld [vmem:[%s3072_s8 + $0x74] sm:$0xf] }
 0x2bb   : >> { %1937 = vst [vmem:[%s3068_s22 + $0x6c] sm:$0xf] %v1936_v51  ;;  %1939 = vst [vmem:[%s3068_s22 + $0x70] sm:$0xf] %v1938_v52  ;;  %v1942_v54 = vld [vmem:[%s3072_s8 + $0x78] sm:$0xf] }
 0x2bc   : >> { %1941 = vst [vmem:[%s3068_s22 + $0x74] sm:$0xf] %v1940_v53  ;;  %v1944_v55 = vld [vmem:[%s3072_s8 + $0x7c] sm:$0xf]  ;;  %v1946_v56 = vld [vmem:[%s3072_s8 + $0x80] sm:$0xf] }
 0x2bd   : >> { %1943 = vst [vmem:[%s3068_s22 + $0x78] sm:$0xf] %v1942_v54  ;;  %1945 = vst [vmem:[%s3068_s22 + $0x7c] sm:$0xf] %v1944_v55  ;;  %v1948_v57 = vld [vmem:[%s3072_s8 + $0x84] sm:$0xf] }
 0x2be   : >> { %1947 = vst [vmem:[%s3068_s22 + $0x80] sm:$0xf] %v1946_v56  ;;  %v1950_v58 = vld [vmem:[%s3072_s8 + $0x88] sm:$0xf]  ;;  %v1952_v59 = vld [vmem:[%s3072_s8 + $0x8c] sm:$0xf] }
 0x2bf   : >> { %1949 = vst [vmem:[%s3068_s22 + $0x84] sm:$0xf] %v1948_v57  ;;  %1951 = vst [vmem:[%s3068_s22 + $0x88] sm:$0xf] %v1950_v58  ;;  %v1954_v60 = vld [vmem:[%s3072_s8 + $0x90] sm:$0xf] }
 0x2c0   : >> { %1953 = vst [vmem:[%s3068_s22 + $0x8c] sm:$0xf] %v1952_v59  ;;  %v1956_v61 = vld [vmem:[%s3072_s8 + $0x94] sm:$0xf]  ;;  %v1958_v62 = vld [vmem:[%s3072_s8 + $0x98] sm:$0xf] }
 0x2c1   : >> { %1955 = vst [vmem:[%s3068_s22 + $0x90] sm:$0xf] %v1954_v60  ;;  %1957 = vst [vmem:[%s3068_s22 + $0x94] sm:$0xf] %v1956_v61  ;;  %v1960_v63 = vld [vmem:[%s3072_s8 + $0x9c] sm:$0xf] }
 0x2c2   : >> { %1959 = vst [vmem:[%s3068_s22 + $0x98] sm:$0xf] %v1958_v62  ;;  %v1962_v0 = vld [vmem:[%s3072_s8 + $0xa0] sm:$0xf]  ;;  %v1964_v1 = vld [vmem:[%s3072_s8 + $0xa4] sm:$0xf] }
 0x2c3   : >> { %1961 = vst [vmem:[%s3068_s22 + $0x9c] sm:$0xf] %v1960_v63  ;;  %1963 = vst [vmem:[%s3068_s22 + $0xa0] sm:$0xf] %v1962_v0  ;;  %v1966_v2 = vld [vmem:[%s3072_s8 + $0xa8] sm:$0xf] }
 0x2c4   : >> { %1965 = vst [vmem:[%s3068_s22 + $0xa4] sm:$0xf] %v1964_v1  ;;  %v1968_v3 = vld [vmem:[%s3072_s8 + $0xac] sm:$0xf]  ;;  %v1970_v4 = vld [vmem:[%s3072_s8 + $0xb0] sm:$0xf] }
 0x2c5   : >> { %1967 = vst [vmem:[%s3068_s22 + $0xa8] sm:$0xf] %v1966_v2  ;;  %1969 = vst [vmem:[%s3068_s22 + $0xac] sm:$0xf] %v1968_v3  ;;  %v1972_v5 = vld [vmem:[%s3072_s8 + $0xb4] sm:$0xf] }
 0x2c6   : >> { %1971 = vst [vmem:[%s3068_s22 + $0xb0] sm:$0xf] %v1970_v4  ;;  %v1974_v6 = vld [vmem:[%s3072_s8 + $0xb8] sm:$0xf]  ;;  %v1976_v7 = vld [vmem:[%s3072_s8 + $0xbc] sm:$0xf] }
 0x2c7   : >> { %1973 = vst [vmem:[%s3068_s22 + $0xb4] sm:$0xf] %v1972_v5  ;;  %1975 = vst [vmem:[%s3068_s22 + $0xb8] sm:$0xf] %v1974_v6  ;;  %v1978_v8 = vld [vmem:[%s3072_s8 + $0xc0] sm:$0xf] }
 0x2c8   : >> { %1977 = vst [vmem:[%s3068_s22 + $0xbc] sm:$0xf] %v1976_v7  ;;  %v1980_v9 = vld [vmem:[%s3072_s8 + $0xc4] sm:$0xf]  ;;  %v1982_v10 = vld [vmem:[%s3072_s8 + $0xc8] sm:$0xf] }
 0x2c9   : >> { %1979 = vst [vmem:[%s3068_s22 + $0xc0] sm:$0xf] %v1978_v8  ;;  %1981 = vst [vmem:[%s3068_s22 + $0xc4] sm:$0xf] %v1980_v9  ;;  %v1984_v11 = vld [vmem:[%s3072_s8 + $0xcc] sm:$0xf] }
 0x2ca   : >> { %1983 = vst [vmem:[%s3068_s22 + $0xc8] sm:$0xf] %v1982_v10  ;;  %v1986_v12 = vld [vmem:[%s3072_s8 + $0xd0] sm:$0xf]  ;;  %v1988_v13 = vld [vmem:[%s3072_s8 + $0xd4] sm:$0xf] }
 0x2cb   : >> { %1985 = vst [vmem:[%s3068_s22 + $0xcc] sm:$0xf] %v1984_v11  ;;  %1987 = vst [vmem:[%s3068_s22 + $0xd0] sm:$0xf] %v1986_v12  ;;  %v1990_v14 = vld [vmem:[%s3072_s8 + $0xd8] sm:$0xf] }
 0x2cc   : >> { %1989 = vst [vmem:[%s3068_s22 + $0xd4] sm:$0xf] %v1988_v13  ;;  %v1992_v15 = vld [vmem:[%s3072_s8 + $0xdc] sm:$0xf]  ;;  %v1994_v16 = vld [vmem:[%s3072_s8 + $0xe0] sm:$0xf] }
 0x2cd   : >> { %1991 = vst [vmem:[%s3068_s22 + $0xd8] sm:$0xf] %v1990_v14  ;;  %1993 = vst [vmem:[%s3068_s22 + $0xdc] sm:$0xf] %v1992_v15  ;;  %v1996_v17 = vld [vmem:[%s3072_s8 + $0xe4] sm:$0xf] }
 0x2ce   : >> { %1995 = vst [vmem:[%s3068_s22 + $0xe0] sm:$0xf] %v1994_v16  ;;  %v1998_v18 = vld [vmem:[%s3072_s8 + $0xe8] sm:$0xf]  ;;  %v2000_v19 = vld [vmem:[%s3072_s8 + $0xec] sm:$0xf] }
 0x2cf   : >> { %1997 = vst [vmem:[%s3068_s22 + $0xe4] sm:$0xf] %v1996_v17  ;;  %1999 = vst [vmem:[%s3068_s22 + $0xe8] sm:$0xf] %v1998_v18  ;;  %v2002_v21 = vld [vmem:[%s3072_s8 + $0xf0] sm:$0xf] }
 0x2d0   : >> { %2001 = vst [vmem:[%s3068_s22 + $0xec] sm:$0xf] %v2000_v19  ;;  %v2004_v22 = vld [vmem:[%s3072_s8 + $0xf4] sm:$0xf]  ;;  %v2006_v48 = vld [vmem:[%s3072_s8 + $0xf8] sm:$0xf] }
 0x2d1   : >> { %2003 = vst [vmem:[%s3068_s22 + $0xf0] sm:$0xf] %v2002_v21  ;;  %2005 = vst [vmem:[%s3068_s22 + $0xf4] sm:$0xf] %v2004_v22  ;;  %v2008_v23 = vld [vmem:[%s3072_s8 + $0xfc] sm:$0xf] }
 0x2d2   : >> { %2007 = vst [vmem:[%s3068_s22 + $0xf8] sm:$0xf] %v2006_v48  ;;  %2009 = vst [vmem:[%s3068_s22 + $0xfc] sm:$0xf] %v2008_v23  ;;  %s3854_s15 = smov (%p2011_p6, %s2010_s15), 0  ;;  %s1876_s21 = sadd.s32 1, %s3080_s21  }
 0x2d3   : >> { %s2520_s16 = sshll.u32 %s3854_s15, 8  ;;  %p1875_p9 = scmp.ge.s32.totalorder %s1876_s21, %s3645_s28 }
 0x2d4   : >> { %s2015_s8 = scalar_lea.vmem %s3442_s7, %s2520_s16 [#allocation4]   ;;  %s2016_s22 = scalar_lea.vmem %s3639_s14, %s2520_s16  }
 0x2d5   : >> { %s3844_s10 = smov %s3854_s15  ;;  %1878 = sbr.rel (!%p1875_p9) target bundleno = 680 (0x2a8), region = 136 }
 0x2dc PF: > { %s3813_s25 = sand.u32 63, %s3852_s11   ;;  %s2596_s29 = sshll.u32 %s3645_s28, 8 }
 0x2dd   : > { %s2021_s27 = scalar_lea.vmem %s3442_s7, %s2596_s29 [#allocation4]   ;;  %s2023_s30 = scalar_lea.vmem %s3639_s14, %s2596_s29  }
 0x2de   : > { %p2525_p10 = scmp.le.s32.totalorder %s3813_s25, 0 }
 0x2df   : > { %s3082_s24 = smov (!%p2525_p10), %s2023_s30   ;;  %s3086_s6 = smov (!%p2525_p10), %s2021_s27  }
 0x2e0   : > { %2293 = sbr.rel (%p2525_p10) target bundleno = 753 (0x2f1), region = 141  ;;  %s3090_s17 = smov (!%p2525_p10), 0  }
 0x2e1   : > { %s3094_s9 = smov (!%p2525_p10), 0  }
 0x2e7 LB: >> { %v2033_v20 = vld [vmem:[%s3088_s6] sm:$0xf]  ;;  %s2035_s11 = sadd.s32 1, %s3092_s17  ;;  %s2027_s9 = sadd.s32 1, %s3096_s9   ;;  %s3096_s9 = sphi %s3094_s9, %s2027_s9   ;;  %s3092_s17 = sphi %s3090_s17, %s3091_s17   ;;  %s3088_s6 = sphi %s3086_s6, %s2040_s6   ;;  %s3084_s24 = sphi %s3082_s24, %s2041_s24  }
 0x2e8   : >> { %2034 = vst [vmem:[%s3084_s24] sm:$0xf] %v2033_v20  ;;  %p2036_p12 = scmp.ge.s32.totalorder %s2035_s11, %s3813_s25  ;;  %p2026_p13 = scmp.ge.s32.totalorder %s2027_s9, %s3813_s25 }
 0x2ea   : >> { %s3856_s11 = smov (%p2036_p12, %s2035_s11), 0  ;;  %2029 = sbr.rel (!%p2026_p13) target bundleno = 743 (0x2e7), region = 147 }
 0x2eb   : >> { %s2526_s7 = sshll.u32 %s3856_s11, 2  ;;  %s3091_s17 = smov %s3856_s11  }
 0x2ec   : >> { %s2040_s6 = scalar_lea.vmem %s2021_s27, %s2526_s7 [#allocation4]   ;;  %s2041_s24 = scalar_lea.vmem %s2023_s30, %s2526_s7  }
 0x2f1 PF: > { %p15_p1 = scmp.ge.s32.totalorder %s3154_s23, 7   ;;  %s3845_s18 = smov %s3056_s19 }
 0x2f2   : > { %s3846_s19 = smov %s3060_s20  ;;  %s3847_s20 = smov %s3164_s26 }
 0x2f3   : > { %s3848_s21 = smov %s3154_s23  ;;  %17 = sbr.rel (!%p15_p1) target bundleno = 3 (0x3), region = 158 }
 0x2fa   :  { %2228 = vsyncpa [#allocation3], 1 }
 0x2fb   :  { %2230 = vsyncpa [#allocation3 + $0x1], 1 }

// kernel: recon_net_forward.7
= control target key start
LH: loop header
LB: loop body
LE: loop exit
PB: predicated region body
PF: predicated region fallthrough
CT: control target
= control target key end

     0   :  { %s4254_s0 = inlined_call_operand.vmem [shape: bf16[2178,1568], index: 0, kind: input, shape index: {}]   ;;  %s4255_s1 = inlined_call_operand.vmem [shape: bf16[1,1568], index: 1, kind: input, shape index: {}]   ;;  %s4256_s2 = inlined_call_operand.<no memory space> [shape: f32[1,1], index: 2, kind: input, shape index: {}]   ;;  %s4257_s3 = inlined_call_operand.vmem [shape: bf16[2178,1], index: 3, kind: output, shape index: {}]  }
   0x1   :  { %v8_v0 = vstv %s4256_s2 }
   0x2   :  { %9 = vst [vmem:[#allocation2] sm:$0x1] %v8_v0 }
   0x3   :  { %s2728_s14 = smov 0   ;;  %s2730_s15 = smov 0  }
   0x4   :  { %s2732_s16 = smov 0  }
   0x5 LB: > { %s2741_s2 = sadd.s32 4294967295, %s2671_s16   ;;  %s2743_s17 = sadd.s32 1, %s2671_s16   ;;  %s2671_s16 = sphi %s2732_s16, %s4264_s16   ;;  %s2667_s15 = sphi %s2730_s15, %s4263_s15   ;;  %s2663_s14 = sphi %s2728_s14, %s4262_s14  }
   0x6   : > { %s87_s18 = ssub.s32 %s2671_s16, %s2743_s17  ;;  %s90_s19 = sadd.s32 1, %s2667_s15 }
   0x7   : > { %p88_p0 = scmp.eq.s32.totalorder %s87_s18, 0  ;;  %p100_p1 = scmp.ne.s32.totalorder %s2667_s15, %s2663_s14 }
   0x8   : > { %p101_p2 = scmp.eq.s32.totalorder %s2741_s2, 8  ;;  %p2439_p3 = scmp.ge.s32.totalorder %s2671_s16, 1 }
   0x9   : > { %s2751_s20 = scalar_select %p88_p0, %s2667_s15, %s90_s19  }
   0xa   : > { %p2753_p4 = por %p101_p2, %p100_p1  ;;  %p151_p5 = scmp.lt.s32.totalorder %s2671_s16, 10 }
   0xc   : > { %p152_p6 = pnand %p2439_p3, %p151_p5 }
   0xd   : > { %s2758_s22 = sshll.u32 (!%p152_p6), %s2741_s2, 5  ;;  %v842_v1 = vld [vmem:[%s4255_s1] sm:$0xff] (!%p152_p6)  ;;  %v852_v2 = vlaneseq (!%p152_p6)  ;;  %v843_v3 = vld [vmem:[%s4255_s1 + $0x8] sm:$0x1f] (!%p152_p6)  ;;  %vm1396_vm0 = vcmask (!%p152_p6), 261120   ;;  %s177_s5 = sand.u32 (!%p152_p6), 1, %s2663_s14  }
   0xe   : > { %155 = sbr.rel (%p152_p6) target bundleno = 576 (0x240), region = 32  ;;  %p186_p7 = scmp.lt.s32.totalorder (!%p152_p6), %s2758_s22, 272  ;;  %v844_v5 = vunpack.c.l.bf16 (!%p152_p6), %v842_v1  ;;  %v845_v6 = vunpack.c.h.bf16 (!%p152_p6), %v842_v1  ;;  %v846_v11 = vunpack.c.l.bf16 (!%p152_p6), %v843_v3  ;;  %v847_v12 = vunpack.c.h.bf16 (!%p152_p6), %v843_v3 }
   0xf   : > { %v853_v4 = vshrl.u32 (!%p152_p6), %v852_v2, 7  ;;  %vm2065_vm1 = vcmask (!%p152_p6), 3072   ;;  %s2440_s6 = sshll.u32 (!%p152_p6), %s177_s5, 7 }
  0x10   : > { %s4007_s7 = scalar_lea.vmem (!%p152_p6), [#allocation3], %s2440_s6  }
  0x11   : > { %v854_v7 = vsub.s32 (!%p152_p6), 0, %v853_v4  ;;  %v858_v8 = vsub.s32 (!%p152_p6), 2, %v853_v4  ;;  %v862_v9 = vsub.s32 (!%p152_p6), 4, %v853_v4  ;;  %v866_v10 = vsub.s32 (!%p152_p6), 6, %v853_v4 }
  0x13   : > { %v855_v13 = vrot.slane (!%p152_p6), %v844_v5, %v854_v7  ;;  %v859_v14 = vrot.slane (!%p152_p6), %v844_v5, %v858_v8  ;;  %v863_v15 = vrot.slane (!%p152_p6), %v844_v5, %v862_v9  ;;  %v867_v16 = vrot.slane (!%p152_p6), %v844_v5, %v866_v10 }
  0x14   : > { %v871_v20 = vrot.slane (!%p152_p6), %v845_v6, %v854_v7  ;;  %v875_v21 = vrot.slane (!%p152_p6), %v845_v6, %v858_v8  ;;  %v879_v22 = vrot.slane (!%p152_p6), %v845_v6, %v862_v9  ;;  %v883_v23 = vrot.slane (!%p152_p6), %v845_v6, %v866_v10 }
  0x15   : > { %s187_s27 = scalar_select %p186_p7, %s2758_s22, 272  ;;  %v887_v26 = vrot.slane %v846_v11, %v854_v7  ;;  %v891_v27 = vrot.slane %v846_v11, %v858_v8  ;;  %v895_v28 = vrot.slane %v846_v11, %v862_v9  ;;  %v899_v29 = vrot.slane %v846_v11, %v866_v10 }
  0x16   : > { %v903_v40 = vrot.slane %v847_v12, %v854_v7  ;;  %v2779_v41 = vrot.slane %v855_v13, %v854_v7  ;;  %v2781_v42 = vrot.slane %v859_v14, %v854_v7  ;;  %v2786_v45 = vrot.slane %v863_v15, %v854_v7  ;;  %s2106_s8 = ssub.s32 (%p2753_p4), 273, %s2758_s22  ;;  %s2525_s9 = sshll.u32 (%p2753_p4), %s2741_s2, 7 }
  0x17   : > { %s2528_s28 = smul.u32 52, %s187_s27  ;;  %v2788_v46 = vrot.slane %v867_v16, %v854_v7  ;;  %v2790_v47 = vrot.slane %v871_v20, %v854_v7  ;;  %v2792_v48 = vrot.slane %v875_v21, %v854_v7  ;;  %v2794_v49 = vrot.slane %v879_v22, %v854_v7  ;;  %p2107_p8 = scmp.lt.s32.totalorder (%p2753_p4), %s2106_s8, 32 }
  0x18   : > { %v2796_v50 = vrot.slane %v883_v23, %v854_v7  ;;  %v2798_v51 = vrot.slane %v887_v26, %v854_v7  ;;  %v2800_v54 = vrot.slane %v891_v27, %v854_v7  ;;  %v2804_v57 = vrot.slane %v895_v28, %v854_v7  ;;  %s4126_s12 = scalar_lea.vmem (%p2753_p4), %s4257_s3, %s2525_s9  }
  0x19   : > { %s2771_s4 = scalar_lea.vmem %s4254_s0, %s2528_s28  ;;  %v2806_v58 = vrot.slane %v903_v40, %v854_v7  ;;  %v2810_v61 = vrot.slane %v899_v29, %v854_v7 }
  0x1a   : > { %v216_v17 = vld [vmem:[%s2771_s4 + $0x68] sm:$0xff]  ;;  %v217_v18 = vld [vmem:[%s2771_s4 + $0x70] sm:$0xff]  ;;  %v218_v19 = vld [vmem:[%s2771_s4 + $0x78] sm:$0xff] }
  0x1b   : > { %v219_v24 = vld [vmem:[%s2771_s4 + $0x80] sm:$0xff]  ;;  %v220_v25 = vld [vmem:[%s2771_s4 + $0x88] sm:$0xff]  ;;  %v452_v30 = vunpack.c.l.bf16 %v216_v17  ;;  %v453_v31 = vunpack.c.h.bf16 %v216_v17  ;;  %v454_v32 = vunpack.c.l.bf16 %v217_v18  ;;  %v455_v33 = vunpack.c.h.bf16 %v217_v18  ;;  %v221_v38 = vld [vmem:[%s2771_s4 + $0x90] sm:$0xff] }
  0x1c   : > { %v456_v34 = vunpack.c.l.bf16 %v218_v19  ;;  %v457_v35 = vunpack.c.h.bf16 %v218_v19  ;;  %v458_v36 = vunpack.c.l.bf16 %v219_v24  ;;  %v459_v37 = vunpack.c.h.bf16 %v219_v24  ;;  %v2784_v43 = vld [vmem:[%s2771_s4 + $0x30] ss:$104 sps:$4 sm:$0xff]   ;;  %v202_v60 = vld [vmem:[%s2771_s4] sm:$0xff]  ;;  %v203_v1 = vld [vmem:[%s2771_s4 + $0x8] sm:$0xff] }
  0x1d   : > { %v460_v39 = vunpack.c.l.bf16 %v220_v25  ;;  %v461_v44 = vunpack.c.h.bf16 %v220_v25  ;;  %v462_v52 = vunpack.c.l.bf16 %v221_v38  ;;  %v463_v53 = vunpack.c.h.bf16 %v221_v38  ;;  %v204_v6 = vld [vmem:[%s2771_s4 + $0x10] sm:$0xff]  ;;  %v205_v7 = vld [vmem:[%s2771_s4 + $0x18] sm:$0xff]  ;;  %v206_v10 = vld [vmem:[%s2771_s4 + $0x20] sm:$0xff] }
  0x1e   : > { %v995_v55 = vmul.f32 %v2779_v41, %v452_v30  ;;  %v464_v56 = vunpack.c.h.bf16 %v2784_v43  ;;  %v996_v59 = vmul.f32 %v2781_v42, %v453_v31  ;;  %v997_v62 = vmul.f32 %v2786_v45, %v454_v32  ;;  %v207_v15 = vld [vmem:[%s2771_s4 + $0x28] sm:$0xff]  ;;  %v223_v38 = vld [vmem:[%s2771_s4 + $0x9c] sm:$0xff] }
  0x1f   : > { %v998_v63 = vmul.f32 %v2788_v46, %v455_v33  ;;  %v999_v0 = vmul.f32 %v2790_v47, %v456_v34  ;;  %v1000_v2 = vmul.f32 %v2792_v48, %v457_v35  ;;  %v1001_v3 = vmul.f32 %v2794_v49, %v458_v36 }
  0x20   : > { %v1002_v4 = vmul.f32 %v2796_v50, %v459_v37  ;;  %v2820_v5 = vmul.f32 %v2798_v51, %v460_v39  ;;  %v2825_v8 = vmul.f32 %v2800_v54, %v461_v44  ;;  %v1416_v9 = vadd.f32 %v996_v59, %v995_v55 }
  0x21   : > { %v426_v11 = vunpack.c.l.bf16 %v202_v60  ;;  %v427_v12 = vunpack.c.h.bf16 %v202_v60  ;;  %v2829_v13 = vmul.f32 %v2804_v57, %v462_v52  ;;  %v1007_v14 = vmul.f32 %v2806_v58, %v464_v56  ;;  %v224_v52 = vld [vmem:[%s2771_s4 + $0xa4] sm:$0xff]  ;;  %v225_v60 = vld [vmem:[%s2771_s4 + $0xac] sm:$0xff] }
  0x22   : > { %v428_v16 = vunpack.c.l.bf16 %v203_v1  ;;  %v429_v17 = vunpack.c.h.bf16 %v203_v1  ;;  %v1417_v18 = vadd.f32 %v1416_v9, %v997_v62  ;;  %v430_v19 = vunpack.c.l.bf16 %v204_v6  ;;  %v226_v62 = vld [vmem:[%s2771_s4 + $0xb4] sm:$0xff]  ;;  %v227_v1 = vld [vmem:[%s2771_s4 + $0xbc] sm:$0xff] }
  0x23   : > { %v431_v20 = vunpack.c.h.bf16 %v204_v6  ;;  %v432_v21 = vunpack.c.l.bf16 %v205_v7  ;;  %v433_v22 = vunpack.c.h.bf16 %v205_v7  ;;  %v434_v23 = vunpack.c.l.bf16 %v206_v10  ;;  %v2865_v6 = vld [vmem:[%s2771_s4 + $0x64] ss:$104 sps:$4 sm:$0xff]  }
  0x24   : > { %v435_v24 = vunpack.c.h.bf16 %v206_v10  ;;  %v438_v25 = vunpack.c.l.bf16 %v2784_v43  ;;  %v1418_v26 = vadd.f32 %v1417_v18, %v998_v63  ;;  %v436_v27 = vunpack.c.l.bf16 %v207_v15 }
  0x25   : > { %v969_v28 = vmul.f32 %v2779_v41, %v426_v11  ;;  %v970_v29 = vmul.f32 %v2781_v42, %v427_v12  ;;  %v2837_v30 = vmul.f32 %v2810_v61, %v463_v53  ;;  %v2840_v31 = vsel %vm1396_vm0, %v1007_v14, 0.0 }
  0x26   : > { %v437_v32 = vunpack.c.h.bf16 %v207_v15  ;;  %v971_v33 = vmul.f32 %v2786_v45, %v428_v16  ;;  %v1419_v34 = vadd.f32 %v1418_v26, %v999_v0  ;;  %v972_v35 = vmul.f32 %v2788_v46, %v429_v17  ;;  %v228_v15 = vld [vmem:[%s2771_s4 + $0xc4] sm:$0xff] }
  0x27   : > { %v973_v36 = vmul.f32 %v2790_v47, %v430_v19  ;;  %v974_v37 = vmul.f32 %v2792_v48, %v431_v20  ;;  %v975_v39 = vmul.f32 %v2794_v49, %v432_v21  ;;  %v976_v40 = vmul.f32 %v2796_v50, %v433_v22 }
  0x28   : > { %v981_v43 = vmul.f32 %v2806_v58, %v438_v25  ;;  %v1385_v44 = vadd.f32 %v970_v29, %v969_v28  ;;  %v1420_v53 = vadd.f32 %v1419_v34, %v1000_v2  ;;  %v977_v55 = vmul.f32 %v2798_v51, %v434_v23 }
  0x29   : > { %v2853_v56 = vmul.f32 %v2800_v54, %v435_v24  ;;  %v2856_v59 = vmul.f32 %v2804_v57, %v436_v27  ;;  %v2861_v63 = vmul.f32 %v2810_v61, %v437_v32  ;;  %v465_v7 = vunpack.c.l.bf16 %v223_v38 }
  0x2a   : > { %v1386_v0 = vadd.f32 %v1385_v44, %v971_v33  ;;  %v466_v2 = vunpack.c.h.bf16 %v223_v38  ;;  %v1421_v9 = vadd.f32 %v1420_v53, %v1001_v3  ;;  %v2868_v10 = vsel %vm1396_vm0, %v981_v43, 0.0 }
  0x2b   : > { %v467_v11 = vunpack.c.l.bf16 %v224_v52  ;;  %v468_v12 = vunpack.c.h.bf16 %v224_v52  ;;  %v469_v16 = vunpack.c.l.bf16 %v225_v60  ;;  %v470_v17 = vunpack.c.h.bf16 %v225_v60  ;;  %v210_v60 = vld [vmem:[%s2771_s4 + $0x3c] sm:$0xff] }
  0x2c   : > { %v1387_v14 = vadd.f32 %v1386_v0, %v972_v35  ;;  %v471_v18 = vunpack.c.l.bf16 %v226_v62  ;;  %v1422_v19 = vadd.f32 %v1421_v9, %v1002_v4  ;;  %v472_v20 = vunpack.c.h.bf16 %v226_v62  ;;  %v209_v35 = vld [vmem:[%s2771_s4 + $0x34] sm:$0xff]  ;;  %v211_v62 = vld [vmem:[%s2771_s4 + $0x44] sm:$0xff] }
  0x2d   : > { %v473_v21 = vunpack.c.l.bf16 %v227_v1  ;;  %v477_v22 = vunpack.c.h.bf16 %v2865_v6  ;;  %v474_v24 = vunpack.c.h.bf16 %v227_v1  ;;  %v1008_v3 = vmul.f32 %v2779_v41, %v465_v7  ;;  %v212_v7 = vld [vmem:[%s2771_s4 + $0x4c] sm:$0xff] }
  0x2e   : > { %v1388_v23 = vadd.f32 %v1387_v14, %v973_v36  ;;  %v1009_v25 = vmul.f32 %v2781_v42, %v466_v2  ;;  %v1423_v26 = vadd.f32 %v1422_v19, %v2820_v5  ;;  %v475_v27 = vunpack.c.l.bf16 %v228_v15 }
  0x2f   : > { %v476_v28 = vunpack.c.h.bf16 %v228_v15  ;;  %v1010_v29 = vmul.f32 %v2786_v45, %v467_v11  ;;  %v1011_v32 = vmul.f32 %v2788_v46, %v468_v12  ;;  %v1012_v33 = vmul.f32 %v2790_v47, %v469_v16  ;;  %v213_v12 = vld [vmem:[%s2771_s4 + $0x54] sm:$0xff] }
  0x30   : > { %v1389_v4 = vadd.f32 %v1388_v23, %v974_v37  ;;  %v1013_v34 = vmul.f32 %v2792_v48, %v470_v17  ;;  %v1424_v36 = vadd.f32 %v1423_v26, %v2825_v8  ;;  %v1014_v38 = vmul.f32 %v2794_v49, %v471_v18 }
  0x31   : > { %v1015_v5 = vmul.f32 %v2796_v50, %v472_v20  ;;  %v1020_v43 = vmul.f32 %v2806_v58, %v477_v22  ;;  %v2885_v37 = vmul.f32 %v2798_v51, %v473_v21  ;;  %v2888_v52 = vmul.f32 %v2800_v54, %v474_v24  ;;  %v214_v20 = vld [vmem:[%s2771_s4 + $0x5c] sm:$0xff] }
  0x32   : > { %v1390_v44 = vadd.f32 %v1389_v4, %v975_v39  ;;  %v1431_v53 = vadd.f32 %v1009_v25, %v1008_v3  ;;  %v1425_v0 = vadd.f32 %v1424_v36, %v2829_v13  ;;  %v2894_v8 = vmul.f32 %v2804_v57, %v475_v27 }
  0x33   : > { %v2897_v1 = vmul.f32 %v2810_v61, %v476_v28  ;;  %v439_v39 = vunpack.c.l.bf16 %v209_v35  ;;  %v2901_v11 = vsel %vm1396_vm0, %v1020_v43, 0.0  ;;  %v440_v14 = vunpack.c.h.bf16 %v209_v35 }
  0x34   : > { %v1391_v2 = vadd.f32 %v1390_v44, %v976_v40  ;;  %v1432_v9 = vadd.f32 %v1431_v53, %v1010_v29  ;;  %v1426_v15 = vadd.f32 %v1425_v0, %v2837_v30  ;;  %v441_v16 = vunpack.c.l.bf16 %v210_v60  ;;  %v239_v0 = vld [vmem:[%s2771_s4 + $0x114] sm:$0xff] }
  0x35   : > { %v442_v13 = vunpack.c.h.bf16 %v210_v60  ;;  %v443_v17 = vunpack.c.l.bf16 %v211_v62  ;;  %v444_v21 = vunpack.c.h.bf16 %v211_v62  ;;  %v445_v22 = vunpack.c.l.bf16 %v212_v7  ;;  %v238_v62 = vld [vmem:[%s2771_s4 + $0x10c] sm:$0xff] }
  0x36   : > { %v1392_v18 = vadd.f32 %v1391_v2, %v977_v55  ;;  %v1433_v19 = vadd.f32 %v1432_v9, %v1011_v32  ;;  %v1428_v23 = vadd.f32 %v2840_v31, %v1426_v15  ;;  %v446_v24 = vunpack.c.h.bf16 %v212_v7  ;;  %v240_v2 = vld [vmem:[%s2771_s4 + $0x11c] sm:$0xff] }
  0x37   : > { %v447_v40 = vunpack.c.l.bf16 %v213_v12  ;;  %v451_v3 = vunpack.c.l.bf16 %v2865_v6  ;;  %v982_v30 = vmul.f32 %v2779_v41, %v439_v39  ;;  %v983_v27 = vmul.f32 %v2781_v42, %v440_v14 }
  0x38   : > { %v1393_v25 = vadd.f32 %v1392_v18, %v2853_v56  ;;  %v1434_v26 = vadd.f32 %v1433_v19, %v1012_v33  ;;  %1429 = vadd.xlane.f32.xlu1 %v1428_v23  ;;  %v448_v55 = vunpack.c.h.bf16 %v213_v12  ;;  %v449_v28 = vunpack.c.l.bf16 %v214_v20  ;;  %v237_v33 = vld [vmem:[%s2771_s4 + $0x104] sm:$0xff]  ;;  %v242_v23 = vld [vmem:[%s2771_s4 + $0x12c] sm:$0xff] }
  0x39   : > { %v450_v29 = vunpack.c.h.bf16 %v214_v20  ;;  %v984_v31 = vmul.f32 %v2786_v45, %v441_v16  ;;  %v985_v6 = vmul.f32 %v2788_v46, %v442_v13  ;;  %v986_v56 = vmul.f32 %v2790_v47, %v443_v17  ;;  %v2938_v16 = vld [vmem:[%s2771_s4 + $0x100] ss:$52 sps:$4 sm:$0xff]   ;;  %v241_v17 = vld [vmem:[%s2771_s4 + $0x124] sm:$0xff] }
  0x3a   : > { %v1394_v4 = vadd.f32 %v1393_v25, %v2856_v59  ;;  %v1435_v32 = vadd.f32 %v1434_v26, %v1013_v34  ;;  %v987_v35 = vmul.f32 %v2792_v48, %v444_v21  ;;  %v988_v36 = vmul.f32 %v2794_v49, %v445_v22 }
  0x3b   : > { %v989_v43 = vmul.f32 %v2796_v50, %v446_v24  ;;  %v994_v44 = vmul.f32 %v2806_v58, %v451_v3  ;;  %v2922_v59 = vmul.f32 %v2798_v51, %v447_v40  ;;  %v1401_v34 = vadd.f32 %v983_v27, %v982_v30 }
  0x3c   : > { %v1395_v53 = vadd.f32 %v1394_v4, %v2861_v63  ;;  %v1436_v60 = vadd.f32 %v1435_v32, %v1014_v38  ;;  %v2927_v7 = vmul.f32 %v2800_v54, %v448_v55  ;;  %v2930_v39 = vmul.f32 %v2804_v57, %v449_v28 }
  0x3d   : > { %v491_v9 = vunpack.c.l.bf16 %v237_v33  ;;  %v492_v12 = vunpack.c.h.bf16 %v237_v33  ;;  %v2935_v14 = vmul.f32 %v2810_v61, %v450_v29  ;;  %v1402_v15 = vadd.f32 %v1401_v34, %v984_v31 }
  0x3e   : > { %v1398_v63 = vadd.f32 %v2868_v10, %v1395_v53  ;;  %v1437_v38 = vadd.f32 %v1436_v60, %v1015_v5  ;;  %v2941_v13 = vsel %vm1396_vm0, %v994_v44, 0.0  ;;  %v493_v18 = vunpack.c.l.bf16 %v238_v62 }
  0x3f   : > { %v494_v19 = vunpack.c.h.bf16 %v238_v62  ;;  %v495_v20 = vunpack.c.l.bf16 %v239_v0  ;;  %v1403_v22 = vadd.f32 %v1402_v15, %v985_v6  ;;  %v496_v10 = vunpack.c.h.bf16 %v239_v0  ;;  %v231_v0 = vld [vmem:[%s2771_s4 + $0xd8] sm:$0xff] }
  0x40   : > { %1399 = vadd.xlane.f32.xlu0 %v1398_v63  ;;  %v1438_v21 = vadd.f32 %v1437_v38, %v2885_v37  ;;  %v497_v5 = vunpack.c.l.bf16 %v240_v2  ;;  %v498_v24 = vunpack.c.h.bf16 %v240_v2  ;;  %v503_v40 = vunpack.c.h.bf16 %v2938_v16  ;;  %v232_v2 = vld [vmem:[%s2771_s4 + $0xe0] sm:$0xff]  ;;  %v233_v63 = vld [vmem:[%s2771_s4 + $0xe8] sm:$0xff] }
  0x41   : > { %v1034_v3 = vmul.f32 %v2779_v41, %v491_v9  ;;  %v1035_v25 = vmul.f32 %v2781_v42, %v492_v12  ;;  %v1404_v30 = vadd.f32 %v1403_v22, %v986_v56  ;;  %v499_v27 = vunpack.c.l.bf16 %v241_v17 }
  0x42   : > { %v1439_v26 = vadd.f32 %v1438_v21, %v2888_v52  ;;  %v500_v55 = vunpack.c.h.bf16 %v241_v17  ;;  %v501_v28 = vunpack.c.l.bf16 %v242_v23  ;;  %v502_v29 = vunpack.c.h.bf16 %v242_v23  ;;  %v230_v52 = vld [vmem:[%s2771_s4 + $0xd0] sm:$0xff]  ;;  %v235_v21 = vld [vmem:[%s2771_s4 + $0xf8] sm:$0xff] }
  0x43   : > { %v1036_v37 = vmul.f32 %v2786_v45, %v493_v18  ;;  %v1037_v31 = vmul.f32 %v2788_v46, %v494_v19  ;;  %v1405_v32 = vadd.f32 %v1404_v30, %v987_v35  ;;  %v1038_v6 = vmul.f32 %v2790_v47, %v495_v20  ;;  %v234_v20 = vld [vmem:[%s2771_s4 + $0xf0] sm:$0xff] }
  0x44   : > { %v1440_v4 = vadd.f32 %v1439_v26, %v2894_v8  ;;  %v1039_v33 = vmul.f32 %v2792_v48, %v496_v10  ;;  %v1040_v56 = vmul.f32 %v2794_v49, %v497_v5  ;;  %v1041_v44 = vmul.f32 %v2796_v50, %v498_v24 }
  0x45   : > { %v1046_v53 = vmul.f32 %v2806_v58, %v503_v40  ;;  %v1461_v60 = vadd.f32 %v1035_v25, %v1034_v3  ;;  %v1406_v62 = vadd.f32 %v1405_v32, %v988_v36  ;;  %v1042_v8 = vmul.f32 %v2798_v51, %v499_v27 }
  0x46   : > { %v1441_v34 = vadd.f32 %v1440_v4, %v2897_v1  ;;  %v2962_v35 = vmul.f32 %v2800_v54, %v500_v55  ;;  %v2967_v9 = vmul.f32 %v2804_v57, %v501_v28  ;;  %v478_v38 = vunpack.c.l.bf16 %v230_v52 }
  0x47   : > { %v1462_v12 = vadd.f32 %v1461_v60, %v1036_v37  ;;  %v479_v15 = vunpack.c.h.bf16 %v230_v52  ;;  %v1407_v1 = vadd.f32 %v1406_v62, %v989_v43  ;;  %v2972_v36 = vmul.f32 %v2810_v61, %v502_v29 }
  0x48   : > { %v1443_v17 = vadd.f32 %v2901_v11, %v1441_v34  ;;  %v2975_v18 = vsel %vm1396_vm0, %v1046_v53, 0.0  ;;  %v480_v22 = vunpack.c.l.bf16 %v231_v0  ;;  %v481_v23 = vunpack.c.h.bf16 %v231_v0  ;;  %v252_v34 = vld [vmem:[%s2771_s4 + $0x174] sm:$0xff] }
  0x49   : > { %v1463_v19 = vadd.f32 %v1462_v12, %v1037_v31  ;;  %v482_v10 = vunpack.c.l.bf16 %v232_v2  ;;  %v1408_v5 = vadd.f32 %v1407_v1, %v2922_v59  ;;  %v483_v24 = vunpack.c.h.bf16 %v232_v2 }
  0x4a   : > { %1444 = vadd.xlane.f32.xlu1 %v1443_v17  ;;  %v484_v40 = vunpack.c.l.bf16 %v233_v63  ;;  %v485_v3 = vunpack.c.h.bf16 %v233_v63  ;;  %v490_v43 = vunpack.c.l.bf16 %v2938_v16  ;;  %v1021_v25 = vmul.f32 %v2779_v41, %v478_v38  ;;  %v254_v38 = vld [vmem:[%s2771_s4 + $0x184] sm:$0xff] }
  0x4b   : > { %v1464_v11 = vadd.f32 %v1463_v19, %v1038_v6  ;;  %v1022_v26 = vmul.f32 %v2781_v42, %v479_v15  ;;  %v1409_v30 = vadd.f32 %v1408_v5, %v2927_v7  ;;  %v486_v27 = vunpack.c.l.bf16 %v234_v20  ;;  %v251_v6 = vld [vmem:[%s2771_s4 + $0x16c] sm:$0xff]  ;;  %v3007_v15 = vld [vmem:[%s2771_s4 + $0x168] ss:$52 sps:$4 sm:$0xff]   ;;  %v256_v5 = vld [vmem:[%s2771_s4 + $0x194] sm:$0xff] }
  0x4c   : > { %v487_v55 = vunpack.c.h.bf16 %v234_v20  ;;  %v488_v28 = vunpack.c.l.bf16 %v235_v21  ;;  %v489_v37 = vunpack.c.h.bf16 %v235_v21  ;;  %v1023_v59 = vmul.f32 %v2786_v45, %v480_v22 }
  0x4d   : > { %v1465_v29 = vadd.f32 %v1464_v11, %v1039_v33  ;;  %v1024_v31 = vmul.f32 %v2788_v46, %v481_v23  ;;  %v1410_v4 = vadd.f32 %v1409_v30, %v2930_v39  ;;  %v1025_v16 = vmul.f32 %v2790_v47, %v482_v10  ;;  %v255_v10 = vld [vmem:[%s2771_s4 + $0x18c] sm:$0xff] }
  0x4e   : > { %v1026_v32 = vmul.f32 %v2792_v48, %v483_v24  ;;  %v1027_v7 = vmul.f32 %v2794_v49, %v484_v40  ;;  %v1028_v33 = vmul.f32 %v2796_v50, %v485_v3  ;;  %v1033_v53 = vmul.f32 %v2806_v58, %v490_v43 }
  0x4f   : > { %v1466_v52 = vadd.f32 %v1465_v29, %v1040_v56  ;;  %v1446_v60 = vadd.f32 %v1022_v26, %v1021_v25  ;;  %v1411_v62 = vadd.f32 %v1410_v4, %v2935_v14  ;;  %v2996_v39 = vmul.f32 %v2798_v51, %v486_v27  ;;  %v253_v56 = vld [vmem:[%s2771_s4 + $0x17c] sm:$0xff] }
  0x50   : > { %v2999_v0 = vmul.f32 %v2800_v54, %v487_v55  ;;  %v3002_v2 = vmul.f32 %v2804_v57, %v488_v28  ;;  %v517_v17 = vunpack.c.l.bf16 %v251_v6  ;;  %v518_v1 = vunpack.c.h.bf16 %v251_v6  ;;  %v244_v4 = vld [vmem:[%s2771_s4 + $0x138] sm:$0xff] }
  0x51   : > { %v1467_v12 = vadd.f32 %v1466_v52, %v1041_v44  ;;  %v1447_v63 = vadd.f32 %v1446_v60, %v1023_v59  ;;  %v1413_v14 = vadd.f32 %v2941_v13, %v1411_v62  ;;  %v3011_v19 = vmul.f32 %v2810_v61, %v489_v37 }
  0x52   : > { %v3014_v20 = vsel %vm1396_vm0, %v1033_v53, 0.0  ;;  %v519_v21 = vunpack.c.l.bf16 %v252_v34  ;;  %v520_v44 = vunpack.c.h.bf16 %v252_v34  ;;  %v521_v24 = vunpack.c.l.bf16 %v253_v56  ;;  %v245_v34 = vld [vmem:[%s2771_s4 + $0x140] sm:$0xff] }
  0x53   : > { %v1468_v22 = vadd.f32 %v1467_v12, %v1042_v8  ;;  %v1448_v23 = vadd.f32 %v1447_v63, %v1024_v31  ;;  %1414 = vadd.xlane.f32.xlu0 %v1413_v14  ;;  %v522_v40 = vunpack.c.h.bf16 %v253_v56  ;;  %v523_v3 = vunpack.c.l.bf16 %v254_v38  ;;  %v246_v63 = vld [vmem:[%s2771_s4 + $0x148] sm:$0xff]  ;;  %v248_v14 = vld [vmem:[%s2771_s4 + $0x158] sm:$0xff] }
  0x54   : > { %v524_v11 = vunpack.c.h.bf16 %v254_v38  ;;  %v529_v13 = vunpack.c.h.bf16 %v3007_v15  ;;  %v1060_v26 = vmul.f32 %v2779_v41, %v517_v17  ;;  %v1061_v30 = vmul.f32 %v2781_v42, %v518_v1  ;;  %v247_v1 = vld [vmem:[%s2771_s4 + $0x150] sm:$0xff] }
  0x55   : > { %v1469_v43 = vadd.f32 %v1468_v22, %v2962_v35  ;;  %v1449_v25 = vadd.f32 %v1448_v23, %v1025_v16  ;;  %v525_v8 = vunpack.c.l.bf16 %v255_v10  ;;  %v526_v27 = vunpack.c.h.bf16 %v255_v10 }
  0x56   : > { %v527_v55 = vunpack.c.l.bf16 %v256_v5  ;;  %v528_v28 = vunpack.c.h.bf16 %v256_v5  ;;  %v1062_v59 = vmul.f32 %v2786_v45, %v519_v21  ;;  %v1063_v31 = vmul.f32 %v2788_v46, %v520_v44 }
  0x57   : > { %v1470_v29 = vadd.f32 %v1469_v43, %v2967_v9  ;;  %v1450_v37 = vadd.f32 %v1449_v25, %v1026_v32  ;;  %v1064_v35 = vmul.f32 %v2790_v47, %v521_v24  ;;  %v1065_v16 = vmul.f32 %v2792_v48, %v522_v40  ;;  %v249_v40 = vld [vmem:[%s2771_s4 + $0x160] sm:$0xff] }
  0x58   : > { %v1066_v6 = vmul.f32 %v2794_v49, %v523_v3  ;;  %v1067_v52 = vmul.f32 %v2796_v50, %v524_v11  ;;  %v1072_v32 = vmul.f32 %v2806_v58, %v529_v13  ;;  %v1491_v60 = vadd.f32 %v1061_v30, %v1060_v26 }
  0x59   : > { %v1471_v53 = vadd.f32 %v1470_v29, %v2972_v36  ;;  %v1451_v9 = vadd.f32 %v1450_v37, %v1027_v7  ;;  %v3034_v62 = vmul.f32 %v2798_v51, %v525_v8  ;;  %v3037_v56 = vmul.f32 %v2800_v54, %v526_v27 }
  0x5a   : > { %v3040_v12 = vmul.f32 %v2804_v57, %v527_v55  ;;  %v504_v38 = vunpack.c.l.bf16 %v244_v4  ;;  %v1492_v7 = vadd.f32 %v1491_v60, %v1062_v59  ;;  %v505_v21 = vunpack.c.h.bf16 %v244_v4  ;;  %v265_v59 = vld [vmem:[%s2771_s4 + $0x1d4] sm:$0xff]  ;;  %v266_v60 = vld [vmem:[%s2771_s4 + $0x1dc] sm:$0xff] }
  0x5b   : > { %v1473_v17 = vadd.f32 %v2975_v18, %v1471_v53  ;;  %v1452_v36 = vadd.f32 %v1451_v9, %v1028_v33  ;;  %v3047_v22 = vmul.f32 %v2810_v61, %v528_v28  ;;  %v3050_v23 = vsel %vm1396_vm0, %v1072_v32, 0.0 }
  0x5c   : > { %v506_v10 = vunpack.c.l.bf16 %v245_v34  ;;  %v507_v5 = vunpack.c.h.bf16 %v245_v34  ;;  %v1493_v24 = vadd.f32 %v1492_v7, %v1063_v31  ;;  %v508_v3 = vunpack.c.l.bf16 %v246_v63  ;;  %v267_v34 = vld [vmem:[%s2771_s4 + $0x1e4] sm:$0xff] }
  0x5d   : > { %1474 = vadd.xlane.f32.xlu1 %v1473_v17  ;;  %v1453_v44 = vadd.f32 %v1452_v36, %v2996_v39  ;;  %v509_v18 = vunpack.c.h.bf16 %v246_v63  ;;  %v510_v33 = vunpack.c.l.bf16 %v247_v1  ;;  %v511_v11 = vunpack.c.h.bf16 %v247_v1  ;;  %v268_v17 = vld [vmem:[%s2771_s4 + $0x1ec] sm:$0xff] }
  0x5e   : > { %v512_v13 = vunpack.c.l.bf16 %v248_v14  ;;  %v516_v43 = vunpack.c.l.bf16 %v3007_v15  ;;  %v1494_v26 = vadd.f32 %v1493_v24, %v1064_v35  ;;  %v1047_v30 = vmul.f32 %v2779_v41, %v504_v38 }
  0x5f   : > { %v1454_v25 = vadd.f32 %v1453_v44, %v2999_v0  ;;  %v1048_v8 = vmul.f32 %v2781_v42, %v505_v21  ;;  %v513_v27 = vunpack.c.h.bf16 %v248_v14  ;;  %v514_v55 = vunpack.c.l.bf16 %v249_v40  ;;  %v3085_v21 = vld [vmem:[%s2771_s4 + $0x1d0] ss:$52 sps:$4 sm:$0xff]  }
  0x60   : > { %v515_v39 = vunpack.c.h.bf16 %v249_v40  ;;  %v1049_v28 = vmul.f32 %v2786_v45, %v506_v10  ;;  %v1495_v37 = vadd.f32 %v1494_v26, %v1065_v16  ;;  %v1050_v15 = vmul.f32 %v2788_v46, %v507_v5  ;;  %v269_v5 = vld [vmem:[%s2771_s4 + $0x1f4] sm:$0xff] }
  0x61   : > { %v1455_v29 = vadd.f32 %v1454_v25, %v3002_v2  ;;  %v1051_v0 = vmul.f32 %v2790_v47, %v508_v3  ;;  %v1052_v31 = vmul.f32 %v2792_v48, %v509_v18  ;;  %v1053_v4 = vmul.f32 %v2794_v49, %v510_v33  ;;  %v270_v33 = vld [vmem:[%s2771_s4 + $0x1fc] sm:$0xff] }
  0x62   : > { %v1054_v35 = vmul.f32 %v2796_v50, %v511_v11  ;;  %v1059_v53 = vmul.f32 %v2806_v58, %v516_v43  ;;  %v1496_v32 = vadd.f32 %v1495_v37, %v1066_v6  ;;  %v3069_v2 = vmul.f32 %v2798_v51, %v512_v13 }
  0x63   : > { %v1456_v9 = vadd.f32 %v1455_v29, %v3011_v19  ;;  %v1476_v16 = vadd.f32 %v1048_v8, %v1047_v30  ;;  %v3074_v63 = vmul.f32 %v2800_v54, %v513_v27  ;;  %v3077_v38 = vmul.f32 %v2804_v57, %v514_v55 }
  0x64   : > { %v543_v36 = vunpack.c.l.bf16 %v265_v59  ;;  %v544_v7 = vunpack.c.h.bf16 %v265_v59  ;;  %v1497_v6 = vadd.f32 %v1496_v32, %v1067_v52  ;;  %v3082_v1 = vmul.f32 %v2810_v61, %v515_v39 }
  0x65   : > { %v1458_v19 = vadd.f32 %v3014_v20, %v1456_v9  ;;  %v1477_v14 = vadd.f32 %v1476_v16, %v1049_v28  ;;  %v3088_v10 = vsel %vm1396_vm0, %v1059_v53, 0.0  ;;  %v545_v44 = vunpack.c.l.bf16 %v266_v60 }
  0x66   : > { %v546_v24 = vunpack.c.h.bf16 %v266_v60  ;;  %v547_v40 = vunpack.c.l.bf16 %v267_v34  ;;  %v1498_v3 = vadd.f32 %v1497_v6, %v3034_v62  ;;  %v548_v20 = vunpack.c.h.bf16 %v267_v34  ;;  %v259_v34 = vld [vmem:[%s2771_s4 + $0x1a8] sm:$0xff] }
  0x67   : > { %1459 = vadd.xlane.f32.xlu0 %v1458_v19  ;;  %v1478_v18 = vadd.f32 %v1477_v14, %v1050_v15  ;;  %v549_v52 = vunpack.c.l.bf16 %v268_v17  ;;  %v550_v11 = vunpack.c.h.bf16 %v268_v17  ;;  %v555_v13 = vunpack.c.h.bf16 %v3085_v21  ;;  %v260_v17 = vld [vmem:[%s2771_s4 + $0x1b0] sm:$0xff]  ;;  %v261_v19 = vld [vmem:[%s2771_s4 + $0x1b8] sm:$0xff] }
  0x68   : > { %v1086_v43 = vmul.f32 %v2779_v41, %v543_v36  ;;  %v1087_v25 = vmul.f32 %v2781_v42, %v544_v7  ;;  %v1499_v26 = vadd.f32 %v1498_v3, %v3037_v56  ;;  %v551_v8 = vunpack.c.l.bf16 %v269_v5  ;;  %v258_v56 = vld [vmem:[%s2771_s4 + $0x1a0] sm:$0xff]  ;;  %v263_v3 = vld [vmem:[%s2771_s4 + $0x1c8] sm:$0xff] }
  0x69   : > { %v1479_v30 = vadd.f32 %v1478_v18, %v1051_v0  ;;  %v552_v27 = vunpack.c.h.bf16 %v269_v5  ;;  %v553_v55 = vunpack.c.l.bf16 %v270_v33  ;;  %v554_v39 = vunpack.c.h.bf16 %v270_v33 }
  0x6a   : > { %v1088_v62 = vmul.f32 %v2786_v45, %v545_v44  ;;  %v1089_v28 = vmul.f32 %v2788_v46, %v546_v24  ;;  %v1500_v29 = vadd.f32 %v1499_v26, %v3040_v12  ;;  %v1090_v15 = vmul.f32 %v2790_v47, %v547_v40  ;;  %v262_v40 = vld [vmem:[%s2771_s4 + $0x1c0] sm:$0xff] }
  0x6b   : > { %v1480_v37 = vadd.f32 %v1479_v30, %v1052_v31  ;;  %v1091_v59 = vmul.f32 %v2792_v48, %v548_v20  ;;  %v1092_v0 = vmul.f32 %v2794_v49, %v549_v52  ;;  %v1093_v53 = vmul.f32 %v2796_v50, %v550_v11 }
  0x6c   : > { %v1098_v9 = vmul.f32 %v2806_v58, %v555_v13  ;;  %v1521_v32 = vadd.f32 %v1087_v25, %v1086_v43  ;;  %v1501_v16 = vadd.f32 %v1500_v29, %v3047_v22  ;;  %v1094_v12 = vmul.f32 %v2798_v51, %v551_v8 }
  0x6d   : > { %v1481_v60 = vadd.f32 %v1480_v37, %v1053_v4  ;;  %v3109_v31 = vmul.f32 %v2800_v54, %v552_v27  ;;  %v3114_v36 = vmul.f32 %v2804_v57, %v553_v55  ;;  %v530_v6 = vunpack.c.l.bf16 %v258_v56 }
  0x6e   : > { %v1522_v7 = vadd.f32 %v1521_v32, %v1088_v62  ;;  %v531_v14 = vunpack.c.h.bf16 %v258_v56  ;;  %v1503_v5 = vadd.f32 %v3050_v23, %v1501_v16  ;;  %v3119_v4 = vmul.f32 %v2810_v61, %v554_v39  ;;  %v280_v16 = vld [vmem:[%s2771_s4 + $0x244] sm:$0xff] }
  0x6f   : > { %v1482_v22 = vadd.f32 %v1481_v60, %v1054_v35  ;;  %v3122_v44 = vsel %vm1396_vm0, %v1098_v9, 0.0  ;;  %v532_v18 = vunpack.c.l.bf16 %v259_v34  ;;  %v533_v33 = vunpack.c.h.bf16 %v259_v34 }
  0x70   : > { %v1523_v24 = vadd.f32 %v1522_v7, %v1089_v28  ;;  %v534_v20 = vunpack.c.l.bf16 %v260_v17  ;;  %1504 = vadd.xlane.f32.xlu1 %v1503_v5  ;;  %v535_v11 = vunpack.c.h.bf16 %v260_v17  ;;  %v536_v13 = vunpack.c.l.bf16 %v261_v19 }
  0x71   : > { %v1483_v52 = vadd.f32 %v1482_v22, %v3069_v2  ;;  %v537_v43 = vunpack.c.h.bf16 %v261_v19  ;;  %v542_v35 = vunpack.c.l.bf16 %v3085_v21  ;;  %v1073_v25 = vmul.f32 %v2779_v41, %v530_v6  ;;  %v282_v6 = vld [vmem:[%s2771_s4 + $0x254] sm:$0xff] }
  0x72   : > { %v1524_v23 = vadd.f32 %v1523_v24, %v1090_v15  ;;  %v1074_v26 = vmul.f32 %v2781_v42, %v531_v14  ;;  %v538_v8 = vunpack.c.l.bf16 %v262_v40  ;;  %v539_v27 = vunpack.c.h.bf16 %v262_v40  ;;  %v279_v15 = vld [vmem:[%s2771_s4 + $0x23c] sm:$0xff]  ;;  %v3154_v14 = vld [vmem:[%s2771_s4 + $0x238] ss:$52 sps:$4 sm:$0xff]  }
  0x73   : > { %v1484_v30 = vadd.f32 %v1483_v52, %v3074_v63  ;;  %v540_v55 = vunpack.c.l.bf16 %v263_v3  ;;  %v541_v62 = vunpack.c.h.bf16 %v263_v3  ;;  %v1075_v2 = vmul.f32 %v2786_v45, %v532_v18  ;;  %v284_v52 = vld [vmem:[%s2771_s4 + $0x264] sm:$0xff] }
  0x74   : > { %v1525_v39 = vadd.f32 %v1524_v23, %v1091_v59  ;;  %v1076_v28 = vmul.f32 %v2788_v46, %v533_v33  ;;  %v1077_v21 = vmul.f32 %v2790_v47, %v534_v20  ;;  %v1078_v37 = vmul.f32 %v2792_v48, %v535_v11  ;;  %v283_v20 = vld [vmem:[%s2771_s4 + $0x25c] sm:$0xff] }
  0x75   : > { %v1485_v29 = vadd.f32 %v1484_v30, %v3077_v38  ;;  %v1079_v63 = vmul.f32 %v2794_v49, %v536_v13  ;;  %v1080_v59 = vmul.f32 %v2796_v50, %v537_v43  ;;  %v1085_v9 = vmul.f32 %v2806_v58, %v542_v35 }
  0x76   : > { %v1526_v56 = vadd.f32 %v1525_v39, %v1092_v0  ;;  %v1506_v32 = vadd.f32 %v1074_v26, %v1073_v25  ;;  %v3143_v38 = vmul.f32 %v2798_v51, %v538_v8  ;;  %v3146_v34 = vmul.f32 %v2800_v54, %v539_v27  ;;  %v281_v0 = vld [vmem:[%s2771_s4 + $0x24c] sm:$0xff] }
  0x77   : > { %v1486_v60 = vadd.f32 %v1485_v29, %v3082_v1  ;;  %v3149_v17 = vmul.f32 %v2804_v57, %v540_v55  ;;  %v569_v5 = vunpack.c.l.bf16 %v279_v15  ;;  %v570_v22 = vunpack.c.h.bf16 %v279_v15  ;;  %v272_v29 = vld [vmem:[%s2771_s4 + $0x208] sm:$0xff] }
  0x78   : > { %v1527_v7 = vadd.f32 %v1526_v56, %v1093_v53  ;;  %v1507_v19 = vadd.f32 %v1506_v32, %v1075_v2  ;;  %v3158_v24 = vmul.f32 %v2810_v61, %v541_v62  ;;  %v3161_v40 = vsel %vm1396_vm0, %v1085_v9, 0.0 }
  0x79   : > { %v1488_v1 = vadd.f32 %v3088_v10, %v1486_v60  ;;  %v571_v3 = vunpack.c.l.bf16 %v280_v16  ;;  %v572_v53 = vunpack.c.h.bf16 %v280_v16  ;;  %v573_v11 = vunpack.c.l.bf16 %v281_v0  ;;  %v273_v16 = vld [vmem:[%s2771_s4 + $0x210] sm:$0xff] }
  0x7a   : > { %v1528_v18 = vadd.f32 %v1527_v7, %v1094_v12  ;;  %v1508_v33 = vadd.f32 %v1507_v19, %v1076_v28  ;;  %v574_v13 = vunpack.c.h.bf16 %v281_v0  ;;  %v575_v43 = vunpack.c.l.bf16 %v282_v6  ;;  %v274_v19 = vld [vmem:[%s2771_s4 + $0x218] sm:$0xff] }
  0x7b   : > { %1489 = vadd.xlane.f32.xlu0 %v1488_v1  ;;  %v576_v23 = vunpack.c.h.bf16 %v282_v6  ;;  %v581_v10 = vunpack.c.h.bf16 %v3154_v14  ;;  %v1112_v26 = vmul.f32 %v2779_v41, %v569_v5  ;;  %v1113_v30 = vmul.f32 %v2781_v42, %v570_v22  ;;  %v275_v22 = vld [vmem:[%s2771_s4 + $0x220] sm:$0xff]  ;;  %v276_v1 = vld [vmem:[%s2771_s4 + $0x228] sm:$0xff] }
  0x7c   : > { %v1529_v35 = vadd.f32 %v1528_v18, %v3109_v31  ;;  %v1509_v25 = vadd.f32 %v1508_v33, %v1077_v21  ;;  %v577_v12 = vunpack.c.l.bf16 %v283_v20  ;;  %v578_v8 = vunpack.c.h.bf16 %v283_v20 }
  0x7d   : > { %v579_v27 = vunpack.c.l.bf16 %v284_v52  ;;  %v580_v55 = vunpack.c.h.bf16 %v284_v52  ;;  %v1114_v2 = vmul.f32 %v2786_v45, %v571_v3  ;;  %v1115_v28 = vmul.f32 %v2788_v46, %v572_v53 }
  0x7e   : > { %v1530_v39 = vadd.f32 %v1529_v35, %v3114_v36  ;;  %v1510_v62 = vadd.f32 %v1509_v25, %v1078_v37  ;;  %v1116_v31 = vmul.f32 %v2790_v47, %v573_v11  ;;  %v1117_v21 = vmul.f32 %v2792_v48, %v574_v13  ;;  %v277_v13 = vld [vmem:[%s2771_s4 + $0x230] sm:$0xff] }
  0x7f   : > { %v1118_v15 = vmul.f32 %v2794_v49, %v575_v43  ;;  %v1119_v56 = vmul.f32 %v2796_v50, %v576_v23  ;;  %v1124_v37 = vmul.f32 %v2806_v58, %v581_v10  ;;  %v1551_v32 = vadd.f32 %v1113_v30, %v1112_v26 }
  0x80   : > { %v1531_v9 = vadd.f32 %v1530_v39, %v3119_v4  ;;  %v1511_v36 = vadd.f32 %v1510_v62, %v1079_v63  ;;  %v3181_v60 = vmul.f32 %v2798_v51, %v577_v12  ;;  %v3184_v0 = vmul.f32 %v2800_v54, %v578_v8 }
  0x81   : > { %v3187_v7 = vmul.f32 %v2804_v57, %v579_v27  ;;  %v556_v6 = vunpack.c.l.bf16 %v272_v29  ;;  %v1552_v63 = vadd.f32 %v1551_v32, %v1114_v2  ;;  %v557_v3 = vunpack.c.h.bf16 %v272_v29  ;;  %v293_v2 = vld [vmem:[%s2771_s4 + $0x2a4] sm:$0xff]  ;;  %v294_v32 = vld [vmem:[%s2771_s4 + $0x2ac] sm:$0xff] }
  0x82   : > { %v1533_v5 = vadd.f32 %v3122_v44, %v1531_v9  ;;  %v1512_v4 = vadd.f32 %v1511_v36, %v1080_v59  ;;  %v3194_v18 = vmul.f32 %v2810_v61, %v580_v55  ;;  %v3197_v33 = vsel %vm1396_vm0, %v1124_v37, 0.0 }
  0x83   : > { %v558_v20 = vunpack.c.l.bf16 %v273_v16  ;;  %v559_v52 = vunpack.c.h.bf16 %v273_v16  ;;  %v1553_v11 = vadd.f32 %v1552_v63, %v1115_v28  ;;  %v560_v43 = vunpack.c.l.bf16 %v274_v19  ;;  %v295_v16 = vld [vmem:[%s2771_s4 + $0x2b4] sm:$0xff] }
  0x84   : > { %1534 = vadd.xlane.f32.xlu1 %v1533_v5  ;;  %v1513_v53 = vadd.f32 %v1512_v4, %v3143_v38  ;;  %v561_v44 = vunpack.c.h.bf16 %v274_v19  ;;  %v562_v59 = vunpack.c.l.bf16 %v275_v22  ;;  %v563_v23 = vunpack.c.h.bf16 %v275_v22  ;;  %v296_v5 = vld [vmem:[%s2771_s4 + $0x2bc] sm:$0xff] }
  0x85   : > { %v564_v10 = vunpack.c.l.bf16 %v276_v1  ;;  %v568_v35 = vunpack.c.l.bf16 %v3154_v14  ;;  %v1554_v26 = vadd.f32 %v1553_v11, %v1116_v31  ;;  %v1099_v30 = vmul.f32 %v2779_v41, %v556_v6 }
  0x86   : > { %v1514_v25 = vadd.f32 %v1513_v53, %v3146_v34  ;;  %v1100_v12 = vmul.f32 %v2781_v42, %v557_v3  ;;  %v565_v8 = vunpack.c.h.bf16 %v276_v1  ;;  %v566_v27 = vunpack.c.l.bf16 %v277_v13  ;;  %v3232_v3 = vld [vmem:[%s2771_s4 + $0x2a0] ss:$52 sps:$4 sm:$0xff]  }
  0x87   : > { %v567_v38 = vunpack.c.h.bf16 %v277_v13  ;;  %v1101_v55 = vmul.f32 %v2786_v45, %v558_v20  ;;  %v1555_v62 = vadd.f32 %v1554_v26, %v1117_v21  ;;  %v1102_v14 = vmul.f32 %v2788_v46, %v559_v52  ;;  %v297_v52 = vld [vmem:[%s2771_s4 + $0x2c4] sm:$0xff] }
  0x88   : > { %v1515_v39 = vadd.f32 %v1514_v25, %v3149_v17  ;;  %v1103_v34 = vmul.f32 %v2790_v47, %v560_v43  ;;  %v1104_v28 = vmul.f32 %v2792_v48, %v561_v44  ;;  %v1105_v29 = vmul.f32 %v2794_v49, %v562_v59  ;;  %v298_v59 = vld [vmem:[%s2771_s4 + $0x2cc] sm:$0xff] }
  0x89   : > { %v1106_v31 = vmul.f32 %v2796_v50, %v563_v23  ;;  %v1111_v9 = vmul.f32 %v2806_v58, %v568_v35  ;;  %v1556_v37 = vadd.f32 %v1555_v62, %v1118_v15  ;;  %v3216_v17 = vmul.f32 %v2798_v51, %v564_v10 }
  0x8a   : > { %v1516_v36 = vadd.f32 %v1515_v39, %v3158_v24  ;;  %v1536_v21 = vadd.f32 %v1100_v12, %v1099_v30  ;;  %v3221_v19 = vmul.f32 %v2800_v54, %v565_v8  ;;  %v3224_v6 = vmul.f32 %v2804_v57, %v566_v27 }
  0x8b   : > { %v595_v4 = vunpack.c.l.bf16 %v293_v2  ;;  %v596_v63 = vunpack.c.h.bf16 %v293_v2  ;;  %v1557_v15 = vadd.f32 %v1556_v37, %v1119_v56  ;;  %v3229_v22 = vmul.f32 %v2810_v61, %v567_v38 }
  0x8c   : > { %v1518_v24 = vadd.f32 %v3161_v40, %v1516_v36  ;;  %v1537_v1 = vadd.f32 %v1536_v21, %v1101_v55  ;;  %v3235_v20 = vsel %vm1396_vm0, %v1111_v9, 0.0  ;;  %v597_v53 = vunpack.c.l.bf16 %v294_v32 }
  0x8d   : > { %v598_v11 = vunpack.c.h.bf16 %v294_v32  ;;  %v599_v13 = vunpack.c.l.bf16 %v295_v16  ;;  %v1558_v43 = vadd.f32 %v1557_v15, %v3181_v60  ;;  %v600_v40 = vunpack.c.h.bf16 %v295_v16  ;;  %v287_v16 = vld [vmem:[%s2771_s4 + $0x278] sm:$0xff] }
  0x8e   : > { %1519 = vadd.xlane.f32.xlu0 %v1518_v24  ;;  %v1538_v44 = vadd.f32 %v1537_v1, %v1102_v14  ;;  %v601_v56 = vunpack.c.l.bf16 %v296_v5  ;;  %v602_v23 = vunpack.c.h.bf16 %v296_v5  ;;  %v607_v10 = vunpack.c.h.bf16 %v3232_v3  ;;  %v288_v5 = vld [vmem:[%s2771_s4 + $0x280] sm:$0xff]  ;;  %v289_v24 = vld [vmem:[%s2771_s4 + $0x288] sm:$0xff] }
  0x8f   : > { %v1138_v35 = vmul.f32 %v2779_v41, %v595_v4  ;;  %v1139_v25 = vmul.f32 %v2781_v42, %v596_v63  ;;  %v1559_v26 = vadd.f32 %v1558_v43, %v3184_v0  ;;  %v603_v12 = vunpack.c.l.bf16 %v297_v52  ;;  %v286_v0 = vld [vmem:[%s2771_s4 + $0x270] sm:$0xff]  ;;  %v291_v43 = vld [vmem:[%s2771_s4 + $0x298] sm:$0xff] }
  0x90   : > { %v1539_v30 = vadd.f32 %v1538_v44, %v1103_v34  ;;  %v604_v8 = vunpack.c.h.bf16 %v297_v52  ;;  %v605_v27 = vunpack.c.l.bf16 %v298_v59  ;;  %v606_v38 = vunpack.c.h.bf16 %v298_v59 }
  0x91   : > { %v1140_v60 = vmul.f32 %v2786_v45, %v597_v53  ;;  %v1141_v55 = vmul.f32 %v2788_v46, %v598_v11  ;;  %v1560_v39 = vadd.f32 %v1559_v26, %v3187_v7  ;;  %v1142_v14 = vmul.f32 %v2790_v47, %v599_v13  ;;  %v290_v13 = vld [vmem:[%s2771_s4 + $0x290] sm:$0xff] }
  0x92   : > { %v1540_v62 = vadd.f32 %v1539_v30, %v1104_v28  ;;  %v1143_v2 = vmul.f32 %v2792_v48, %v600_v40  ;;  %v1144_v34 = vmul.f32 %v2794_v49, %v601_v56  ;;  %v1145_v9 = vmul.f32 %v2796_v50, %v602_v23 }
  0x93   : > { %v1150_v36 = vmul.f32 %v2806_v58, %v607_v10  ;;  %v1581_v37 = vadd.f32 %v1139_v25, %v1138_v35  ;;  %v1561_v21 = vadd.f32 %v1560_v39, %v3194_v18  ;;  %v1146_v7 = vmul.f32 %v2798_v51, %v603_v12 }
  0x94   : > { %v1541_v32 = vadd.f32 %v1540_v62, %v1105_v29  ;;  %v3256_v28 = vmul.f32 %v2800_v54, %v604_v8  ;;  %v3261_v4 = vmul.f32 %v2804_v57, %v605_v27  ;;  %v582_v15 = vunpack.c.l.bf16 %v286_v0 }
  0x95   : > { %v1582_v63 = vadd.f32 %v1581_v37, %v1140_v60  ;;  %v583_v1 = vunpack.c.h.bf16 %v286_v0  ;;  %v1563_v52 = vadd.f32 %v3197_v33, %v1561_v21  ;;  %v3266_v29 = vmul.f32 %v2810_v61, %v606_v38  ;;  %v308_v21 = vld [vmem:[%s2771_s4 + $0x314] sm:$0xff] }
  0x96   : > { %v1542_v18 = vadd.f32 %v1541_v32, %v1106_v31  ;;  %v3269_v53 = vsel %vm1396_vm0, %v1150_v36, 0.0  ;;  %v584_v44 = vunpack.c.l.bf16 %v287_v16  ;;  %v585_v59 = vunpack.c.h.bf16 %v287_v16 }
  0x97   : > { %v1583_v11 = vadd.f32 %v1582_v63, %v1141_v55  ;;  %v586_v40 = vunpack.c.l.bf16 %v288_v5  ;;  %1564 = vadd.xlane.f32.xlu1 %v1563_v52  ;;  %v587_v23 = vunpack.c.h.bf16 %v288_v5  ;;  %v588_v10 = vunpack.c.l.bf16 %v289_v24 }
  0x98   : > { %v1543_v56 = vadd.f32 %v1542_v18, %v3216_v17  ;;  %v589_v35 = vunpack.c.h.bf16 %v289_v24  ;;  %v594_v31 = vunpack.c.l.bf16 %v3232_v3  ;;  %v1125_v25 = vmul.f32 %v2779_v41, %v582_v15  ;;  %v310_v15 = vld [vmem:[%s2771_s4 + $0x324] sm:$0xff] }
  0x99   : > { %v1584_v33 = vadd.f32 %v1583_v11, %v1142_v14  ;;  %v1126_v26 = vmul.f32 %v2781_v42, %v583_v1  ;;  %v590_v12 = vunpack.c.l.bf16 %v290_v13  ;;  %v591_v8 = vunpack.c.h.bf16 %v290_v13  ;;  %v307_v14 = vld [vmem:[%s2771_s4 + $0x30c] sm:$0xff]  ;;  %v3301_v1 = vld [vmem:[%s2771_s4 + $0x308] ss:$52 sps:$4 sm:$0xff]  }
  0x9a   : > { %v1544_v30 = vadd.f32 %v1543_v56, %v3221_v19  ;;  %v592_v27 = vunpack.c.l.bf16 %v291_v43  ;;  %v593_v60 = vunpack.c.h.bf16 %v291_v43  ;;  %v1127_v17 = vmul.f32 %v2786_v45, %v584_v44  ;;  %v312_v56 = vld [vmem:[%s2771_s4 + $0x334] sm:$0xff] }
  0x9b   : > { %v1585_v38 = vadd.f32 %v1584_v33, %v1143_v2  ;;  %v1128_v55 = vmul.f32 %v2788_v46, %v585_v59  ;;  %v1129_v3 = vmul.f32 %v2790_v47, %v586_v40  ;;  %v1130_v62 = vmul.f32 %v2792_v48, %v587_v23  ;;  %v311_v40 = vld [vmem:[%s2771_s4 + $0x32c] sm:$0xff] }
  0x9c   : > { %v1545_v39 = vadd.f32 %v1544_v30, %v3224_v6  ;;  %v1131_v19 = vmul.f32 %v2794_v49, %v588_v10  ;;  %v1132_v2 = vmul.f32 %v2796_v50, %v589_v35  ;;  %v1137_v36 = vmul.f32 %v2806_v58, %v594_v31 }
  0x9d   : > { %v1586_v0 = vadd.f32 %v1585_v38, %v1144_v34  ;;  %v1566_v37 = vadd.f32 %v1126_v26, %v1125_v25  ;;  %v3290_v6 = vmul.f32 %v2798_v51, %v590_v12  ;;  %v3293_v16 = vmul.f32 %v2800_v54, %v591_v8  ;;  %v309_v34 = vld [vmem:[%s2771_s4 + $0x31c] sm:$0xff] }
  0x9e   : > { %v1546_v32 = vadd.f32 %v1545_v39, %v3229_v22  ;;  %v3296_v5 = vmul.f32 %v2804_v57, %v592_v27  ;;  %v621_v52 = vunpack.c.l.bf16 %v307_v14  ;;  %v622_v18 = vunpack.c.h.bf16 %v307_v14  ;;  %v300_v39 = vld [vmem:[%s2771_s4 + $0x2d8] sm:$0xff] }
  0x9f   : > { %v1587_v63 = vadd.f32 %v1586_v0, %v1145_v9  ;;  %v1567_v24 = vadd.f32 %v1566_v37, %v1127_v17  ;;  %v3305_v11 = vmul.f32 %v2810_v61, %v593_v60  ;;  %v3308_v13 = vsel %vm1396_vm0, %v1137_v36, 0.0 }
  0xa0   : > { %v1548_v22 = vadd.f32 %v3235_v20, %v1546_v32  ;;  %v623_v43 = vunpack.c.l.bf16 %v308_v21  ;;  %v624_v9 = vunpack.c.h.bf16 %v308_v21  ;;  %v625_v23 = vunpack.c.l.bf16 %v309_v34  ;;  %v301_v21 = vld [vmem:[%s2771_s4 + $0x2e0] sm:$0xff] }
  0xa1   : > { %v1588_v44 = vadd.f32 %v1587_v63, %v1146_v7  ;;  %v1568_v59 = vadd.f32 %v1567_v24, %v1128_v55  ;;  %v626_v10 = vunpack.c.h.bf16 %v309_v34  ;;  %v627_v35 = vunpack.c.l.bf16 %v310_v15  ;;  %v302_v24 = vld [vmem:[%s2771_s4 + $0x2e8] sm:$0xff] }
  0xa2   : > { %1549 = vadd.xlane.f32.xlu0 %v1548_v22  ;;  %v628_v33 = vunpack.c.h.bf16 %v310_v15  ;;  %v633_v20 = vunpack.c.h.bf16 %v3301_v1  ;;  %v1164_v26 = vmul.f32 %v2779_v41, %v621_v52  ;;  %v1165_v30 = vmul.f32 %v2781_v42, %v622_v18  ;;  %v303_v18 = vld [vmem:[%s2771_s4 + $0x2f0] sm:$0xff]  ;;  %v304_v22 = vld [vmem:[%s2771_s4 + $0x2f8] sm:$0xff] }
  0xa3   : > { %v1589_v31 = vadd.f32 %v1588_v44, %v3256_v28  ;;  %v1569_v25 = vadd.f32 %v1568_v59, %v1129_v3  ;;  %v629_v7 = vunpack.c.l.bf16 %v311_v40  ;;  %v630_v12 = vunpack.c.h.bf16 %v311_v40 }
  0xa4   : > { %v631_v8 = vunpack.c.l.bf16 %v312_v56  ;;  %v632_v27 = vunpack.c.h.bf16 %v312_v56  ;;  %v1166_v17 = vmul.f32 %v2786_v45, %v623_v43  ;;  %v1167_v55 = vmul.f32 %v2788_v46, %v624_v9 }
  0xa5   : > { %v1590_v38 = vadd.f32 %v1589_v31, %v3261_v4  ;;  %v1570_v60 = vadd.f32 %v1569_v25, %v1130_v62  ;;  %v1168_v28 = vmul.f32 %v2790_v47, %v625_v23  ;;  %v1169_v3 = vmul.f32 %v2792_v48, %v626_v10  ;;  %v305_v10 = vld [vmem:[%s2771_s4 + $0x300] sm:$0xff] }
  0xa6   : > { %v1170_v14 = vmul.f32 %v2794_v49, %v627_v35  ;;  %v1171_v0 = vmul.f32 %v2796_v50, %v628_v33  ;;  %v1176_v62 = vmul.f32 %v2806_v58, %v633_v20  ;;  %v1611_v37 = vadd.f32 %v1165_v30, %v1164_v26 }
  0xa7   : > { %v1591_v36 = vadd.f32 %v1590_v38, %v3266_v29  ;;  %v1571_v4 = vadd.f32 %v1570_v60, %v1131_v19  ;;  %v3328_v32 = vmul.f32 %v2798_v51, %v629_v7  ;;  %v3331_v34 = vmul.f32 %v2800_v54, %v630_v12 }
  0xa8   : > { %v3334_v63 = vmul.f32 %v2804_v57, %v631_v8  ;;  %v608_v15 = vunpack.c.l.bf16 %v300_v39  ;;  %v1612_v19 = vadd.f32 %v1611_v37, %v1166_v17  ;;  %v609_v43 = vunpack.c.h.bf16 %v300_v39  ;;  %v321_v17 = vld [vmem:[%s2771_s4 + $0x374] sm:$0xff]  ;;  %v322_v37 = vld [vmem:[%s2771_s4 + $0x37c] sm:$0xff] }
  0xa9   : > { %v1593_v52 = vadd.f32 %v3269_v53, %v1591_v36  ;;  %v1572_v29 = vadd.f32 %v1571_v4, %v1132_v2  ;;  %v3341_v44 = vmul.f32 %v2810_v61, %v632_v27  ;;  %v3344_v59 = vsel %vm1396_vm0, %v1176_v62, 0.0 }
  0xaa   : > { %v610_v40 = vunpack.c.l.bf16 %v301_v21  ;;  %v611_v56 = vunpack.c.h.bf16 %v301_v21  ;;  %v1613_v23 = vadd.f32 %v1612_v19, %v1167_v55  ;;  %v612_v35 = vunpack.c.l.bf16 %v302_v24  ;;  %v323_v21 = vld [vmem:[%s2771_s4 + $0x384] sm:$0xff] }
  0xab   : > { %1594 = vadd.xlane.f32.xlu1 %v1593_v52  ;;  %v1573_v9 = vadd.f32 %v1572_v29, %v3290_v6  ;;  %v613_v53 = vunpack.c.h.bf16 %v302_v24  ;;  %v614_v2 = vunpack.c.l.bf16 %v303_v18  ;;  %v615_v33 = vunpack.c.h.bf16 %v303_v18  ;;  %v324_v52 = vld [vmem:[%s2771_s4 + $0x38c] sm:$0xff] }
  0xac   : > { %v616_v20 = vunpack.c.l.bf16 %v304_v22  ;;  %v620_v31 = vunpack.c.l.bf16 %v3301_v1  ;;  %v1614_v26 = vadd.f32 %v1613_v23, %v1168_v28  ;;  %v1151_v30 = vmul.f32 %v2779_v41, %v608_v15 }
  0xad   : > { %v1574_v25 = vadd.f32 %v1573_v9, %v3293_v16  ;;  %v1152_v7 = vmul.f32 %v2781_v42, %v609_v43  ;;  %v617_v12 = vunpack.c.h.bf16 %v304_v22  ;;  %v618_v8 = vunpack.c.l.bf16 %v305_v10  ;;  %v3379_v43 = vld [vmem:[%s2771_s4 + $0x370] ss:$52 sps:$4 sm:$0xff]  }
  0xae   : > { %v619_v6 = vunpack.c.h.bf16 %v305_v10  ;;  %v1153_v27 = vmul.f32 %v2786_v45, %v610_v40  ;;  %v1615_v60 = vadd.f32 %v1614_v26, %v1169_v3  ;;  %v1154_v1 = vmul.f32 %v2788_v46, %v611_v56  ;;  %v325_v56 = vld [vmem:[%s2771_s4 + $0x394] sm:$0xff] }
  0xaf   : > { %v1575_v38 = vadd.f32 %v1574_v25, %v3296_v5  ;;  %v1155_v16 = vmul.f32 %v2790_v47, %v612_v35  ;;  %v1156_v55 = vmul.f32 %v2792_v48, %v613_v53  ;;  %v1157_v39 = vmul.f32 %v2794_v49, %v614_v2  ;;  %v326_v2 = vld [vmem:[%s2771_s4 + $0x39c] sm:$0xff] }
  0xb0   : > { %v1158_v28 = vmul.f32 %v2796_v50, %v615_v33  ;;  %v1163_v36 = vmul.f32 %v2806_v58, %v620_v31  ;;  %v1616_v62 = vadd.f32 %v1615_v60, %v1170_v14  ;;  %v3363_v5 = vmul.f32 %v2798_v51, %v616_v20 }
  0xb1   : > { %v1576_v4 = vadd.f32 %v1575_v38, %v3305_v11  ;;  %v1596_v3 = vadd.f32 %v1152_v7, %v1151_v30  ;;  %v3368_v24 = vmul.f32 %v2800_v54, %v617_v12  ;;  %v3371_v15 = vmul.f32 %v2804_v57, %v618_v8 }
  0xb2   : > { %v647_v29 = vunpack.c.l.bf16 %v321_v17  ;;  %v648_v19 = vunpack.c.h.bf16 %v321_v17  ;;  %v1617_v14 = vadd.f32 %v1616_v62, %v1171_v0  ;;  %v3376_v18 = vmul.f32 %v2810_v61, %v619_v6 }
  0xb3   : > { %v1578_v11 = vadd.f32 %v3308_v13, %v1576_v4  ;;  %v1597_v22 = vadd.f32 %v1596_v3, %v1153_v27  ;;  %v3382_v40 = vsel %vm1396_vm0, %v1163_v36, 0.0  ;;  %v649_v9 = vunpack.c.l.bf16 %v322_v37 }
  0xb4   : > { %v650_v23 = vunpack.c.h.bf16 %v322_v37  ;;  %v651_v10 = vunpack.c.l.bf16 %v323_v21  ;;  %v1618_v35 = vadd.f32 %v1617_v14, %v3328_v32  ;;  %v652_v13 = vunpack.c.h.bf16 %v323_v21  ;;  %v315_v21 = vld [vmem:[%s2771_s4 + $0x348] sm:$0xff] }
  0xb5   : > { %1579 = vadd.xlane.f32.xlu0 %v1578_v11  ;;  %v1598_v53 = vadd.f32 %v1597_v22, %v1154_v1  ;;  %v653_v0 = vunpack.c.l.bf16 %v324_v52  ;;  %v654_v33 = vunpack.c.h.bf16 %v324_v52  ;;  %v659_v20 = vunpack.c.h.bf16 %v3379_v43  ;;  %v316_v52 = vld [vmem:[%s2771_s4 + $0x350] sm:$0xff]  ;;  %v317_v11 = vld [vmem:[%s2771_s4 + $0x358] sm:$0xff] }
  0xb6   : > { %v1190_v31 = vmul.f32 %v2779_v41, %v647_v29  ;;  %v1191_v25 = vmul.f32 %v2781_v42, %v648_v19  ;;  %v1619_v26 = vadd.f32 %v1618_v35, %v3331_v34  ;;  %v655_v7 = vunpack.c.l.bf16 %v325_v56  ;;  %v314_v34 = vld [vmem:[%s2771_s4 + $0x340] sm:$0xff]  ;;  %v319_v35 = vld [vmem:[%s2771_s4 + $0x368] sm:$0xff] }
  0xb7   : > { %v1599_v30 = vadd.f32 %v1598_v53, %v1155_v16  ;;  %v656_v12 = vunpack.c.h.bf16 %v325_v56  ;;  %v657_v8 = vunpack.c.l.bf16 %v326_v2  ;;  %v658_v6 = vunpack.c.h.bf16 %v326_v2 }
  0xb8   : > { %v1192_v32 = vmul.f32 %v2786_v45, %v649_v9  ;;  %v1193_v27 = vmul.f32 %v2788_v46, %v650_v23  ;;  %v1620_v38 = vadd.f32 %v1619_v26, %v3334_v63  ;;  %v1194_v1 = vmul.f32 %v2790_v47, %v651_v10  ;;  %v318_v10 = vld [vmem:[%s2771_s4 + $0x360] sm:$0xff] }
  0xb9   : > { %v1600_v60 = vadd.f32 %v1599_v30, %v1156_v55  ;;  %v1195_v17 = vmul.f32 %v2792_v48, %v652_v13  ;;  %v1196_v16 = vmul.f32 %v2794_v49, %v653_v0  ;;  %v1197_v36 = vmul.f32 %v2796_v50, %v654_v33 }
  0xba   : > { %v1202_v4 = vmul.f32 %v2806_v58, %v659_v20  ;;  %v1641_v62 = vadd.f32 %v1191_v25, %v1190_v31  ;;  %v1621_v3 = vadd.f32 %v1620_v38, %v3341_v44  ;;  %v1198_v63 = vmul.f32 %v2798_v51, %v655_v7 }
  0xbb   : > { %v1601_v37 = vadd.f32 %v1600_v60, %v1157_v39  ;;  %v3403_v55 = vmul.f32 %v2800_v54, %v656_v12  ;;  %v3408_v29 = vmul.f32 %v2804_v57, %v657_v8  ;;  %v634_v14 = vunpack.c.l.bf16 %v314_v34 }
  0xbc   : > { %v1642_v19 = vadd.f32 %v1641_v62, %v1192_v32  ;;  %v635_v22 = vunpack.c.h.bf16 %v314_v34  ;;  %v1623_v56 = vadd.f32 %v3344_v59, %v1621_v3  ;;  %v3413_v39 = vmul.f32 %v2810_v61, %v658_v6  ;;  %v336_v3 = vld [vmem:[%s2771_s4 + $0x3e4] sm:$0xff] }
  0xbd   : > { %v1602_v44 = vadd.f32 %v1601_v37, %v1158_v28  ;;  %v3416_v9 = vsel %vm1396_vm0, %v1202_v4, 0.0  ;;  %v636_v53 = vunpack.c.l.bf16 %v315_v21  ;;  %v637_v2 = vunpack.c.h.bf16 %v315_v21 }
  0xbe   : > { %v1643_v23 = vadd.f32 %v1642_v19, %v1193_v27  ;;  %v638_v13 = vunpack.c.l.bf16 %v316_v52  ;;  %1624 = vadd.xlane.f32.xlu1 %v1623_v56  ;;  %v639_v33 = vunpack.c.h.bf16 %v316_v52  ;;  %v640_v20 = vunpack.c.l.bf16 %v317_v11 }
  0xbf   : > { %v1603_v0 = vadd.f32 %v1602_v44, %v3363_v5  ;;  %v641_v31 = vunpack.c.h.bf16 %v317_v11  ;;  %v646_v28 = vunpack.c.l.bf16 %v3379_v43  ;;  %v1177_v25 = vmul.f32 %v2779_v41, %v634_v14  ;;  %v338_v14 = vld [vmem:[%s2771_s4 + $0x3f4] sm:$0xff] }
  0xc0   : > { %v1644_v59 = vadd.f32 %v1643_v23, %v1194_v1  ;;  %v1178_v26 = vmul.f32 %v2781_v42, %v635_v22  ;;  %v642_v7 = vunpack.c.l.bf16 %v318_v10  ;;  %v643_v12 = vunpack.c.h.bf16 %v318_v10  ;;  %v335_v1 = vld [vmem:[%s2771_s4 + $0x3dc] sm:$0xff]  ;;  %v3448_v22 = vld [vmem:[%s2771_s4 + $0x3d8] ss:$52 sps:$4 sm:$0xff]  }
  0xc1   : > { %v1604_v30 = vadd.f32 %v1603_v0, %v3368_v24  ;;  %v644_v8 = vunpack.c.l.bf16 %v319_v35  ;;  %v645_v32 = vunpack.c.h.bf16 %v319_v35  ;;  %v1179_v5 = vmul.f32 %v2786_v45, %v636_v53  ;;  %v340_v0 = vld [vmem:[%s2771_s4 + $0x404] sm:$0xff] }
  0xc2   : > { %v1645_v6 = vadd.f32 %v1644_v59, %v1195_v17  ;;  %v1180_v27 = vmul.f32 %v2788_v46, %v637_v2  ;;  %v1181_v43 = vmul.f32 %v2790_v47, %v638_v13  ;;  %v1182_v60 = vmul.f32 %v2792_v48, %v639_v33  ;;  %v339_v13 = vld [vmem:[%s2771_s4 + $0x3fc] sm:$0xff] }
  0xc3   : > { %v1605_v38 = vadd.f32 %v1604_v30, %v3371_v15  ;;  %v1183_v24 = vmul.f32 %v2794_v49, %v640_v20  ;;  %v1184_v17 = vmul.f32 %v2796_v50, %v641_v31  ;;  %v1189_v4 = vmul.f32 %v2806_v58, %v646_v28 }
  0xc4   : > { %v1646_v34 = vadd.f32 %v1645_v6, %v1196_v16  ;;  %v1626_v62 = vadd.f32 %v1178_v26, %v1177_v25  ;;  %v3437_v15 = vmul.f32 %v2798_v51, %v642_v7  ;;  %v3440_v21 = vmul.f32 %v2800_v54, %v643_v12  ;;  %v337_v16 = vld [vmem:[%s2771_s4 + $0x3ec] sm:$0xff] }
  0xc5   : > { %v1606_v37 = vadd.f32 %v1605_v38, %v3376_v18  ;;  %v3443_v52 = vmul.f32 %v2804_v57, %v644_v8  ;;  %v673_v56 = vunpack.c.l.bf16 %v335_v1  ;;  %v674_v44 = vunpack.c.h.bf16 %v335_v1  ;;  %v328_v38 = vld [vmem:[%s2771_s4 + $0x3a8] sm:$0xff] }
  0xc6   : > { %v1647_v19 = vadd.f32 %v1646_v34, %v1197_v36  ;;  %v1627_v11 = vadd.f32 %v1626_v62, %v1179_v5  ;;  %v3452_v23 = vmul.f32 %v2810_v61, %v645_v32  ;;  %v3455_v10 = vsel %vm1396_vm0, %v1189_v4, 0.0 }
  0xc7   : > { %v1608_v18 = vadd.f32 %v3382_v40, %v1606_v37  ;;  %v675_v35 = vunpack.c.l.bf16 %v336_v3  ;;  %v676_v36 = vunpack.c.h.bf16 %v336_v3  ;;  %v677_v33 = vunpack.c.l.bf16 %v337_v16  ;;  %v329_v3 = vld [vmem:[%s2771_s4 + $0x3b0] sm:$0xff] }
  0xc8   : > { %v1648_v53 = vadd.f32 %v1647_v19, %v1198_v63  ;;  %v1628_v2 = vadd.f32 %v1627_v11, %v1180_v27  ;;  %v678_v20 = vunpack.c.h.bf16 %v337_v16  ;;  %v679_v31 = vunpack.c.l.bf16 %v338_v14  ;;  %v330_v11 = vld [vmem:[%s2771_s4 + $0x3b8] sm:$0xff] }
  0xc9   : > { %1609 = vadd.xlane.f32.xlu0 %v1608_v18  ;;  %v680_v59 = vunpack.c.h.bf16 %v338_v14  ;;  %v685_v40 = vunpack.c.h.bf16 %v3448_v22  ;;  %v1216_v26 = vmul.f32 %v2779_v41, %v673_v56  ;;  %v1217_v30 = vmul.f32 %v2781_v42, %v674_v44  ;;  %v331_v44 = vld [vmem:[%s2771_s4 + $0x3c0] sm:$0xff]  ;;  %v332_v18 = vld [vmem:[%s2771_s4 + $0x3c8] sm:$0xff] }
  0xca   : > { %v1649_v28 = vadd.f32 %v1648_v53, %v3403_v55  ;;  %v1629_v25 = vadd.f32 %v1628_v2, %v1181_v43  ;;  %v681_v63 = vunpack.c.l.bf16 %v339_v13  ;;  %v682_v7 = vunpack.c.h.bf16 %v339_v13 }
  0xcb   : > { %v683_v12 = vunpack.c.l.bf16 %v340_v0  ;;  %v684_v8 = vunpack.c.h.bf16 %v340_v0  ;;  %v1218_v5 = vmul.f32 %v2786_v45, %v675_v35  ;;  %v1219_v27 = vmul.f32 %v2788_v46, %v676_v36 }
  0xcc   : > { %v1650_v6 = vadd.f32 %v1649_v28, %v3408_v29  ;;  %v1630_v32 = vadd.f32 %v1629_v25, %v1182_v60  ;;  %v1220_v55 = vmul.f32 %v2790_v47, %v677_v33  ;;  %v1221_v43 = vmul.f32 %v2792_v48, %v678_v20  ;;  %v333_v20 = vld [vmem:[%s2771_s4 + $0x3d0] sm:$0xff] }
  0xcd   : > { %v1222_v1 = vmul.f32 %v2794_v49, %v679_v31  ;;  %v1223_v34 = vmul.f32 %v2796_v50, %v680_v59  ;;  %v1228_v60 = vmul.f32 %v2806_v58, %v685_v40  ;;  %v1671_v62 = vadd.f32 %v1217_v30, %v1216_v26 }
  0xce   : > { %v1651_v4 = vadd.f32 %v1650_v6, %v3413_v39  ;;  %v1631_v29 = vadd.f32 %v1630_v32, %v1183_v24  ;;  %v3475_v37 = vmul.f32 %v2798_v51, %v681_v63  ;;  %v3478_v16 = vmul.f32 %v2800_v54, %v682_v7 }
  0xcf   : > { %v3481_v19 = vmul.f32 %v2804_v57, %v683_v12  ;;  %v660_v14 = vunpack.c.l.bf16 %v328_v38  ;;  %v1672_v24 = vadd.f32 %v1671_v62, %v1218_v5  ;;  %v661_v35 = vunpack.c.h.bf16 %v328_v38  ;;  %v349_v5 = vld [vmem:[%s2771_s4 + $0x444] sm:$0xff]  ;;  %v350_v62 = vld [vmem:[%s2771_s4 + $0x44c] sm:$0xff] }
  0xd0   : > { %v1653_v56 = vadd.f32 %v3416_v9, %v1651_v4  ;;  %v1632_v39 = vadd.f32 %v1631_v29, %v1184_v17  ;;  %v3488_v53 = vmul.f32 %v2810_v61, %v684_v8  ;;  %v3491_v2 = vsel %vm1396_vm0, %v1228_v60, 0.0 }
  0xd1   : > { %v662_v13 = vunpack.c.l.bf16 %v329_v3  ;;  %v663_v0 = vunpack.c.h.bf16 %v329_v3  ;;  %v1673_v33 = vadd.f32 %v1672_v24, %v1219_v27  ;;  %v664_v31 = vunpack.c.l.bf16 %v330_v11  ;;  %v351_v3 = vld [vmem:[%s2771_s4 + $0x454] sm:$0xff] }
  0xd2   : > { %1654 = vadd.xlane.f32.xlu1 %v1653_v56  ;;  %v1633_v36 = vadd.f32 %v1632_v39, %v3437_v15  ;;  %v665_v9 = vunpack.c.h.bf16 %v330_v11  ;;  %v666_v17 = vunpack.c.l.bf16 %v331_v44  ;;  %v667_v59 = vunpack.c.h.bf16 %v331_v44  ;;  %v352_v56 = vld [vmem:[%s2771_s4 + $0x45c] sm:$0xff] }
  0xd3   : > { %v668_v40 = vunpack.c.l.bf16 %v332_v18  ;;  %v672_v28 = vunpack.c.l.bf16 %v3448_v22  ;;  %v1674_v26 = vadd.f32 %v1673_v33, %v1220_v55  ;;  %v1203_v30 = vmul.f32 %v2779_v41, %v660_v14 }
  0xd4   : > { %v1634_v25 = vadd.f32 %v1633_v36, %v3440_v21  ;;  %v1204_v63 = vmul.f32 %v2781_v42, %v661_v35  ;;  %v669_v7 = vunpack.c.h.bf16 %v332_v18  ;;  %v670_v12 = vunpack.c.l.bf16 %v333_v20  ;;  %v3526_v35 = vld [vmem:[%s2771_s4 + $0x440] ss:$52 sps:$4 sm:$0xff]  }
  0xd5   : > { %v671_v15 = vunpack.c.h.bf16 %v333_v20  ;;  %v1205_v8 = vmul.f32 %v2786_v45, %v662_v13  ;;  %v1675_v32 = vadd.f32 %v1674_v26, %v1221_v43  ;;  %v1206_v22 = vmul.f32 %v2788_v46, %v663_v0  ;;  %v353_v0 = vld [vmem:[%s2771_s4 + $0x464] sm:$0xff] }
  0xd6   : > { %v1635_v6 = vadd.f32 %v1634_v25, %v3443_v52  ;;  %v1207_v21 = vmul.f32 %v2790_v47, %v664_v31  ;;  %v1208_v27 = vmul.f32 %v2792_v48, %v665_v9  ;;  %v1209_v38 = vmul.f32 %v2794_v49, %v666_v17  ;;  %v354_v17 = vld [vmem:[%s2771_s4 + $0x46c] sm:$0xff] }
  0xd7   : > { %v1210_v55 = vmul.f32 %v2796_v50, %v667_v59  ;;  %v1215_v4 = vmul.f32 %v2806_v58, %v672_v28  ;;  %v1676_v60 = vadd.f32 %v1675_v32, %v1222_v1  ;;  %v3510_v52 = vmul.f32 %v2798_v51, %v668_v40 }
  0xd8   : > { %v1636_v29 = vadd.f32 %v1635_v6, %v3452_v23  ;;  %v1656_v43 = vadd.f32 %v1204_v63, %v1203_v30  ;;  %v3515_v11 = vmul.f32 %v2800_v54, %v669_v7  ;;  %v3518_v14 = vmul.f32 %v2804_v57, %v670_v12 }
  0xd9   : > { %v699_v39 = vunpack.c.l.bf16 %v349_v5  ;;  %v700_v24 = vunpack.c.h.bf16 %v349_v5  ;;  %v1677_v1 = vadd.f32 %v1676_v60, %v1223_v34  ;;  %v3523_v44 = vmul.f32 %v2810_v61, %v671_v15 }
  0xda   : > { %v1638_v23 = vadd.f32 %v3455_v10, %v1636_v29  ;;  %v1657_v18 = vadd.f32 %v1656_v43, %v1205_v8  ;;  %v3529_v13 = vsel %vm1396_vm0, %v1215_v4, 0.0  ;;  %v701_v36 = vunpack.c.l.bf16 %v350_v62 }
  0xdb   : > { %v702_v33 = vunpack.c.h.bf16 %v350_v62  ;;  %v703_v20 = vunpack.c.l.bf16 %v351_v3  ;;  %v1678_v31 = vadd.f32 %v1677_v1, %v3475_v37  ;;  %v704_v10 = vunpack.c.h.bf16 %v351_v3  ;;  %v343_v3 = vld [vmem:[%s2771_s4 + $0x418] sm:$0xff] }
  0xdc   : > { %1639 = vadd.xlane.f32.xlu0 %v1638_v23  ;;  %v1658_v9 = vadd.f32 %v1657_v18, %v1206_v22  ;;  %v705_v34 = vunpack.c.l.bf16 %v352_v56  ;;  %v706_v59 = vunpack.c.h.bf16 %v352_v56  ;;  %v711_v40 = vunpack.c.h.bf16 %v3526_v35  ;;  %v344_v56 = vld [vmem:[%s2771_s4 + $0x420] sm:$0xff]  ;;  %v345_v23 = vld [vmem:[%s2771_s4 + $0x428] sm:$0xff] }
  0xdd   : > { %v1242_v28 = vmul.f32 %v2779_v41, %v699_v39  ;;  %v1243_v25 = vmul.f32 %v2781_v42, %v700_v24  ;;  %v1679_v26 = vadd.f32 %v1678_v31, %v3478_v16  ;;  %v707_v63 = vunpack.c.l.bf16 %v353_v0  ;;  %v342_v16 = vld [vmem:[%s2771_s4 + $0x410] sm:$0xff]  ;;  %v347_v31 = vld [vmem:[%s2771_s4 + $0x438] sm:$0xff] }
  0xde   : > { %v1659_v30 = vadd.f32 %v1658_v9, %v1207_v21  ;;  %v708_v7 = vunpack.c.h.bf16 %v353_v0  ;;  %v709_v12 = vunpack.c.l.bf16 %v354_v17  ;;  %v710_v15 = vunpack.c.h.bf16 %v354_v17 }
  0xdf   : > { %v1244_v37 = vmul.f32 %v2786_v45, %v701_v36  ;;  %v1245_v8 = vmul.f32 %v2788_v46, %v702_v33  ;;  %v1680_v6 = vadd.f32 %v1679_v26, %v3481_v19  ;;  %v1246_v22 = vmul.f32 %v2790_v47, %v703_v20  ;;  %v346_v20 = vld [vmem:[%s2771_s4 + $0x430] sm:$0xff] }
  0xe0   : > { %v1660_v32 = vadd.f32 %v1659_v30, %v1208_v27  ;;  %v1247_v5 = vmul.f32 %v2792_v48, %v704_v10  ;;  %v1248_v21 = vmul.f32 %v2794_v49, %v705_v34  ;;  %v1249_v4 = vmul.f32 %v2796_v50, %v706_v59 }
  0xe1   : > { %v1254_v29 = vmul.f32 %v2806_v58, %v711_v40  ;;  %v1701_v60 = vadd.f32 %v1243_v25, %v1242_v28  ;;  %v1681_v43 = vadd.f32 %v1680_v6, %v3488_v53  ;;  %v1250_v19 = vmul.f32 %v2798_v51, %v707_v63 }
  0xe2   : > { %v1661_v62 = vadd.f32 %v1660_v32, %v1209_v38  ;;  %v3550_v27 = vmul.f32 %v2800_v54, %v708_v7  ;;  %v3555_v39 = vmul.f32 %v2804_v57, %v709_v12  ;;  %v686_v1 = vunpack.c.l.bf16 %v342_v16 }
  0xe3   : > { %v1702_v24 = vadd.f32 %v1701_v60, %v1244_v37  ;;  %v687_v18 = vunpack.c.h.bf16 %v342_v16  ;;  %v1683_v0 = vadd.f32 %v3491_v2, %v1681_v43  ;;  %v3560_v38 = vmul.f32 %v2810_v61, %v710_v15  ;;  %v364_v43 = vld [vmem:[%s2771_s4 + $0x4b4] sm:$0xff] }
  0xe4   : > { %v1662_v53 = vadd.f32 %v1661_v62, %v1210_v55  ;;  %v3563_v36 = vsel %vm1396_vm0, %v1254_v29, 0.0  ;;  %v688_v9 = vunpack.c.l.bf16 %v343_v3  ;;  %v689_v17 = vunpack.c.h.bf16 %v343_v3 }
  0xe5   : > { %v1703_v33 = vadd.f32 %v1702_v24, %v1245_v8  ;;  %v690_v10 = vunpack.c.l.bf16 %v344_v56  ;;  %1684 = vadd.xlane.f32.xlu1 %v1683_v0  ;;  %v691_v59 = vunpack.c.h.bf16 %v344_v56  ;;  %v692_v40 = vunpack.c.l.bf16 %v345_v23 }
  0xe6   : > { %v1663_v34 = vadd.f32 %v1662_v53, %v3510_v52  ;;  %v693_v28 = vunpack.c.h.bf16 %v345_v23  ;;  %v698_v55 = vunpack.c.l.bf16 %v3526_v35  ;;  %v1229_v25 = vmul.f32 %v2779_v41, %v686_v1  ;;  %v366_v1 = vld [vmem:[%s2771_s4 + $0x4c4] sm:$0xff] }
  0xe7   : > { %v1704_v2 = vadd.f32 %v1703_v33, %v1246_v22  ;;  %v1230_v26 = vmul.f32 %v2781_v42, %v687_v18  ;;  %v694_v63 = vunpack.c.l.bf16 %v346_v20  ;;  %v695_v7 = vunpack.c.h.bf16 %v346_v20  ;;  %v363_v22 = vld [vmem:[%s2771_s4 + $0x4ac] sm:$0xff]  ;;  %v3595_v18 = vld [vmem:[%s2771_s4 + $0x4a8] ss:$52 sps:$4 sm:$0xff]  }
  0xe8   : > { %v1664_v30 = vadd.f32 %v1663_v34, %v3515_v11  ;;  %v696_v12 = vunpack.c.l.bf16 %v347_v31  ;;  %v697_v37 = vunpack.c.h.bf16 %v347_v31  ;;  %v1231_v52 = vmul.f32 %v2786_v45, %v688_v9  ;;  %v368_v34 = vld [vmem:[%s2771_s4 + $0x4d4] sm:$0xff] }
  0xe9   : > { %v1705_v15 = vadd.f32 %v1704_v2, %v1247_v5  ;;  %v1232_v8 = vmul.f32 %v2788_v46, %v689_v17  ;;  %v1233_v35 = vmul.f32 %v2790_v47, %v690_v10  ;;  %v1234_v32 = vmul.f32 %v2792_v48, %v691_v59  ;;  %v367_v10 = vld [vmem:[%s2771_s4 + $0x4cc] sm:$0xff] }
  0xea   : > { %v1665_v6 = vadd.f32 %v1664_v30, %v3518_v14  ;;  %v1235_v11 = vmul.f32 %v2794_v49, %v692_v40  ;;  %v1236_v5 = vmul.f32 %v2796_v50, %v693_v28  ;;  %v1241_v29 = vmul.f32 %v2806_v58, %v698_v55 }
  0xeb   : > { %v1706_v16 = vadd.f32 %v1705_v15, %v1248_v21  ;;  %v1686_v60 = vadd.f32 %v1230_v26, %v1229_v25  ;;  %v3584_v14 = vmul.f32 %v2798_v51, %v694_v63  ;;  %v3587_v3 = vmul.f32 %v2800_v54, %v695_v7  ;;  %v365_v21 = vld [vmem:[%s2771_s4 + $0x4bc] sm:$0xff] }
  0xec   : > { %v1666_v62 = vadd.f32 %v1665_v6, %v3523_v44  ;;  %v3590_v56 = vmul.f32 %v2804_v57, %v696_v12  ;;  %v725_v0 = vunpack.c.l.bf16 %v363_v22  ;;  %v726_v53 = vunpack.c.h.bf16 %v363_v22  ;;  %v356_v6 = vld [vmem:[%s2771_s4 + $0x478] sm:$0xff] }
  0xed   : > { %v1707_v24 = vadd.f32 %v1706_v16, %v1249_v4  ;;  %v1687_v23 = vadd.f32 %v1686_v60, %v1231_v52  ;;  %v3599_v33 = vmul.f32 %v2810_v61, %v697_v37  ;;  %v3602_v20 = vsel %vm1396_vm0, %v1241_v29, 0.0 }
  0xee   : > { %v1668_v44 = vadd.f32 %v3529_v13, %v1666_v62  ;;  %v727_v31 = vunpack.c.l.bf16 %v364_v43  ;;  %v728_v4 = vunpack.c.h.bf16 %v364_v43  ;;  %v729_v59 = vunpack.c.l.bf16 %v365_v21  ;;  %v357_v43 = vld [vmem:[%s2771_s4 + $0x480] sm:$0xff] }
  0xef   : > { %v1708_v9 = vadd.f32 %v1707_v24, %v1250_v19  ;;  %v1688_v17 = vadd.f32 %v1687_v23, %v1232_v8  ;;  %v730_v40 = vunpack.c.h.bf16 %v365_v21  ;;  %v731_v28 = vunpack.c.l.bf16 %v366_v1  ;;  %v358_v23 = vld [vmem:[%s2771_s4 + $0x488] sm:$0xff] }
  0xf0   : > { %1669 = vadd.xlane.f32.xlu0 %v1668_v44  ;;  %v732_v2 = vunpack.c.h.bf16 %v366_v1  ;;  %v737_v13 = vunpack.c.h.bf16 %v3595_v18  ;;  %v1268_v26 = vmul.f32 %v2779_v41, %v725_v0  ;;  %v1269_v30 = vmul.f32 %v2781_v42, %v726_v53  ;;  %v359_v53 = vld [vmem:[%s2771_s4 + $0x490] sm:$0xff]  ;;  %v360_v44 = vld [vmem:[%s2771_s4 + $0x498] sm:$0xff] }
  0xf1   : > { %v1709_v55 = vadd.f32 %v1708_v9, %v3550_v27  ;;  %v1689_v25 = vadd.f32 %v1688_v17, %v1233_v35  ;;  %v733_v19 = vunpack.c.l.bf16 %v367_v10  ;;  %v734_v63 = vunpack.c.h.bf16 %v367_v10 }
  0xf2   : > { %v735_v7 = vunpack.c.l.bf16 %v368_v34  ;;  %v736_v12 = vunpack.c.h.bf16 %v368_v34  ;;  %v1270_v52 = vmul.f32 %v2786_v45, %v727_v31  ;;  %v1271_v8 = vmul.f32 %v2788_v46, %v728_v4 }
  0xf3   : > { %v1710_v15 = vadd.f32 %v1709_v55, %v3555_v39  ;;  %v1690_v37 = vadd.f32 %v1689_v25, %v1234_v32  ;;  %v1272_v27 = vmul.f32 %v2790_v47, %v729_v59  ;;  %v1273_v35 = vmul.f32 %v2792_v48, %v730_v40  ;;  %v361_v40 = vld [vmem:[%s2771_s4 + $0x4a0] sm:$0xff] }
  0xf4   : > { %v1274_v22 = vmul.f32 %v2794_v49, %v731_v28  ;;  %v1275_v16 = vmul.f32 %v2796_v50, %v732_v2  ;;  %v1280_v32 = vmul.f32 %v2806_v58, %v737_v13  ;;  %v1731_v60 = vadd.f32 %v1269_v30, %v1268_v26 }
  0xf5   : > { %v1711_v29 = vadd.f32 %v1710_v15, %v3560_v38  ;;  %v1691_v39 = vadd.f32 %v1690_v37, %v1235_v11  ;;  %v3622_v62 = vmul.f32 %v2798_v51, %v733_v19  ;;  %v3625_v21 = vmul.f32 %v2800_v54, %v734_v63 }
  0xf6   : > { %v3628_v24 = vmul.f32 %v2804_v57, %v735_v7  ;;  %v712_v1 = vunpack.c.l.bf16 %v356_v6  ;;  %v1732_v11 = vadd.f32 %v1731_v60, %v1270_v52  ;;  %v713_v31 = vunpack.c.h.bf16 %v356_v6  ;;  %v377_v52 = vld [vmem:[%s2771_s4 + $0x514] sm:$0xff]  ;;  %v378_v60 = vld [vmem:[%s2771_s4 + $0x51c] sm:$0xff] }
  0xf7   : > { %v1713_v0 = vadd.f32 %v3563_v36, %v1711_v29  ;;  %v1692_v38 = vadd.f32 %v1691_v39, %v1236_v5  ;;  %v3635_v9 = vmul.f32 %v2810_v61, %v736_v12  ;;  %v3638_v17 = vsel %vm1396_vm0, %v1280_v32, 0.0 }
  0xf8   : > { %v714_v10 = vunpack.c.l.bf16 %v357_v43  ;;  %v715_v34 = vunpack.c.h.bf16 %v357_v43  ;;  %v1733_v59 = vadd.f32 %v1732_v11, %v1271_v8  ;;  %v716_v28 = vunpack.c.l.bf16 %v358_v23  ;;  %v379_v43 = vld [vmem:[%s2771_s4 + $0x524] sm:$0xff] }
  0xf9   : > { %1714 = vadd.xlane.f32.xlu1 %v1713_v0  ;;  %v1693_v4 = vadd.f32 %v1692_v38, %v3584_v14  ;;  %v717_v36 = vunpack.c.h.bf16 %v358_v23  ;;  %v718_v5 = vunpack.c.l.bf16 %v359_v53  ;;  %v719_v2 = vunpack.c.h.bf16 %v359_v53  ;;  %v380_v0 = vld [vmem:[%s2771_s4 + $0x52c] sm:$0xff] }
  0xfa   : > { %v720_v13 = vunpack.c.l.bf16 %v360_v44  ;;  %v724_v55 = vunpack.c.l.bf16 %v3595_v18  ;;  %v1734_v26 = vadd.f32 %v1733_v59, %v1272_v27  ;;  %v1255_v30 = vmul.f32 %v2779_v41, %v712_v1 }
  0xfb   : > { %v1694_v25 = vadd.f32 %v1693_v4, %v3587_v3  ;;  %v1256_v19 = vmul.f32 %v2781_v42, %v713_v31  ;;  %v721_v63 = vunpack.c.h.bf16 %v360_v44  ;;  %v722_v7 = vunpack.c.l.bf16 %v361_v40  ;;  %v3673_v31 = vld [vmem:[%s2771_s4 + $0x510] ss:$52 sps:$4 sm:$0xff]  }
  0xfc   : > { %v723_v14 = vunpack.c.h.bf16 %v361_v40  ;;  %v1257_v12 = vmul.f32 %v2786_v45, %v714_v10  ;;  %v1735_v37 = vadd.f32 %v1734_v26, %v1273_v35  ;;  %v1258_v18 = vmul.f32 %v2788_v46, %v715_v34  ;;  %v381_v34 = vld [vmem:[%s2771_s4 + $0x534] sm:$0xff] }
  0xfd   : > { %v1695_v15 = vadd.f32 %v1694_v25, %v3590_v56  ;;  %v1259_v3 = vmul.f32 %v2790_v47, %v716_v28  ;;  %v1260_v8 = vmul.f32 %v2792_v48, %v717_v36  ;;  %v1261_v6 = vmul.f32 %v2794_v49, %v718_v5  ;;  %v382_v5 = vld [vmem:[%s2771_s4 + $0x53c] sm:$0xff] }
  0xfe   : > { %v1262_v27 = vmul.f32 %v2796_v50, %v719_v2  ;;  %v1267_v29 = vmul.f32 %v2806_v58, %v724_v55  ;;  %v1736_v32 = vadd.f32 %v1735_v37, %v1274_v22  ;;  %v3657_v56 = vmul.f32 %v2798_v51, %v720_v13 }
  0xff   : > { %v1696_v39 = vadd.f32 %v1695_v15, %v3599_v33  ;;  %v1716_v35 = vadd.f32 %v1256_v19, %v1255_v30  ;;  %v3662_v23 = vmul.f32 %v2800_v54, %v721_v63  ;;  %v3665_v1 = vmul.f32 %v2804_v57, %v722_v7 }
 0x100   : > { %v751_v38 = vunpack.c.l.bf16 %v377_v52  ;;  %v752_v11 = vunpack.c.h.bf16 %v377_v52  ;;  %v1737_v22 = vadd.f32 %v1736_v32, %v1275_v16  ;;  %v3670_v53 = vmul.f32 %v2810_v61, %v723_v14 }
 0x101   : > { %v1698_v33 = vadd.f32 %v3602_v20, %v1696_v39  ;;  %v1717_v44 = vadd.f32 %v1716_v35, %v1257_v12  ;;  %v3676_v10 = vsel %vm1396_vm0, %v1267_v29, 0.0  ;;  %v753_v4 = vunpack.c.l.bf16 %v378_v60 }
 0x102   : > { %v754_v59 = vunpack.c.h.bf16 %v378_v60  ;;  %v755_v40 = vunpack.c.l.bf16 %v379_v43  ;;  %v1738_v28 = vadd.f32 %v1737_v22, %v3622_v62  ;;  %v756_v20 = vunpack.c.h.bf16 %v379_v43  ;;  %v371_v43 = vld [vmem:[%s2771_s4 + $0x4e8] sm:$0xff] }
 0x103   : > { %1699 = vadd.xlane.f32.xlu0 %v1698_v33  ;;  %v1718_v36 = vadd.f32 %v1717_v44, %v1258_v18  ;;  %v757_v16 = vunpack.c.l.bf16 %v380_v0  ;;  %v758_v2 = vunpack.c.h.bf16 %v380_v0  ;;  %v763_v13 = vunpack.c.h.bf16 %v3673_v31  ;;  %v372_v0 = vld [vmem:[%s2771_s4 + $0x4f0] sm:$0xff]  ;;  %v373_v33 = vld [vmem:[%s2771_s4 + $0x4f8] sm:$0xff] }
 0x104   : > { %v1294_v55 = vmul.f32 %v2779_v41, %v751_v38  ;;  %v1295_v25 = vmul.f32 %v2781_v42, %v752_v11  ;;  %v1739_v26 = vadd.f32 %v1738_v28, %v3625_v21  ;;  %v759_v19 = vunpack.c.l.bf16 %v381_v34  ;;  %v370_v21 = vld [vmem:[%s2771_s4 + $0x4e0] sm:$0xff]  ;;  %v375_v28 = vld [vmem:[%s2771_s4 + $0x508] sm:$0xff] }
 0x105   : > { %v1719_v30 = vadd.f32 %v1718_v36, %v1259_v3  ;;  %v760_v63 = vunpack.c.h.bf16 %v381_v34  ;;  %v761_v7 = vunpack.c.l.bf16 %v382_v5  ;;  %v762_v14 = vunpack.c.h.bf16 %v382_v5 }
 0x106   : > { %v1296_v62 = vmul.f32 %v2786_v45, %v753_v4  ;;  %v1297_v12 = vmul.f32 %v2788_v46, %v754_v59  ;;  %v1740_v15 = vadd.f32 %v1739_v26, %v3628_v24  ;;  %v1298_v18 = vmul.f32 %v2790_v47, %v755_v40  ;;  %v374_v40 = vld [vmem:[%s2771_s4 + $0x500] sm:$0xff] }
 0x107   : > { %v1720_v37 = vadd.f32 %v1719_v30, %v1260_v8  ;;  %v1299_v52 = vmul.f32 %v2792_v48, %v756_v20  ;;  %v1300_v3 = vmul.f32 %v2794_v49, %v757_v16  ;;  %v1301_v29 = vmul.f32 %v2796_v50, %v758_v2 }
 0x108   : > { %v1306_v39 = vmul.f32 %v2806_v58, %v763_v13  ;;  %v1761_v32 = vadd.f32 %v1295_v25, %v1294_v55  ;;  %v1741_v35 = vadd.f32 %v1740_v15, %v3635_v9  ;;  %v1302_v24 = vmul.f32 %v2798_v51, %v759_v19 }
 0x109   : > { %v1721_v60 = vadd.f32 %v1720_v37, %v1261_v6  ;;  %v3697_v8 = vmul.f32 %v2800_v54, %v760_v63  ;;  %v3702_v38 = vmul.f32 %v2804_v57, %v761_v7  ;;  %v738_v22 = vunpack.c.l.bf16 %v370_v21 }
 0x10a   : > { %v1762_v11 = vadd.f32 %v1761_v32, %v1296_v62  ;;  %v739_v44 = vunpack.c.h.bf16 %v370_v21  ;;  %v1743_v34 = vadd.f32 %v3638_v17, %v1741_v35  ;;  %v3707_v6 = vmul.f32 %v2810_v61, %v762_v14  ;;  %v392_v35 = vld [vmem:[%s2771_s4 + $0x584] sm:$0xff] }
 0x10b   : > { %v1722_v9 = vadd.f32 %v1721_v60, %v1262_v27  ;;  %v3710_v4 = vsel %vm1396_vm0, %v1306_v39, 0.0  ;;  %v740_v36 = vunpack.c.l.bf16 %v371_v43  ;;  %v741_v5 = vunpack.c.h.bf16 %v371_v43 }
 0x10c   : > { %v1763_v59 = vadd.f32 %v1762_v11, %v1297_v12  ;;  %v742_v20 = vunpack.c.l.bf16 %v372_v0  ;;  %1744 = vadd.xlane.f32.xlu1 %v1743_v34  ;;  %v743_v2 = vunpack.c.h.bf16 %v372_v0  ;;  %v744_v13 = vunpack.c.l.bf16 %v373_v33 }
 0x10d   : > { %v1723_v16 = vadd.f32 %v1722_v9, %v3657_v56  ;;  %v745_v55 = vunpack.c.h.bf16 %v373_v33  ;;  %v750_v27 = vunpack.c.l.bf16 %v3673_v31  ;;  %v1281_v25 = vmul.f32 %v2779_v41, %v738_v22  ;;  %v394_v22 = vld [vmem:[%s2771_s4 + $0x594] sm:$0xff] }
 0x10e   : > { %v1764_v17 = vadd.f32 %v1763_v59, %v1298_v18  ;;  %v1282_v26 = vmul.f32 %v2781_v42, %v739_v44  ;;  %v746_v19 = vunpack.c.l.bf16 %v374_v40  ;;  %v747_v63 = vunpack.c.h.bf16 %v374_v40  ;;  %v391_v18 = vld [vmem:[%s2771_s4 + $0x57c] sm:$0xff]  ;;  %v3742_v44 = vld [vmem:[%s2771_s4 + $0x578] ss:$52 sps:$4 sm:$0xff]  }
 0x10f   : > { %v1724_v30 = vadd.f32 %v1723_v16, %v3662_v23  ;;  %v748_v7 = vunpack.c.l.bf16 %v375_v28  ;;  %v749_v62 = vunpack.c.h.bf16 %v375_v28  ;;  %v1283_v56 = vmul.f32 %v2786_v45, %v740_v36  ;;  %v396_v16 = vld [vmem:[%s2771_s4 + $0x5a4] sm:$0xff] }
 0x110   : > { %v1765_v14 = vadd.f32 %v1764_v17, %v1299_v52  ;;  %v1284_v12 = vmul.f32 %v2788_v46, %v741_v5  ;;  %v1285_v31 = vmul.f32 %v2790_v47, %v742_v20  ;;  %v1286_v37 = vmul.f32 %v2792_v48, %v743_v2  ;;  %v395_v20 = vld [vmem:[%s2771_s4 + $0x59c] sm:$0xff] }
 0x111   : > { %v1725_v15 = vadd.f32 %v1724_v30, %v3665_v1  ;;  %v1287_v23 = vmul.f32 %v2794_v49, %v744_v13  ;;  %v1288_v52 = vmul.f32 %v2796_v50, %v745_v55  ;;  %v1293_v39 = vmul.f32 %v2806_v58, %v750_v27 }
 0x112   : > { %v1766_v21 = vadd.f32 %v1765_v14, %v1300_v3  ;;  %v1746_v32 = vadd.f32 %v1282_v26, %v1281_v25  ;;  %v3731_v1 = vmul.f32 %v2798_v51, %v746_v19  ;;  %v3734_v43 = vmul.f32 %v2800_v54, %v747_v63  ;;  %v393_v3 = vld [vmem:[%s2771_s4 + $0x58c] sm:$0xff] }
 0x113   : > { %v1726_v60 = vadd.f32 %v1725_v15, %v3670_v53  ;;  %v3737_v0 = vmul.f32 %v2804_v57, %v748_v7  ;;  %v777_v34 = vunpack.c.l.bf16 %v391_v18  ;;  %v778_v9 = vunpack.c.h.bf16 %v391_v18  ;;  %v384_v15 = vld [vmem:[%s2771_s4 + $0x548] sm:$0xff] }
 0x114   : > { %v1767_v11 = vadd.f32 %v1766_v21, %v1301_v29  ;;  %v1747_v33 = vadd.f32 %v1746_v32, %v1283_v56  ;;  %v3746_v59 = vmul.f32 %v2810_v61, %v749_v62  ;;  %v3749_v40 = vsel %vm1396_vm0, %v1293_v39, 0.0 }
 0x115   : > { %v1728_v53 = vadd.f32 %v3676_v10, %v1726_v60  ;;  %v779_v28 = vunpack.c.l.bf16 %v392_v35  ;;  %v780_v29 = vunpack.c.h.bf16 %v392_v35  ;;  %v781_v2 = vunpack.c.l.bf16 %v393_v3  ;;  %v385_v35 = vld [vmem:[%s2771_s4 + $0x550] sm:$0xff] }
 0x116   : > { %v1768_v36 = vadd.f32 %v1767_v11, %v1302_v24  ;;  %v1748_v5 = vadd.f32 %v1747_v33, %v1284_v12  ;;  %v782_v13 = vunpack.c.h.bf16 %v393_v3  ;;  %v783_v55 = vunpack.c.l.bf16 %v394_v22  ;;  %v386_v33 = vld [vmem:[%s2771_s4 + $0x558] sm:$0xff] }
 0x117   : > { %1729 = vadd.xlane.f32.xlu0 %v1728_v53  ;;  %v784_v17 = vunpack.c.h.bf16 %v394_v22  ;;  %v789_v10 = vunpack.c.h.bf16 %v3742_v44  ;;  %v1320_v26 = vmul.f32 %v2779_v41, %v777_v34  ;;  %v1321_v30 = vmul.f32 %v2781_v42, %v778_v9  ;;  %v387_v9 = vld [vmem:[%s2771_s4 + $0x560] sm:$0xff]  ;;  %v388_v53 = vld [vmem:[%s2771_s4 + $0x568] sm:$0xff] }
 0x118   : > { %v1769_v27 = vadd.f32 %v1768_v36, %v3697_v8  ;;  %v1749_v25 = vadd.f32 %v1748_v5, %v1285_v31  ;;  %v785_v24 = vunpack.c.l.bf16 %v395_v20  ;;  %v786_v19 = vunpack.c.h.bf16 %v395_v20 }
 0x119   : > { %v787_v63 = vunpack.c.l.bf16 %v396_v16  ;;  %v788_v7 = vunpack.c.h.bf16 %v396_v16  ;;  %v1322_v56 = vmul.f32 %v2786_v45, %v779_v28  ;;  %v1323_v12 = vmul.f32 %v2788_v46, %v780_v29 }
 0x11a   : > { %v1770_v14 = vadd.f32 %v1769_v27, %v3702_v38  ;;  %v1750_v62 = vadd.f32 %v1749_v25, %v1286_v37  ;;  %v1324_v8 = vmul.f32 %v2790_v47, %v781_v2  ;;  %v1325_v31 = vmul.f32 %v2792_v48, %v782_v13  ;;  %v389_v13 = vld [vmem:[%s2771_s4 + $0x570] sm:$0xff] }
 0x11b   : > { %v1326_v18 = vmul.f32 %v2794_v49, %v783_v55  ;;  %v1327_v21 = vmul.f32 %v2796_v50, %v784_v17  ;;  %v1332_v37 = vmul.f32 %v2806_v58, %v789_v10  ;;  %v1791_v32 = vadd.f32 %v1321_v30, %v1320_v26 }
 0x11c   : > { %v1771_v39 = vadd.f32 %v1770_v14, %v3707_v6  ;;  %v1751_v38 = vadd.f32 %v1750_v62, %v1287_v23  ;;  %v3769_v60 = vmul.f32 %v2798_v51, %v785_v24  ;;  %v3772_v3 = vmul.f32 %v2800_v54, %v786_v19 }
 0x11d   : > { %v3775_v11 = vmul.f32 %v2804_v57, %v787_v63  ;;  %v764_v22 = vunpack.c.l.bf16 %v384_v15  ;;  %v1792_v23 = vadd.f32 %v1791_v32, %v1322_v56  ;;  %v765_v28 = vunpack.c.h.bf16 %v384_v15  ;;  %v405_v56 = vld [vmem:[%s2771_s4 + $0x5e4] sm:$0xff]  ;;  %v406_v32 = vld [vmem:[%s2771_s4 + $0x5ec] sm:$0xff] }
 0x11e   : > { %v1773_v34 = vadd.f32 %v3710_v4, %v1771_v39  ;;  %v1752_v6 = vadd.f32 %v1751_v38, %v1288_v52  ;;  %v3782_v36 = vmul.f32 %v2810_v61, %v788_v7  ;;  %v3785_v5 = vsel %vm1396_vm0, %v1332_v37, 0.0 }
 0x11f   : > { %v766_v20 = vunpack.c.l.bf16 %v385_v35  ;;  %v767_v16 = vunpack.c.h.bf16 %v385_v35  ;;  %v1793_v2 = vadd.f32 %v1792_v23, %v1323_v12  ;;  %v768_v55 = vunpack.c.l.bf16 %v386_v33  ;;  %v407_v35 = vld [vmem:[%s2771_s4 + $0x5f4] sm:$0xff] }
 0x120   : > { %1774 = vadd.xlane.f32.xlu1 %v1773_v34  ;;  %v1753_v29 = vadd.f32 %v1752_v6, %v3731_v1  ;;  %v769_v4 = vunpack.c.h.bf16 %v386_v33  ;;  %v770_v52 = vunpack.c.l.bf16 %v387_v9  ;;  %v771_v17 = vunpack.c.h.bf16 %v387_v9  ;;  %v408_v34 = vld [vmem:[%s2771_s4 + $0x5fc] sm:$0xff] }
 0x121   : > { %v772_v10 = vunpack.c.l.bf16 %v388_v53  ;;  %v776_v27 = vunpack.c.l.bf16 %v3742_v44  ;;  %v1794_v26 = vadd.f32 %v1793_v2, %v1324_v8  ;;  %v1307_v30 = vmul.f32 %v2779_v41, %v764_v22 }
 0x122   : > { %v1754_v25 = vadd.f32 %v1753_v29, %v3734_v43  ;;  %v1308_v24 = vmul.f32 %v2781_v42, %v765_v28  ;;  %v773_v19 = vunpack.c.h.bf16 %v388_v53  ;;  %v774_v63 = vunpack.c.l.bf16 %v389_v13  ;;  %v3822_v28 = vld [vmem:[%s2771_s4 + $0x5e0] ss:$52 sps:$4 sm:$0xff]  }
 0x123   : > { %v775_v1 = vunpack.c.h.bf16 %v389_v13  ;;  %v1309_v7 = vmul.f32 %v2786_v45, %v766_v20  ;;  %v1795_v62 = vadd.f32 %v1794_v26, %v1325_v31  ;;  %v1310_v44 = vmul.f32 %v2788_v46, %v767_v16  ;;  %v409_v16 = vld [vmem:[%s2771_s4 + $0x604] sm:$0xff] }
 0x124   : > { %v1755_v14 = vadd.f32 %v1754_v25, %v3737_v0  ;;  %v1311_v43 = vmul.f32 %v2790_v47, %v768_v55  ;;  %v1312_v12 = vmul.f32 %v2792_v48, %v769_v4  ;;  %v1313_v15 = vmul.f32 %v2794_v49, %v770_v52  ;;  %v410_v52 = vld [vmem:[%s2771_s4 + $0x60c] sm:$0xff] }
 0x125   : > { %v3801_v8 = vmul.f32 %v2796_v50, %v771_v17  ;;  %v1319_v39 = vmul.f32 %v2806_v58, %v776_v27  ;;  %v1796_v0 = vadd.f32 %v1795_v62, %v1326_v18  ;;  %v3806_v31 = vmul.f32 %v2798_v51, %v772_v10 }
 0x126   : > { %v1756_v38 = vadd.f32 %v1755_v14, %v3746_v59  ;;  %v1776_v37 = vadd.f32 %v1308_v24, %v1307_v30  ;;  %v3811_v33 = vmul.f32 %v2800_v54, %v773_v19  ;;  %v3814_v22 = vmul.f32 %v2804_v57, %v774_v63  ;;  %v3836_v14 = vpop.xlane.xlu1 %1429 }
 0x127   : > { %v803_v6 = vunpack.c.l.bf16 %v405_v56  ;;  %v804_v23 = vunpack.c.h.bf16 %v405_v56  ;;  %v1797_v18 = vadd.f32 %v1796_v0, %v1327_v21  ;;  %v3819_v9 = vmul.f32 %v2810_v61, %v775_v1 }
 0x128   : > { %v1758_v59 = vadd.f32 %v3749_v40, %v1756_v38  ;;  %v1777_v53 = vadd.f32 %v1776_v37, %v1309_v7  ;;  %v3825_v20 = vsel %vm1396_vm0, %v1319_v39, 0.0  ;;  %v805_v29 = vunpack.c.l.bf16 %v406_v32  ;;  %v3842_v39 = vpop.xlane.xlu0 %1399 }
 0x129   : > { %v806_v2 = vunpack.c.h.bf16 %v406_v32  ;;  %v807_v13 = vunpack.c.l.bf16 %v407_v35  ;;  %v1798_v55 = vadd.f32 %v1797_v18, %v3769_v60  ;;  %v808_v40 = vunpack.c.h.bf16 %v407_v35 }
 0x12a   : > { %1759 = vadd.xlane.f32.xlu0 %v1758_v59  ;;  %v1778_v4 = vadd.f32 %v1777_v53, %v1310_v44  ;;  %v809_v21 = vunpack.c.l.bf16 %v408_v34  ;;  %v810_v17 = vunpack.c.h.bf16 %v408_v34  ;;  %v815_v10 = vunpack.c.h.bf16 %v3822_v28  ;;  %v401_v53 = vld [vmem:[%s2771_s4 + $0x5c8] sm:$0xff] }
 0x12b   : > { %v1346_v27 = vmul.f32 %v2779_v41, %v803_v6  ;;  %v1347_v25 = vmul.f32 %v2781_v42, %v804_v23  ;;  %v1799_v26 = vadd.f32 %v1798_v55, %v3772_v3  ;;  %v811_v24 = vunpack.c.l.bf16 %v409_v16  ;;  %v399_v6 = vld [vmem:[%s2771_s4 + $0x5b8] sm:$0xff]  ;;  %v400_v23 = vld [vmem:[%s2771_s4 + $0x5c0] sm:$0xff] }
 0x12c   : > { %v1779_v30 = vadd.f32 %v1778_v4, %v1311_v43  ;;  %v812_v19 = vunpack.c.h.bf16 %v409_v16  ;;  %v813_v63 = vunpack.c.l.bf16 %v410_v52  ;;  %v814_v1 = vunpack.c.h.bf16 %v410_v52  ;;  %v398_v43 = vld [vmem:[%s2771_s4 + $0x5b0] sm:$0xff]  ;;  %v403_v52 = vld [vmem:[%s2771_s4 + $0x5d8] sm:$0xff] }
 0x12d   : > { %v1348_v60 = vmul.f32 %v2786_v45, %v805_v29  ;;  %v1349_v7 = vmul.f32 %v2788_v46, %v806_v2  ;;  %v1800_v62 = vadd.f32 %v1799_v26, %v3775_v11  ;;  %v1350_v56 = vmul.f32 %v2790_v47, %v807_v13  ;;  %v402_v4 = vld [vmem:[%s2771_s4 + $0x5d0] sm:$0xff]  ;;  %v3873_v26 = vpop.xlane.xlu0 %1414 }
 0x12e   : > { %v1780_v44 = vadd.f32 %v1779_v30, %v1312_v12  ;;  %v1351_v3 = vmul.f32 %v2792_v48, %v808_v40  ;;  %v1352_v38 = vmul.f32 %v2794_v49, %v809_v21  ;;  %v1353_v0 = vmul.f32 %v2796_v50, %v810_v17 }
 0x12f   : > { %v1358_v37 = vmul.f32 %v2806_v58, %v815_v10  ;;  %v1821_v32 = vadd.f32 %v1347_v25, %v1346_v27  ;;  %v1801_v35 = vadd.f32 %v1800_v62, %v3782_v36  ;;  %v3849_v12 = vmul.f32 %v2798_v51, %v811_v24  ;;  %v3870_v10 = vpop.xlane.xlu1 %1444 }
 0x130   : > { %v1781_v11 = vadd.f32 %v1780_v44, %v1313_v15  ;;  %v3852_v34 = vmul.f32 %v2800_v54, %v812_v19  ;;  %v3857_v59 = vmul.f32 %v2804_v57, %v813_v63  ;;  %v790_v16 = vunpack.c.l.bf16 %v398_v43 }
 0x131   : > { %v1822_v18 = vadd.f32 %v1821_v32, %v1348_v60  ;;  %v791_v29 = vunpack.c.h.bf16 %v398_v43  ;;  %v1803_v36 = vadd.f32 %v3785_v5, %v1801_v35  ;;  %v3863_v2 = vmul.f32 %v2810_v61, %v814_v1 }
 0x132   : > { %v1782_v15 = vadd.f32 %v1781_v11, %v3801_v8  ;;  %v3866_v13 = vsel %vm1396_vm0, %v1358_v37, 0.0  ;;  %v792_v40 = vunpack.c.l.bf16 %v399_v6  ;;  %v793_v21 = vunpack.c.h.bf16 %v399_v6 }
 0x133   : > { %v1823_v55 = vadd.f32 %v1822_v18, %v1349_v7  ;;  %v794_v17 = vunpack.c.l.bf16 %v400_v23  ;;  %1804 = vadd.xlane.f32.xlu1 %v1803_v36  ;;  %v795_v5 = vunpack.c.h.bf16 %v400_v23  ;;  %v796_v25 = vunpack.c.l.bf16 %v401_v53  ;;  %v420_v18 = vld [vmem:[%s2771_s4 + $0x654] sm:$0xff] }
 0x134   : > { %v1783_v27 = vadd.f32 %v1782_v15, %v3806_v31  ;;  %v797_v8 = vunpack.c.h.bf16 %v401_v53  ;;  %v802_v24 = vunpack.c.l.bf16 %v3822_v28  ;;  %v1333_v19 = vmul.f32 %v2779_v41, %v790_v16  ;;  %v3889_v53 = vpop.xlane.xlu1 %1474  ;;  %v3902_v15 = vpop.xlane.xlu0 %1459 }
 0x135   : > { %v1824_v30 = vadd.f32 %v1823_v55, %v1350_v56  ;;  %v1334_v63 = vmul.f32 %v2781_v42, %v791_v29  ;;  %v798_v60 = vunpack.c.l.bf16 %v402_v4  ;;  %v799_v7 = vunpack.c.h.bf16 %v402_v4 }
 0x136   : > { %v1784_v1 = vadd.f32 %v1783_v27, %v3811_v33  ;;  %v800_v62 = vunpack.c.l.bf16 %v403_v52  ;;  %v801_v44 = vunpack.c.h.bf16 %v403_v52  ;;  %v1335_v43 = vmul.f32 %v2786_v45, %v792_v40  ;;  %v419_v33 = vld [vmem:[%s2771_s4 + $0x64c] sm:$0xff]  ;;  %v422_v52 = vld [vmem:[%s2771_s4 + $0x664] sm:$0xff] }
 0x137   : > { %v1825_v31 = vadd.f32 %v1824_v30, %v1351_v3  ;;  %v1336_v37 = vmul.f32 %v2788_v46, %v793_v21  ;;  %v1337_v28 = vmul.f32 %v2790_v47, %v794_v17  ;;  %v1338_v32 = vmul.f32 %v2792_v48, %v795_v5  ;;  %v3906_v40 = vld [vmem:[%s2771_s4 + $0x648] ss:$52 sps:$4 sm:$0xff]  }
 0x138   : > { %v1785_v56 = vadd.f32 %v1784_v1, %v3814_v22  ;;  %v1339_v35 = vmul.f32 %v2794_v49, %v796_v25  ;;  %v1340_v3 = vmul.f32 %v2796_v50, %v797_v8  ;;  %v1345_v6 = vmul.f32 %v2806_v58, %v802_v24  ;;  %v423_v24 = vld [vmem:[%s2771_s4 + $0x66c] sm:$0xff] }
 0x139   : > { %v1826_v11 = vadd.f32 %v1825_v31, %v1352_v38  ;;  %v1806_v23 = vadd.f32 %v1334_v63, %v1333_v19  ;;  %v3893_v16 = vmul.f32 %v2798_v51, %v798_v60  ;;  %v3896_v29 = vmul.f32 %v2800_v54, %v799_v7  ;;  %v421_v38 = vld [vmem:[%s2771_s4 + $0x65c] sm:$0xff] }
 0x13a   : > { %v1786_v22 = vadd.f32 %v1785_v56, %v3819_v9  ;;  %v3899_v36 = vmul.f32 %v2804_v57, %v800_v62  ;;  %v829_v9 = vunpack.c.l.bf16 %v419_v33  ;;  %v830_v21 = vunpack.c.h.bf16 %v419_v33 }
 0x13b   : > { %v1827_v55 = vadd.f32 %v1826_v11, %v1353_v0  ;;  %v1807_v4 = vadd.f32 %v1806_v23, %v1335_v43  ;;  %v3910_v27 = vmul.f32 %v2810_v61, %v801_v44  ;;  %v3913_v5 = vsel %vm1396_vm0, %v1345_v6, 0.0  ;;  %v424_v0 = vld [vmem:[%s2771_s4 + $0x674] sm:$0xff]  ;;  %v3924_v6 = vpop.xlane.xlu0 %1489 }
 0x13c   : > { %v1788_v17 = vadd.f32 %v3825_v20, %v1786_v22  ;;  %v831_v25 = vunpack.c.l.bf16 %v420_v18  ;;  %v832_v19 = vunpack.c.h.bf16 %v420_v18  ;;  %v833_v63 = vunpack.c.l.bf16 %v421_v38  ;;  %v412_v22 = vld [vmem:[%s2771_s4 + $0x618] sm:$0xff] }
 0x13d   : > { %v1828_v8 = vadd.f32 %v1827_v55, %v3849_v12  ;;  %v1808_v30 = vadd.f32 %v1807_v4, %v1336_v37  ;;  %v834_v1 = vunpack.c.h.bf16 %v421_v38  ;;  %v835_v60 = vunpack.c.l.bf16 %v422_v52  ;;  %v3922_v12 = vpop.xlane.xlu1 %1504 }
 0x13e   : > { %1789 = vadd.xlane.f32.xlu0 %v1788_v17  ;;  %v836_v7 = vunpack.c.h.bf16 %v422_v52  ;;  %v841_v20 = vunpack.c.h.bf16 %v3906_v40  ;;  %v1372_v44 = vmul.f32 %v2779_v41, %v829_v9  ;;  %v1373_v43 = vmul.f32 %v2781_v42, %v830_v21  ;;  %v413_v17 = vld [vmem:[%s2771_s4 + $0x620] sm:$0xff] }
 0x13f   : > { %v1829_v62 = vadd.f32 %v1828_v8, %v3852_v34  ;;  %v1809_v31 = vadd.f32 %v1808_v30, %v1337_v28  ;;  %v837_v37 = vunpack.c.l.bf16 %v423_v24  ;;  %v838_v56 = vunpack.c.h.bf16 %v423_v24  ;;  %v414_v24 = vld [vmem:[%s2771_s4 + $0x628] sm:$0xff] }
 0x140   : > { %v839_v33 = vunpack.c.l.bf16 %v424_v0  ;;  %v840_v11 = vunpack.c.h.bf16 %v424_v0  ;;  %v1374_v34 = vmul.f32 %v2786_v45, %v831_v25  ;;  %v1375_v28 = vmul.f32 %v2788_v46, %v832_v19 }
 0x141   : > { %v1830_v23 = vadd.f32 %v1829_v62, %v3857_v59  ;;  %v1810_v18 = vadd.f32 %v1809_v31, %v1338_v32  ;;  %v1376_v38 = vmul.f32 %v2790_v47, %v833_v63  ;;  %v1377_v55 = vmul.f32 %v2792_v48, %v834_v1  ;;  %v415_v63 = vld [vmem:[%s2771_s4 + $0x630] sm:$0xff]  ;;  %v416_v1 = vld [vmem:[%s2771_s4 + $0x638] sm:$0xff] }
 0x142   : > { %v1378_v4 = vmul.f32 %v2794_v49, %v835_v60  ;;  %v3934_v52 = vmul.f32 %v2796_v50, %v836_v7  ;;  %v1384_v9 = vmul.f32 %v2806_v58, %v841_v20  ;;  %v1851_v21 = vadd.f32 %v1373_v43, %v1372_v44  ;;  %v3952_v7 = vpop.xlane.xlu1 %1534  ;;  %v3960_v43 = vpop.xlane.xlu0 %1519 }
 0x143   : > { %v1831_v59 = vadd.f32 %v1830_v23, %v3863_v2  ;;  %v1811_v32 = vadd.f32 %v1810_v18, %v1339_v35  ;;  %v3940_v25 = vmul.f32 %v2798_v51, %v837_v37  ;;  %v3943_v8 = vmul.f32 %v2800_v54, %v838_v56  ;;  %v3964_v37 = vld [vmem:[%s2771_s4 + $0x640] sm:$0xff] }
 0x144   : > { %v3946_v30 = vmul.f32 %v2804_v57, %v839_v33  ;;  %v816_v0 = vunpack.c.l.bf16 %v412_v22  ;;  %v1852_v35 = vadd.f32 %v1851_v21, %v1374_v34  ;;  %v817_v60 = vunpack.c.h.bf16 %v412_v22 }
 0x145   : > { %v1833_v19 = vadd.f32 %v3866_v13, %v1831_v59  ;;  %v1812_v2 = vadd.f32 %v1811_v32, %v1340_v3  ;;  %v3955_v20 = vmul.f32 %v2810_v61, %v840_v11  ;;  %v3958_v62 = vsel %vm1396_vm0, %v1384_v9, 0.0 }
 0x146   : > { %v818_v31 = vunpack.c.l.bf16 %v413_v17  ;;  %v819_v44 = vunpack.c.h.bf16 %v413_v17  ;;  %v1853_v3 = vadd.f32 %v1852_v35, %v1375_v28  ;;  %v820_v56 = vunpack.c.l.bf16 %v414_v24 }
 0x147   : > { %1834 = vadd.xlane.f32.xlu1 %v1833_v19  ;;  %v1813_v13 = vadd.f32 %v1812_v2, %v3893_v16  ;;  %v821_v33 = vunpack.c.h.bf16 %v414_v24  ;;  %v822_v23 = vunpack.c.l.bf16 %v415_v63  ;;  %v823_v18 = vunpack.c.h.bf16 %v415_v63 }
 0x148   : > { %v824_v11 = vunpack.c.l.bf16 %v416_v1  ;;  %v825_v34 = vunpack.c.h.bf16 %v416_v1  ;;  %v1854_v59 = vadd.f32 %v1853_v3, %v1376_v38  ;;  %v1359_v32 = vmul.f32 %v2779_v41, %v816_v0  ;;  %v3976_v38 = vld [vmem:[#allocation2] ss:$0 sm:$0xff]  ;;  %v1565_v41 = vpop.xlane.xlu1 %1564 }
 0x149   : > { %v1814_v22 = vadd.f32 %v1813_v13, %v3896_v29  ;;  %v1360_v9 = vmul.f32 %v2781_v42, %v817_v60  ;;  %v826_v21 = vunpack.c.l.bf16 %v3964_v37  ;;  %v827_v16 = vunpack.c.h.bf16 %v3964_v37 }
 0x14a   : > { %v828_v28 = vunpack.c.l.bf16 %v3906_v40  ;;  %v1361_v17 = vmul.f32 %v2786_v45, %v818_v31  ;;  %v1855_v19 = vadd.f32 %v1854_v59, %v1377_v55  ;;  %v1362_v2 = vmul.f32 %v2788_v46, %v819_v44 }
 0x14b   : > { %v1815_v24 = vadd.f32 %v1814_v22, %v3899_v36  ;;  %v1363_v29 = vmul.f32 %v2790_v47, %v820_v56  ;;  %v1364_v42 = vmul.f32 %v2792_v48, %v821_v33  ;;  %v1365_v0 = vmul.f32 %v2794_v49, %v822_v23  ;;  %v1550_v36 = vpop.xlane.xlu0 %1549 }
 0x14c   : > { %v3982_v35 = vmul.f32 %v2796_v50, %v823_v18  ;;  %v3985_v45 = vmul.f32 %v2798_v51, %v824_v11  ;;  %v1856_v46 = vadd.f32 %v1855_v19, %v1378_v4  ;;  %v3989_v47 = vmul.f32 %v2800_v54, %v825_v34 }
 0x14d   : > { %v1816_v55 = vadd.f32 %v1815_v24, %v3910_v27  ;;  %v1836_v63 = vadd.f32 %v1360_v9, %v1359_v32  ;;  %v1875_v48 = vadd.f32 %v3976_v38, %v3836_v14  ;;  %v1873_v49 = vadd.f32 %v3976_v38, %v3842_v39 }
 0x14e   : > { %v1876_v50 = vadd.f32 %v3976_v38, %v3870_v10  ;;  %v1857_v27 = vadd.f32 %v1856_v46, %v3934_v52  ;;  %v1874_v54 = vadd.f32 %v3976_v38, %v3873_v26  ;;  %v1878_v14 = vadd.f32 %v3976_v38, %v3889_v53 }
 0x14f   : > { %v1818_v51 = vadd.f32 %v3913_v5, %v1816_v55  ;;  %v1837_v4 = vadd.f32 %v1836_v63, %v1361_v17  ;;  %v1907_v1 = vmax.f32 %v1875_v48, 0.0  ;;  %v1905_v60 = vmax.f32 %v1873_v49, 0.0  ;;  %v1595_v5 = vpop.xlane.xlu1 %1594  ;;  %v1580_v26 = vpop.xlane.xlu0 %1579 }
 0x150   : > { %v1908_v31 = vmax.f32 %v1876_v50, 0.0  ;;  %v1858_v39 = vadd.f32 %v1857_v27, %v3940_v25  ;;  %v1906_v13 = vmax.f32 %v1874_v54, 0.0  ;;  %v1877_v10 = vadd.f32 %v3976_v38, %v3902_v15 }
 0x151   : > { %1819 = vadd.xlane.f32.xlu0 %v1818_v51  ;;  %v1838_v44 = vadd.f32 %v1837_v4, %v1362_v2  ;;  %v2495_v52 = vpack.c.bf16 %v1907_v1, %v1907_v1  ;;  %v2493_v3 = vpack.c.bf16 %v1905_v60, %v1905_v60  ;;  %v1910_v33 = vmax.f32 %v1878_v14, 0.0 }
 0x152   : > { %v2496_v56 = vpack.c.bf16 %v1908_v31, %v1908_v31  ;;  %v1859_v23 = vadd.f32 %v1858_v39, %v3943_v8  ;;  %v2494_v11 = vpack.c.bf16 %v1906_v13, %v1906_v13  ;;  %v1909_v34 = vmax.f32 %v1877_v10, 0.0 }
 0x153   : > { %v1839_v18 = vadd.f32 %v1838_v44, %v1363_v29  ;;  %2068 = vst.msk [vmem:[%s4007_s7 + $0x8] sm:$0xf] %vm2065_vm1, %v2495_v52  ;;  %2066 = vst.msk [vmem:[%s4007_s7] sm:$0xf] %vm2065_vm1, %v2493_v3  ;;  %v2498_v53 = vpack.c.bf16 %v1910_v33, %v1910_v33  ;;  %v1880_v15 = vadd.f32 %v3976_v38, %v3922_v12  ;;  %v1625_v29 = vpop.xlane.xlu1 %1624 }
 0x154   : > { %2069 = vst.msk [vmem:[%s4007_s7 + $0xc] sm:$0xf] %vm2065_vm1, %v2496_v56  ;;  %v1879_v25 = vadd.f32 %v3976_v38, %v3924_v6  ;;  %v1882_v8 = vadd.f32 %v3976_v38, %v3952_v7  ;;  %v1860_v22 = vadd.f32 %v1859_v23, %v3946_v30  ;;  %2067 = vst.msk [vmem:[%s4007_s7 + $0x4] sm:$0xf] %vm2065_vm1, %v2494_v11 }
 0x155   : > { %v1840_v59 = vadd.f32 %v1839_v18, %v1364_v42  ;;  %v2497_v32 = vpack.c.bf16 %v1909_v34, %v1909_v34  ;;  %v1881_v9 = vadd.f32 %v3976_v38, %v3960_v43  ;;  %2071 = vst.msk [vmem:[%s4007_s7 + $0x14] sm:$0xf] %vm2065_vm1, %v2498_v53  ;;  %v1912_v17 = vmax.f32 %v1880_v15, 0.0 }
 0x156   : > { %v1911_v24 = vmax.f32 %v1879_v25, 0.0  ;;  %v1914_v12 = vmax.f32 %v1882_v8, 0.0  ;;  %v1884_v19 = vadd.f32 %v3976_v38, %v1565_v41  ;;  %v1861_v6 = vadd.f32 %v1860_v22, %v3955_v20  ;;  %v1610_v63 = vpop.xlane.xlu0 %1609 }
 0x157   : > { %v1841_v7 = vadd.f32 %v1840_v59, %v1365_v0  ;;  %2070 = vst.msk [vmem:[%s4007_s7 + $0x10] sm:$0xf] %vm2065_vm1, %v2497_v32  ;;  %v1913_v30 = vmax.f32 %v1881_v9, 0.0  ;;  %v1883_v2 = vadd.f32 %v3976_v38, %v1550_v36  ;;  %v2500_v43 = vpack.c.bf16 %v1912_v17, %v1912_v17 }
 0x158   : > { %v2499_v42 = vpack.c.bf16 %v1911_v24, %v1911_v24  ;;  %v2502_v55 = vpack.c.bf16 %v1914_v12, %v1914_v12  ;;  %v1916_v46 = vmax.f32 %v1884_v19, 0.0  ;;  %v1863_v41 = vadd.f32 %v3958_v62, %v1861_v6 }
 0x159   : > { %v1842_v48 = vadd.f32 %v1841_v7, %v3982_v35  ;;  %v2501_v20 = vpack.c.bf16 %v1913_v30, %v1913_v30  ;;  %v1915_v0 = vmax.f32 %v1883_v2, 0.0  ;;  %2073 = vst.msk [vmem:[%s4007_s7 + $0x1c] sm:$0xf] %vm2065_vm1, %v2500_v43  ;;  %v1886_v49 = vadd.f32 %v3976_v38, %v1595_v5 }
 0x15a   : > { %2072 = vst.msk [vmem:[%s4007_s7 + $0x18] sm:$0xf] %vm2065_vm1, %v2499_v42  ;;  %2075 = vst.msk [vmem:[%s4007_s7 + $0x24] sm:$0xf] %vm2065_vm1, %v2502_v55  ;;  %v2504_v36 = vpack.c.bf16 %v1916_v46, %v1916_v46  ;;  %v1885_v50 = vadd.f32 %v3976_v38, %v1580_v26  ;;  %v1888_v51 = vadd.f32 %v3976_v38, %v1625_v29  ;;  %1864 = vadd.xlane.f32.xlu1 %v1863_v41 }
 0x15b   : > { %v1369_v62 = vmul.f32 %v2804_v57, %v826_v21  ;;  %v1843_v35 = vadd.f32 %v1842_v48, %v3985_v45  ;;  %2074 = vst.msk [vmem:[%s4007_s7 + $0x20] sm:$0xf] %vm2065_vm1, %v2501_v20  ;;  %v2503_v27 = vpack.c.bf16 %v1915_v0, %v1915_v0  ;;  %v1887_v4 = vadd.f32 %v3976_v38, %v1610_v63 }
 0x15c   : > { %v1371_v54 = vmul.f32 %v2806_v58, %v828_v28  ;;  %2077 = vst.msk [vmem:[%s4007_s7 + $0x2c] sm:$0xf] %vm2065_vm1, %v2504_v36  ;;  %v1918_v1 = vmax.f32 %v1886_v49, 0.0  ;;  %v1917_v60 = vmax.f32 %v1885_v50, 0.0  ;;  %v1920_v31 = vmax.f32 %v1888_v51, 0.0 }
 0x15d   : > { %v1370_v57 = vmul.f32 %v2810_v61, %v827_v16  ;;  %v1844_v21 = vadd.f32 %v1843_v35, %v3989_v47  ;;  %2076 = vst.msk [vmem:[%s4007_s7 + $0x28] sm:$0xf] %vm2065_vm1, %v2503_v27  ;;  %v1919_v40 = vmax.f32 %v1887_v4, 0.0 }
 0x15e   : > { %v2506_v45 = vpack.c.bf16 %v1918_v1, %v1918_v1  ;;  %v2505_v58 = vpack.c.bf16 %v1917_v60, %v1917_v60  ;;  %v2508_v28 = vpack.c.bf16 %v1920_v31, %v1920_v31  ;;  %v1847_v13 = vsel %vm1396_vm0, %v1371_v54, 0.0 }
 0x15f   : > { %v1845_v14 = vadd.f32 %v1844_v21, %v1369_v62  ;;  %v2507_v39 = vpack.c.bf16 %v1919_v40, %v1919_v40  ;;  %v1655_v44 = vpop.xlane.xlu1 %1654 }
 0x160   : > { %2079 = vst.msk [vmem:[%s4007_s7 + $0x34] sm:$0xf] %vm2065_vm1, %v2506_v45  ;;  %2078 = vst.msk [vmem:[%s4007_s7 + $0x30] sm:$0xf] %vm2065_vm1, %v2505_v58  ;;  %v1890_v61 = vadd.f32 %v3976_v38, %v1655_v44 }
 0x161   : > { %2081 = vst.msk [vmem:[%s4007_s7 + $0x3c] sm:$0xf] %vm2065_vm1, %v2508_v28  ;;  %v1846_v37 = vadd.f32 %v1845_v14, %v1370_v57  ;;  %2080 = vst.msk [vmem:[%s4007_s7 + $0x38] sm:$0xf] %vm2065_vm1, %v2507_v39 }
 0x162   : > { %v1922_v16 = vmax.f32 %v1890_v61, 0.0 }
 0x163   : > { %v1848_v47 = vadd.f32 %v1847_v13, %v1846_v37 }
 0x164   : > { %v2510_v10 = vpack.c.bf16 %v1922_v16, %v1922_v16 }
 0x165   : > { %1849 = vadd.xlane.f32.xlu0 %v1848_v47 }
 0x166   : > { %2083 = vst.msk [vmem:[%s4007_s7 + $0x44] sm:$0xf] %vm2065_vm1, %v2510_v10 }
 0x169   : > { %v1640_v5 = vpop.xlane.xlu0 %1639 }
 0x16a   : > { %v1889_v52 = vadd.f32 %v3976_v38, %v1640_v5 }
 0x16c   : > { %v1921_v3 = vmax.f32 %v1889_v52, 0.0 }
 0x16e   : > { %v2509_v56 = vpack.c.bf16 %v1921_v3, %v1921_v3 }
 0x170   : > { %2082 = vst.msk [vmem:[%s4007_s7 + $0x40] sm:$0xf] %vm2065_vm1, %v2509_v56 }
 0x172   : > { %v1685_v33 = vpop.xlane.xlu1 %1684 }
 0x173   : > { %v1892_v26 = vadd.f32 %v3976_v38, %v1685_v33 }
 0x175   : > { %v1924_v23 = vmax.f32 %v1892_v26, 0.0 }
 0x177   : > { %v2512_v18 = vpack.c.bf16 %v1924_v23, %v1924_v23 }
 0x179   : > { %2085 = vst.msk [vmem:[%s4007_s7 + $0x4c] sm:$0xf] %vm2065_vm1, %v2512_v18 }
 0x17d   : > { %v1670_v11 = vpop.xlane.xlu0 %1669 }
 0x17e   : > { %v1891_v34 = vadd.f32 %v3976_v38, %v1670_v11 }
 0x180   : > { %v1923_v53 = vmax.f32 %v1891_v34, 0.0 }
 0x182   : > { %v2511_v15 = vpack.c.bf16 %v1923_v53, %v1923_v53 }
 0x184   : > { %2084 = vst.msk [vmem:[%s4007_s7 + $0x48] sm:$0xf] %vm2065_vm1, %v2511_v15 }
 0x186   : > { %v1715_v25 = vpop.xlane.xlu1 %1714 }
 0x187   : > { %v1894_v8 = vadd.f32 %v3976_v38, %v1715_v25 }
 0x189   : > { %v1926_v22 = vmax.f32 %v1894_v8, 0.0 }
 0x18b   : > { %v2514_v59 = vpack.c.bf16 %v1926_v22, %v1926_v22 }
 0x18d   : > { %2087 = vst.msk [vmem:[%s4007_s7 + $0x54] sm:$0xf] %vm2065_vm1, %v2514_v59 }
 0x190   : > { %v1700_v32 = vpop.xlane.xlu0 %1699 }
 0x191   : > { %v1893_v9 = vadd.f32 %v3976_v38, %v1700_v32 }
 0x193   : > { %v1925_v17 = vmax.f32 %v1893_v9, 0.0 }
 0x195   : > { %v2513_v24 = vpack.c.bf16 %v1925_v17, %v1925_v17 }
 0x197   : > { %2086 = vst.msk [vmem:[%s4007_s7 + $0x50] sm:$0xf] %vm2065_vm1, %v2513_v24 }
 0x199   : > { %v1745_v12 = vpop.xlane.xlu1 %1744 }
 0x19a   : > { %v1896_v19 = vadd.f32 %v3976_v38, %v1745_v12 }
 0x19c   : > { %v1928_v6 = vmax.f32 %v1896_v19, 0.0 }
 0x19e   : > { %v2516_v7 = vpack.c.bf16 %v1928_v6, %v1928_v6 }
 0x1a0   : > { %2089 = vst.msk [vmem:[%s4007_s7 + $0x5c] sm:$0xf] %vm2065_vm1, %v2516_v7 }
 0x1a4   : > { %v1730_v30 = vpop.xlane.xlu0 %1729 }
 0x1a5   : > { %v1895_v2 = vadd.f32 %v3976_v38, %v1730_v30 }
 0x1a7   : > { %v1927_v29 = vmax.f32 %v1895_v2, 0.0 }
 0x1a9   : > { %v2515_v43 = vpack.c.bf16 %v1927_v29, %v1927_v29 }
 0x1ab   : > { %2088 = vst.msk [vmem:[%s4007_s7 + $0x58] sm:$0xf] %vm2065_vm1, %v2515_v43 }
 0x1ad   : > { %v1775_v42 = vpop.xlane.xlu1 %1774 }
 0x1ae   : > { %v1898_v55 = vadd.f32 %v3976_v38, %v1775_v42 }
 0x1b0   : > { %v1930_v46 = vmax.f32 %v1898_v55, 0.0 }
 0x1b2   : > { %v2518_v63 = vpack.c.bf16 %v1930_v46, %v1930_v46 }
 0x1b4   : > { %2091 = vst.msk [vmem:[%s4007_s7 + $0x64] sm:$0xf] %vm2065_vm1, %v2518_v63 }
 0x1b7   : > { %v1760_v41 = vpop.xlane.xlu0 %1759 }
 0x1b8   : > { %v1897_v48 = vadd.f32 %v3976_v38, %v1760_v41 }
 0x1ba   : > { %v1929_v20 = vmax.f32 %v1897_v48, 0.0 }
 0x1bc   : > { %v2517_v0 = vpack.c.bf16 %v1929_v20, %v1929_v20 }
 0x1be   : > { %2090 = vst.msk [vmem:[%s4007_s7 + $0x60] sm:$0xf] %vm2065_vm1, %v2517_v0 }
 0x1c0   : > { %v1805_v36 = vpop.xlane.xlu1 %1804 }
 0x1c1   : > { %v1900_v49 = vadd.f32 %v3976_v38, %v1805_v36 }
 0x1c3   : > { %v1932_v50 = vmax.f32 %v1900_v49, 0.0 }
 0x1c5   : > { %v2520_v51 = vpack.c.bf16 %v1932_v50, %v1932_v50 }
 0x1c7   : > { %2093 = vst.msk [vmem:[%s4007_s7 + $0x6c] sm:$0xf] %vm2065_vm1, %v2520_v51 }
 0x1cb   : > { %v1790_v62 = vpop.xlane.xlu0 %1789 }
 0x1cc   : > { %v1899_v35 = vadd.f32 %v3976_v38, %v1790_v62 }
 0x1ce   : > { %v1931_v27 = vmax.f32 %v1899_v35, 0.0 }
 0x1d0   : > { %v2519_v4 = vpack.c.bf16 %v1931_v27, %v1931_v27 }
 0x1d2   : > { %2092 = vst.msk [vmem:[%s4007_s7 + $0x68] sm:$0xf] %vm2065_vm1, %v2519_v4 }
 0x1d4   : > { %v1835_v54 = vpop.xlane.xlu1 %1834 }
 0x1d5   : > { %v1902_v1 = vadd.f32 %v3976_v38, %v1835_v54 }
 0x1d7   : > { %v1934_v60 = vmax.f32 %v1902_v1, 0.0 }
 0x1d9   : > { %v2522_v31 = vpack.c.bf16 %v1934_v60, %v1934_v60 }
 0x1db   : > { %2095 = vst.msk [vmem:[%s4007_s7 + $0x74] sm:$0xf] %vm2065_vm1, %v2522_v31 }
 0x1de   : > { %v1820_v57 = vpop.xlane.xlu0 %1819 }
 0x1df   : > { %v1901_v21 = vadd.f32 %v3976_v38, %v1820_v57 }
 0x1e1   : > { %v1933_v40 = vmax.f32 %v1901_v21, 0.0 }
 0x1e3   : > { %v2521_v45 = vpack.c.bf16 %v1933_v40, %v1933_v40 }
 0x1e5   : > { %2094 = vst.msk [vmem:[%s4007_s7 + $0x70] sm:$0xf] %vm2065_vm1, %v2521_v45 }
 0x1e7   : > { %v1865_v58 = vpop.xlane.xlu1 %1864 }
 0x1e8   : > { %v1904_v28 = vadd.f32 %v3976_v38, %v1865_v58 }
 0x1ea   : > { %v1936_v14 = vmax.f32 %v1904_v28, 0.0 }
 0x1ec   : > { %v2524_v39 = vpack.c.bf16 %v1936_v14, %v1936_v14 }
 0x1ee   : > { %2097 = vst.msk [vmem:[%s4007_s7 + $0x7c] sm:$0xf] %vm2065_vm1, %v2524_v39 }
 0x1f2   : > { %v1850_v44 = vpop.xlane.xlu0 %1849 }
 0x1f3   : > { %v1903_v13 = vadd.f32 %v3976_v38, %v1850_v44  ;;  %2104 = sbr.rel (!%p2753_p4) target bundleno = 576 (0x240), region = 36 }
 0x1f5   : > { %v1935_v61 = vmax.f32 %v1903_v13, 0.0 }
 0x1f7   : > { %v2523_v37 = vpack.c.bf16 %v1935_v61, %v1935_v61 }
 0x1f9   : > { %2096 = vst.msk [vmem:[%s4007_s7 + $0x78] sm:$0xf] %vm2065_vm1, %v2523_v37 }
 0x1fa   : > { %s4266_s8 = smov (!%p2107_p8, %s2106_s8), 32 }
 0x1fb   : > { %s2478_s13 = sshll.u32 %s4266_s8, 6 }
 0x1fc   : > { %p2481_p9 = scmp.eq.s32.totalorder %s2478_s13, 0 }
 0x1fd   : > { %s4132_s14 = sshrl.u32 (!%p2481_p9), %s4266_s8, 5 }
 0x1fe   : > { %2115 = sbr.rel (%p2481_p9) target bundleno = 576 (0x240), region = 40  ;;  %p2482_p10 = scmp.le.s32.totalorder (!%p2481_p9), %s4132_s14, 0 }
 0x205   : > { %2392 = sbr.rel (%p2482_p10) target bundleno = 555 (0x22b), region = 112  ;;  %s4259_s16 = smov (!%p2482_p10), %s4126_s12 }
 0x206   : > { %s4260_s2 = smov (!%p2482_p10), %s4007_s7  ;;  %s4141_s18 = smov (!%p2482_p10), 0  }
 0x207   : > { %s4143_s19 = smov (!%p2482_p10), 0  }
 0x20c LB: >> { %v2131_v38 = vld [vmem:[%s2679_s2] sm:$0xf]  ;;  %v2133_v16 = vld [vmem:[%s2679_s2 + $0x4] sm:$0xf]  ;;  %v2135_v47 = vld [vmem:[%s2679_s2 + $0x8] sm:$0xf]  ;;  %s2687_s19 = sphi %s4143_s19, %s2125_s19   ;;  %s2683_s18 = sphi %s4141_s18, %s4261_s18   ;;  %s2679_s2 = sphi %s4260_s2, %s2200_s2   ;;  %s2675_s16 = sphi %s4259_s16, %s2201_s16  }
 0x20d   : >> { %2132 = vst [vmem:[%s2675_s16] sm:$0xf] %v2131_v38  ;;  %2134 = vst [vmem:[%s2675_s16 + $0x4] sm:$0xf] %v2133_v16  ;;  %v2137_v10 = vld [vmem:[%s2679_s2 + $0xc] sm:$0xf]  ;;  %s2195_s21 = sadd.s32 1, %s2683_s18 }
 0x20e   : >> { %2136 = vst [vmem:[%s2675_s16 + $0x8] sm:$0xf] %v2135_v47  ;;  %v2139_v5 = vld [vmem:[%s2679_s2 + $0x10] sm:$0xf]  ;;  %v2141_v52 = vld [vmem:[%s2679_s2 + $0x14] sm:$0xf]  ;;  %p2196_p11 = scmp.ge.s32.totalorder %s2195_s21, %s4132_s14 }
 0x20f   : >> { %2138 = vst [vmem:[%s2675_s16 + $0xc] sm:$0xf] %v2137_v10  ;;  %2140 = vst [vmem:[%s2675_s16 + $0x10] sm:$0xf] %v2139_v5  ;;  %v2143_v3 = vld [vmem:[%s2679_s2 + $0x18] sm:$0xf] }
 0x210   : >> { %2142 = vst [vmem:[%s2675_s16 + $0x14] sm:$0xf] %v2141_v52  ;;  %v2145_v56 = vld [vmem:[%s2679_s2 + $0x1c] sm:$0xf]  ;;  %v2147_v33 = vld [vmem:[%s2679_s2 + $0x20] sm:$0xf] }
 0x211   : >> { %2144 = vst [vmem:[%s2675_s16 + $0x18] sm:$0xf] %v2143_v3  ;;  %2146 = vst [vmem:[%s2675_s16 + $0x1c] sm:$0xf] %v2145_v56  ;;  %v2149_v26 = vld [vmem:[%s2679_s2 + $0x24] sm:$0xf] }
 0x212   : >> { %2148 = vst [vmem:[%s2675_s16 + $0x20] sm:$0xf] %v2147_v33  ;;  %v2151_v23 = vld [vmem:[%s2679_s2 + $0x28] sm:$0xf]  ;;  %v2153_v18 = vld [vmem:[%s2679_s2 + $0x2c] sm:$0xf] }
 0x213   : >> { %2150 = vst [vmem:[%s2675_s16 + $0x24] sm:$0xf] %v2149_v26  ;;  %2152 = vst [vmem:[%s2675_s16 + $0x28] sm:$0xf] %v2151_v23  ;;  %v2155_v11 = vld [vmem:[%s2679_s2 + $0x30] sm:$0xf] }
 0x214   : >> { %2154 = vst [vmem:[%s2675_s16 + $0x2c] sm:$0xf] %v2153_v18  ;;  %v2157_v34 = vld [vmem:[%s2679_s2 + $0x34] sm:$0xf]  ;;  %v2159_v53 = vld [vmem:[%s2679_s2 + $0x38] sm:$0xf] }
 0x215   : >> { %2156 = vst [vmem:[%s2675_s16 + $0x30] sm:$0xf] %v2155_v11  ;;  %2158 = vst [vmem:[%s2675_s16 + $0x34] sm:$0xf] %v2157_v34  ;;  %v2161_v15 = vld [vmem:[%s2679_s2 + $0x3c] sm:$0xf] }
 0x216   : >> { %2160 = vst [vmem:[%s2675_s16 + $0x38] sm:$0xf] %v2159_v53  ;;  %v2163_v25 = vld [vmem:[%s2679_s2 + $0x40] sm:$0xf]  ;;  %v2165_v8 = vld [vmem:[%s2679_s2 + $0x44] sm:$0xf] }
 0x217   : >> { %2162 = vst [vmem:[%s2675_s16 + $0x3c] sm:$0xf] %v2161_v15  ;;  %2164 = vst [vmem:[%s2675_s16 + $0x40] sm:$0xf] %v2163_v25  ;;  %v2167_v22 = vld [vmem:[%s2679_s2 + $0x48] sm:$0xf] }
 0x218   : >> { %2166 = vst [vmem:[%s2675_s16 + $0x44] sm:$0xf] %v2165_v8  ;;  %v2169_v59 = vld [vmem:[%s2679_s2 + $0x4c] sm:$0xf]  ;;  %v2171_v32 = vld [vmem:[%s2679_s2 + $0x50] sm:$0xf] }
 0x219   : >> { %2168 = vst [vmem:[%s2675_s16 + $0x48] sm:$0xf] %v2167_v22  ;;  %2170 = vst [vmem:[%s2675_s16 + $0x4c] sm:$0xf] %v2169_v59  ;;  %v2173_v9 = vld [vmem:[%s2679_s2 + $0x54] sm:$0xf] }
 0x21a   : >> { %2172 = vst [vmem:[%s2675_s16 + $0x50] sm:$0xf] %v2171_v32  ;;  %v2175_v17 = vld [vmem:[%s2679_s2 + $0x58] sm:$0xf]  ;;  %v2177_v24 = vld [vmem:[%s2679_s2 + $0x5c] sm:$0xf] }
 0x21b   : >> { %2174 = vst [vmem:[%s2675_s16 + $0x54] sm:$0xf] %v2173_v9  ;;  %2176 = vst [vmem:[%s2675_s16 + $0x58] sm:$0xf] %v2175_v17  ;;  %v2179_v12 = vld [vmem:[%s2679_s2 + $0x60] sm:$0xf] }
 0x21c   : >> { %2178 = vst [vmem:[%s2675_s16 + $0x5c] sm:$0xf] %v2177_v24  ;;  %v2181_v19 = vld [vmem:[%s2679_s2 + $0x64] sm:$0xf]  ;;  %v2183_v6 = vld [vmem:[%s2679_s2 + $0x68] sm:$0xf] }
 0x21d   : >> { %2180 = vst [vmem:[%s2675_s16 + $0x60] sm:$0xf] %v2179_v12  ;;  %2182 = vst [vmem:[%s2675_s16 + $0x64] sm:$0xf] %v2181_v19  ;;  %v2185_v7 = vld [vmem:[%s2679_s2 + $0x6c] sm:$0xf] }
 0x21e   : >> { %2184 = vst [vmem:[%s2675_s16 + $0x68] sm:$0xf] %v2183_v6  ;;  %v2187_v30 = vld [vmem:[%s2679_s2 + $0x70] sm:$0xf]  ;;  %v2189_v2 = vld [vmem:[%s2679_s2 + $0x74] sm:$0xf] }
 0x21f   : >> { %2186 = vst [vmem:[%s2675_s16 + $0x6c] sm:$0xf] %v2185_v7  ;;  %2188 = vst [vmem:[%s2675_s16 + $0x70] sm:$0xf] %v2187_v30  ;;  %v2191_v29 = vld [vmem:[%s2679_s2 + $0x78] sm:$0xf] }
 0x220   : >> { %2190 = vst [vmem:[%s2675_s16 + $0x74] sm:$0xf] %v2189_v2  ;;  %v2193_v43 = vld [vmem:[%s2679_s2 + $0x7c] sm:$0xf]  ;;  %2192 = vst [vmem:[%s2675_s16 + $0x78] sm:$0xf] %v2191_v29 }
 0x221   : >> { %2194 = vst [vmem:[%s2675_s16 + $0x7c] sm:$0xf] %v2193_v43  ;;  %s4268_s21 = smov (%p2196_p11, %s2195_s21), 0  ;;  %s2125_s19 = sadd.s32 1, %s2687_s19  }
 0x222   : >> { %s2483_s22 = sshll.u32 %s4268_s21, 7  ;;  %p2124_p12 = scmp.ge.s32.totalorder %s2125_s19, %s4132_s14 }
 0x223   : >> { %s2200_s2 = scalar_lea.vmem %s4007_s7, %s2483_s22 [#allocation3]   ;;  %s2201_s16 = scalar_lea.vmem %s4126_s12, %s2483_s22  }
 0x224   : >> { %s4261_s18 = smov %s4268_s21  ;;  %2127 = sbr.rel (!%p2124_p12) target bundleno = 524 (0x20c), region = 118 }
 0x22b PF: > { %s4236_s23 = sand.u32 31, %s4266_s8   ;;  %s2526_s24 = sshll.u32 %s4132_s14, 7 }
 0x22c   : > { %s2206_s25 = scalar_lea.vmem %s4007_s7, %s2526_s24 [#allocation3]   ;;  %s2208_s26 = scalar_lea.vmem %s4126_s12, %s2526_s24  }
 0x22d   : > { %p2488_p13 = scmp.le.s32.totalorder %s4236_s23, 0 }
 0x22e   : > { %s2689_s27 = smov (!%p2488_p13), %s2208_s26   ;;  %s2693_s28 = smov (!%p2488_p13), %s2206_s25  }
 0x22f   : > { %2406 = sbr.rel (%p2488_p13) target bundleno = 576 (0x240), region = 123  ;;  %s2697_s29 = smov (!%p2488_p13), 0  }
 0x230   : > { %s2701_s30 = smov (!%p2488_p13), 0  }
 0x236 LB: >> { %v2218_v42 = vld [vmem:[%s2695_s28] sm:$0xf]  ;;  %s2220_s4 = sadd.s32 1, %s2699_s29  ;;  %s2212_s30 = sadd.s32 1, %s2703_s30   ;;  %s2703_s30 = sphi %s2701_s30, %s2212_s30   ;;  %s2699_s29 = sphi %s2697_s29, %s2698_s29   ;;  %s2695_s28 = sphi %s2693_s28, %s2225_s28   ;;  %s2691_s27 = sphi %s2689_s27, %s2226_s27  }
 0x237   : >> { %2219 = vst [vmem:[%s2691_s27] sm:$0xf] %v2218_v42  ;;  %p2221_p0 = scmp.ge.s32.totalorder %s2220_s4, %s4236_s23  ;;  %p2211_p1 = scmp.ge.s32.totalorder %s2212_s30, %s4236_s23 }
 0x239   : >> { %s4270_s4 = smov (%p2221_p0, %s2220_s4), 0  ;;  %2214 = sbr.rel (!%p2211_p1) target bundleno = 566 (0x236), region = 129 }
 0x23a   : >> { %s2489_s5 = sshll.u32 %s4270_s4, 2  ;;  %s2698_s29 = smov %s4270_s4  }
 0x23b   : >> { %s2225_s28 = scalar_lea.vmem %s2206_s25, %s2489_s5 [#allocation3]   ;;  %s2226_s27 = scalar_lea.vmem %s2208_s26, %s2489_s5  }
 0x240 PF: > { %p12_p2 = scmp.ge.s32.totalorder %s2743_s17, 11   ;;  %s4262_s14 = smov %s2667_s15 }
 0x241   : > { %s4263_s15 = smov %s2751_s20  ;;  %s4264_s16 = smov %s2743_s17 }
 0x242   :  { %14 = sbr.rel (!%p12_p2) target bundleno = 5 (0x5), region = 140 }

// kernel: recon_net_forward.9
= control target key start
LH: loop header
LB: loop body
LE: loop exit
PB: predicated region body
PF: predicated region fallthrough
CT: control target
= control target key end

     0   :  { %s3755_s0 = inlined_call_operand.vmem [shape: bf16[2178,1568], index: 0, kind: input, shape index: {}]   ;;  %s3756_s1 = inlined_call_operand.vmem [shape: bf16[1,1568], index: 1, kind: input, shape index: {}]   ;;  %s3757_s2 = inlined_call_operand.<no memory space> [shape: f32[1,1], index: 2, kind: input, shape index: {}]   ;;  %s3758_s3 = inlined_call_operand.vmem [shape: f32[2178,1], index: 3, kind: output, shape index: {}]  }
   0x1   :  { %v8_v0 = vstv %s3757_s2 }
   0x2   :  { %9 = vst [vmem:[#allocation2] sm:$0x1] %v8_v0 }
   0x3   :  { %s2601_s14 = smov 0   ;;  %s2603_s15 = smov 0  }
   0x4   :  { %s2605_s16 = smov 0  }
   0x5 LB: > { %s2614_s2 = sadd.s32 4294967295, %s2544_s16   ;;  %s2616_s17 = sadd.s32 1, %s2544_s16   ;;  %s2544_s16 = sphi %s2605_s16, %s3767_s16   ;;  %s2540_s15 = sphi %s2603_s15, %s3766_s15   ;;  %s2536_s14 = sphi %s2601_s14, %s3765_s14  }
   0x6   : > { %s87_s18 = ssub.s32 %s2544_s16, %s2616_s17  ;;  %s90_s19 = sadd.s32 1, %s2540_s15 }
   0x7   : > { %p88_p0 = scmp.eq.s32.totalorder %s87_s18, 0  ;;  %p100_p1 = scmp.ne.s32.totalorder %s2540_s15, %s2536_s14 }
   0x8   : > { %p101_p2 = scmp.eq.s32.totalorder %s2614_s2, 8  ;;  %p2312_p3 = scmp.ge.s32.totalorder %s2544_s16, 1 }
   0x9   : > { %s2624_s20 = scalar_select %p88_p0, %s2540_s15, %s90_s19  }
   0xa   : > { %p2626_p4 = por %p101_p2, %p100_p1  ;;  %p151_p5 = scmp.lt.s32.totalorder %s2544_s16, 10 }
   0xc   : > { %p152_p6 = pnand %p2312_p3, %p151_p5 }
   0xd   : > { %s2631_s22 = sshll.u32 (!%p152_p6), %s2614_s2, 5  ;;  %v852_v1 = vlaneseq (!%p152_p6)  ;;  %v842_v2 = vld [vmem:[%s3756_s1] sm:$0xff] (!%p152_p6)  ;;  %v843_v4 = vld [vmem:[%s3756_s1 + $0x8] sm:$0x1f] (!%p152_p6)  ;;  %vm1396_vm0 = vcmask (!%p152_p6), 261120   ;;  %s177_s5 = sand.u32 (!%p152_p6), 1, %s2536_s14  }
   0xe   : > { %155 = sbr.rel (%p152_p6) target bundleno = 566 (0x236), region = 32  ;;  %p186_p7 = scmp.lt.s32.totalorder (!%p152_p6), %s2631_s22, 272  ;;  %v844_v5 = vunpack.c.l.bf16 (!%p152_p6), %v842_v2  ;;  %v845_v9 = vunpack.c.h.bf16 (!%p152_p6), %v842_v2  ;;  %v846_v11 = vunpack.c.l.bf16 (!%p152_p6), %v843_v4  ;;  %v847_v15 = vunpack.c.h.bf16 (!%p152_p6), %v843_v4 }
   0xf   : > { %v853_v3 = vshrl.u32 (!%p152_p6), %v852_v1, 7  ;;  %s2313_s6 = sshll.u32 (!%p152_p6), %s177_s5, 8  ;;  %vm1937_vm1 = vcmask (!%p152_p6), 7168  }
  0x10   : > { %s3530_s7 = scalar_lea.vmem (!%p152_p6), [#allocation3], %s2313_s6  }
  0x11   : > { %v2641_v6 = vsub.s32 (!%p152_p6), 0, %v853_v3  ;;  %v858_v7 = vsub.s32 (!%p152_p6), 2, %v853_v3  ;;  %v862_v8 = vsub.s32 (!%p152_p6), 4, %v853_v3  ;;  %v866_v10 = vsub.s32 (!%p152_p6), 6, %v853_v3 }
  0x13   : > { %v855_v13 = vrot.slane (!%p152_p6), %v844_v5, %v2641_v6  ;;  %v859_v14 = vrot.slane (!%p152_p6), %v844_v5, %v858_v7  ;;  %v863_v16 = vrot.slane (!%p152_p6), %v844_v5, %v862_v8  ;;  %v867_v18 = vrot.slane (!%p152_p6), %v844_v5, %v866_v10 }
  0x14   : > { %v871_v19 = vrot.slane (!%p152_p6), %v845_v9, %v2641_v6  ;;  %v875_v20 = vrot.slane (!%p152_p6), %v845_v9, %v858_v7  ;;  %v879_v23 = vrot.slane (!%p152_p6), %v845_v9, %v862_v8  ;;  %v883_v24 = vrot.slane (!%p152_p6), %v845_v9, %v866_v10 }
  0x15   : > { %s187_s25 = scalar_select %p186_p7, %s2631_s22, 272  ;;  %v887_v25 = vrot.slane %v846_v11, %v2641_v6  ;;  %v891_v28 = vrot.slane %v846_v11, %v858_v7  ;;  %v2656_v29 = vrot.slane %v855_v13, %v2641_v6  ;;  %v2659_v30 = vrot.slane %v859_v14, %v2641_v6 }
  0x16   : > { %v895_v34 = vrot.slane %v846_v11, %v862_v8  ;;  %v903_v35 = vrot.slane %v847_v15, %v2641_v6  ;;  %v2665_v36 = vrot.slane %v863_v16, %v2641_v6  ;;  %v899_v41 = vrot.slane %v846_v11, %v866_v10  ;;  %s1978_s8 = ssub.s32 (%p2626_p4), 273, %s2631_s22  ;;  %s2334_s9 = sshll.u32 (%p2626_p4), %s2614_s2, 8 }
  0x17   : > { %s2337_s28 = smul.u32 52, %s187_s25  ;;  %v2671_v44 = vrot.slane %v867_v18, %v2641_v6  ;;  %v2678_v52 = vrot.slane %v871_v19, %v2641_v6  ;;  %v2686_v56 = vrot.slane %v875_v20, %v2641_v6  ;;  %v2689_v57 = vrot.slane %v879_v23, %v2641_v6  ;;  %p1979_p8 = scmp.lt.s32.totalorder (%p2626_p4), %s1978_s8, 32 }
  0x18   : > { %v2681_v53 = vrot.slane %v903_v35, %v2641_v6  ;;  %v2692_v58 = vrot.slane %v883_v24, %v2641_v6  ;;  %v2695_v59 = vrot.slane %v887_v25, %v2641_v6  ;;  %v2699_v1 = vrot.slane %v891_v28, %v2641_v6  ;;  %s3623_s12 = scalar_lea.vmem (%p2626_p4), %s3758_s3, %s2334_s9  }
  0x19   : > { %s2646_s4 = scalar_lea.vmem %s3755_s0, %s2337_s28  ;;  %v2702_v2 = vrot.slane %v895_v34, %v2641_v6  ;;  %v2705_v4 = vrot.slane %v899_v41, %v2641_v6 }
  0x1a   : > { %v216_v12 = vld [vmem:[%s2646_s4 + $0x68] sm:$0xff]  ;;  %v217_v17 = vld [vmem:[%s2646_s4 + $0x70] sm:$0xff]  ;;  %v218_v21 = vld [vmem:[%s2646_s4 + $0x78] sm:$0xff] }
  0x1b   : > { %v452_v22 = vunpack.c.l.bf16 %v216_v12  ;;  %v219_v26 = vld [vmem:[%s2646_s4 + $0x80] sm:$0xff]  ;;  %v453_v27 = vunpack.c.h.bf16 %v216_v12  ;;  %v220_v31 = vld [vmem:[%s2646_s4 + $0x88] sm:$0xff]  ;;  %v221_v32 = vld [vmem:[%s2646_s4 + $0x90] sm:$0xff]  ;;  %v454_v33 = vunpack.c.l.bf16 %v217_v17  ;;  %v455_v38 = vunpack.c.h.bf16 %v217_v17 }
  0x1c   : > { %v2668_v37 = vld [vmem:[%s2646_s4 + $0x30] ss:$104 sps:$4 sm:$0xff]   ;;  %v456_v39 = vunpack.c.l.bf16 %v218_v21  ;;  %v457_v40 = vunpack.c.h.bf16 %v218_v21  ;;  %v458_v42 = vunpack.c.l.bf16 %v219_v26  ;;  %v459_v43 = vunpack.c.h.bf16 %v219_v26  ;;  %v202_v50 = vld [vmem:[%s2646_s4] sm:$0xff]  ;;  %v203_v55 = vld [vmem:[%s2646_s4 + $0x8] sm:$0xff] }
  0x1d   : > { %v995_v45 = vmul.f32 %v2656_v29, %v452_v22  ;;  %v460_v46 = vunpack.c.l.bf16 %v220_v31  ;;  %v461_v47 = vunpack.c.h.bf16 %v220_v31  ;;  %v462_v48 = vunpack.c.l.bf16 %v221_v32  ;;  %v204_v9 = vld [vmem:[%s2646_s4 + $0x10] sm:$0xff]  ;;  %v205_v15 = vld [vmem:[%s2646_s4 + $0x18] sm:$0xff]  ;;  %v206_v20 = vld [vmem:[%s2646_s4 + $0x20] sm:$0xff] }
  0x1e   : > { %v996_v49 = vmul.f32 %v2659_v30, %v453_v27  ;;  %v464_v51 = vunpack.c.h.bf16 %v2668_v37  ;;  %v997_v54 = vmul.f32 %v2665_v36, %v454_v33  ;;  %v998_v60 = vmul.f32 %v2671_v44, %v455_v38  ;;  %v223_v27 = vld [vmem:[%s2646_s4 + $0x9c] sm:$0xff]  ;;  %v207_v28 = vld [vmem:[%s2646_s4 + $0x28] sm:$0xff] }
  0x1f   : > { %v426_v62 = vunpack.c.l.bf16 %v202_v50  ;;  %v427_v63 = vunpack.c.h.bf16 %v202_v50  ;;  %v463_v0 = vunpack.c.h.bf16 %v221_v32  ;;  %v428_v3 = vunpack.c.l.bf16 %v203_v55  ;;  %v224_v41 = vld [vmem:[%s2646_s4 + $0xa4] sm:$0xff] }
  0x20   : > { %v1416_v61 = vadd.f32 %v996_v49, %v995_v45  ;;  %v999_v5 = vmul.f32 %v2678_v52, %v456_v39  ;;  %v1007_v7 = vmul.f32 %v2681_v53, %v464_v51  ;;  %v1000_v10 = vmul.f32 %v2686_v56, %v457_v40 }
  0x21   : > { %v1001_v11 = vmul.f32 %v2689_v57, %v458_v42  ;;  %v1002_v12 = vmul.f32 %v2692_v58, %v459_v43  ;;  %v429_v13 = vunpack.c.h.bf16 %v203_v55  ;;  %v1003_v14 = vmul.f32 %v2695_v59, %v460_v46  ;;  %v225_v55 = vld [vmem:[%s2646_s4 + $0xac] sm:$0xff] }
  0x22   : > { %v1417_v8 = vadd.f32 %v1416_v61, %v997_v54  ;;  %v969_v16 = vmul.f32 %v2656_v29, %v426_v62  ;;  %v970_v17 = vmul.f32 %v2659_v30, %v427_v63  ;;  %v1004_v18 = vmul.f32 %v2699_v1, %v461_v47 }
  0x23   : > { %v1005_v19 = vmul.f32 %v2702_v2, %v462_v48  ;;  %v430_v21 = vunpack.c.l.bf16 %v204_v9  ;;  %v971_v22 = vmul.f32 %v2665_v36, %v428_v3  ;;  %v2722_v23 = vmul.f32 %v2705_v4, %v463_v0 }
  0x24   : > { %v1418_v6 = vadd.f32 %v1417_v8, %v998_v60  ;;  %v2725_v25 = vsel %vm1396_vm0, %v1007_v7, 0.0  ;;  %v431_v26 = vunpack.c.h.bf16 %v204_v9  ;;  %v432_v31 = vunpack.c.l.bf16 %v205_v15  ;;  %v2742_v7 = vld [vmem:[%s2646_s4 + $0x64] ss:$104 sps:$4 sm:$0xff]  }
  0x25   : > { %v438_v32 = vunpack.c.l.bf16 %v2668_v37  ;;  %v972_v33 = vmul.f32 %v2671_v44, %v429_v13  ;;  %v1385_v34 = vadd.f32 %v970_v17, %v969_v16  ;;  %v433_v38 = vunpack.c.h.bf16 %v205_v15 }
  0x26   : > { %v1419_v24 = vadd.f32 %v1418_v6, %v999_v5  ;;  %v434_v39 = vunpack.c.l.bf16 %v206_v20  ;;  %v435_v40 = vunpack.c.h.bf16 %v206_v20  ;;  %v973_v42 = vmul.f32 %v2678_v52, %v430_v21  ;;  %v226_v5 = vld [vmem:[%s2646_s4 + $0xb4] sm:$0xff]  ;;  %v227_v6 = vld [vmem:[%s2646_s4 + $0xbc] sm:$0xff]  ;;  %v228_v20 = vld [vmem:[%s2646_s4 + $0xc4] sm:$0xff] }
  0x27   : > { %v1386_v43 = vadd.f32 %v1385_v34, %v971_v22  ;;  %v465_v45 = vunpack.c.l.bf16 %v223_v27  ;;  %v466_v46 = vunpack.c.h.bf16 %v223_v27  ;;  %v436_v48 = vunpack.c.l.bf16 %v207_v28 }
  0x28   : > { %v1420_v35 = vadd.f32 %v1419_v24, %v1000_v10  ;;  %v437_v49 = vunpack.c.h.bf16 %v207_v28  ;;  %v974_v37 = vmul.f32 %v2686_v56, %v431_v26  ;;  %v975_v50 = vmul.f32 %v2689_v57, %v432_v31  ;;  %v209_v28 = vld [vmem:[%s2646_s4 + $0x34] sm:$0xff] }
  0x29   : > { %v981_v51 = vmul.f32 %v2681_v53, %v438_v32  ;;  %v1387_v54 = vadd.f32 %v1386_v43, %v972_v33  ;;  %v467_v60 = vunpack.c.l.bf16 %v224_v41  ;;  %v976_v62 = vmul.f32 %v2692_v58, %v433_v38 }
  0x2a   : > { %v1421_v47 = vadd.f32 %v1420_v35, %v1001_v11  ;;  %v977_v63 = vmul.f32 %v2695_v59, %v434_v39  ;;  %v978_v0 = vmul.f32 %v2699_v1, %v435_v40  ;;  %v468_v8 = vunpack.c.h.bf16 %v224_v41  ;;  %v210_v41 = vld [vmem:[%s2646_s4 + $0x3c] sm:$0xff] }
  0x2b   : > { %v1388_v3 = vadd.f32 %v1387_v54, %v973_v42  ;;  %v1008_v9 = vmul.f32 %v2656_v29, %v465_v45  ;;  %v1009_v10 = vmul.f32 %v2659_v30, %v466_v46  ;;  %v980_v13 = vmul.f32 %v2705_v4, %v437_v49 }
  0x2c   : > { %v1422_v61 = vadd.f32 %v1421_v47, %v1002_v12  ;;  %v979_v12 = vmul.f32 %v2702_v2, %v436_v48  ;;  %v469_v15 = vunpack.c.l.bf16 %v225_v55  ;;  %v2750_v17 = vsel %vm1396_vm0, %v981_v51, 0.0 }
  0x2d   : > { %v1389_v16 = vadd.f32 %v1388_v3, %v974_v37  ;;  %v470_v21 = vunpack.c.h.bf16 %v225_v55  ;;  %v1010_v22 = vmul.f32 %v2665_v36, %v467_v60  ;;  %v471_v26 = vunpack.c.l.bf16 %v226_v5 }
  0x2e   : > { %v1423_v11 = vadd.f32 %v1422_v61, %v1003_v14  ;;  %v472_v27 = vunpack.c.h.bf16 %v226_v5  ;;  %v477_v14 = vunpack.c.h.bf16 %v2742_v7  ;;  %v473_v32 = vunpack.c.l.bf16 %v227_v6  ;;  %v211_v61 = vld [vmem:[%s2646_s4 + $0x44] sm:$0xff]  ;;  %v212_v5 = vld [vmem:[%s2646_s4 + $0x4c] sm:$0xff] }
  0x2f   : > { %v1390_v31 = vadd.f32 %v1389_v16, %v975_v50  ;;  %v1011_v33 = vmul.f32 %v2671_v44, %v468_v8  ;;  %v1431_v34 = vadd.f32 %v1009_v10, %v1008_v9  ;;  %v474_v38 = vunpack.c.h.bf16 %v227_v6 }
  0x30   : > { %v1424_v24 = vadd.f32 %v1423_v11, %v1004_v18  ;;  %v475_v39 = vunpack.c.l.bf16 %v228_v20  ;;  %v1012_v40 = vmul.f32 %v2678_v52, %v469_v15  ;;  %v439_v18 = vunpack.c.l.bf16 %v209_v28  ;;  %v213_v15 = vld [vmem:[%s2646_s4 + $0x54] sm:$0xff] }
  0x31   : > { %v1391_v42 = vadd.f32 %v1390_v31, %v976_v62  ;;  %v1432_v43 = vadd.f32 %v1431_v34, %v1010_v22  ;;  %v440_v45 = vunpack.c.h.bf16 %v209_v28  ;;  %v476_v47 = vunpack.c.h.bf16 %v228_v20  ;;  %v214_v31 = vld [vmem:[%s2646_s4 + $0x5c] sm:$0xff]  ;;  %v238_v34 = vld [vmem:[%s2646_s4 + $0x10c] sm:$0xff] }
  0x32   : > { %v1425_v35 = vadd.f32 %v1424_v24, %v1005_v19  ;;  %v1013_v48 = vmul.f32 %v2686_v56, %v470_v21  ;;  %v1020_v49 = vmul.f32 %v2681_v53, %v477_v14  ;;  %v1014_v19 = vmul.f32 %v2689_v57, %v471_v26  ;;  %v237_v21 = vld [vmem:[%s2646_s4 + $0x104] sm:$0xff] }
  0x33   : > { %v1392_v37 = vadd.f32 %v1391_v42, %v977_v63  ;;  %v1433_v50 = vadd.f32 %v1432_v43, %v1011_v33  ;;  %v441_v51 = vunpack.c.l.bf16 %v210_v41  ;;  %v1015_v55 = vmul.f32 %v2692_v58, %v472_v27 }
  0x34   : > { %v1426_v46 = vadd.f32 %v1425_v35, %v2722_v23  ;;  %v1016_v60 = vmul.f32 %v2695_v59, %v473_v32  ;;  %v442_v62 = vunpack.c.h.bf16 %v210_v41  ;;  %v982_v8 = vmul.f32 %v2656_v29, %v439_v18 }
  0x35   : > { %v1393_v23 = vadd.f32 %v1392_v37, %v978_v0  ;;  %v1434_v3 = vadd.f32 %v1433_v50, %v1012_v40  ;;  %v983_v63 = vmul.f32 %v2659_v30, %v440_v45  ;;  %v1017_v9 = vmul.f32 %v2699_v1, %v474_v38 }
  0x36   : > { %v1428_v54 = vadd.f32 %v2725_v25, %v1426_v46  ;;  %v1018_v25 = vmul.f32 %v2702_v2, %v475_v39  ;;  %v1019_v10 = vmul.f32 %v2705_v4, %v476_v47  ;;  %v2774_v11 = vsel %vm1396_vm0, %v1020_v49, 0.0 }
  0x37   : > { %v1394_v6 = vadd.f32 %v1393_v23, %v979_v12  ;;  %v1435_v0 = vadd.f32 %v1434_v3, %v1013_v48  ;;  %v443_v16 = vunpack.c.l.bf16 %v211_v61  ;;  %v984_v20 = vmul.f32 %v2665_v36, %v441_v51 }
  0x38   : > { %1429 = vadd.xlane.f32.xlu1 %v1428_v54  ;;  %v444_v22 = vunpack.c.h.bf16 %v211_v61  ;;  %v445_v24 = vunpack.c.l.bf16 %v212_v5  ;;  %v446_v26 = vunpack.c.h.bf16 %v212_v5  ;;  %v451_v27 = vunpack.c.l.bf16 %v2742_v7  ;;  %v241_v5 = vld [vmem:[%s2646_s4 + $0x124] sm:$0xff] }
  0x39   : > { %v1395_v14 = vadd.f32 %v1394_v6, %v980_v13  ;;  %v1436_v28 = vadd.f32 %v1435_v0, %v1014_v19  ;;  %v985_v32 = vmul.f32 %v2671_v44, %v442_v62  ;;  %v1401_v33 = vadd.f32 %v983_v63, %v982_v8  ;;  %v240_v62 = vld [vmem:[%s2646_s4 + $0x11c] sm:$0xff] }
  0x3a   : > { %v447_v35 = vunpack.c.l.bf16 %v213_v15  ;;  %v448_v12 = vunpack.c.h.bf16 %v213_v15  ;;  %v491_v38 = vunpack.c.l.bf16 %v237_v21  ;;  %v492_v39 = vunpack.c.h.bf16 %v237_v21  ;;  %v2799_v8 = vld [vmem:[%s2646_s4 + $0x100] ss:$52 sps:$4 sm:$0xff]   ;;  %v242_v21 = vld [vmem:[%s2646_s4 + $0x12c] sm:$0xff] }
  0x3b   : > { %v1398_v40 = vadd.f32 %v2750_v17, %v1395_v14  ;;  %v1437_v41 = vadd.f32 %v1436_v28, %v1015_v55  ;;  %v986_v42 = vmul.f32 %v2678_v52, %v443_v16  ;;  %v1402_v43 = vadd.f32 %v1401_v33, %v984_v20  ;;  %v239_v17 = vld [vmem:[%s2646_s4 + $0x114] sm:$0xff] }
  0x3c   : > { %v449_v18 = vunpack.c.l.bf16 %v214_v31  ;;  %v450_v7 = vunpack.c.h.bf16 %v214_v31  ;;  %v987_v13 = vmul.f32 %v2686_v56, %v444_v22  ;;  %v493_v45 = vunpack.c.l.bf16 %v238_v34  ;;  %v230_v20 = vld [vmem:[%s2646_s4 + $0xd0] sm:$0xff]  ;;  %v231_v33 = vld [vmem:[%s2646_s4 + $0xd8] sm:$0xff] }
  0x3d   : > { %1399 = vadd.xlane.f32.xlu0 %v1398_v40  ;;  %v1438_v46 = vadd.f32 %v1437_v41, %v1016_v60  ;;  %v988_v47 = vmul.f32 %v2689_v57, %v445_v24  ;;  %v994_v48 = vmul.f32 %v2681_v53, %v451_v27  ;;  %v1403_v49 = vadd.f32 %v1402_v43, %v985_v32 }
  0x3e   : > { %v989_v37 = vmul.f32 %v2692_v58, %v446_v26  ;;  %v494_v19 = vunpack.c.h.bf16 %v238_v34  ;;  %v1034_v50 = vmul.f32 %v2656_v29, %v491_v38  ;;  %v1035_v51 = vmul.f32 %v2659_v30, %v492_v39 }
  0x3f   : > { %v1439_v54 = vadd.f32 %v1438_v46, %v1017_v9  ;;  %v990_v55 = vmul.f32 %v2695_v59, %v447_v35  ;;  %v991_v60 = vmul.f32 %v2699_v1, %v448_v12  ;;  %v1404_v61 = vadd.f32 %v1403_v49, %v986_v42 }
  0x40   : > { %v992_v23 = vmul.f32 %v2702_v2, %v449_v18  ;;  %v993_v3 = vmul.f32 %v2705_v4, %v450_v7  ;;  %v495_v63 = vunpack.c.l.bf16 %v239_v17  ;;  %v1036_v6 = vmul.f32 %v2665_v36, %v493_v45  ;;  %v232_v18 = vld [vmem:[%s2646_s4 + $0xe0] sm:$0xff] }
  0x41   : > { %v1440_v0 = vadd.f32 %v1439_v54, %v1018_v25  ;;  %v1405_v9 = vadd.f32 %v1404_v61, %v987_v13  ;;  %v2803_v15 = vsel %vm1396_vm0, %v994_v48, 0.0  ;;  %v496_v16 = vunpack.c.h.bf16 %v239_v17 }
  0x42   : > { %v497_v22 = vunpack.c.l.bf16 %v240_v62  ;;  %v498_v24 = vunpack.c.h.bf16 %v240_v62  ;;  %v1037_v26 = vmul.f32 %v2671_v44, %v494_v19  ;;  %v1461_v27 = vadd.f32 %v1035_v51, %v1034_v50 }
  0x43   : > { %v1441_v14 = vadd.f32 %v1440_v0, %v1019_v10  ;;  %v1406_v28 = vadd.f32 %v1405_v9, %v988_v47  ;;  %v499_v31 = vunpack.c.l.bf16 %v241_v5  ;;  %v503_v32 = vunpack.c.h.bf16 %v2799_v8 }
  0x44   : > { %v1038_v25 = vmul.f32 %v2678_v52, %v495_v63  ;;  %v1462_v34 = vadd.f32 %v1461_v27, %v1036_v6  ;;  %v478_v35 = vunpack.c.l.bf16 %v230_v20  ;;  %v479_v12 = vunpack.c.h.bf16 %v230_v20 }
  0x45   : > { %v1443_v38 = vadd.f32 %v2774_v11, %v1441_v14  ;;  %v1407_v39 = vadd.f32 %v1406_v28, %v989_v37  ;;  %v500_v40 = vunpack.c.h.bf16 %v241_v5  ;;  %v501_v41 = vunpack.c.l.bf16 %v242_v21  ;;  %v233_v11 = vld [vmem:[%s2646_s4 + $0xe8] sm:$0xff]  ;;  %v234_v5 = vld [vmem:[%s2646_s4 + $0xf0] sm:$0xff] }
  0x46   : > { %v502_v42 = vunpack.c.h.bf16 %v242_v21  ;;  %v1039_v10 = vmul.f32 %v2686_v56, %v496_v16  ;;  %v1463_v43 = vadd.f32 %v1462_v34, %v1037_v26  ;;  %v480_v7 = vunpack.c.l.bf16 %v231_v33  ;;  %v235_v21 = vld [vmem:[%s2646_s4 + $0xf8] sm:$0xff] }
  0x47   : > { %1444 = vadd.xlane.f32.xlu1 %v1443_v38  ;;  %v1408_v13 = vadd.f32 %v1407_v39, %v990_v55  ;;  %v1040_v45 = vmul.f32 %v2689_v57, %v497_v22  ;;  %v1041_v46 = vmul.f32 %v2692_v58, %v498_v24  ;;  %v1046_v47 = vmul.f32 %v2681_v53, %v503_v32  ;;  %v252_v32 = vld [vmem:[%s2646_s4 + $0x174] sm:$0xff] }
  0x48   : > { %v1464_v48 = vadd.f32 %v1463_v43, %v1038_v25  ;;  %v481_v49 = vunpack.c.h.bf16 %v231_v33  ;;  %v1021_v17 = vmul.f32 %v2656_v29, %v478_v35  ;;  %v1022_v37 = vmul.f32 %v2659_v30, %v479_v12 }
  0x49   : > { %v1409_v19 = vadd.f32 %v1408_v13, %v991_v60  ;;  %v1042_v50 = vmul.f32 %v2695_v59, %v499_v31  ;;  %v1043_v51 = vmul.f32 %v2699_v1, %v500_v40  ;;  %v482_v54 = vunpack.c.l.bf16 %v232_v18  ;;  %v251_v60 = vld [vmem:[%s2646_s4 + $0x16c] sm:$0xff] }
  0x4a   : > { %v1044_v55 = vmul.f32 %v2702_v2, %v501_v41  ;;  %v1045_v61 = vmul.f32 %v2705_v4, %v502_v42  ;;  %v1465_v62 = vadd.f32 %v1464_v48, %v1039_v10  ;;  %v1023_v63 = vmul.f32 %v2665_v36, %v480_v7  ;;  %v253_v42 = vld [vmem:[%s2646_s4 + $0x17c] sm:$0xff] }
  0x4b   : > { %v1410_v6 = vadd.f32 %v1409_v19, %v992_v23  ;;  %v1472_v0 = vsel %vm1396_vm0, %v1046_v47, 0.0  ;;  %v483_v9 = vunpack.c.h.bf16 %v232_v18  ;;  %v484_v16 = vunpack.c.l.bf16 %v233_v11 }
  0x4c   : > { %v1466_v20 = vadd.f32 %v1465_v62, %v1040_v45  ;;  %v485_v22 = vunpack.c.h.bf16 %v233_v11  ;;  %v1024_v24 = vmul.f32 %v2671_v44, %v481_v49  ;;  %v1446_v26 = vadd.f32 %v1022_v37, %v1021_v17  ;;  %v254_v45 = vld [vmem:[%s2646_s4 + $0x184] sm:$0xff] }
  0x4d   : > { %v1411_v27 = vadd.f32 %v1410_v6, %v993_v3  ;;  %v486_v14 = vunpack.c.l.bf16 %v234_v5  ;;  %v490_v28 = vunpack.c.l.bf16 %v2799_v8  ;;  %v1025_v31 = vmul.f32 %v2678_v52, %v482_v54  ;;  %v255_v54 = vld [vmem:[%s2646_s4 + $0x18c] sm:$0xff] }
  0x4e   : > { %v1467_v23 = vadd.f32 %v1466_v20, %v1041_v46  ;;  %v1447_v33 = vadd.f32 %v1446_v26, %v1023_v63  ;;  %v517_v25 = vunpack.c.l.bf16 %v251_v60  ;;  %v518_v34 = vunpack.c.h.bf16 %v251_v60  ;;  %v2841_v46 = vld [vmem:[%s2646_s4 + $0x168] ss:$52 sps:$4 sm:$0xff]  }
  0x4f   : > { %v1413_v35 = vadd.f32 %v2803_v15, %v1411_v27  ;;  %v487_v12 = vunpack.c.h.bf16 %v234_v5  ;;  %v488_v38 = vunpack.c.l.bf16 %v235_v21  ;;  %v489_v39 = vunpack.c.h.bf16 %v235_v21  ;;  %v244_v5 = vld [vmem:[%s2646_s4 + $0x138] sm:$0xff] }
  0x50   : > { %v1468_v40 = vadd.f32 %v1467_v23, %v1042_v50  ;;  %v1026_v3 = vmul.f32 %v2686_v56, %v483_v9  ;;  %v1448_v41 = vadd.f32 %v1447_v33, %v1024_v24  ;;  %v519_v8 = vunpack.c.l.bf16 %v252_v32  ;;  %v256_v21 = vld [vmem:[%s2646_s4 + $0x194] sm:$0xff] }
  0x51   : > { %1414 = vadd.xlane.f32.xlu0 %v1413_v35  ;;  %v1027_v10 = vmul.f32 %v2689_v57, %v484_v16  ;;  %v1028_v43 = vmul.f32 %v2692_v58, %v485_v22  ;;  %v1033_v18 = vmul.f32 %v2681_v53, %v490_v28  ;;  %v520_v15 = vunpack.c.h.bf16 %v252_v32 }
  0x52   : > { %v1469_v7 = vadd.f32 %v1468_v40, %v1043_v51  ;;  %v1449_v13 = vadd.f32 %v1448_v41, %v1025_v31  ;;  %v1060_v47 = vmul.f32 %v2656_v29, %v517_v25  ;;  %v1061_v48 = vmul.f32 %v2659_v30, %v518_v34 }
  0x53   : > { %v1029_v11 = vmul.f32 %v2695_v59, %v486_v14  ;;  %v1030_v49 = vmul.f32 %v2699_v1, %v487_v12  ;;  %v1031_v17 = vmul.f32 %v2702_v2, %v488_v38  ;;  %v521_v37 = vunpack.c.l.bf16 %v253_v42  ;;  %v245_v14 = vld [vmem:[%s2646_s4 + $0x140] sm:$0xff] }
  0x54   : > { %v1470_v19 = vadd.f32 %v1469_v7, %v1044_v55  ;;  %v1032_v50 = vmul.f32 %v2705_v4, %v489_v39  ;;  %v1450_v51 = vadd.f32 %v1449_v13, %v1026_v3  ;;  %v1062_v62 = vmul.f32 %v2665_v36, %v519_v8 }
  0x55   : > { %v1457_v63 = vsel %vm1396_vm0, %v1033_v18, 0.0  ;;  %v522_v6 = vunpack.c.h.bf16 %v253_v42  ;;  %v523_v9 = vunpack.c.l.bf16 %v254_v45  ;;  %v529_v16 = vunpack.c.h.bf16 %v2841_v46  ;;  %v246_v42 = vld [vmem:[%s2646_s4 + $0x148] sm:$0xff]  ;;  %v247_v18 = vld [vmem:[%s2646_s4 + $0x150] sm:$0xff] }
  0x56   : > { %v1471_v60 = vadd.f32 %v1470_v19, %v1045_v61  ;;  %v1451_v20 = vadd.f32 %v1450_v51, %v1027_v10  ;;  %v1063_v22 = vmul.f32 %v2671_v44, %v520_v15  ;;  %v1491_v55 = vadd.f32 %v1061_v48, %v1060_v47 }
  0x57   : > { %v524_v24 = vunpack.c.h.bf16 %v254_v45  ;;  %v525_v26 = vunpack.c.l.bf16 %v255_v54  ;;  %v1064_v27 = vmul.f32 %v2678_v52, %v521_v37  ;;  %v504_v28 = vunpack.c.l.bf16 %v244_v5 }
  0x58   : > { %v1473_v31 = vadd.f32 %v1472_v0, %v1471_v60  ;;  %v1452_v32 = vadd.f32 %v1451_v20, %v1028_v43  ;;  %v1492_v23 = vadd.f32 %v1491_v55, %v1062_v62  ;;  %v505_v33 = vunpack.c.h.bf16 %v244_v5  ;;  %v249_v20 = vld [vmem:[%s2646_s4 + $0x160] sm:$0xff] }
  0x59   : > { %v526_v25 = vunpack.c.h.bf16 %v255_v54  ;;  %v527_v34 = vunpack.c.l.bf16 %v256_v21  ;;  %v528_v61 = vunpack.c.h.bf16 %v256_v21  ;;  %v1072_v35 = vmul.f32 %v2681_v53, %v529_v16  ;;  %v265_v54 = vld [vmem:[%s2646_s4 + $0x1d4] sm:$0xff]  ;;  %v266_v55 = vld [vmem:[%s2646_s4 + $0x1dc] sm:$0xff] }
  0x5a   : > { %1474 = vadd.xlane.f32.xlu1 %v1473_v31  ;;  %v1453_v12 = vadd.f32 %v1452_v32, %v1029_v11  ;;  %v1065_v38 = vmul.f32 %v2686_v56, %v522_v6  ;;  %v1493_v39 = vadd.f32 %v1492_v23, %v1063_v22  ;;  %v506_v40 = vunpack.c.l.bf16 %v245_v14 }
  0x5b   : > { %v1066_v3 = vmul.f32 %v2689_v57, %v523_v9  ;;  %v1067_v0 = vmul.f32 %v2692_v58, %v524_v24  ;;  %v1068_v41 = vmul.f32 %v2695_v59, %v525_v26  ;;  %v507_v8 = vunpack.c.h.bf16 %v245_v14 }
  0x5c   : > { %v1454_v10 = vadd.f32 %v1453_v12, %v1030_v49  ;;  %v1494_v43 = vadd.f32 %v1493_v39, %v1064_v27  ;;  %v1047_v15 = vmul.f32 %v2656_v29, %v504_v28  ;;  %v1048_v7 = vmul.f32 %v2659_v30, %v505_v33  ;;  %v248_v49 = vld [vmem:[%s2646_s4 + $0x158] sm:$0xff] }
  0x5d   : > { %v1069_v13 = vmul.f32 %v2699_v1, %v526_v25  ;;  %v1070_v45 = vmul.f32 %v2702_v2, %v527_v34  ;;  %v1071_v47 = vmul.f32 %v2705_v4, %v528_v61  ;;  %v2871_v48 = vsel %vm1396_vm0, %v1072_v35, 0.0 }
  0x5e   : > { %v1455_v11 = vadd.f32 %v1454_v10, %v1031_v17  ;;  %v1495_v37 = vadd.f32 %v1494_v43, %v1065_v38  ;;  %v508_v19 = vunpack.c.l.bf16 %v246_v42  ;;  %v1049_v51 = vmul.f32 %v2665_v36, %v506_v40 }
  0x5f   : > { %v509_v62 = vunpack.c.h.bf16 %v246_v42  ;;  %v510_v5 = vunpack.c.l.bf16 %v247_v18  ;;  %v511_v6 = vunpack.c.h.bf16 %v247_v18  ;;  %v516_v9 = vunpack.c.l.bf16 %v2841_v46  ;;  %v269_v18 = vld [vmem:[%s2646_s4 + $0x1f4] sm:$0xff] }
  0x60   : > { %v1456_v16 = vadd.f32 %v1455_v11, %v1032_v50  ;;  %v1496_v60 = vadd.f32 %v1495_v37, %v1066_v3  ;;  %v1050_v21 = vmul.f32 %v2671_v44, %v507_v8  ;;  %v1476_v22 = vadd.f32 %v1048_v7, %v1047_v15  ;;  %v268_v8 = vld [vmem:[%s2646_s4 + $0x1ec] sm:$0xff] }
  0x61   : > { %v512_v24 = vunpack.c.l.bf16 %v248_v49  ;;  %v513_v17 = vunpack.c.h.bf16 %v248_v49  ;;  %v543_v26 = vunpack.c.l.bf16 %v265_v54  ;;  %v544_v27 = vunpack.c.h.bf16 %v265_v54  ;;  %v2895_v15 = vld [vmem:[%s2646_s4 + $0x1d0] ss:$52 sps:$4 sm:$0xff]   ;;  %v270_v54 = vld [vmem:[%s2646_s4 + $0x1fc] sm:$0xff] }
  0x62   : > { %v1458_v14 = vadd.f32 %v1457_v63, %v1456_v16  ;;  %v1497_v28 = vadd.f32 %v1496_v60, %v1067_v0  ;;  %v1051_v31 = vmul.f32 %v2678_v52, %v508_v19  ;;  %v1477_v32 = vadd.f32 %v1476_v22, %v1049_v51  ;;  %v267_v63 = vld [vmem:[%s2646_s4 + $0x1e4] sm:$0xff] }
  0x63   : > { %v514_v23 = vunpack.c.l.bf16 %v249_v20  ;;  %v515_v33 = vunpack.c.h.bf16 %v249_v20  ;;  %v1052_v46 = vmul.f32 %v2686_v56, %v509_v62  ;;  %v545_v50 = vunpack.c.l.bf16 %v266_v55  ;;  %v258_v51 = vld [vmem:[%s2646_s4 + $0x1a0] sm:$0xff]  ;;  %v259_v22 = vld [vmem:[%s2646_s4 + $0x1a8] sm:$0xff] }
  0x64   : > { %1459 = vadd.xlane.f32.xlu0 %v1458_v14  ;;  %v1498_v25 = vadd.f32 %v1497_v28, %v1068_v41  ;;  %v1053_v34 = vmul.f32 %v2689_v57, %v510_v5  ;;  %v1059_v61 = vmul.f32 %v2681_v53, %v516_v9  ;;  %v1478_v35 = vadd.f32 %v1477_v32, %v1050_v21 }
  0x65   : > { %v1054_v12 = vmul.f32 %v2692_v58, %v511_v6  ;;  %v546_v38 = vunpack.c.h.bf16 %v266_v55  ;;  %v1086_v39 = vmul.f32 %v2656_v29, %v543_v26  ;;  %v1087_v40 = vmul.f32 %v2659_v30, %v544_v27 }
  0x66   : > { %v1499_v3 = vadd.f32 %v1498_v25, %v1069_v13  ;;  %v1055_v0 = vmul.f32 %v2695_v59, %v512_v24  ;;  %v1056_v41 = vmul.f32 %v2699_v1, %v513_v17  ;;  %v1479_v42 = vadd.f32 %v1478_v35, %v1051_v31 }
  0x67   : > { %v1057_v10 = vmul.f32 %v2702_v2, %v514_v23  ;;  %v1058_v43 = vmul.f32 %v2705_v4, %v515_v33  ;;  %v547_v7 = vunpack.c.l.bf16 %v267_v63  ;;  %v1088_v11 = vmul.f32 %v2665_v36, %v545_v50  ;;  %v260_v23 = vld [vmem:[%s2646_s4 + $0x1b0] sm:$0xff] }
  0x68   : > { %v1500_v37 = vadd.f32 %v1499_v3, %v1070_v45  ;;  %v1480_v13 = vadd.f32 %v1479_v42, %v1052_v46  ;;  %v2899_v49 = vsel %vm1396_vm0, %v1059_v61, 0.0  ;;  %v548_v19 = vunpack.c.h.bf16 %v267_v63 }
  0x69   : > { %v549_v62 = vunpack.c.l.bf16 %v268_v8  ;;  %v550_v5 = vunpack.c.h.bf16 %v268_v8  ;;  %v1089_v6 = vmul.f32 %v2671_v44, %v546_v38  ;;  %v1521_v9 = vadd.f32 %v1087_v40, %v1086_v39 }
  0x6a   : > { %v1501_v16 = vadd.f32 %v1500_v37, %v1071_v47  ;;  %v1481_v60 = vadd.f32 %v1480_v13, %v1053_v34  ;;  %v551_v20 = vunpack.c.l.bf16 %v269_v18  ;;  %v555_v21 = vunpack.c.h.bf16 %v2895_v15 }
  0x6b   : > { %v1090_v45 = vmul.f32 %v2678_v52, %v547_v7  ;;  %v1522_v55 = vadd.f32 %v1521_v9, %v1088_v11  ;;  %v530_v24 = vunpack.c.l.bf16 %v258_v51  ;;  %v531_v17 = vunpack.c.h.bf16 %v258_v51 }
  0x6c   : > { %v1503_v26 = vadd.f32 %v2871_v48, %v1501_v16  ;;  %v1482_v27 = vadd.f32 %v1481_v60, %v1054_v12  ;;  %v552_v14 = vunpack.c.h.bf16 %v269_v18  ;;  %v553_v28 = vunpack.c.l.bf16 %v270_v54  ;;  %v261_v48 = vld [vmem:[%s2646_s4 + $0x1b8] sm:$0xff]  ;;  %v262_v18 = vld [vmem:[%s2646_s4 + $0x1c0] sm:$0xff] }
  0x6d   : > { %v554_v31 = vunpack.c.h.bf16 %v270_v54  ;;  %v1091_v47 = vmul.f32 %v2686_v56, %v548_v19  ;;  %v1523_v32 = vadd.f32 %v1522_v55, %v1089_v6  ;;  %v532_v33 = vunpack.c.l.bf16 %v259_v22  ;;  %v263_v54 = vld [vmem:[%s2646_s4 + $0x1c8] sm:$0xff] }
  0x6e   : > { %1504 = vadd.xlane.f32.xlu1 %v1503_v26  ;;  %v1483_v46 = vadd.f32 %v1482_v27, %v1055_v0  ;;  %v1092_v50 = vmul.f32 %v2689_v57, %v549_v62  ;;  %v1093_v25 = vmul.f32 %v2692_v58, %v550_v5  ;;  %v1098_v34 = vmul.f32 %v2681_v53, %v555_v21  ;;  %v280_v21 = vld [vmem:[%s2646_s4 + $0x244] sm:$0xff] }
  0x6f   : > { %v1524_v61 = vadd.f32 %v1523_v32, %v1090_v45  ;;  %v533_v35 = vunpack.c.h.bf16 %v259_v22  ;;  %v1073_v63 = vmul.f32 %v2656_v29, %v530_v24  ;;  %v1074_v12 = vmul.f32 %v2659_v30, %v531_v17 }
  0x70   : > { %v1484_v38 = vadd.f32 %v1483_v46, %v1056_v41  ;;  %v1094_v39 = vmul.f32 %v2695_v59, %v551_v20  ;;  %v1095_v40 = vmul.f32 %v2699_v1, %v552_v14  ;;  %v534_v3 = vunpack.c.l.bf16 %v260_v23  ;;  %v279_v41 = vld [vmem:[%s2646_s4 + $0x23c] sm:$0xff] }
  0x71   : > { %v1096_v0 = vmul.f32 %v2702_v2, %v553_v28  ;;  %v1097_v42 = vmul.f32 %v2705_v4, %v554_v31  ;;  %v1525_v8 = vadd.f32 %v1524_v61, %v1091_v47  ;;  %v1075_v7 = vmul.f32 %v2665_v36, %v532_v33  ;;  %v281_v31 = vld [vmem:[%s2646_s4 + $0x24c] sm:$0xff] }
  0x72   : > { %v1485_v11 = vadd.f32 %v1484_v38, %v1057_v10  ;;  %v1532_v37 = vsel %vm1396_vm0, %v1098_v34, 0.0  ;;  %v535_v13 = vunpack.c.h.bf16 %v260_v23  ;;  %v536_v19 = vunpack.c.l.bf16 %v261_v48 }
  0x73   : > { %v1526_v51 = vadd.f32 %v1525_v8, %v1092_v50  ;;  %v537_v62 = vunpack.c.h.bf16 %v261_v48  ;;  %v1076_v5 = vmul.f32 %v2671_v44, %v533_v35  ;;  %v1506_v6 = vadd.f32 %v1074_v12, %v1073_v63  ;;  %v282_v50 = vld [vmem:[%s2646_s4 + $0x254] sm:$0xff] }
  0x74   : > { %v1486_v9 = vadd.f32 %v1485_v11, %v1058_v43  ;;  %v538_v16 = vunpack.c.l.bf16 %v262_v18  ;;  %v542_v60 = vunpack.c.l.bf16 %v2895_v15  ;;  %v1077_v20 = vmul.f32 %v2678_v52, %v534_v3  ;;  %v283_v3 = vld [vmem:[%s2646_s4 + $0x25c] sm:$0xff] }
  0x75   : > { %v1527_v10 = vadd.f32 %v1526_v51, %v1093_v25  ;;  %v1507_v22 = vadd.f32 %v1506_v6, %v1075_v7  ;;  %v569_v45 = vunpack.c.l.bf16 %v279_v41  ;;  %v570_v55 = vunpack.c.h.bf16 %v279_v41  ;;  %v2937_v25 = vld [vmem:[%s2646_s4 + $0x238] ss:$52 sps:$4 sm:$0xff]  }
  0x76   : > { %v1488_v24 = vadd.f32 %v2899_v49, %v1486_v9  ;;  %v539_v17 = vunpack.c.h.bf16 %v262_v18  ;;  %v540_v26 = vunpack.c.l.bf16 %v263_v54  ;;  %v541_v27 = vunpack.c.h.bf16 %v263_v54  ;;  %v272_v18 = vld [vmem:[%s2646_s4 + $0x208] sm:$0xff] }
  0x77   : > { %v1528_v14 = vadd.f32 %v1527_v10, %v1094_v39  ;;  %v1078_v43 = vmul.f32 %v2686_v56, %v535_v13  ;;  %v1508_v28 = vadd.f32 %v1507_v22, %v1076_v5  ;;  %v571_v15 = vunpack.c.l.bf16 %v280_v21  ;;  %v284_v54 = vld [vmem:[%s2646_s4 + $0x264] sm:$0xff] }
  0x78   : > { %1489 = vadd.xlane.f32.xlu0 %v1488_v24  ;;  %v1079_v47 = vmul.f32 %v2689_v57, %v536_v19  ;;  %v1080_v32 = vmul.f32 %v2692_v58, %v537_v62  ;;  %v1085_v23 = vmul.f32 %v2681_v53, %v542_v60  ;;  %v572_v49 = vunpack.c.h.bf16 %v280_v21 }
  0x79   : > { %v1529_v33 = vadd.f32 %v1528_v14, %v1095_v40  ;;  %v1509_v46 = vadd.f32 %v1508_v28, %v1077_v20  ;;  %v1112_v34 = vmul.f32 %v2656_v29, %v569_v45  ;;  %v1113_v61 = vmul.f32 %v2659_v30, %v570_v55 }
  0x7a   : > { %v1081_v48 = vmul.f32 %v2695_v59, %v538_v16  ;;  %v1082_v35 = vmul.f32 %v2699_v1, %v539_v17  ;;  %v1083_v63 = vmul.f32 %v2702_v2, %v540_v26  ;;  %v573_v12 = vunpack.c.l.bf16 %v281_v31  ;;  %v273_v16 = vld [vmem:[%s2646_s4 + $0x210] sm:$0xff] }
  0x7b   : > { %v1530_v38 = vadd.f32 %v1529_v33, %v1096_v0  ;;  %v1084_v39 = vmul.f32 %v2705_v4, %v541_v27  ;;  %v1510_v40 = vadd.f32 %v1509_v46, %v1078_v43  ;;  %v1114_v8 = vmul.f32 %v2665_v36, %v571_v15 }
  0x7c   : > { %v1517_v7 = vsel %vm1396_vm0, %v1085_v23, 0.0  ;;  %v574_v11 = vunpack.c.h.bf16 %v281_v31  ;;  %v575_v13 = vunpack.c.l.bf16 %v282_v50  ;;  %v581_v19 = vunpack.c.h.bf16 %v2937_v25  ;;  %v274_v31 = vld [vmem:[%s2646_s4 + $0x218] sm:$0xff]  ;;  %v275_v23 = vld [vmem:[%s2646_s4 + $0x220] sm:$0xff] }
  0x7d   : > { %v1531_v41 = vadd.f32 %v1530_v38, %v1097_v42  ;;  %v1511_v51 = vadd.f32 %v1510_v40, %v1079_v47  ;;  %v1115_v62 = vmul.f32 %v2671_v44, %v572_v49  ;;  %v1551_v0 = vadd.f32 %v1113_v61, %v1112_v34 }
  0x7e   : > { %v576_v5 = vunpack.c.h.bf16 %v282_v50  ;;  %v577_v6 = vunpack.c.l.bf16 %v283_v3  ;;  %v1116_v9 = vmul.f32 %v2678_v52, %v573_v12  ;;  %v556_v60 = vunpack.c.l.bf16 %v272_v18 }
  0x7f   : > { %v1533_v20 = vadd.f32 %v1532_v37, %v1531_v41  ;;  %v1512_v21 = vadd.f32 %v1511_v51, %v1080_v32  ;;  %v1552_v10 = vadd.f32 %v1551_v0, %v1114_v8  ;;  %v557_v22 = vunpack.c.h.bf16 %v272_v18  ;;  %v277_v51 = vld [vmem:[%s2646_s4 + $0x230] sm:$0xff] }
  0x80   : > { %v578_v45 = vunpack.c.h.bf16 %v283_v3  ;;  %v579_v55 = vunpack.c.l.bf16 %v284_v54  ;;  %v580_v42 = vunpack.c.h.bf16 %v284_v54  ;;  %v1124_v24 = vmul.f32 %v2681_v53, %v581_v19  ;;  %v293_v3 = vld [vmem:[%s2646_s4 + $0x2a4] sm:$0xff]  ;;  %v294_v0 = vld [vmem:[%s2646_s4 + $0x2ac] sm:$0xff] }
  0x81   : > { %1534 = vadd.xlane.f32.xlu1 %v1533_v20  ;;  %v1513_v17 = vadd.f32 %v1512_v21, %v1081_v48  ;;  %v1117_v26 = vmul.f32 %v2686_v56, %v574_v11  ;;  %v1553_v27 = vadd.f32 %v1552_v10, %v1115_v62  ;;  %v558_v14 = vunpack.c.l.bf16 %v273_v16 }
  0x82   : > { %v1118_v43 = vmul.f32 %v2689_v57, %v575_v13  ;;  %v1119_v37 = vmul.f32 %v2692_v58, %v576_v5  ;;  %v1120_v28 = vmul.f32 %v2695_v59, %v577_v6  ;;  %v559_v15 = vunpack.c.h.bf16 %v273_v16 }
  0x83   : > { %v1514_v47 = vadd.f32 %v1513_v17, %v1082_v35  ;;  %v1554_v32 = vadd.f32 %v1553_v27, %v1116_v9  ;;  %v1099_v49 = vmul.f32 %v2656_v29, %v556_v60  ;;  %v1100_v33 = vmul.f32 %v2659_v30, %v557_v22  ;;  %v276_v35 = vld [vmem:[%s2646_s4 + $0x228] sm:$0xff] }
  0x84   : > { %v1121_v46 = vmul.f32 %v2699_v1, %v578_v45  ;;  %v1122_v50 = vmul.f32 %v2702_v2, %v579_v55  ;;  %v1123_v34 = vmul.f32 %v2705_v4, %v580_v42  ;;  %v2967_v61 = vsel %vm1396_vm0, %v1124_v24, 0.0 }
  0x85   : > { %v1515_v48 = vadd.f32 %v1514_v47, %v1083_v63  ;;  %v1555_v12 = vadd.f32 %v1554_v32, %v1117_v26  ;;  %v560_v38 = vunpack.c.l.bf16 %v274_v31  ;;  %v1101_v40 = vmul.f32 %v2665_v36, %v558_v14 }
  0x86   : > { %v561_v8 = vunpack.c.h.bf16 %v274_v31  ;;  %v562_v18 = vunpack.c.l.bf16 %v275_v23  ;;  %v563_v11 = vunpack.c.h.bf16 %v275_v23  ;;  %v568_v13 = vunpack.c.l.bf16 %v2937_v25  ;;  %v297_v23 = vld [vmem:[%s2646_s4 + $0x2c4] sm:$0xff] }
  0x87   : > { %v1516_v19 = vadd.f32 %v1515_v48, %v1084_v39  ;;  %v1556_v41 = vadd.f32 %v1555_v12, %v1118_v43  ;;  %v1102_v54 = vmul.f32 %v2671_v44, %v559_v15  ;;  %v1536_v62 = vadd.f32 %v1100_v33, %v1099_v49  ;;  %v296_v15 = vld [vmem:[%s2646_s4 + $0x2bc] sm:$0xff] }
  0x88   : > { %v564_v5 = vunpack.c.l.bf16 %v276_v35  ;;  %v565_v63 = vunpack.c.h.bf16 %v276_v35  ;;  %v595_v6 = vunpack.c.l.bf16 %v293_v3  ;;  %v596_v9 = vunpack.c.h.bf16 %v293_v3  ;;  %v2991_v49 = vld [vmem:[%s2646_s4 + $0x2a0] ss:$52 sps:$4 sm:$0xff]   ;;  %v298_v3 = vld [vmem:[%s2646_s4 + $0x2cc] sm:$0xff] }
  0x89   : > { %v1518_v16 = vadd.f32 %v1517_v7, %v1516_v19  ;;  %v1557_v60 = vadd.f32 %v1556_v41, %v1119_v37  ;;  %v1103_v20 = vmul.f32 %v2678_v52, %v560_v38  ;;  %v1537_v21 = vadd.f32 %v1536_v62, %v1101_v40  ;;  %v295_v7 = vld [vmem:[%s2646_s4 + $0x2b4] sm:$0xff] }
  0x8a   : > { %v566_v10 = vunpack.c.l.bf16 %v277_v51  ;;  %v567_v22 = vunpack.c.h.bf16 %v277_v51  ;;  %v1104_v25 = vmul.f32 %v2686_v56, %v561_v8  ;;  %v597_v39 = vunpack.c.l.bf16 %v294_v0  ;;  %v286_v40 = vld [vmem:[%s2646_s4 + $0x270] sm:$0xff]  ;;  %v287_v62 = vld [vmem:[%s2646_s4 + $0x278] sm:$0xff] }
  0x8b   : > { %1519 = vadd.xlane.f32.xlu0 %v1518_v16  ;;  %v1558_v45 = vadd.f32 %v1557_v60, %v1120_v28  ;;  %v1105_v55 = vmul.f32 %v2689_v57, %v562_v18  ;;  %v1111_v42 = vmul.f32 %v2681_v53, %v568_v13  ;;  %v1538_v24 = vadd.f32 %v1537_v21, %v1102_v54 }
  0x8c   : > { %v1106_v17 = vmul.f32 %v2692_v58, %v563_v11  ;;  %v598_v26 = vunpack.c.h.bf16 %v294_v0  ;;  %v1138_v27 = vmul.f32 %v2656_v29, %v595_v6  ;;  %v1139_v14 = vmul.f32 %v2659_v30, %v596_v9 }
  0x8d   : > { %v1559_v43 = vadd.f32 %v1558_v45, %v1121_v46  ;;  %v1107_v37 = vmul.f32 %v2695_v59, %v564_v5  ;;  %v1108_v28 = vmul.f32 %v2699_v1, %v565_v63  ;;  %v1539_v31 = vadd.f32 %v1538_v24, %v1103_v20 }
  0x8e   : > { %v1109_v47 = vmul.f32 %v2702_v2, %v566_v10  ;;  %v1110_v32 = vmul.f32 %v2705_v4, %v567_v22  ;;  %v599_v33 = vunpack.c.l.bf16 %v295_v7  ;;  %v1140_v48 = vmul.f32 %v2665_v36, %v597_v39  ;;  %v288_v10 = vld [vmem:[%s2646_s4 + $0x280] sm:$0xff] }
  0x8f   : > { %v1560_v12 = vadd.f32 %v1559_v43, %v1122_v50  ;;  %v1540_v46 = vadd.f32 %v1539_v31, %v1104_v25  ;;  %v2995_v35 = vsel %vm1396_vm0, %v1111_v42, 0.0  ;;  %v600_v38 = vunpack.c.h.bf16 %v295_v7 }
  0x90   : > { %v601_v8 = vunpack.c.l.bf16 %v296_v15  ;;  %v602_v18 = vunpack.c.h.bf16 %v296_v15  ;;  %v1141_v11 = vmul.f32 %v2671_v44, %v598_v26  ;;  %v1581_v13 = vadd.f32 %v1139_v14, %v1138_v27 }
  0x91   : > { %v1561_v19 = vadd.f32 %v1560_v12, %v1123_v34  ;;  %v1541_v41 = vadd.f32 %v1540_v46, %v1105_v55  ;;  %v603_v51 = vunpack.c.l.bf16 %v297_v23  ;;  %v607_v54 = vunpack.c.h.bf16 %v2991_v49 }
  0x92   : > { %v1142_v50 = vmul.f32 %v2678_v52, %v599_v33  ;;  %v1582_v0 = vadd.f32 %v1581_v13, %v1140_v48  ;;  %v582_v5 = vunpack.c.l.bf16 %v286_v40  ;;  %v583_v63 = vunpack.c.h.bf16 %v286_v40 }
  0x93   : > { %v1563_v6 = vadd.f32 %v2967_v61, %v1561_v19  ;;  %v1542_v9 = vadd.f32 %v1541_v41, %v1106_v17  ;;  %v604_v16 = vunpack.c.h.bf16 %v297_v23  ;;  %v605_v60 = vunpack.c.l.bf16 %v298_v3  ;;  %v289_v61 = vld [vmem:[%s2646_s4 + $0x288] sm:$0xff]  ;;  %v290_v23 = vld [vmem:[%s2646_s4 + $0x290] sm:$0xff] }
  0x94   : > { %v606_v20 = vunpack.c.h.bf16 %v298_v3  ;;  %v1143_v34 = vmul.f32 %v2686_v56, %v600_v38  ;;  %v1583_v21 = vadd.f32 %v1582_v0, %v1141_v11  ;;  %v584_v22 = vunpack.c.l.bf16 %v287_v62  ;;  %v291_v3 = vld [vmem:[%s2646_s4 + $0x298] sm:$0xff] }
  0x95   : > { %1564 = vadd.xlane.f32.xlu1 %v1563_v6  ;;  %v1543_v25 = vadd.f32 %v1542_v9, %v1107_v37  ;;  %v1144_v39 = vmul.f32 %v2689_v57, %v601_v8  ;;  %v1145_v45 = vmul.f32 %v2692_v58, %v602_v18  ;;  %v1150_v55 = vmul.f32 %v2681_v53, %v607_v54  ;;  %v308_v54 = vld [vmem:[%s2646_s4 + $0x314] sm:$0xff] }
  0x96   : > { %v1584_v42 = vadd.f32 %v1583_v21, %v1142_v50  ;;  %v585_v24 = vunpack.c.h.bf16 %v287_v62  ;;  %v1125_v7 = vmul.f32 %v2656_v29, %v582_v5  ;;  %v1126_v17 = vmul.f32 %v2659_v30, %v583_v63 }
  0x97   : > { %v1544_v26 = vadd.f32 %v1543_v25, %v1108_v28  ;;  %v1146_v27 = vmul.f32 %v2695_v59, %v603_v51  ;;  %v1147_v14 = vmul.f32 %v2699_v1, %v604_v16  ;;  %v586_v43 = vunpack.c.l.bf16 %v288_v10  ;;  %v307_v28 = vld [vmem:[%s2646_s4 + $0x30c] sm:$0xff] }
  0x98   : > { %v1148_v37 = vmul.f32 %v2702_v2, %v605_v60  ;;  %v1149_v31 = vmul.f32 %v2705_v4, %v606_v20  ;;  %v1585_v15 = vadd.f32 %v1584_v42, %v1143_v34  ;;  %v1127_v33 = vmul.f32 %v2665_v36, %v584_v22  ;;  %v309_v20 = vld [vmem:[%s2646_s4 + $0x31c] sm:$0xff] }
  0x99   : > { %v1545_v48 = vadd.f32 %v1544_v26, %v1109_v47  ;;  %v1592_v12 = vsel %vm1396_vm0, %v1150_v55, 0.0  ;;  %v587_v46 = vunpack.c.h.bf16 %v288_v10  ;;  %v588_v38 = vunpack.c.l.bf16 %v289_v61 }
  0x9a   : > { %v1586_v40 = vadd.f32 %v1585_v15, %v1144_v39  ;;  %v589_v8 = vunpack.c.h.bf16 %v289_v61  ;;  %v1128_v18 = vmul.f32 %v2671_v44, %v585_v24  ;;  %v1566_v11 = vadd.f32 %v1126_v17, %v1125_v7  ;;  %v310_v39 = vld [vmem:[%s2646_s4 + $0x324] sm:$0xff] }
  0x9b   : > { %v1546_v13 = vadd.f32 %v1545_v48, %v1110_v32  ;;  %v590_v19 = vunpack.c.l.bf16 %v290_v23  ;;  %v594_v41 = vunpack.c.l.bf16 %v2991_v49  ;;  %v1129_v51 = vmul.f32 %v2678_v52, %v586_v43  ;;  %v311_v43 = vld [vmem:[%s2646_s4 + $0x32c] sm:$0xff] }
  0x9c   : > { %v1587_v47 = vadd.f32 %v1586_v40, %v1145_v45  ;;  %v1567_v62 = vadd.f32 %v1566_v11, %v1127_v33  ;;  %v621_v50 = vunpack.c.l.bf16 %v307_v28  ;;  %v622_v0 = vunpack.c.h.bf16 %v307_v28  ;;  %v3033_v45 = vld [vmem:[%s2646_s4 + $0x308] ss:$52 sps:$4 sm:$0xff]  }
  0x9d   : > { %v1548_v5 = vadd.f32 %v2995_v35, %v1546_v13  ;;  %v591_v63 = vunpack.c.h.bf16 %v290_v23  ;;  %v592_v6 = vunpack.c.l.bf16 %v291_v3  ;;  %v593_v9 = vunpack.c.h.bf16 %v291_v3  ;;  %v300_v23 = vld [vmem:[%s2646_s4 + $0x2d8] sm:$0xff] }
  0x9e   : > { %v1588_v16 = vadd.f32 %v1587_v47, %v1146_v27  ;;  %v1130_v32 = vmul.f32 %v2686_v56, %v587_v46  ;;  %v1568_v60 = vadd.f32 %v1567_v62, %v1128_v18  ;;  %v623_v49 = vunpack.c.l.bf16 %v308_v54  ;;  %v312_v3 = vld [vmem:[%s2646_s4 + $0x334] sm:$0xff] }
  0x9f   : > { %1549 = vadd.xlane.f32.xlu0 %v1548_v5  ;;  %v1131_v34 = vmul.f32 %v2689_v57, %v588_v38  ;;  %v1132_v21 = vmul.f32 %v2692_v58, %v589_v8  ;;  %v1137_v10 = vmul.f32 %v2681_v53, %v594_v41  ;;  %v624_v35 = vunpack.c.h.bf16 %v308_v54 }
  0xa0   : > { %v1589_v22 = vadd.f32 %v1588_v16, %v1147_v14  ;;  %v1569_v25 = vadd.f32 %v1568_v60, %v1129_v51  ;;  %v1164_v55 = vmul.f32 %v2656_v29, %v621_v50  ;;  %v1165_v42 = vmul.f32 %v2659_v30, %v622_v0 }
  0xa1   : > { %v1133_v61 = vmul.f32 %v2695_v59, %v590_v19  ;;  %v1134_v24 = vmul.f32 %v2699_v1, %v591_v63  ;;  %v1135_v7 = vmul.f32 %v2702_v2, %v592_v6  ;;  %v625_v17 = vunpack.c.l.bf16 %v309_v20  ;;  %v301_v19 = vld [vmem:[%s2646_s4 + $0x2e0] sm:$0xff] }
  0xa2   : > { %v1590_v26 = vadd.f32 %v1589_v22, %v1148_v37  ;;  %v1136_v27 = vmul.f32 %v2705_v4, %v593_v9  ;;  %v1570_v14 = vadd.f32 %v1569_v25, %v1130_v32  ;;  %v1166_v15 = vmul.f32 %v2665_v36, %v623_v49 }
  0xa3   : > { %v1577_v33 = vsel %vm1396_vm0, %v1137_v10, 0.0  ;;  %v626_v48 = vunpack.c.h.bf16 %v309_v20  ;;  %v627_v46 = vunpack.c.l.bf16 %v310_v39  ;;  %v633_v38 = vunpack.c.h.bf16 %v3033_v45  ;;  %v302_v20 = vld [vmem:[%s2646_s4 + $0x2e8] sm:$0xff]  ;;  %v303_v10 = vld [vmem:[%s2646_s4 + $0x2f0] sm:$0xff] }
  0xa4   : > { %v1591_v28 = vadd.f32 %v1590_v26, %v1149_v31  ;;  %v1571_v40 = vadd.f32 %v1570_v14, %v1131_v34  ;;  %v1167_v8 = vmul.f32 %v2671_v44, %v624_v35  ;;  %v1611_v37 = vadd.f32 %v1165_v42, %v1164_v55 }
  0xa5   : > { %v628_v18 = vunpack.c.h.bf16 %v310_v39  ;;  %v629_v11 = vunpack.c.l.bf16 %v311_v43  ;;  %v1168_v13 = vmul.f32 %v2678_v52, %v625_v17  ;;  %v608_v41 = vunpack.c.l.bf16 %v300_v23 }
  0xa6   : > { %v1593_v51 = vadd.f32 %v1592_v12, %v1591_v28  ;;  %v1572_v54 = vadd.f32 %v1571_v40, %v1132_v21  ;;  %v1612_v47 = vadd.f32 %v1611_v37, %v1166_v15  ;;  %v609_v62 = vunpack.c.h.bf16 %v300_v23  ;;  %v305_v40 = vld [vmem:[%s2646_s4 + $0x300] sm:$0xff] }
  0xa7   : > { %v630_v50 = vunpack.c.h.bf16 %v311_v43  ;;  %v631_v0 = vunpack.c.l.bf16 %v312_v3  ;;  %v632_v31 = vunpack.c.h.bf16 %v312_v3  ;;  %v1176_v5 = vmul.f32 %v2681_v53, %v633_v38  ;;  %v321_v43 = vld [vmem:[%s2646_s4 + $0x374] sm:$0xff]  ;;  %v322_v37 = vld [vmem:[%s2646_s4 + $0x37c] sm:$0xff] }
  0xa8   : > { %1594 = vadd.xlane.f32.xlu1 %v1593_v51  ;;  %v1573_v63 = vadd.f32 %v1572_v54, %v1133_v61  ;;  %v1169_v6 = vmul.f32 %v2686_v56, %v626_v48  ;;  %v1613_v9 = vadd.f32 %v1612_v47, %v1167_v8  ;;  %v610_v16 = vunpack.c.l.bf16 %v301_v19 }
  0xa9   : > { %v1170_v32 = vmul.f32 %v2689_v57, %v627_v46  ;;  %v1171_v12 = vmul.f32 %v2692_v58, %v628_v18  ;;  %v1172_v60 = vmul.f32 %v2695_v59, %v629_v11  ;;  %v611_v49 = vunpack.c.h.bf16 %v301_v19 }
  0xaa   : > { %v1574_v34 = vadd.f32 %v1573_v63, %v1134_v24  ;;  %v1614_v21 = vadd.f32 %v1613_v9, %v1168_v13  ;;  %v1151_v35 = vmul.f32 %v2656_v29, %v608_v41  ;;  %v1152_v22 = vmul.f32 %v2659_v30, %v609_v62  ;;  %v304_v24 = vld [vmem:[%s2646_s4 + $0x2f8] sm:$0xff] }
  0xab   : > { %v1173_v25 = vmul.f32 %v2699_v1, %v630_v50  ;;  %v1174_v39 = vmul.f32 %v2702_v2, %v631_v0  ;;  %v1175_v55 = vmul.f32 %v2705_v4, %v632_v31  ;;  %v3063_v42 = vsel %vm1396_vm0, %v1176_v5, 0.0 }
  0xac   : > { %v1575_v61 = vadd.f32 %v1574_v34, %v1135_v7  ;;  %v1615_v17 = vadd.f32 %v1614_v21, %v1169_v6  ;;  %v612_v26 = vunpack.c.l.bf16 %v302_v20  ;;  %v1153_v14 = vmul.f32 %v2665_v36, %v610_v16 }
  0xad   : > { %v613_v15 = vunpack.c.h.bf16 %v302_v20  ;;  %v614_v23 = vunpack.c.l.bf16 %v303_v10  ;;  %v615_v48 = vunpack.c.h.bf16 %v303_v10  ;;  %v620_v46 = vunpack.c.l.bf16 %v3033_v45  ;;  %v325_v10 = vld [vmem:[%s2646_s4 + $0x394] sm:$0xff] }
  0xae   : > { %v1576_v38 = vadd.f32 %v1575_v61, %v1136_v27  ;;  %v1616_v28 = vadd.f32 %v1615_v17, %v1170_v32  ;;  %v1154_v3 = vmul.f32 %v2671_v44, %v611_v49  ;;  %v1596_v8 = vadd.f32 %v1152_v22, %v1151_v35  ;;  %v324_v49 = vld [vmem:[%s2646_s4 + $0x38c] sm:$0xff] }
  0xaf   : > { %v616_v18 = vunpack.c.l.bf16 %v304_v24  ;;  %v617_v7 = vunpack.c.h.bf16 %v304_v24  ;;  %v647_v11 = vunpack.c.l.bf16 %v321_v43  ;;  %v648_v13 = vunpack.c.h.bf16 %v321_v43  ;;  %v3087_v35 = vld [vmem:[%s2646_s4 + $0x370] ss:$52 sps:$4 sm:$0xff]   ;;  %v326_v43 = vld [vmem:[%s2646_s4 + $0x39c] sm:$0xff] }
  0xb0   : > { %v1578_v19 = vadd.f32 %v1577_v33, %v1576_v38  ;;  %v1617_v41 = vadd.f32 %v1616_v28, %v1171_v12  ;;  %v1155_v51 = vmul.f32 %v2678_v52, %v612_v26  ;;  %v1597_v54 = vadd.f32 %v1596_v8, %v1153_v14  ;;  %v323_v33 = vld [vmem:[%s2646_s4 + $0x384] sm:$0xff] }
  0xb1   : > { %v618_v47 = vunpack.c.l.bf16 %v305_v40  ;;  %v619_v62 = vunpack.c.h.bf16 %v305_v40  ;;  %v1156_v45 = vmul.f32 %v2686_v56, %v613_v15  ;;  %v649_v27 = vunpack.c.l.bf16 %v322_v37  ;;  %v314_v14 = vld [vmem:[%s2646_s4 + $0x340] sm:$0xff]  ;;  %v315_v8 = vld [vmem:[%s2646_s4 + $0x348] sm:$0xff] }
  0xb2   : > { %1579 = vadd.xlane.f32.xlu0 %v1578_v19  ;;  %v1618_v50 = vadd.f32 %v1617_v41, %v1172_v60  ;;  %v1157_v0 = vmul.f32 %v2689_v57, %v614_v23  ;;  %v1163_v31 = vmul.f32 %v2681_v53, %v620_v46  ;;  %v1598_v5 = vadd.f32 %v1597_v54, %v1154_v3 }
  0xb3   : > { %v1158_v63 = vmul.f32 %v2692_v58, %v615_v48  ;;  %v650_v6 = vunpack.c.h.bf16 %v322_v37  ;;  %v1190_v9 = vmul.f32 %v2656_v29, %v647_v11  ;;  %v1191_v16 = vmul.f32 %v2659_v30, %v648_v13 }
  0xb4   : > { %v1619_v32 = vadd.f32 %v1618_v50, %v1173_v25  ;;  %v1159_v12 = vmul.f32 %v2695_v59, %v616_v18  ;;  %v1160_v60 = vmul.f32 %v2699_v1, %v617_v7  ;;  %v1599_v20 = vadd.f32 %v1598_v5, %v1155_v51 }
  0xb5   : > { %v1161_v34 = vmul.f32 %v2702_v2, %v618_v47  ;;  %v1162_v21 = vmul.f32 %v2705_v4, %v619_v62  ;;  %v651_v22 = vunpack.c.l.bf16 %v323_v33  ;;  %v1192_v61 = vmul.f32 %v2665_v36, %v649_v27  ;;  %v316_v47 = vld [vmem:[%s2646_s4 + $0x350] sm:$0xff] }
  0xb6   : > { %v1620_v17 = vadd.f32 %v1619_v32, %v1174_v39  ;;  %v1600_v25 = vadd.f32 %v1599_v20, %v1156_v45  ;;  %v3091_v24 = vsel %vm1396_vm0, %v1163_v31, 0.0  ;;  %v652_v26 = vunpack.c.h.bf16 %v323_v33 }
  0xb7   : > { %v653_v15 = vunpack.c.l.bf16 %v324_v49  ;;  %v654_v23 = vunpack.c.h.bf16 %v324_v49  ;;  %v1193_v48 = vmul.f32 %v2671_v44, %v650_v6  ;;  %v1641_v46 = vadd.f32 %v1191_v16, %v1190_v9 }
  0xb8   : > { %v1621_v38 = vadd.f32 %v1620_v17, %v1175_v55  ;;  %v1601_v28 = vadd.f32 %v1600_v25, %v1157_v0  ;;  %v655_v40 = vunpack.c.l.bf16 %v325_v10  ;;  %v659_v3 = vunpack.c.h.bf16 %v3087_v35 }
  0xb9   : > { %v1194_v39 = vmul.f32 %v2678_v52, %v651_v22  ;;  %v1642_v37 = vadd.f32 %v1641_v46, %v1192_v61  ;;  %v634_v18 = vunpack.c.l.bf16 %v314_v14  ;;  %v635_v7 = vunpack.c.h.bf16 %v314_v14 }
  0xba   : > { %v1623_v11 = vadd.f32 %v3063_v42, %v1621_v38  ;;  %v1602_v13 = vadd.f32 %v1601_v28, %v1158_v63  ;;  %v656_v19 = vunpack.c.h.bf16 %v325_v10  ;;  %v657_v41 = vunpack.c.l.bf16 %v326_v43  ;;  %v317_v42 = vld [vmem:[%s2646_s4 + $0x358] sm:$0xff]  ;;  %v318_v10 = vld [vmem:[%s2646_s4 + $0x360] sm:$0xff] }
  0xbb   : > { %v658_v51 = vunpack.c.h.bf16 %v326_v43  ;;  %v1195_v55 = vmul.f32 %v2686_v56, %v652_v26  ;;  %v1643_v54 = vadd.f32 %v1642_v37, %v1193_v48  ;;  %v636_v62 = vunpack.c.l.bf16 %v315_v8  ;;  %v319_v43 = vld [vmem:[%s2646_s4 + $0x368] sm:$0xff] }
  0xbc   : > { %1624 = vadd.xlane.f32.xlu1 %v1623_v11  ;;  %v1603_v45 = vadd.f32 %v1602_v13, %v1159_v12  ;;  %v1196_v27 = vmul.f32 %v2689_v57, %v653_v15  ;;  %v1197_v50 = vmul.f32 %v2692_v58, %v654_v23  ;;  %v1202_v0 = vmul.f32 %v2681_v53, %v659_v3  ;;  %v336_v3 = vld [vmem:[%s2646_s4 + $0x3e4] sm:$0xff] }
  0xbd   : > { %v1644_v31 = vadd.f32 %v1643_v54, %v1194_v39  ;;  %v637_v5 = vunpack.c.h.bf16 %v315_v8  ;;  %v1177_v33 = vmul.f32 %v2656_v29, %v634_v18  ;;  %v1178_v63 = vmul.f32 %v2659_v30, %v635_v7 }
  0xbe   : > { %v1604_v6 = vadd.f32 %v1603_v45, %v1160_v60  ;;  %v1198_v9 = vmul.f32 %v2695_v59, %v655_v40  ;;  %v1199_v16 = vmul.f32 %v2699_v1, %v656_v19  ;;  %v638_v32 = vunpack.c.l.bf16 %v316_v47  ;;  %v335_v60 = vld [vmem:[%s2646_s4 + $0x3dc] sm:$0xff] }
  0xbf   : > { %v1200_v12 = vmul.f32 %v2702_v2, %v657_v41  ;;  %v1201_v20 = vmul.f32 %v2705_v4, %v658_v51  ;;  %v1645_v49 = vadd.f32 %v1644_v31, %v1195_v55  ;;  %v1179_v22 = vmul.f32 %v2665_v36, %v636_v62  ;;  %v337_v51 = vld [vmem:[%s2646_s4 + $0x3ec] sm:$0xff] }
  0xc0   : > { %v1605_v61 = vadd.f32 %v1604_v6, %v1161_v34  ;;  %v1652_v17 = vsel %vm1396_vm0, %v1202_v0, 0.0  ;;  %v639_v25 = vunpack.c.h.bf16 %v316_v47  ;;  %v640_v26 = vunpack.c.l.bf16 %v317_v42 }
  0xc1   : > { %v1646_v14 = vadd.f32 %v1645_v49, %v1196_v27  ;;  %v641_v15 = vunpack.c.h.bf16 %v317_v42  ;;  %v1180_v23 = vmul.f32 %v2671_v44, %v637_v5  ;;  %v1626_v48 = vadd.f32 %v1178_v63, %v1177_v33  ;;  %v338_v27 = vld [vmem:[%s2646_s4 + $0x3f4] sm:$0xff] }
  0xc2   : > { %v1606_v46 = vadd.f32 %v1605_v61, %v1162_v21  ;;  %v642_v38 = vunpack.c.l.bf16 %v318_v10  ;;  %v646_v28 = vunpack.c.l.bf16 %v3087_v35  ;;  %v1181_v40 = vmul.f32 %v2678_v52, %v638_v32  ;;  %v339_v32 = vld [vmem:[%s2646_s4 + $0x3fc] sm:$0xff] }
  0xc3   : > { %v1647_v34 = vadd.f32 %v1646_v14, %v1197_v50  ;;  %v1627_v8 = vadd.f32 %v1626_v48, %v1179_v22  ;;  %v673_v39 = vunpack.c.l.bf16 %v335_v60  ;;  %v674_v37 = vunpack.c.h.bf16 %v335_v60  ;;  %v3129_v50 = vld [vmem:[%s2646_s4 + $0x3d8] ss:$52 sps:$4 sm:$0xff]  }
  0xc4   : > { %v1608_v18 = vadd.f32 %v3091_v24, %v1606_v46  ;;  %v643_v7 = vunpack.c.h.bf16 %v318_v10  ;;  %v644_v11 = vunpack.c.l.bf16 %v319_v43  ;;  %v645_v13 = vunpack.c.h.bf16 %v319_v43  ;;  %v328_v10 = vld [vmem:[%s2646_s4 + $0x3a8] sm:$0xff] }
  0xc5   : > { %v1648_v19 = vadd.f32 %v1647_v34, %v1198_v9  ;;  %v1182_v21 = vmul.f32 %v2686_v56, %v639_v25  ;;  %v1628_v41 = vadd.f32 %v1627_v8, %v1180_v23  ;;  %v675_v35 = vunpack.c.l.bf16 %v336_v3  ;;  %v340_v43 = vld [vmem:[%s2646_s4 + $0x404] sm:$0xff] }
  0xc6   : > { %1609 = vadd.xlane.f32.xlu0 %v1608_v18  ;;  %v1183_v55 = vmul.f32 %v2689_v57, %v640_v26  ;;  %v1184_v54 = vmul.f32 %v2692_v58, %v641_v15  ;;  %v1189_v47 = vmul.f32 %v2681_v53, %v646_v28  ;;  %v676_v24 = vunpack.c.h.bf16 %v336_v3 }
  0xc7   : > { %v1649_v62 = vadd.f32 %v1648_v19, %v1199_v16  ;;  %v1629_v45 = vadd.f32 %v1628_v41, %v1181_v40  ;;  %v1216_v0 = vmul.f32 %v2656_v29, %v673_v39  ;;  %v1217_v31 = vmul.f32 %v2659_v30, %v674_v37 }
  0xc8   : > { %v1185_v42 = vmul.f32 %v2695_v59, %v642_v38  ;;  %v1186_v5 = vmul.f32 %v2699_v1, %v643_v7  ;;  %v1187_v33 = vmul.f32 %v2702_v2, %v644_v11  ;;  %v677_v63 = vunpack.c.l.bf16 %v337_v51  ;;  %v329_v38 = vld [vmem:[%s2646_s4 + $0x3b0] sm:$0xff] }
  0xc9   : > { %v1650_v6 = vadd.f32 %v1649_v62, %v1200_v12  ;;  %v1188_v9 = vmul.f32 %v2705_v4, %v645_v13  ;;  %v1630_v16 = vadd.f32 %v1629_v45, %v1182_v21  ;;  %v1218_v49 = vmul.f32 %v2665_v36, %v675_v35 }
  0xca   : > { %v1637_v22 = vsel %vm1396_vm0, %v1189_v47, 0.0  ;;  %v678_v61 = vunpack.c.h.bf16 %v337_v51  ;;  %v679_v25 = vunpack.c.l.bf16 %v338_v27  ;;  %v685_v26 = vunpack.c.h.bf16 %v3129_v50  ;;  %v330_v51 = vld [vmem:[%s2646_s4 + $0x3b8] sm:$0xff]  ;;  %v331_v47 = vld [vmem:[%s2646_s4 + $0x3c0] sm:$0xff] }
  0xcb   : > { %v1651_v60 = vadd.f32 %v1650_v6, %v1201_v20  ;;  %v1631_v14 = vadd.f32 %v1630_v16, %v1183_v55  ;;  %v1219_v15 = vmul.f32 %v2671_v44, %v676_v24  ;;  %v1671_v12 = vadd.f32 %v1217_v31, %v1216_v0 }
  0xcc   : > { %v680_v23 = vunpack.c.h.bf16 %v338_v27  ;;  %v681_v48 = vunpack.c.l.bf16 %v339_v32  ;;  %v1220_v46 = vmul.f32 %v2678_v52, %v677_v63  ;;  %v660_v28 = vunpack.c.l.bf16 %v328_v10 }
  0xcd   : > { %v1653_v40 = vadd.f32 %v1652_v17, %v1651_v60  ;;  %v1632_v3 = vadd.f32 %v1631_v14, %v1184_v54  ;;  %v1672_v34 = vadd.f32 %v1671_v12, %v1218_v49  ;;  %v661_v8 = vunpack.c.h.bf16 %v328_v10  ;;  %v333_v14 = vld [vmem:[%s2646_s4 + $0x3d0] sm:$0xff] }
  0xce   : > { %v682_v39 = vunpack.c.h.bf16 %v339_v32  ;;  %v683_v37 = vunpack.c.l.bf16 %v340_v43  ;;  %v684_v20 = vunpack.c.h.bf16 %v340_v43  ;;  %v1228_v18 = vmul.f32 %v2681_v53, %v685_v26  ;;  %v349_v32 = vld [vmem:[%s2646_s4 + $0x444] sm:$0xff]  ;;  %v350_v12 = vld [vmem:[%s2646_s4 + $0x44c] sm:$0xff] }
  0xcf   : > { %1654 = vadd.xlane.f32.xlu1 %v1653_v40  ;;  %v1633_v7 = vadd.f32 %v1632_v3, %v1185_v42  ;;  %v1221_v11 = vmul.f32 %v2686_v56, %v678_v61  ;;  %v1673_v13 = vadd.f32 %v1672_v34, %v1219_v15  ;;  %v662_v19 = vunpack.c.l.bf16 %v329_v38 }
  0xd0   : > { %v1222_v21 = vmul.f32 %v2689_v57, %v679_v25  ;;  %v1223_v17 = vmul.f32 %v2692_v58, %v680_v23  ;;  %v1224_v41 = vmul.f32 %v2695_v59, %v681_v48  ;;  %v663_v35 = vunpack.c.h.bf16 %v329_v38 }
  0xd1   : > { %v1634_v55 = vadd.f32 %v1633_v7, %v1186_v5  ;;  %v1674_v54 = vadd.f32 %v1673_v13, %v1220_v46  ;;  %v1203_v24 = vmul.f32 %v2656_v29, %v660_v28  ;;  %v1204_v62 = vmul.f32 %v2659_v30, %v661_v8  ;;  %v332_v5 = vld [vmem:[%s2646_s4 + $0x3c8] sm:$0xff] }
  0xd2   : > { %v1225_v45 = vmul.f32 %v2699_v1, %v682_v39  ;;  %v1226_v27 = vmul.f32 %v2702_v2, %v683_v37  ;;  %v1227_v0 = vmul.f32 %v2705_v4, %v684_v20  ;;  %v3159_v31 = vsel %vm1396_vm0, %v1228_v18, 0.0 }
  0xd3   : > { %v1635_v42 = vadd.f32 %v1634_v55, %v1187_v33  ;;  %v1675_v63 = vadd.f32 %v1674_v54, %v1221_v11  ;;  %v664_v6 = vunpack.c.l.bf16 %v330_v51  ;;  %v1205_v16 = vmul.f32 %v2665_v36, %v662_v19 }
  0xd4   : > { %v665_v49 = vunpack.c.h.bf16 %v330_v51  ;;  %v666_v10 = vunpack.c.l.bf16 %v331_v47  ;;  %v667_v61 = vunpack.c.h.bf16 %v331_v47  ;;  %v672_v25 = vunpack.c.l.bf16 %v3129_v50  ;;  %v353_v47 = vld [vmem:[%s2646_s4 + $0x464] sm:$0xff] }
  0xd5   : > { %v1636_v26 = vadd.f32 %v1635_v42, %v1188_v9  ;;  %v1676_v60 = vadd.f32 %v1675_v63, %v1222_v21  ;;  %v1206_v43 = vmul.f32 %v2671_v44, %v663_v35  ;;  %v1656_v15 = vadd.f32 %v1204_v62, %v1203_v24  ;;  %v352_v35 = vld [vmem:[%s2646_s4 + $0x45c] sm:$0xff] }
  0xd6   : > { %v668_v23 = vunpack.c.l.bf16 %v332_v5  ;;  %v669_v33 = vunpack.c.h.bf16 %v332_v5  ;;  %v699_v48 = vunpack.c.l.bf16 %v349_v32  ;;  %v700_v46 = vunpack.c.h.bf16 %v349_v32  ;;  %v3183_v24 = vld [vmem:[%s2646_s4 + $0x440] ss:$52 sps:$4 sm:$0xff]   ;;  %v354_v32 = vld [vmem:[%s2646_s4 + $0x46c] sm:$0xff] }
  0xd7   : > { %v1638_v38 = vadd.f32 %v1637_v22, %v1636_v26  ;;  %v1677_v28 = vadd.f32 %v1676_v60, %v1223_v17  ;;  %v1207_v40 = vmul.f32 %v2678_v52, %v664_v6  ;;  %v1657_v3 = vadd.f32 %v1656_v15, %v1205_v16  ;;  %v351_v22 = vld [vmem:[%s2646_s4 + $0x454] sm:$0xff] }
  0xd8   : > { %v670_v34 = vunpack.c.l.bf16 %v333_v14  ;;  %v671_v8 = vunpack.c.h.bf16 %v333_v14  ;;  %v1208_v50 = vmul.f32 %v2686_v56, %v665_v49  ;;  %v701_v9 = vunpack.c.l.bf16 %v350_v12  ;;  %v342_v16 = vld [vmem:[%s2646_s4 + $0x410] sm:$0xff]  ;;  %v343_v15 = vld [vmem:[%s2646_s4 + $0x418] sm:$0xff] }
  0xd9   : > { %1639 = vadd.xlane.f32.xlu0 %v1638_v38  ;;  %v1678_v39 = vadd.f32 %v1677_v28, %v1224_v41  ;;  %v1209_v37 = vmul.f32 %v2689_v57, %v666_v10  ;;  %v1215_v20 = vmul.f32 %v2681_v53, %v672_v25  ;;  %v1658_v18 = vadd.f32 %v1657_v3, %v1206_v43 }
  0xda   : > { %v1210_v7 = vmul.f32 %v2692_v58, %v667_v61  ;;  %v702_v11 = vunpack.c.h.bf16 %v350_v12  ;;  %v1242_v13 = vmul.f32 %v2656_v29, %v699_v48  ;;  %v1243_v19 = vmul.f32 %v2659_v30, %v700_v46 }
  0xdb   : > { %v1679_v21 = vadd.f32 %v1678_v39, %v1225_v45  ;;  %v1211_v17 = vmul.f32 %v2695_v59, %v668_v23  ;;  %v1212_v41 = vmul.f32 %v2699_v1, %v669_v33  ;;  %v1659_v51 = vadd.f32 %v1658_v18, %v1207_v40 }
  0xdc   : > { %v1213_v55 = vmul.f32 %v2702_v2, %v670_v34  ;;  %v1214_v54 = vmul.f32 %v2705_v4, %v671_v8  ;;  %v703_v62 = vunpack.c.l.bf16 %v351_v22  ;;  %v1244_v42 = vmul.f32 %v2665_v36, %v701_v9  ;;  %v344_v34 = vld [vmem:[%s2646_s4 + $0x420] sm:$0xff] }
  0xdd   : > { %v1680_v63 = vadd.f32 %v1679_v21, %v1226_v27  ;;  %v1660_v45 = vadd.f32 %v1659_v51, %v1208_v50  ;;  %v3187_v5 = vsel %vm1396_vm0, %v1215_v20, 0.0  ;;  %v704_v6 = vunpack.c.h.bf16 %v351_v22 }
  0xde   : > { %v705_v49 = vunpack.c.l.bf16 %v352_v35  ;;  %v706_v10 = vunpack.c.h.bf16 %v352_v35  ;;  %v1245_v61 = vmul.f32 %v2671_v44, %v702_v11  ;;  %v1701_v25 = vadd.f32 %v1243_v19, %v1242_v13 }
  0xdf   : > { %v1681_v26 = vadd.f32 %v1680_v63, %v1227_v0  ;;  %v1661_v60 = vadd.f32 %v1660_v45, %v1209_v37  ;;  %v707_v14 = vunpack.c.l.bf16 %v353_v47  ;;  %v711_v43 = vunpack.c.h.bf16 %v3183_v24 }
  0xe0   : > { %v1246_v27 = vmul.f32 %v2678_v52, %v703_v62  ;;  %v1702_v12 = vadd.f32 %v1701_v25, %v1244_v42  ;;  %v686_v23 = vunpack.c.l.bf16 %v342_v16  ;;  %v687_v33 = vunpack.c.h.bf16 %v342_v16 }
  0xe1   : > { %v1683_v48 = vadd.f32 %v3159_v31, %v1681_v26  ;;  %v1662_v46 = vadd.f32 %v1661_v60, %v1210_v7  ;;  %v708_v38 = vunpack.c.h.bf16 %v353_v47  ;;  %v709_v28 = vunpack.c.l.bf16 %v354_v32  ;;  %v345_v31 = vld [vmem:[%s2646_s4 + $0x428] sm:$0xff]  ;;  %v346_v47 = vld [vmem:[%s2646_s4 + $0x430] sm:$0xff] }
  0xe2   : > { %v710_v40 = vunpack.c.h.bf16 %v354_v32  ;;  %v1247_v0 = vmul.f32 %v2686_v56, %v704_v6  ;;  %v1703_v3 = vadd.f32 %v1702_v12, %v1245_v61  ;;  %v688_v8 = vunpack.c.l.bf16 %v343_v15  ;;  %v347_v32 = vld [vmem:[%s2646_s4 + $0x438] sm:$0xff] }
  0xe3   : > { %1684 = vadd.xlane.f32.xlu1 %v1683_v48  ;;  %v1663_v50 = vadd.f32 %v1662_v46, %v1211_v17  ;;  %v1248_v9 = vmul.f32 %v2689_v57, %v705_v49  ;;  %v1249_v39 = vmul.f32 %v2692_v58, %v706_v10  ;;  %v1254_v37 = vmul.f32 %v2681_v53, %v711_v43  ;;  %v364_v43 = vld [vmem:[%s2646_s4 + $0x4b4] sm:$0xff] }
  0xe4   : > { %v1704_v20 = vadd.f32 %v1703_v3, %v1246_v27  ;;  %v689_v18 = vunpack.c.h.bf16 %v343_v15  ;;  %v1229_v22 = vmul.f32 %v2656_v29, %v686_v23  ;;  %v1230_v7 = vmul.f32 %v2659_v30, %v687_v33 }
  0xe5   : > { %v1664_v11 = vadd.f32 %v1663_v50, %v1212_v41  ;;  %v1250_v13 = vmul.f32 %v2695_v59, %v707_v14  ;;  %v1251_v19 = vmul.f32 %v2699_v1, %v708_v38  ;;  %v690_v21 = vunpack.c.l.bf16 %v344_v34  ;;  %v363_v41 = vld [vmem:[%s2646_s4 + $0x4ac] sm:$0xff] }
  0xe6   : > { %v1252_v17 = vmul.f32 %v2702_v2, %v709_v28  ;;  %v1253_v51 = vmul.f32 %v2705_v4, %v710_v40  ;;  %v1705_v35 = vadd.f32 %v1704_v20, %v1247_v0  ;;  %v1231_v62 = vmul.f32 %v2665_v36, %v688_v8  ;;  %v365_v40 = vld [vmem:[%s2646_s4 + $0x4bc] sm:$0xff] }
  0xe7   : > { %v1665_v42 = vadd.f32 %v1664_v11, %v1213_v55  ;;  %v1712_v63 = vsel %vm1396_vm0, %v1254_v37, 0.0  ;;  %v691_v45 = vunpack.c.h.bf16 %v344_v34  ;;  %v692_v6 = vunpack.c.l.bf16 %v345_v31 }
  0xe8   : > { %v1706_v16 = vadd.f32 %v1705_v35, %v1248_v9  ;;  %v693_v49 = vunpack.c.h.bf16 %v345_v31  ;;  %v1232_v10 = vmul.f32 %v2671_v44, %v689_v18  ;;  %v1686_v61 = vadd.f32 %v1230_v7, %v1229_v22  ;;  %v366_v9 = vld [vmem:[%s2646_s4 + $0x4c4] sm:$0xff] }
  0xe9   : > { %v1666_v25 = vadd.f32 %v1665_v42, %v1214_v54  ;;  %v694_v26 = vunpack.c.l.bf16 %v346_v47  ;;  %v698_v60 = vunpack.c.l.bf16 %v3183_v24  ;;  %v1233_v14 = vmul.f32 %v2678_v52, %v690_v21  ;;  %v367_v21 = vld [vmem:[%s2646_s4 + $0x4cc] sm:$0xff] }
  0xea   : > { %v1707_v55 = vadd.f32 %v1706_v16, %v1249_v39  ;;  %v1687_v15 = vadd.f32 %v1686_v61, %v1231_v62  ;;  %v725_v27 = vunpack.c.l.bf16 %v363_v41  ;;  %v726_v12 = vunpack.c.h.bf16 %v363_v41  ;;  %v3225_v39 = vld [vmem:[%s2646_s4 + $0x4a8] ss:$52 sps:$4 sm:$0xff]  }
  0xeb   : > { %v1668_v23 = vadd.f32 %v3187_v5, %v1666_v25  ;;  %v695_v33 = vunpack.c.h.bf16 %v346_v47  ;;  %v696_v48 = vunpack.c.l.bf16 %v347_v32  ;;  %v697_v46 = vunpack.c.h.bf16 %v347_v32  ;;  %v356_v47 = vld [vmem:[%s2646_s4 + $0x478] sm:$0xff] }
  0xec   : > { %v1708_v38 = vadd.f32 %v1707_v55, %v1250_v13  ;;  %v1234_v54 = vmul.f32 %v2686_v56, %v691_v45  ;;  %v1688_v28 = vadd.f32 %v1687_v15, %v1232_v10  ;;  %v727_v24 = vunpack.c.l.bf16 %v364_v43  ;;  %v368_v32 = vld [vmem:[%s2646_s4 + $0x4d4] sm:$0xff] }
  0xed   : > { %1669 = vadd.xlane.f32.xlu0 %v1668_v23  ;;  %v1235_v0 = vmul.f32 %v2689_v57, %v692_v6  ;;  %v1236_v3 = vmul.f32 %v2692_v58, %v693_v49  ;;  %v1241_v34 = vmul.f32 %v2681_v53, %v698_v60  ;;  %v728_v5 = vunpack.c.h.bf16 %v364_v43 }
  0xee   : > { %v1709_v8 = vadd.f32 %v1708_v38, %v1251_v19  ;;  %v1689_v50 = vadd.f32 %v1688_v28, %v1233_v14  ;;  %v1268_v37 = vmul.f32 %v2656_v29, %v725_v27  ;;  %v1269_v20 = vmul.f32 %v2659_v30, %v726_v12 }
  0xef   : > { %v1237_v31 = vmul.f32 %v2695_v59, %v694_v26  ;;  %v1238_v18 = vmul.f32 %v2699_v1, %v695_v33  ;;  %v1239_v22 = vmul.f32 %v2702_v2, %v696_v48  ;;  %v729_v7 = vunpack.c.l.bf16 %v365_v40  ;;  %v357_v26 = vld [vmem:[%s2646_s4 + $0x480] sm:$0xff] }
  0xf0   : > { %v1710_v11 = vadd.f32 %v1709_v8, %v1252_v17  ;;  %v1240_v13 = vmul.f32 %v2705_v4, %v697_v46  ;;  %v1690_v19 = vadd.f32 %v1689_v50, %v1234_v54  ;;  %v1270_v35 = vmul.f32 %v2665_v36, %v727_v24 }
  0xf1   : > { %v1697_v62 = vsel %vm1396_vm0, %v1241_v34, 0.0  ;;  %v730_v42 = vunpack.c.h.bf16 %v365_v40  ;;  %v731_v45 = vunpack.c.l.bf16 %v366_v9  ;;  %v737_v6 = vunpack.c.h.bf16 %v3225_v39  ;;  %v358_v40 = vld [vmem:[%s2646_s4 + $0x488] sm:$0xff]  ;;  %v359_v34 = vld [vmem:[%s2646_s4 + $0x490] sm:$0xff] }
  0xf2   : > { %v1711_v41 = vadd.f32 %v1710_v11, %v1253_v51  ;;  %v1691_v16 = vadd.f32 %v1690_v19, %v1235_v0  ;;  %v1271_v49 = vmul.f32 %v2671_v44, %v728_v5  ;;  %v1731_v17 = vadd.f32 %v1269_v20, %v1268_v37 }
  0xf3   : > { %v732_v10 = vunpack.c.h.bf16 %v366_v9  ;;  %v733_v61 = vunpack.c.l.bf16 %v367_v21  ;;  %v1272_v25 = vmul.f32 %v2678_v52, %v729_v7  ;;  %v712_v60 = vunpack.c.l.bf16 %v356_v47 }
  0xf4   : > { %v1713_v14 = vadd.f32 %v1712_v63, %v1711_v41  ;;  %v1692_v43 = vadd.f32 %v1691_v16, %v1236_v3  ;;  %v1732_v55 = vadd.f32 %v1731_v17, %v1270_v35  ;;  %v713_v15 = vunpack.c.h.bf16 %v356_v47  ;;  %v361_v16 = vld [vmem:[%s2646_s4 + $0x4a0] sm:$0xff] }
  0xf5   : > { %v734_v27 = vunpack.c.h.bf16 %v367_v21  ;;  %v735_v12 = vunpack.c.l.bf16 %v368_v32  ;;  %v736_v51 = vunpack.c.h.bf16 %v368_v32  ;;  %v1280_v23 = vmul.f32 %v2681_v53, %v737_v6  ;;  %v377_v21 = vld [vmem:[%s2646_s4 + $0x514] sm:$0xff]  ;;  %v378_v17 = vld [vmem:[%s2646_s4 + $0x51c] sm:$0xff] }
  0xf6   : > { %1714 = vadd.xlane.f32.xlu1 %v1713_v14  ;;  %v1693_v33 = vadd.f32 %v1692_v43, %v1237_v31  ;;  %v1273_v48 = vmul.f32 %v2686_v56, %v730_v42  ;;  %v1733_v46 = vadd.f32 %v1732_v55, %v1271_v49  ;;  %v714_v38 = vunpack.c.l.bf16 %v357_v26 }
  0xf7   : > { %v1274_v54 = vmul.f32 %v2689_v57, %v731_v45  ;;  %v1275_v63 = vmul.f32 %v2692_v58, %v732_v10  ;;  %v1276_v28 = vmul.f32 %v2695_v59, %v733_v61  ;;  %v715_v24 = vunpack.c.h.bf16 %v357_v26 }
  0xf8   : > { %v1694_v0 = vadd.f32 %v1693_v33, %v1238_v18  ;;  %v1734_v3 = vadd.f32 %v1733_v46, %v1272_v25  ;;  %v1255_v5 = vmul.f32 %v2656_v29, %v712_v60  ;;  %v1256_v8 = vmul.f32 %v2659_v30, %v713_v15  ;;  %v360_v18 = vld [vmem:[%s2646_s4 + $0x498] sm:$0xff] }
  0xf9   : > { %v1277_v50 = vmul.f32 %v2699_v1, %v734_v27  ;;  %v1278_v9 = vmul.f32 %v2702_v2, %v735_v12  ;;  %v1279_v37 = vmul.f32 %v2705_v4, %v736_v51  ;;  %v3255_v20 = vsel %vm1396_vm0, %v1280_v23, 0.0 }
  0xfa   : > { %v1695_v31 = vadd.f32 %v1694_v0, %v1239_v22  ;;  %v1735_v7 = vadd.f32 %v1734_v3, %v1273_v48  ;;  %v716_v11 = vunpack.c.l.bf16 %v358_v40  ;;  %v1257_v19 = vmul.f32 %v2665_v36, %v714_v38 }
  0xfb   : > { %v717_v35 = vunpack.c.h.bf16 %v358_v40  ;;  %v718_v47 = vunpack.c.l.bf16 %v359_v34  ;;  %v719_v42 = vunpack.c.h.bf16 %v359_v34  ;;  %v724_v45 = vunpack.c.l.bf16 %v3225_v39  ;;  %v381_v34 = vld [vmem:[%s2646_s4 + $0x534] sm:$0xff] }
  0xfc   : > { %v1696_v6 = vadd.f32 %v1695_v31, %v1240_v13  ;;  %v1736_v41 = vadd.f32 %v1735_v7, %v1274_v54  ;;  %v1258_v32 = vmul.f32 %v2671_v44, %v715_v24  ;;  %v1716_v49 = vadd.f32 %v1256_v8, %v1255_v5  ;;  %v380_v24 = vld [vmem:[%s2646_s4 + $0x52c] sm:$0xff] }
  0xfd   : > { %v720_v10 = vunpack.c.l.bf16 %v360_v18  ;;  %v721_v22 = vunpack.c.h.bf16 %v360_v18  ;;  %v751_v61 = vunpack.c.l.bf16 %v377_v21  ;;  %v752_v25 = vunpack.c.h.bf16 %v377_v21  ;;  %v3279_v5 = vld [vmem:[%s2646_s4 + $0x510] ss:$52 sps:$4 sm:$0xff]   ;;  %v382_v21 = vld [vmem:[%s2646_s4 + $0x53c] sm:$0xff] }
  0xfe   : > { %v1698_v26 = vadd.f32 %v1697_v62, %v1696_v6  ;;  %v1737_v60 = vadd.f32 %v1736_v41, %v1275_v63  ;;  %v1259_v14 = vmul.f32 %v2678_v52, %v716_v11  ;;  %v1717_v43 = vadd.f32 %v1716_v49, %v1257_v19  ;;  %v379_v62 = vld [vmem:[%s2646_s4 + $0x524] sm:$0xff] }
  0xff   : > { %v722_v55 = vunpack.c.l.bf16 %v361_v16  ;;  %v723_v15 = vunpack.c.h.bf16 %v361_v16  ;;  %v1260_v39 = vmul.f32 %v2686_v56, %v717_v35  ;;  %v753_v13 = vunpack.c.l.bf16 %v378_v17  ;;  %v370_v19 = vld [vmem:[%s2646_s4 + $0x4e0] sm:$0xff]  ;;  %v371_v49 = vld [vmem:[%s2646_s4 + $0x4e8] sm:$0xff] }
 0x100   : > { %1699 = vadd.xlane.f32.xlu0 %v1698_v26  ;;  %v1738_v27 = vadd.f32 %v1737_v60, %v1276_v28  ;;  %v1261_v12 = vmul.f32 %v2689_v57, %v718_v47  ;;  %v1267_v51 = vmul.f32 %v2681_v53, %v724_v45  ;;  %v1718_v23 = vadd.f32 %v1717_v43, %v1258_v32 }
 0x101   : > { %v1262_v33 = vmul.f32 %v2692_v58, %v719_v42  ;;  %v754_v48 = vunpack.c.h.bf16 %v378_v17  ;;  %v1294_v46 = vmul.f32 %v2656_v29, %v751_v61  ;;  %v1295_v38 = vmul.f32 %v2659_v30, %v752_v25 }
 0x102   : > { %v1739_v54 = vadd.f32 %v1738_v27, %v1277_v50  ;;  %v1263_v63 = vmul.f32 %v2695_v59, %v720_v10  ;;  %v1264_v28 = vmul.f32 %v2699_v1, %v721_v22  ;;  %v1719_v40 = vadd.f32 %v1718_v23, %v1259_v14 }
 0x103   : > { %v1265_v0 = vmul.f32 %v2702_v2, %v722_v55  ;;  %v1266_v3 = vmul.f32 %v2705_v4, %v723_v15  ;;  %v755_v8 = vunpack.c.l.bf16 %v379_v62  ;;  %v1296_v31 = vmul.f32 %v2665_v36, %v753_v13  ;;  %v372_v55 = vld [vmem:[%s2646_s4 + $0x4f0] sm:$0xff] }
 0x104   : > { %v1740_v7 = vadd.f32 %v1739_v54, %v1278_v9  ;;  %v1720_v50 = vadd.f32 %v1719_v40, %v1260_v39  ;;  %v3283_v18 = vsel %vm1396_vm0, %v1267_v51, 0.0  ;;  %v756_v11 = vunpack.c.h.bf16 %v379_v62 }
 0x105   : > { %v757_v35 = vunpack.c.l.bf16 %v380_v24  ;;  %v758_v47 = vunpack.c.h.bf16 %v380_v24  ;;  %v1297_v42 = vmul.f32 %v2671_v44, %v754_v48  ;;  %v1761_v45 = vadd.f32 %v1295_v38, %v1294_v46 }
 0x106   : > { %v1741_v6 = vadd.f32 %v1740_v7, %v1279_v37  ;;  %v1721_v41 = vadd.f32 %v1720_v50, %v1261_v12  ;;  %v759_v16 = vunpack.c.l.bf16 %v381_v34  ;;  %v763_v32 = vunpack.c.h.bf16 %v3279_v5 }
 0x107   : > { %v1298_v9 = vmul.f32 %v2678_v52, %v755_v8  ;;  %v1762_v17 = vadd.f32 %v1761_v45, %v1296_v31  ;;  %v738_v10 = vunpack.c.l.bf16 %v370_v19  ;;  %v739_v22 = vunpack.c.h.bf16 %v370_v19 }
 0x108   : > { %v1743_v61 = vadd.f32 %v3255_v20, %v1741_v6  ;;  %v1722_v25 = vadd.f32 %v1721_v41, %v1262_v33  ;;  %v760_v26 = vunpack.c.h.bf16 %v381_v34  ;;  %v761_v60 = vunpack.c.l.bf16 %v382_v21  ;;  %v373_v20 = vld [vmem:[%s2646_s4 + $0x4f8] sm:$0xff]  ;;  %v374_v34 = vld [vmem:[%s2646_s4 + $0x500] sm:$0xff] }
 0x109   : > { %v762_v14 = vunpack.c.h.bf16 %v382_v21  ;;  %v1299_v37 = vmul.f32 %v2686_v56, %v756_v11  ;;  %v1763_v43 = vadd.f32 %v1762_v17, %v1297_v42  ;;  %v740_v15 = vunpack.c.l.bf16 %v371_v49  ;;  %v375_v21 = vld [vmem:[%s2646_s4 + $0x508] sm:$0xff] }
 0x10a   : > { %1744 = vadd.xlane.f32.xlu1 %v1743_v61  ;;  %v1723_v39 = vadd.f32 %v1722_v25, %v1263_v63  ;;  %v1300_v13 = vmul.f32 %v2689_v57, %v757_v35  ;;  %v1301_v27 = vmul.f32 %v2692_v58, %v758_v47  ;;  %v1306_v12 = vmul.f32 %v2681_v53, %v763_v32  ;;  %v392_v32 = vld [vmem:[%s2646_s4 + $0x584] sm:$0xff] }
 0x10b   : > { %v1764_v51 = vadd.f32 %v1763_v43, %v1298_v9  ;;  %v741_v23 = vunpack.c.h.bf16 %v371_v49  ;;  %v1281_v62 = vmul.f32 %v2656_v29, %v738_v10  ;;  %v1282_v33 = vmul.f32 %v2659_v30, %v739_v22 }
 0x10c   : > { %v1724_v48 = vadd.f32 %v1723_v39, %v1264_v28  ;;  %v1302_v46 = vmul.f32 %v2695_v59, %v759_v16  ;;  %v1303_v38 = vmul.f32 %v2699_v1, %v760_v26  ;;  %v742_v54 = vunpack.c.l.bf16 %v372_v55  ;;  %v391_v28 = vld [vmem:[%s2646_s4 + $0x57c] sm:$0xff] }
 0x10d   : > { %v1304_v63 = vmul.f32 %v2702_v2, %v761_v60  ;;  %v1305_v40 = vmul.f32 %v2705_v4, %v762_v14  ;;  %v1765_v24 = vadd.f32 %v1764_v51, %v1299_v37  ;;  %v1283_v8 = vmul.f32 %v2665_v36, %v740_v15  ;;  %v393_v14 = vld [vmem:[%s2646_s4 + $0x58c] sm:$0xff] }
 0x10e   : > { %v1725_v31 = vadd.f32 %v1724_v48, %v1265_v0  ;;  %v1772_v7 = vsel %vm1396_vm0, %v1306_v12, 0.0  ;;  %v743_v50 = vunpack.c.h.bf16 %v372_v55  ;;  %v744_v11 = vunpack.c.l.bf16 %v373_v20 }
 0x10f   : > { %v1766_v19 = vadd.f32 %v1765_v24, %v1300_v13  ;;  %v745_v35 = vunpack.c.h.bf16 %v373_v20  ;;  %v1284_v47 = vmul.f32 %v2671_v44, %v741_v23  ;;  %v1746_v42 = vadd.f32 %v1282_v33, %v1281_v62  ;;  %v394_v13 = vld [vmem:[%s2646_s4 + $0x594] sm:$0xff] }
 0x110   : > { %v1726_v45 = vadd.f32 %v1725_v31, %v1266_v3  ;;  %v746_v6 = vunpack.c.l.bf16 %v374_v34  ;;  %v750_v41 = vunpack.c.l.bf16 %v3279_v5  ;;  %v1285_v16 = vmul.f32 %v2678_v52, %v742_v54  ;;  %v395_v54 = vld [vmem:[%s2646_s4 + $0x59c] sm:$0xff] }
 0x111   : > { %v1767_v0 = vadd.f32 %v1766_v19, %v1301_v27  ;;  %v1747_v49 = vadd.f32 %v1746_v42, %v1283_v8  ;;  %v777_v9 = vunpack.c.l.bf16 %v391_v28  ;;  %v778_v17 = vunpack.c.h.bf16 %v391_v28  ;;  %v3321_v27 = vld [vmem:[%s2646_s4 + $0x578] ss:$52 sps:$4 sm:$0xff]  }
 0x112   : > { %v1728_v10 = vadd.f32 %v3283_v18, %v1726_v45  ;;  %v747_v22 = vunpack.c.h.bf16 %v374_v34  ;;  %v748_v61 = vunpack.c.l.bf16 %v375_v21  ;;  %v749_v25 = vunpack.c.h.bf16 %v375_v21  ;;  %v384_v34 = vld [vmem:[%s2646_s4 + $0x548] sm:$0xff] }
 0x113   : > { %v1768_v26 = vadd.f32 %v1767_v0, %v1302_v46  ;;  %v1286_v3 = vmul.f32 %v2686_v56, %v743_v50  ;;  %v1748_v60 = vadd.f32 %v1747_v49, %v1284_v47  ;;  %v779_v5 = vunpack.c.l.bf16 %v392_v32  ;;  %v396_v21 = vld [vmem:[%s2646_s4 + $0x5a4] sm:$0xff] }
 0x114   : > { %1729 = vadd.xlane.f32.xlu0 %v1728_v10  ;;  %v1287_v37 = vmul.f32 %v2689_v57, %v744_v11  ;;  %v1288_v43 = vmul.f32 %v2692_v58, %v745_v35  ;;  %v1293_v55 = vmul.f32 %v2681_v53, %v750_v41  ;;  %v780_v18 = vunpack.c.h.bf16 %v392_v32 }
 0x115   : > { %v1769_v15 = vadd.f32 %v1768_v26, %v1303_v38  ;;  %v1749_v39 = vadd.f32 %v1748_v60, %v1285_v16  ;;  %v1320_v12 = vmul.f32 %v2656_v29, %v777_v9  ;;  %v1321_v51 = vmul.f32 %v2659_v30, %v778_v17 }
 0x116   : > { %v1289_v20 = vmul.f32 %v2695_v59, %v746_v6  ;;  %v1290_v23 = vmul.f32 %v2699_v1, %v747_v22  ;;  %v1291_v62 = vmul.f32 %v2702_v2, %v748_v61  ;;  %v781_v33 = vunpack.c.l.bf16 %v393_v14  ;;  %v385_v6 = vld [vmem:[%s2646_s4 + $0x550] sm:$0xff] }
 0x117   : > { %v1770_v48 = vadd.f32 %v1769_v15, %v1304_v63  ;;  %v1292_v46 = vmul.f32 %v2705_v4, %v749_v25  ;;  %v1750_v38 = vadd.f32 %v1749_v39, %v1286_v3  ;;  %v1322_v24 = vmul.f32 %v2665_v36, %v779_v5 }
 0x118   : > { %v1757_v8 = vsel %vm1396_vm0, %v1293_v55, 0.0  ;;  %v782_v31 = vunpack.c.h.bf16 %v393_v14  ;;  %v783_v50 = vunpack.c.l.bf16 %v394_v13  ;;  %v789_v11 = vunpack.c.h.bf16 %v3321_v27  ;;  %v386_v14 = vld [vmem:[%s2646_s4 + $0x558] sm:$0xff]  ;;  %v387_v55 = vld [vmem:[%s2646_s4 + $0x560] sm:$0xff] }
 0x119   : > { %v1771_v28 = vadd.f32 %v1770_v48, %v1305_v40  ;;  %v1751_v19 = vadd.f32 %v1750_v38, %v1287_v37  ;;  %v1323_v35 = vmul.f32 %v2671_v44, %v780_v18  ;;  %v1791_v63 = vadd.f32 %v1321_v51, %v1320_v12 }
 0x11a   : > { %v784_v47 = vunpack.c.h.bf16 %v394_v13  ;;  %v785_v42 = vunpack.c.l.bf16 %v395_v54  ;;  %v1324_v45 = vmul.f32 %v2678_v52, %v781_v33  ;;  %v764_v41 = vunpack.c.l.bf16 %v384_v34  ;;  %v388_v33 = vld [vmem:[%s2646_s4 + $0x568] sm:$0xff] }
 0x11b   : > { %v1773_v16 = vadd.f32 %v1772_v7, %v1771_v28  ;;  %v1752_v32 = vadd.f32 %v1751_v19, %v1288_v43  ;;  %v1792_v0 = vadd.f32 %v1791_v63, %v1322_v24  ;;  %v765_v49 = vunpack.c.h.bf16 %v384_v34  ;;  %v389_v19 = vld [vmem:[%s2646_s4 + $0x570] sm:$0xff] }
 0x11c   : > { %v786_v9 = vunpack.c.h.bf16 %v395_v54  ;;  %v787_v17 = vunpack.c.l.bf16 %v396_v21  ;;  %v788_v40 = vunpack.c.h.bf16 %v396_v21  ;;  %v1332_v10 = vmul.f32 %v2681_v53, %v789_v11  ;;  %v405_v54 = vld [vmem:[%s2646_s4 + $0x5e4] sm:$0xff]  ;;  %v406_v63 = vld [vmem:[%s2646_s4 + $0x5ec] sm:$0xff] }
 0x11d   : > { %1774 = vadd.xlane.f32.xlu1 %v1773_v16  ;;  %v1753_v22 = vadd.f32 %v1752_v32, %v1289_v20  ;;  %v1325_v61 = vmul.f32 %v2686_v56, %v782_v31  ;;  %v1793_v25 = vadd.f32 %v1792_v0, %v1323_v35  ;;  %v766_v26 = vunpack.c.l.bf16 %v385_v6 }
 0x11e   : > { %v1326_v3 = vmul.f32 %v2689_v57, %v783_v50  ;;  %v1327_v7 = vmul.f32 %v2692_v58, %v784_v47  ;;  %v1328_v60 = vmul.f32 %v2695_v59, %v785_v42  ;;  %v767_v5 = vunpack.c.h.bf16 %v385_v6 }
 0x11f   : > { %v1754_v37 = vadd.f32 %v1753_v22, %v1290_v23  ;;  %v1794_v43 = vadd.f32 %v1793_v25, %v1324_v45  ;;  %v1307_v18 = vmul.f32 %v2656_v29, %v764_v41  ;;  %v1308_v15 = vmul.f32 %v2659_v30, %v765_v49 }
 0x120   : > { %v1329_v39 = vmul.f32 %v2699_v1, %v786_v9  ;;  %v1330_v13 = vmul.f32 %v2702_v2, %v787_v17  ;;  %v3350_v12 = vmul.f32 %v2705_v4, %v788_v40  ;;  %v3353_v51 = vsel %vm1396_vm0, %v1332_v10, 0.0 }
 0x121   : > { %v1755_v20 = vadd.f32 %v1754_v37, %v1291_v62  ;;  %v1795_v23 = vadd.f32 %v1794_v43, %v1325_v61  ;;  %v768_v48 = vunpack.c.l.bf16 %v386_v14  ;;  %v1309_v38 = vmul.f32 %v2665_v36, %v766_v26 }
 0x122   : > { %v769_v24 = vunpack.c.h.bf16 %v386_v14  ;;  %v770_v34 = vunpack.c.l.bf16 %v387_v55  ;;  %v771_v31 = vunpack.c.h.bf16 %v387_v55  ;;  %v776_v50 = vunpack.c.l.bf16 %v3321_v27  ;;  %v409_v55 = vld [vmem:[%s2646_s4 + $0x604] sm:$0xff] }
 0x123   : > { %v1756_v11 = vadd.f32 %v1755_v20, %v1292_v46  ;;  %v1796_v28 = vadd.f32 %v1795_v23, %v1326_v3  ;;  %v1310_v21 = vmul.f32 %v2671_v44, %v767_v5  ;;  %v1776_v35 = vadd.f32 %v1308_v15, %v1307_v18  ;;  %v408_v5 = vld [vmem:[%s2646_s4 + $0x5fc] sm:$0xff] }
 0x124   : > { %v772_v47 = vunpack.c.l.bf16 %v388_v33  ;;  %v773_v62 = vunpack.c.h.bf16 %v388_v33  ;;  %v803_v42 = vunpack.c.l.bf16 %v405_v54  ;;  %v804_v45 = vunpack.c.h.bf16 %v405_v54  ;;  %v3379_v18 = vld [vmem:[%s2646_s4 + $0x5e0] ss:$52 sps:$4 sm:$0xff]  }
 0x125   : > { %v1758_v6 = vadd.f32 %v1757_v8, %v1756_v11  ;;  %v1797_v41 = vadd.f32 %v1796_v28, %v1327_v7  ;;  %v1311_v16 = vmul.f32 %v2678_v52, %v768_v48  ;;  %v1777_v32 = vadd.f32 %v1776_v35, %v1309_v38  ;;  %v407_v8 = vld [vmem:[%s2646_s4 + $0x5f4] sm:$0xff] }
 0x126   : > { %v774_v0 = vunpack.c.l.bf16 %v389_v19  ;;  %v775_v49 = vunpack.c.h.bf16 %v389_v19  ;;  %v1312_v27 = vmul.f32 %v2686_v56, %v769_v24  ;;  %v805_v46 = vunpack.c.l.bf16 %v406_v63  ;;  %v398_v54 = vld [vmem:[%s2646_s4 + $0x5b0] sm:$0xff]  ;;  %v3388_v24 = vpop.xlane.xlu0 %1399 }
 0x127   : > { %1759 = vadd.xlane.f32.xlu0 %v1758_v6  ;;  %v1798_v9 = vadd.f32 %v1797_v41, %v1328_v60  ;;  %v1313_v17 = vmul.f32 %v2689_v57, %v770_v34  ;;  %v1319_v40 = vmul.f32 %v2681_v53, %v776_v50  ;;  %v1778_v10 = vadd.f32 %v1777_v32, %v1310_v21  ;;  %v410_v34 = vld [vmem:[%s2646_s4 + $0x60c] sm:$0xff] }
 0x128   : > { %v1314_v22 = vmul.f32 %v2692_v58, %v771_v31  ;;  %v806_v61 = vunpack.c.h.bf16 %v406_v63  ;;  %v1346_v25 = vmul.f32 %v2656_v29, %v803_v42  ;;  %v1347_v26 = vmul.f32 %v2659_v30, %v804_v45  ;;  %v399_v63 = vld [vmem:[%s2646_s4 + $0x5b8] sm:$0xff] }
 0x129   : > { %v1799_v3 = vadd.f32 %v1798_v9, %v1329_v39  ;;  %v1315_v7 = vmul.f32 %v2695_v59, %v772_v47  ;;  %v1316_v60 = vmul.f32 %v2699_v1, %v773_v62  ;;  %v1779_v14 = vadd.f32 %v1778_v10, %v1311_v16  ;;  %v3382_v39 = vpop.xlane.xlu1 %1429 }
 0x12a   : > { %v1317_v37 = vmul.f32 %v2702_v2, %v774_v0  ;;  %v3375_v43 = vmul.f32 %v2705_v4, %v775_v49  ;;  %v807_v15 = vunpack.c.l.bf16 %v407_v8  ;;  %v1348_v20 = vmul.f32 %v2665_v36, %v805_v46 }
 0x12b   : > { %v1800_v23 = vadd.f32 %v1799_v3, %v1330_v13  ;;  %v1780_v33 = vadd.f32 %v1779_v14, %v1312_v27  ;;  %v3385_v48 = vsel %vm1396_vm0, %v1319_v40, 0.0  ;;  %v808_v38 = vunpack.c.h.bf16 %v407_v8  ;;  %v400_v27 = vld [vmem:[%s2646_s4 + $0x5c0] sm:$0xff]  ;;  %v3404_v8 = vpop.xlane.xlu0 %1414 }
 0x12c   : > { %v809_v31 = vunpack.c.l.bf16 %v408_v5  ;;  %v810_v50 = vunpack.c.h.bf16 %v408_v5  ;;  %v1349_v11 = vmul.f32 %v2671_v44, %v806_v61  ;;  %v1821_v28 = vadd.f32 %v1347_v26, %v1346_v25  ;;  %v401_v61 = vld [vmem:[%s2646_s4 + $0x5c8] sm:$0xff] }
 0x12d   : > { %v1801_v19 = vadd.f32 %v1800_v23, %v3350_v12  ;;  %v1781_v21 = vadd.f32 %v1780_v33, %v1313_v17  ;;  %v811_v35 = vunpack.c.l.bf16 %v409_v55  ;;  %v815_v13 = vunpack.c.h.bf16 %v3379_v18  ;;  %v3399_v9 = vpop.xlane.xlu1 %1444  ;;  %v402_v33 = vld [vmem:[%s2646_s4 + $0x5d0] sm:$0xff] }
 0x12e   : > { %v1350_v47 = vmul.f32 %v2678_v52, %v807_v15  ;;  %v1822_v62 = vadd.f32 %v1821_v28, %v1348_v20  ;;  %v790_v42 = vunpack.c.l.bf16 %v398_v54  ;;  %v791_v45 = vunpack.c.h.bf16 %v398_v54  ;;  %v403_v28 = vld [vmem:[%s2646_s4 + $0x5d8] sm:$0xff] }
 0x12f   : > { %v1803_v6 = vadd.f32 %v3353_v51, %v1801_v19  ;;  %v1782_v41 = vadd.f32 %v1781_v21, %v1314_v22  ;;  %v812_v16 = vunpack.c.h.bf16 %v409_v55  ;;  %v813_v32 = vunpack.c.l.bf16 %v410_v34 }
 0x130   : > { %v814_v0 = vunpack.c.h.bf16 %v410_v34  ;;  %v1351_v12 = vmul.f32 %v2686_v56, %v808_v38  ;;  %v1823_v49 = vadd.f32 %v1822_v62, %v1349_v11  ;;  %v792_v46 = vunpack.c.l.bf16 %v399_v63 }
 0x131   : > { %1804 = vadd.xlane.f32.xlu1 %v1803_v6  ;;  %v1783_v17 = vadd.f32 %v1782_v41, %v1315_v7  ;;  %v1352_v40 = vmul.f32 %v2689_v57, %v809_v31  ;;  %v1353_v10 = vmul.f32 %v2692_v58, %v810_v50  ;;  %v1358_v51 = vmul.f32 %v2681_v53, %v815_v13  ;;  %v419_v50 = vld [vmem:[%s2646_s4 + $0x64c] sm:$0xff]  ;;  %v3421_v13 = vpop.xlane.xlu1 %1474 }
 0x132   : > { %v1824_v22 = vadd.f32 %v1823_v49, %v1350_v47  ;;  %v793_v25 = vunpack.c.h.bf16 %v399_v63  ;;  %v1333_v26 = vmul.f32 %v2656_v29, %v790_v42  ;;  %v1334_v3 = vmul.f32 %v2659_v30, %v791_v45  ;;  %v420_v42 = vld [vmem:[%s2646_s4 + $0x654] sm:$0xff]  ;;  %v3427_v45 = vpop.xlane.xlu0 %1459 }
 0x133   : > { %v1784_v14 = vadd.f32 %v1783_v17, %v1316_v60  ;;  %v1354_v7 = vmul.f32 %v2695_v59, %v811_v35  ;;  %v1355_v5 = vmul.f32 %v2699_v1, %v812_v16  ;;  %v794_v55 = vunpack.c.l.bf16 %v400_v27  ;;  %v421_v17 = vld [vmem:[%s2646_s4 + $0x65c] sm:$0xff] }
 0x134   : > { %v1356_v15 = vmul.f32 %v2702_v2, %v813_v32  ;;  %v1357_v20 = vmul.f32 %v2705_v4, %v814_v0  ;;  %v1825_v23 = vadd.f32 %v1824_v22, %v1351_v12  ;;  %v1335_v38 = vmul.f32 %v2665_v36, %v792_v46 }
 0x135   : > { %v1785_v54 = vadd.f32 %v1784_v14, %v1317_v37  ;;  %v3416_v34 = vsel %vm1396_vm0, %v1358_v51, 0.0  ;;  %v795_v31 = vunpack.c.h.bf16 %v400_v27  ;;  %v796_v60 = vunpack.c.l.bf16 %v401_v61 }
 0x136   : > { %v1826_v11 = vadd.f32 %v1825_v23, %v1352_v40  ;;  %v797_v19 = vunpack.c.h.bf16 %v401_v61  ;;  %v1336_v21 = vmul.f32 %v2671_v44, %v793_v25  ;;  %v1806_v35 = vadd.f32 %v1334_v3, %v1333_v26  ;;  %v422_v26 = vld [vmem:[%s2646_s4 + $0x664] sm:$0xff] }
 0x137   : > { %v1786_v63 = vadd.f32 %v1785_v54, %v3375_v43  ;;  %v798_v47 = vunpack.c.l.bf16 %v402_v33  ;;  %v802_v37 = vunpack.c.l.bf16 %v3379_v18  ;;  %v1337_v62 = vmul.f32 %v2678_v52, %v794_v55  ;;  %v3437_v3 = vld [vmem:[%s2646_s4 + $0x648] ss:$52 sps:$4 sm:$0xff]   ;;  %v3441_v55 = vpop.xlane.xlu1 %1504 }
 0x138   : > { %v1827_v6 = vadd.f32 %v1826_v11, %v1353_v10  ;;  %v1807_v41 = vadd.f32 %v1806_v35, %v1335_v38  ;;  %v829_v16 = vunpack.c.l.bf16 %v419_v50  ;;  %v830_v32 = vunpack.c.h.bf16 %v419_v50  ;;  %v423_v11 = vld [vmem:[%s2646_s4 + $0x66c] sm:$0xff] }
 0x139   : > { %v1788_v0 = vadd.f32 %v3385_v48, %v1786_v63  ;;  %v799_v12 = vunpack.c.h.bf16 %v402_v33  ;;  %v800_v49 = vunpack.c.l.bf16 %v403_v28  ;;  %v801_v43 = vunpack.c.h.bf16 %v403_v28 }
 0x13a   : > { %v1828_v27 = vadd.f32 %v1827_v6, %v1354_v7  ;;  %v1338_v46 = vmul.f32 %v2686_v56, %v795_v31  ;;  %v1808_v18 = vadd.f32 %v1807_v41, %v1336_v21  ;;  %v831_v40 = vunpack.c.l.bf16 %v420_v42 }
 0x13b   : > { %1789 = vadd.xlane.f32.xlu0 %v1788_v0  ;;  %v1339_v51 = vmul.f32 %v2689_v57, %v796_v60  ;;  %v1340_v10 = vmul.f32 %v2692_v58, %v797_v19  ;;  %v1345_v22 = vmul.f32 %v2681_v53, %v802_v37  ;;  %v832_v61 = vunpack.c.h.bf16 %v420_v42  ;;  %v412_v19 = vld [vmem:[%s2646_s4 + $0x618] sm:$0xff]  ;;  %v413_v0 = vld [vmem:[%s2646_s4 + $0x620] sm:$0xff] }
 0x13c   : > { %v1829_v48 = vadd.f32 %v1828_v27, %v1355_v5  ;;  %v1809_v25 = vadd.f32 %v1808_v18, %v1337_v62  ;;  %v1372_v14 = vmul.f32 %v2656_v29, %v829_v16  ;;  %v1373_v7 = vmul.f32 %v2659_v30, %v830_v32  ;;  %v3446_v5 = vpop.xlane.xlu0 %1489  ;;  %v424_v42 = vld [vmem:[%s2646_s4 + $0x674] sm:$0xff]  ;;  %v3461_v18 = vpop.xlane.xlu1 %1534 }
 0x13d   : > { %v1341_v23 = vmul.f32 %v2695_v59, %v798_v47  ;;  %v1342_v33 = vmul.f32 %v2699_v1, %v799_v12  ;;  %v1343_v38 = vmul.f32 %v2702_v2, %v800_v49  ;;  %v833_v54 = vunpack.c.l.bf16 %v421_v17 }
 0x13e   : > { %v1830_v31 = vadd.f32 %v1829_v48, %v1356_v15  ;;  %v1344_v60 = vmul.f32 %v2705_v4, %v801_v43  ;;  %v1810_v50 = vadd.f32 %v1809_v25, %v1338_v46  ;;  %v1374_v28 = vmul.f32 %v2665_v36, %v831_v40 }
 0x13f   : > { %v3453_v21 = vsel %vm1396_vm0, %v1345_v22, 0.0  ;;  %v834_v35 = vunpack.c.h.bf16 %v421_v17  ;;  %v835_v63 = vunpack.c.l.bf16 %v422_v26  ;;  %v841_v47 = vunpack.c.h.bf16 %v3437_v3 }
 0x140   : > { %v1831_v37 = vadd.f32 %v1830_v31, %v1357_v20  ;;  %v1811_v62 = vadd.f32 %v1810_v50, %v1339_v51  ;;  %v1375_v15 = vmul.f32 %v2671_v44, %v832_v61  ;;  %v1851_v6 = vadd.f32 %v1373_v7, %v1372_v14  ;;  %v3464_v22 = vpop.xlane.xlu0 %1519 }
 0x141   : > { %v836_v41 = vunpack.c.h.bf16 %v422_v26  ;;  %v837_v16 = vunpack.c.l.bf16 %v423_v11  ;;  %v1376_v32 = vmul.f32 %v2678_v52, %v833_v54  ;;  %v816_v12 = vunpack.c.l.bf16 %v412_v19 }
 0x142   : > { %v1833_v49 = vadd.f32 %v3416_v34, %v1831_v37  ;;  %v1812_v43 = vadd.f32 %v1811_v62, %v1340_v10  ;;  %v1852_v27 = vadd.f32 %v1851_v6, %v1374_v28  ;;  %v817_v46 = vunpack.c.h.bf16 %v412_v19  ;;  %v414_v34 = vld [vmem:[%s2646_s4 + $0x628] sm:$0xff]  ;;  %v3473_v28 = vld [vmem:[%s2646_s4 + $0x638] sm:$0xff]  ;;  %v3484_v6 = vld [vmem:[#allocation2] ss:$0 sm:$0xff] }
 0x143   : > { %v838_v20 = vunpack.c.h.bf16 %v423_v11  ;;  %v839_v17 = vunpack.c.l.bf16 %v424_v42  ;;  %v840_v40 = vunpack.c.h.bf16 %v424_v42  ;;  %v1377_v51 = vmul.f32 %v2686_v56, %v834_v35  ;;  %v415_v11 = vld [vmem:[%s2646_s4 + $0x630] sm:$0xff] }
 0x144   : > { %1834 = vadd.xlane.f32.xlu1 %v1833_v49  ;;  %v1813_v61 = vadd.f32 %v1812_v43, %v1341_v23  ;;  %v1384_v48 = vmul.f32 %v2681_v53, %v841_v47  ;;  %v1853_v25 = vadd.f32 %v1852_v27, %v1375_v15  ;;  %v818_v10 = vunpack.c.l.bf16 %v413_v0 }
 0x145   : > { %v1378_v26 = vmul.f32 %v2689_v57, %v835_v63  ;;  %v1379_v14 = vmul.f32 %v2692_v58, %v836_v41  ;;  %v1380_v7 = vmul.f32 %v2695_v59, %v837_v16  ;;  %v819_v54 = vunpack.c.h.bf16 %v413_v0  ;;  %v1565_v41 = vpop.xlane.xlu1 %1564  ;;  %v1550_v0 = vpop.xlane.xlu0 %1549 }
 0x146   : > { %v1814_v31 = vadd.f32 %v1813_v61, %v1342_v33  ;;  %v1854_v50 = vadd.f32 %v1853_v25, %v1376_v32  ;;  %v1359_v19 = vmul.f32 %v2656_v29, %v816_v12  ;;  %v1360_v23 = vmul.f32 %v2659_v30, %v817_v46 }
 0x147   : > { %v1381_v35 = vmul.f32 %v2699_v1, %v838_v20  ;;  %v1382_v47 = vmul.f32 %v2702_v2, %v839_v17  ;;  %v1383_v63 = vmul.f32 %v2705_v4, %v840_v40  ;;  %v820_v37 = vunpack.c.l.bf16 %v414_v34 }
 0x148   : > { %v1815_v62 = vadd.f32 %v1814_v31, %v1343_v38  ;;  %v1855_v42 = vadd.f32 %v1854_v50, %v1377_v51  ;;  %v3481_v15 = vsel %vm1396_vm0, %v1384_v48, 0.0  ;;  %v1361_v33 = vmul.f32 %v2665_v36, %v818_v10 }
 0x149   : > { %v821_v29 = vunpack.c.h.bf16 %v414_v34  ;;  %v822_v30 = vunpack.c.l.bf16 %v415_v11  ;;  %v823_v16 = vunpack.c.h.bf16 %v415_v11  ;;  %v824_v32 = vunpack.c.l.bf16 %v3473_v28  ;;  %v1595_v48 = vpop.xlane.xlu1 %1594  ;;  %v1580_v34 = vpop.xlane.xlu0 %1579 }
 0x14a   : > { %v1816_v12 = vadd.f32 %v1815_v62, %v1344_v60  ;;  %v1856_v49 = vadd.f32 %v1855_v42, %v1378_v26  ;;  %v1362_v38 = vmul.f32 %v2671_v44, %v819_v54  ;;  %v1836_v43 = vadd.f32 %v1360_v23, %v1359_v19  ;;  %v3497_v60 = vld [vmem:[%s2646_s4 + $0x640] sm:$0xff] }
 0x14b   : > { %v1363_v27 = vmul.f32 %v2678_v52, %v820_v37  ;;  %v1875_v36 = vadd.f32 %v3484_v6, %v3382_v39  ;;  %v1873_v46 = vadd.f32 %v3484_v6, %v3388_v24  ;;  %v1876_v20 = vadd.f32 %v3484_v6, %v3399_v9 }
 0x14c   : > { %v1818_v17 = vadd.f32 %v3453_v21, %v1816_v12  ;;  %v1857_v40 = vadd.f32 %v1856_v49, %v1379_v14  ;;  %v1837_v51 = vadd.f32 %v1836_v43, %v1361_v33  ;;  %v1874_v44 = vadd.f32 %v3484_v6, %v3404_v8 }
 0x14d   : > { %v825_v52 = vunpack.c.h.bf16 %v3473_v28  ;;  %v1364_v39 = vmul.f32 %v2686_v56, %v821_v29  ;;  %2426 = vtanh.f32 %v1875_v36  ;;  %v1878_v24 = vadd.f32 %v3484_v6, %v3421_v13 }
 0x14e   : > { %1819 = vadd.xlane.f32.xlu0 %v1818_v17  ;;  %v1858_v9 = vadd.f32 %v1857_v40, %v1380_v7  ;;  %v1838_v61 = vadd.f32 %v1837_v51, %v1362_v38  ;;  %2428 = vtanh.f32 %v1873_v46  ;;  %v1877_v21 = vadd.f32 %v3484_v6, %v3427_v45 }
 0x14f   : > { %v826_v25 = vunpack.c.l.bf16 %v3497_v60  ;;  %v1365_v8 = vmul.f32 %v2689_v57, %v822_v30  ;;  %2430 = vtanh.f32 %v1876_v20  ;;  %v1880_v56 = vadd.f32 %v3484_v6, %v3441_v55 }
 0x150   : > { %v1859_v10 = vadd.f32 %v1858_v9, %v1381_v35  ;;  %v1839_v13 = vadd.f32 %v1838_v61, %v1363_v27  ;;  %2432 = vtanh.f32 %v1874_v44  ;;  %v1879_v26 = vadd.f32 %v3484_v6, %v3446_v5 }
 0x151   : > { %v827_v14 = vunpack.c.h.bf16 %v3497_v60  ;;  %v1366_v45 = vmul.f32 %v2692_v58, %v823_v16  ;;  %2434 = vtanh.f32 %v1878_v24  ;;  %v1882_v57 = vadd.f32 %v3484_v6, %v3461_v18  ;;  %v1625_v18 = vpop.xlane.xlu1 %1624 }
 0x152   : > { %v1860_v7 = vadd.f32 %v1859_v10, %v1382_v47  ;;  %v1840_v54 = vadd.f32 %v1839_v13, %v1364_v39  ;;  %2436 = vtanh.f32 %v1877_v21  ;;  %v1881_v55 = vadd.f32 %v3484_v6, %v3464_v22 }
 0x153   : > { %v828_v31 = vunpack.c.l.bf16 %v3437_v3  ;;  %v1367_v50 = vmul.f32 %v2695_v59, %v824_v32  ;;  %2438 = vtanh.f32 %v1880_v56  ;;  %v1884_v5 = vadd.f32 %v3484_v6, %v1565_v41  ;;  %v1610_v22 = vpop.xlane.xlu0 %1609 }
 0x154   : > { %v1861_v11 = vadd.f32 %v1860_v7, %v1383_v63  ;;  %v1841_v58 = vadd.f32 %v1840_v54, %v1365_v8  ;;  %2440 = vtanh.f32 %v1879_v26  ;;  %v1883_v28 = vadd.f32 %v3484_v6, %v1550_v0 }
 0x155   : > { %v1368_v19 = vmul.f32 %v2699_v1, %v825_v52  ;;  %2442 = vtanh.f32 %v1882_v57  ;;  %v1886_v23 = vadd.f32 %v3484_v6, %v1595_v48  ;;  %v1885_v59 = vadd.f32 %v3484_v6, %v1580_v34 }
 0x156   : > { %v1863_v3 = vadd.f32 %v3481_v15, %v1861_v11  ;;  %v1842_v35 = vadd.f32 %v1841_v58, %v1366_v45  ;;  %2444 = vtanh.f32 %v1881_v55  ;;  %v1888_v63 = vadd.f32 %v3484_v6, %v1625_v18 }
 0x157   : > { %v2427_v47 = vpop.eup %2426  ;;  %2446 = vtanh.f32 %v1884_v5  ;;  %v1369_v62 = vmul.f32 %v2702_v2, %v826_v25  ;;  %v1887_v42 = vadd.f32 %v3484_v6, %v1610_v22  ;;  %v1371_v33 = vmul.f32 %v2681_v53, %v828_v31 }
 0x158   : > { %v2429_v37 = vpop.eup %2428  ;;  %1864 = vadd.xlane.f32.xlu1 %v1863_v3  ;;  %v1843_v1 = vadd.f32 %v1842_v35, %v1367_v50  ;;  %1940 = vst.msk [vmem:[%s3530_s7 + $0x10] sm:$0xff] %vm1937_vm1, %v2427_v47  ;;  %2448 = vtanh.f32 %v1883_v28  ;;  %v1370_v41 = vmul.f32 %v2705_v4, %v827_v14 }
 0x159   : > { %v2431_v15 = vpop.eup %2430  ;;  %1938 = vst.msk [vmem:[%s3530_s7] sm:$0xff] %vm1937_vm1, %v2429_v37  ;;  %2450 = vtanh.f32 %v1886_v23  ;;  %v1847_v4 = vsel %vm1396_vm0, %v1371_v33, 0.0 }
 0x15a   : > { %v2433_v2 = vpop.eup %2432  ;;  %v1844_v29 = vadd.f32 %v1843_v1, %v1368_v19  ;;  %1941 = vst.msk [vmem:[%s3530_s7 + $0x18] sm:$0xff] %vm1937_vm1, %v2431_v15  ;;  %2452 = vtanh.f32 %v1885_v59 }
 0x15b   : > { %v2435_v30 = vpop.eup %2434  ;;  %1939 = vst.msk [vmem:[%s3530_s7 + $0x8] sm:$0xff] %vm1937_vm1, %v2433_v2  ;;  %2454 = vtanh.f32 %v1888_v63 }
 0x15c   : > { %v2437_v16 = vpop.eup %2436  ;;  %v1845_v32 = vadd.f32 %v1844_v29, %v1369_v62  ;;  %1943 = vst.msk [vmem:[%s3530_s7 + $0x28] sm:$0xff] %vm1937_vm1, %v2435_v30  ;;  %2456 = vtanh.f32 %v1887_v42  ;;  %v1655_v53 = vpop.xlane.xlu1 %1654 }
 0x15d   : > { %v2439_v0 = vpop.eup %2438  ;;  %1942 = vst.msk [vmem:[%s3530_s7 + $0x20] sm:$0xff] %vm1937_vm1, %v2437_v16  ;;  %v1890_v12 = vadd.f32 %v3484_v6, %v1655_v53 }
 0x15e   : > { %v2441_v49 = vpop.eup %2440  ;;  %v1846_v38 = vadd.f32 %v1845_v32, %v1370_v41  ;;  %1945 = vst.msk [vmem:[%s3530_s7 + $0x38] sm:$0xff] %vm1937_vm1, %v2439_v0 }
 0x15f   : > { %v2443_v43 = vpop.eup %2442  ;;  %1944 = vst.msk [vmem:[%s3530_s7 + $0x30] sm:$0xff] %vm1937_vm1, %v2441_v49  ;;  %2458 = vtanh.f32 %v1890_v12 }
 0x160   : > { %v2445_v27 = vpop.eup %2444  ;;  %v1848_v36 = vadd.f32 %v1847_v4, %v1846_v38  ;;  %1947 = vst.msk [vmem:[%s3530_s7 + $0x48] sm:$0xff] %vm1937_vm1, %v2443_v43 }
 0x161   : > { %v2447_v46 = vpop.eup %2446  ;;  %1946 = vst.msk [vmem:[%s3530_s7 + $0x40] sm:$0xff] %vm1937_vm1, %v2445_v27 }
 0x162   : > { %v2449_v20 = vpop.eup %2448  ;;  %1849 = vadd.xlane.f32.xlu0 %v1848_v36  ;;  %1949 = vst.msk [vmem:[%s3530_s7 + $0x58] sm:$0xff] %vm1937_vm1, %v2447_v46 }
 0x163   : > { %v2451_v17 = vpop.eup %2450  ;;  %1948 = vst.msk [vmem:[%s3530_s7 + $0x50] sm:$0xff] %vm1937_vm1, %v2449_v20 }
 0x164   : > { %v2453_v40 = vpop.eup %2452  ;;  %1951 = vst.msk [vmem:[%s3530_s7 + $0x68] sm:$0xff] %vm1937_vm1, %v2451_v17 }
 0x165   : > { %v2455_v60 = vpop.eup %2454  ;;  %1950 = vst.msk [vmem:[%s3530_s7 + $0x60] sm:$0xff] %vm1937_vm1, %v2453_v40 }
 0x166   : > { %v2457_v51 = vpop.eup %2456  ;;  %1953 = vst.msk [vmem:[%s3530_s7 + $0x78] sm:$0xff] %vm1937_vm1, %v2455_v60  ;;  %v1640_v44 = vpop.xlane.xlu0 %1639 }
 0x167   : > { %1952 = vst.msk [vmem:[%s3530_s7 + $0x70] sm:$0xff] %vm1937_vm1, %v2457_v51  ;;  %v1889_v52 = vadd.f32 %v3484_v6, %v1640_v44 }
 0x169   : > { %v2459_v39 = vpop.eup %2458  ;;  %2460 = vtanh.f32 %v1889_v52 }
 0x16a   : > { %1955 = vst.msk [vmem:[%s3530_s7 + $0x88] sm:$0xff] %vm1937_vm1, %v2459_v39 }
 0x170   : > { %v1685_v24 = vpop.xlane.xlu1 %1684 }
 0x171   : > { %v1892_v9 = vadd.f32 %v3484_v6, %v1685_v24 }
 0x173   : > { %v2461_v61 = vpop.eup %2460  ;;  %2462 = vtanh.f32 %v1892_v9 }
 0x174   : > { %1954 = vst.msk [vmem:[%s3530_s7 + $0x80] sm:$0xff] %vm1937_vm1, %v2461_v61 }
 0x17a   : > { %v1670_v21 = vpop.xlane.xlu0 %1669 }
 0x17b   : > { %v1891_v48 = vadd.f32 %v3484_v6, %v1670_v21 }
 0x17d   : > { %v2463_v25 = vpop.eup %2462  ;;  %2464 = vtanh.f32 %v1891_v48 }
 0x17e   : > { %1957 = vst.msk [vmem:[%s3530_s7 + $0x98] sm:$0xff] %vm1937_vm1, %v2463_v25 }
 0x183   : > { %v1715_v8 = vpop.xlane.xlu1 %1714 }
 0x184   : > { %v1894_v56 = vadd.f32 %v3484_v6, %v1715_v8 }
 0x186   : > { %2466 = vtanh.f32 %v1894_v56 }
 0x187   : > { %v2465_v34 = vpop.eup %2464 }
 0x188   : > { %1956 = vst.msk [vmem:[%s3530_s7 + $0x90] sm:$0xff] %vm1937_vm1, %v2465_v34 }
 0x18d   : > { %v1700_v10 = vpop.xlane.xlu0 %1699 }
 0x18e   : > { %v1893_v13 = vadd.f32 %v3484_v6, %v1700_v10 }
 0x190   : > { %v2467_v26 = vpop.eup %2466  ;;  %2468 = vtanh.f32 %v1893_v13 }
 0x191   : > { %1959 = vst.msk [vmem:[%s3530_s7 + $0xa8] sm:$0xff] %vm1937_vm1, %v2467_v26 }
 0x197   : > { %v1745_v14 = vpop.xlane.xlu1 %1744 }
 0x198   : > { %v1896_v45 = vadd.f32 %v3484_v6, %v1745_v14 }
 0x19a   : > { %v2469_v57 = vpop.eup %2468  ;;  %2470 = vtanh.f32 %v1896_v45 }
 0x19b   : > { %1958 = vst.msk [vmem:[%s3530_s7 + $0xa0] sm:$0xff] %vm1937_vm1, %v2469_v57 }
 0x1a1   : > { %v1730_v7 = vpop.xlane.xlu0 %1729 }
 0x1a2   : > { %v1895_v54 = vadd.f32 %v3484_v6, %v1730_v7 }
 0x1a4   : > { %v2471_v55 = vpop.eup %2470  ;;  %2472 = vtanh.f32 %v1895_v54 }
 0x1a5   : > { %1961 = vst.msk [vmem:[%s3530_s7 + $0xb8] sm:$0xff] %vm1937_vm1, %v2471_v55 }
 0x1aa   : > { %v1775_v31 = vpop.xlane.xlu1 %1774 }
 0x1ab   : > { %v1898_v50 = vadd.f32 %v3484_v6, %v1775_v31 }
 0x1ad   : > { %2474 = vtanh.f32 %v1898_v50 }
 0x1ae   : > { %v2473_v5 = vpop.eup %2472 }
 0x1af   : > { %1960 = vst.msk [vmem:[%s3530_s7 + $0xb0] sm:$0xff] %vm1937_vm1, %v2473_v5 }
 0x1b4   : > { %v1760_v11 = vpop.xlane.xlu0 %1759 }
 0x1b5   : > { %v1897_v58 = vadd.f32 %v3484_v6, %v1760_v11 }
 0x1b7   : > { %v2475_v28 = vpop.eup %2474  ;;  %2476 = vtanh.f32 %v1897_v58 }
 0x1b8   : > { %1963 = vst.msk [vmem:[%s3530_s7 + $0xc8] sm:$0xff] %vm1937_vm1, %v2475_v28 }
 0x1be   : > { %v1805_v18 = vpop.xlane.xlu1 %1804 }
 0x1bf   : > { %v1900_v19 = vadd.f32 %v3484_v6, %v1805_v18 }
 0x1c1   : > { %v2477_v23 = vpop.eup %2476  ;;  %2478 = vtanh.f32 %v1900_v19 }
 0x1c2   : > { %1962 = vst.msk [vmem:[%s3530_s7 + $0xc0] sm:$0xff] %vm1937_vm1, %v2477_v23 }
 0x1c8   : > { %v1790_v22 = vpop.xlane.xlu0 %1789 }
 0x1c9   : > { %v1899_v3 = vadd.f32 %v3484_v6, %v1790_v22 }
 0x1cb   : > { %v2479_v35 = vpop.eup %2478  ;;  %2480 = vtanh.f32 %v1899_v3 }
 0x1cc   : > { %1965 = vst.msk [vmem:[%s3530_s7 + $0xd8] sm:$0xff] %vm1937_vm1, %v2479_v35 }
 0x1d1   : > { %v1835_v59 = vpop.xlane.xlu1 %1834 }
 0x1d2   : > { %v1902_v47 = vadd.f32 %v3484_v6, %v1835_v59 }
 0x1d4   : > { %2482 = vtanh.f32 %v1902_v47 }
 0x1d5   : > { %v2481_v63 = vpop.eup %2480 }
 0x1d6   : > { %1964 = vst.msk [vmem:[%s3530_s7 + $0xd0] sm:$0xff] %vm1937_vm1, %v2481_v63 }
 0x1db   : > { %v1820_v37 = vpop.xlane.xlu0 %1819 }
 0x1dc   : > { %v1901_v62 = vadd.f32 %v3484_v6, %v1820_v37 }
 0x1de   : > { %v2483_v1 = vpop.eup %2482  ;;  %2484 = vtanh.f32 %v1901_v62 }
 0x1df   : > { %1967 = vst.msk [vmem:[%s3530_s7 + $0xe8] sm:$0xff] %vm1937_vm1, %v2483_v1 }
 0x1e5   : > { %v1865_v42 = vpop.xlane.xlu1 %1864 }
 0x1e6   : > { %v1904_v15 = vadd.f32 %v3484_v6, %v1865_v42 }
 0x1e8   : > { %v2485_v33 = vpop.eup %2484  ;;  %2486 = vtanh.f32 %v1904_v15 }
 0x1e9   : > { %1966 = vst.msk [vmem:[%s3530_s7 + $0xe0] sm:$0xff] %vm1937_vm1, %v2485_v33 }
 0x1ef   : > { %v1850_v2 = vpop.xlane.xlu0 %1849 }
 0x1f0   : > { %v1903_v41 = vadd.f32 %v3484_v6, %v1850_v2 }
 0x1f2   : > { %v2487_v29 = vpop.eup %2486  ;;  %2488 = vtanh.f32 %v1903_v41 }
 0x1f3   : > { %1969 = vst.msk [vmem:[%s3530_s7 + $0xf8] sm:$0xff] %vm1937_vm1, %v2487_v29 }
 0x1f7   : > { %1976 = sbr.rel (!%p2626_p4) target bundleno = 566 (0x236), region = 36 }
 0x1fc   : > { %v2489_v30 = vpop.eup %2488 }
 0x1fd   : > { %1968 = vst.msk [vmem:[%s3530_s7 + $0xf0] sm:$0xff] %vm1937_vm1, %v2489_v30 }
 0x1fe   : > { %s3769_s8 = smov (!%p1979_p8, %s1978_s8), 32 }
 0x1ff   : > { %s2319_s13 = sshll.u32 %s3769_s8, 7 }
 0x200   : > { %p2322_p9 = scmp.eq.s32.totalorder %s2319_s13, 0 }
 0x201   : > { %s3629_s14 = sshrl.u32 (!%p2322_p9), %s3769_s8, 5 }
 0x202   : > { %1987 = sbr.rel (%p2322_p9) target bundleno = 566 (0x236), region = 40  ;;  %p2323_p10 = scmp.le.s32.totalorder (!%p2322_p9), %s3629_s14, 0 }
 0x209   : > { %2265 = sbr.rel (%p2323_p10) target bundleno = 545 (0x221), region = 116  ;;  %s3760_s16 = smov (!%p2323_p10), %s3623_s12 }
 0x20a   : > { %s3761_s2 = smov (!%p2323_p10), %s3530_s7  ;;  %s3638_s18 = smov (!%p2323_p10), 0  }
 0x20b   : > { %s3640_s19 = smov (!%p2323_p10), 0  }
 0x210 LB: >> { %v2111_v6 = vld [vmem:[%s2552_s2] sm:$0xff]  ;;  %v2113_v16 = vld [vmem:[%s2552_s2 + $0x8] sm:$0xff]  ;;  %v2115_v32 = vld [vmem:[%s2552_s2 + $0x10] sm:$0xff]  ;;  %s2175_s21 = sadd.s32 1, %s2556_s18  ;;  %s2105_s19 = sadd.s32 1, %s2560_s19   ;;  %s2560_s19 = sphi %s3640_s19, %s2105_s19   ;;  %s2556_s18 = sphi %s3638_s18, %s3764_s18   ;;  %s2552_s2 = sphi %s3761_s2, %s3763_s2   ;;  %s2548_s16 = sphi %s3760_s16, %s3762_s16  }
 0x211   : >> { %2112 = vst [vmem:[%s2548_s16] sm:$0xff] %v2111_v6  ;;  %2114 = vst [vmem:[%s2548_s16 + $0x8] sm:$0xff] %v2113_v16  ;;  %v2117_v53 = vld [vmem:[%s2552_s2 + $0x18] sm:$0xff]  ;;  %v2119_v0 = vld [vmem:[%s2552_s2 + $0x20] sm:$0xff]  ;;  %p2176_p11 = scmp.ge.s32.totalorder %s2175_s21, %s3629_s14  ;;  %p2104_p12 = scmp.ge.s32.totalorder %s2105_s19, %s3629_s14 }
 0x212   : >> { %2116 = vst [vmem:[%s2548_s16 + $0x10] sm:$0xff] %v2115_v32  ;;  %v2121_v4 = vld [vmem:[%s2552_s2 + $0x28] sm:$0xff]  ;;  %2118 = vst [vmem:[%s2548_s16 + $0x18] sm:$0xff] %v2117_v53  ;;  %v2123_v12 = vld [vmem:[%s2552_s2 + $0x30] sm:$0xff] }
 0x213   : >> { %2120 = vst [vmem:[%s2548_s16 + $0x20] sm:$0xff] %v2119_v0  ;;  %2122 = vst [vmem:[%s2548_s16 + $0x28] sm:$0xff] %v2121_v4  ;;  %v2125_v49 = vld [vmem:[%s2552_s2 + $0x38] sm:$0xff]  ;;  %v2127_v38 = vld [vmem:[%s2552_s2 + $0x40] sm:$0xff]  ;;  %s3771_s21 = smov (%p2176_p11, %s2175_s21), 0 }
 0x214   : >> { %2124 = vst [vmem:[%s2548_s16 + $0x30] sm:$0xff] %v2123_v12  ;;  %2126 = vst [vmem:[%s2548_s16 + $0x38] sm:$0xff] %v2125_v49  ;;  %v2129_v43 = vld [vmem:[%s2552_s2 + $0x48] sm:$0xff]  ;;  %v2131_v27 = vld [vmem:[%s2552_s2 + $0x50] sm:$0xff]  ;;  %s2324_s22 = sshll.u32 %s3771_s21, 8  ;;  %s3764_s18 = smov %s3771_s21 }
 0x215   : >> { %2128 = vst [vmem:[%s2548_s16 + $0x40] sm:$0xff] %v2127_v38  ;;  %v2133_v36 = vld [vmem:[%s2552_s2 + $0x58] sm:$0xff]  ;;  %2130 = vst [vmem:[%s2548_s16 + $0x48] sm:$0xff] %v2129_v43  ;;  %v2135_v46 = vld [vmem:[%s2552_s2 + $0x60] sm:$0xff]  ;;  %s3696_s23 = scalar_lea.vmem %s3530_s7, %s2324_s22 [#allocation3]   ;;  %s2181_s24 = scalar_lea.vmem %s3623_s12, %s2324_s22  }
 0x216   : >> { %2132 = vst [vmem:[%s2548_s16 + $0x50] sm:$0xff] %v2131_v27  ;;  %2134 = vst [vmem:[%s2548_s16 + $0x58] sm:$0xff] %v2133_v36  ;;  %v2137_v20 = vld [vmem:[%s2552_s2 + $0x68] sm:$0xff]  ;;  %v2139_v17 = vld [vmem:[%s2552_s2 + $0x70] sm:$0xff] }
 0x217   : >> { %2136 = vst [vmem:[%s2548_s16 + $0x60] sm:$0xff] %v2135_v46  ;;  %2138 = vst [vmem:[%s2548_s16 + $0x68] sm:$0xff] %v2137_v20  ;;  %v2141_v40 = vld [vmem:[%s2552_s2 + $0x78] sm:$0xff]  ;;  %v2143_v60 = vld [vmem:[%s2552_s2 + $0x80] sm:$0xff] }
 0x218   : >> { %2140 = vst [vmem:[%s2548_s16 + $0x70] sm:$0xff] %v2139_v17  ;;  %v2145_v51 = vld [vmem:[%s2552_s2 + $0x88] sm:$0xff]  ;;  %2142 = vst [vmem:[%s2548_s16 + $0x78] sm:$0xff] %v2141_v40  ;;  %v2147_v44 = vld [vmem:[%s2552_s2 + $0x90] sm:$0xff] }
 0x219   : >> { %2144 = vst [vmem:[%s2548_s16 + $0x80] sm:$0xff] %v2143_v60  ;;  %2146 = vst [vmem:[%s2548_s16 + $0x88] sm:$0xff] %v2145_v51  ;;  %v2149_v52 = vld [vmem:[%s2552_s2 + $0x98] sm:$0xff]  ;;  %v2151_v39 = vld [vmem:[%s2552_s2 + $0xa0] sm:$0xff] }
 0x21a   : >> { %2148 = vst [vmem:[%s2548_s16 + $0x90] sm:$0xff] %v2147_v44  ;;  %2150 = vst [vmem:[%s2548_s16 + $0x98] sm:$0xff] %v2149_v52  ;;  %v2153_v24 = vld [vmem:[%s2552_s2 + $0xa8] sm:$0xff]  ;;  %v2155_v9 = vld [vmem:[%s2552_s2 + $0xb0] sm:$0xff]  ;;  %2107 = sbr.rel (!%p2104_p12) target bundleno = 528 (0x210), region = 122 }
 0x21b   : >> { %2152 = vst [vmem:[%s2548_s16 + $0xa0] sm:$0xff] %v2151_v39  ;;  %v2157_v61 = vld [vmem:[%s2552_s2 + $0xb8] sm:$0xff]  ;;  %2154 = vst [vmem:[%s2548_s16 + $0xa8] sm:$0xff] %v2153_v24  ;;  %v2159_v21 = vld [vmem:[%s2552_s2 + $0xc0] sm:$0xff] }
 0x21c   : >> { %2156 = vst [vmem:[%s2548_s16 + $0xb0] sm:$0xff] %v2155_v9  ;;  %2158 = vst [vmem:[%s2548_s16 + $0xb8] sm:$0xff] %v2157_v61  ;;  %v2161_v48 = vld [vmem:[%s2552_s2 + $0xc8] sm:$0xff]  ;;  %v2163_v25 = vld [vmem:[%s2552_s2 + $0xd0] sm:$0xff] }
 0x21d   : >> { %2160 = vst [vmem:[%s2548_s16 + $0xc0] sm:$0xff] %v2159_v21  ;;  %2162 = vst [vmem:[%s2548_s16 + $0xc8] sm:$0xff] %v2161_v48  ;;  %v2165_v8 = vld [vmem:[%s2552_s2 + $0xd8] sm:$0xff]  ;;  %v2167_v56 = vld [vmem:[%s2552_s2 + $0xe0] sm:$0xff] }
 0x21e   : >> { %2164 = vst [vmem:[%s2548_s16 + $0xd0] sm:$0xff] %v2163_v25  ;;  %v2169_v34 = vld [vmem:[%s2552_s2 + $0xe8] sm:$0xff]  ;;  %2166 = vst [vmem:[%s2548_s16 + $0xd8] sm:$0xff] %v2165_v8  ;;  %v2171_v10 = vld [vmem:[%s2552_s2 + $0xf0] sm:$0xff] }
 0x21f   : >> { %2168 = vst [vmem:[%s2548_s16 + $0xe0] sm:$0xff] %v2167_v56  ;;  %2170 = vst [vmem:[%s2548_s16 + $0xe8] sm:$0xff] %v2169_v34  ;;  %v2173_v13 = vld [vmem:[%s2552_s2 + $0xf8] sm:$0xff]  ;;  %s3763_s2 = smov %s3696_s23 }
 0x220   : >> { %2172 = vst [vmem:[%s2548_s16 + $0xf0] sm:$0xff] %v2171_v10  ;;  %2174 = vst [vmem:[%s2548_s16 + $0xf8] sm:$0xff] %v2173_v13  ;;  %s3762_s16 = smov %s2181_s24 }
 0x221 PF: > { %s3737_s25 = sand.u32 31, %s3769_s8   ;;  %s2335_s26 = sshll.u32 %s3629_s14, 8 }
 0x222   : > { %s2186_s27 = scalar_lea.vmem %s3530_s7, %s2335_s26 [#allocation3]   ;;  %s2188_s28 = scalar_lea.vmem %s3623_s12, %s2335_s26  }
 0x223   : > { %p2329_p13 = scmp.le.s32.totalorder %s3737_s25, 0 }
 0x224   : > { %s2562_s29 = smov (!%p2329_p13), %s2188_s28   ;;  %s2566_s30 = smov (!%p2329_p13), %s2186_s27  }
 0x225   : > { %2279 = sbr.rel (%p2329_p13) target bundleno = 566 (0x236), region = 127  ;;  %s2570_s4 = smov (!%p2329_p13), 0  }
 0x226   : > { %s2574_s5 = smov (!%p2329_p13), 0  }
 0x22c LB: >> { %v2198_v26 = vld [vmem:[%s2568_s30] sm:$0xff]  ;;  %s2200_s6 = sadd.s32 1, %s2572_s4  ;;  %s2192_s5 = sadd.s32 1, %s2576_s5   ;;  %s2576_s5 = sphi %s2574_s5, %s2192_s5   ;;  %s2572_s4 = sphi %s2570_s4, %s2571_s4   ;;  %s2568_s30 = sphi %s2566_s30, %s2205_s30   ;;  %s2564_s29 = sphi %s2562_s29, %s2206_s29  }
 0x22d   : >> { %2199 = vst [vmem:[%s2564_s29] sm:$0xff] %v2198_v26  ;;  %p2201_p0 = scmp.ge.s32.totalorder %s2200_s6, %s3737_s25  ;;  %p2191_p1 = scmp.ge.s32.totalorder %s2192_s5, %s3737_s25 }
 0x22f   : >> { %s3773_s6 = smov (%p2201_p0, %s2200_s6), 0  ;;  %2194 = sbr.rel (!%p2191_p1) target bundleno = 556 (0x22c), region = 133 }
 0x230   : >> { %s2330_s7 = sshll.u32 %s3773_s6, 3  ;;  %s2571_s4 = smov %s3773_s6  }
 0x231   : >> { %s2205_s30 = scalar_lea.vmem %s2186_s27, %s2330_s7 [#allocation3]   ;;  %s2206_s29 = scalar_lea.vmem %s2188_s28, %s2330_s7  }
 0x236 PF: > { %p12_p2 = scmp.ge.s32.totalorder %s2616_s17, 11   ;;  %s3765_s14 = smov %s2540_s15 }
 0x237   : > { %s3766_s15 = smov %s2624_s20  ;;  %s3767_s16 = smov %s2616_s17 }
 0x238   :  { %14 = sbr.rel (!%p12_p2) target bundleno = 5 (0x5), region = 144 }

</bundles_post_ra>
